<compile_context>
chip_gen: v6e
topology: v6e:2x2x1
jax: 0.10.0
libtpu: 0.0.40
codegen_flags: <defaults>
</compile_context>

<pallas_src>
import numpy as np

import jax
import jax.numpy as jnp
from jax.experimental import pallas as pl
from jax.experimental.pallas import tpu as pltpu

_BN_EPS = 1e-5
_OUT_PAD = 128  # lane-dense output width


def _build_kernel(hw):
    """Fused forward kernel for a square hw x hw board (hw divisible by 8)."""
    wp1, wp2, wp3, wp4 = hw + 2, hw // 2 + 2, hw // 4 + 2, hw // 8 + 2

    def shift_rows(v, k):
        # y[r] = v[r + k] for every row the network actually consumes (interior rows);
        # wrap-around rows are never selected downstream.  k is a static Python int.
        if k == 0:
            return v
        return jnp.roll(v, -k, axis=0)

    def conv3x3(act, w_ref, b_ref, wp, cin):
        # act: (rows, cin) zero-padded-flattened f32; w_ref: (9*cin, cout). Returns relu(conv+b).
        acc = None
        tap = 0
        for dy in (-1, 0, 1):
            for dx in (-1, 0, 1):
                shifted = shift_rows(act, dy * wp + dx)
                w_tap = w_ref[tap * cin:(tap + 1) * cin, :]
                if cin == 1:
                    # K=1 "matmul" -> plain broadcast multiply on the VPU (kept in f32).
                    contrib = shifted * w_tap
                else:
                    contrib = jnp.dot(shifted.astype(jnp.bfloat16), w_tap,
                                      preferred_element_type=jnp.float32)
                acc = contrib if acc is None else acc + contrib
                tap += 1
        return jnp.maximum(acc + b_ref[...], 0.0)

    def pool2x2_and_repad(y, wp, s_ref):
        # 2x2 max-pool of interior rows, then a constant 0/1 selection matmul that re-lays
        # the pooled rows out in the next stage's zero-padded flattened form (exact zeros
        # in padding rows, so no in-kernel padding is ever needed).
        m = jnp.maximum(jnp.maximum(y, shift_rows(y, 1)),
                        jnp.maximum(shift_rows(y, wp), shift_rows(y, wp + 1)))
        return jnp.dot(s_ref[...], m, preferred_element_type=jnp.float32)

    def kernel(x_ref,
               w1_ref, b1_ref, w2_ref, b2_ref, w3_ref, b3_ref, w4_ref, b4_ref,
               s1_ref, s2_ref, s3_ref, g_ref,
               wf1_ref, bf1_ref, wf2_ref, bf2_ref,
               o_ref):
        y = x_ref[...].astype(jnp.float32)          # ((hw+2)^2, 1)
        y = conv3x3(y, w1_ref, b1_ref, wp1, 1)       # (., 32)
        y = pool2x2_and_repad(y, wp1, s1_ref)
        y = conv3x3(y, w2_ref, b2_ref, wp2, 32)      # (., 64)
        y = pool2x2_and_repad(y, wp2, s2_ref)
        y = conv3x3(y, w3_ref, b3_ref, wp3, 64)      # (., 128)
        y = pool2x2_and_repad(y, wp3, s3_ref)
        y = conv3x3(y, w4_ref, b4_ref, wp4, 128)     # (., 256)

        gap = jnp.dot(g_ref[...], y, preferred_element_type=jnp.float32)    # (1, 256)
        h = jnp.dot(gap.astype(jnp.bfloat16), wf1_ref[...],
                    preferred_element_type=jnp.float32) + bf1_ref[...]
        h = jnp.maximum(h, 0.0)                                              # (1, 128)
        out = jnp.dot(h.astype(jnp.bfloat16), wf2_ref[...],
                      preferred_element_type=jnp.float32) + bf2_ref[...]     # (1, _OUT_PAD)
        o_ref[...] = out.astype(o_ref.dtype)

    return kernel


def _pool_selection_matrix(h):
    """(h x h) conv output -> 2x2 max-pooled (h/2 x h/2), both in padded-flattened row layout."""
    hp, h2, hp2 = h + 2, h // 2, h // 2 + 2
    s = np.zeros((hp2 * hp2, hp * hp), np.float32)
    for i2 in range(h2):
        for j2 in range(h2):
            dst = (i2 + 1) * hp2 + (j2 + 1)           # interior row of next padded layout
            src = (2 * i2 + 1) * hp + (2 * j2 + 1)    # top-left corner of the 2x2 window max
            s[dst, src] = 1.0
    return jnp.asarray(s)


def _gap_vector(h):
    """Row vector that averages the interior rows of the final padded-flattened activation."""
    hp = h + 2
    g = np.zeros((1, hp * hp), np.float32)
    for i in range(h):
        for j in range(h):
            g[0, (i + 1) * hp + (j + 1)] = 1.0 / (h * h)
    return jnp.asarray(g)


def _fold_bn_into_conv(w, b, gamma, beta, mean, var):
    scale = gamma / jnp.sqrt(var + _BN_EPS)           # per out-channel (eval-mode BN)
    w_f = w * scale[:, None, None, None]
    b_f = scale * b + (beta - scale * mean)
    return w_f, b_f


def game_of_life_cnn(x, params, *, output_dim=3):
    """Pallas forward of GameOfLifeCNN. x: (B, H, W) or (B, 1, H, W). Returns (B, output_dim)."""
    if x.ndim == 4:
        x = x[:, 0]
    B, H, W = x.shape
    assert H == W and H % 8 == 0, "expects a square board with side divisible by 8"

    # --- parameter / constant preparation (layout + BN folding only; the hot path is the kernel) ---
    kparams = []
    for s in range(4):
        w, b = _fold_bn_into_conv(
            params[f"conv{s + 1}_w"], params[f"conv{s + 1}_b"],
            params[f"bn{s + 1}_gamma"], params[f"bn{s + 1}_beta"],
            params[f"bn{s + 1}_mean"], params[f"bn{s + 1}_var"])
        cout, cin = w.shape[0], w.shape[1]
        w_k = jnp.transpose(w, (2, 3, 1, 0)).reshape(9 * cin, cout)   # tap-major, (in, out)
        if cin > 1:
            w_k = w_k.astype(jnp.bfloat16)                            # MXU input dtype
        kparams += [w_k, b.reshape(1, cout).astype(jnp.float32)]

    kparams += [_pool_selection_matrix(H), _pool_selection_matrix(H // 2),
                _pool_selection_matrix(H // 4), _gap_vector(H // 8)]

    wf1 = jnp.transpose(params["fc1_w"]).astype(jnp.bfloat16)          # (256, 128)
    bf1 = params["fc1_b"].reshape(1, -1).astype(jnp.float32)
    # Pad fc2 to 128 output lanes so the kernel's only HBM store is an unmasked, lane-dense vst.
    wf2 = jnp.zeros((params["fc2_w"].shape[1], _OUT_PAD), jnp.float32)
    wf2 = wf2.at[:, :output_dim].set(jnp.transpose(params["fc2_w"])).astype(jnp.bfloat16)
    bf2 = jnp.zeros((1, _OUT_PAD), jnp.float32).at[0, :output_dim].set(params["fc2_b"])
    kparams += [wf1, bf1, wf2, bf2]

    # Zero-padded, flattened, channels-last input: (B, (H+2)*(W+2), 1).
    n_rows = (H + 2) * (W + 2)
    x_pf = jnp.pad(x.astype(jnp.float32), ((0, 0), (1, 1), (1, 1))).reshape(B, n_rows, 1)

    in_specs = [pl.BlockSpec((None, n_rows, 1), lambda b: (b, 0, 0))]
    for p in kparams:   # weights / constants: full-array blocks, constant index map (resident)
        in_specs.append(pl.BlockSpec(p.shape, lambda b, nd=p.ndim: (0,) * nd))
    out_specs = pl.BlockSpec((None, 1, _OUT_PAD), lambda b: (b, 0, 0))

    out = pl.pallas_call(
        _build_kernel(H),
        out_shape=jax.ShapeDtypeStruct((B, 1, _OUT_PAD), jnp.float32),
        grid_spec=pltpu.PrefetchScalarGridSpec(
            num_scalar_prefetch=0,
            grid=(B,),
            in_specs=in_specs,
            out_specs=out_specs,
        ),
        compiler_params=pltpu.CompilerParams(
            dimension_semantics=("parallel",),   # v7x: shard images across both TensorCores
        ),
    )(x_pf, *kparams)
    return out.reshape(B, _OUT_PAD)[:, :output_dim]


def init_params(key, *, output_dim=3):
    """Deterministic parameters in PyTorch layout (conv: (out,in,3,3); linear: (out,in)).

    Conv/FC weights are scaled ~3x above the PyTorch default bound so activations stay O(1)
    through the 6-layer stack and the numerical check against the f32 reference is meaningful.
    """
    params = {}
    chans = (1, 32, 64, 128, 256)
    for s in range(4):
        cin, cout = chans[s], chans[s + 1]
        bound = 3.0 / np.sqrt(cin * 9)
        key, kw, kb, kg, kbeta, km, kv = jax.random.split(key, 7)
        params[f"conv{s + 1}_w"] = jax.random.uniform(kw, (cout, cin, 3, 3), jnp.float32, -bound, bound)
        params[f"conv{s + 1}_b"] = jax.random.uniform(kb, (cout,), jnp.float32, -0.1, 0.1)
        params[f"bn{s + 1}_gamma"] = jax.random.uniform(kg, (cout,), jnp.float32, 0.8, 1.2)
        params[f"bn{s + 1}_beta"] = jax.random.uniform(kbeta, (cout,), jnp.float32, -0.3, 0.3)
        params[f"bn{s + 1}_mean"] = jax.random.uniform(km, (cout,), jnp.float32, -0.2, 0.2)
        params[f"bn{s + 1}_var"] = jax.random.uniform(kv, (cout,), jnp.float32, 0.8, 1.2)
    key, k1, k2, k3, k4 = jax.random.split(key, 5)
    params["fc1_w"] = jax.random.uniform(k1, (128, 256), jnp.float32, -3.0 / np.sqrt(256), 3.0 / np.sqrt(256))
    params["fc1_b"] = jax.random.uniform(k2, (128,), jnp.float32, -0.1, 0.1)
    params["fc2_w"] = jax.random.uniform(k3, (output_dim, 128), jnp.float32, -3.0 / np.sqrt(128), 3.0 / np.sqrt(128))
    params["fc2_b"] = jax.random.uniform(k4, (output_dim,), jnp.float32, -0.1, 0.1)
    return params


def reference_forward(x, params):
    """Pure-JAX (XLA) eval-mode forward matching the PyTorch module, in f32."""
    if x.ndim == 3:
        x = x[:, None]                                   # -> NCHW
    y = x.astype(jnp.float32)
    for s in range(4):
        y = jax.lax.conv_general_dilated(
            y, params[f"conv{s + 1}_w"], (1, 1), "SAME",
            dimension_numbers=("NCHW", "OIHW", "NCHW"))
        y = y + params[f"conv{s + 1}_b"][None, :, None, None]
        gamma = params[f"bn{s + 1}_gamma"][None, :, None, None]
        beta = params[f"bn{s + 1}_beta"][None, :, None, None]
        mean = params[f"bn{s + 1}_mean"][None, :, None, None]
        var = params[f"bn{s + 1}_var"][None, :, None, None]
        y = gamma * (y - mean) / jnp.sqrt(var + _BN_EPS) + beta
        y = jnp.maximum(y, 0.0)
        if s < 3:
            y = jax.lax.reduce_window(y, -jnp.inf, jax.lax.max,
                                      (1, 1, 2, 2), (1, 1, 2, 2), "VALID")
    y = jnp.mean(y, axis=(2, 3))                         # global average pool -> (B, 256)
    y = jnp.maximum(y @ params["fc1_w"].T + params["fc1_b"], 0.0)
    return y @ params["fc2_w"].T + params["fc2_b"]


if __name__ == "__main__":
    B, H, W, OUT_DIM = 2, 16, 16, 3
    key = jax.random.PRNGKey(0)
    key, kx = jax.random.split(key)
    x = jax.random.bernoulli(kx, 0.5, (B, H, W)).astype(jnp.float32)   # Game-of-Life board
    params = init_params(key, output_dim=OUT_DIM)

    out = jax.block_until_ready(game_of_life_cnn(x, params, output_dim=OUT_DIM))
    ref = reference_forward(x, params)

    assert out.shape == (B, OUT_DIM)
    # bf16 MXU inputs with f32 accumulation -> loosened tolerance vs the pure-f32 reference.
    assert jnp.allclose(out, ref, atol=5e-2, rtol=5e-2), (out, ref)
    print("KERNEL_OK")
</pallas_src>

<mosaic_0001>
module attributes {stable_mosaic.version = 11 : i64} {
  func.func @kernel(%arg0: i32, %arg1: memref<1x324x1xf32, #tpu.memory_space<vmem>>, %arg2: memref<9x32xf32, #tpu.memory_space<vmem>>, %arg3: memref<1x32xf32, #tpu.memory_space<vmem>>, %arg4: memref<288x64xbf16, #tpu.memory_space<vmem>>, %arg5: memref<1x64xf32, #tpu.memory_space<vmem>>, %arg6: memref<576x128xbf16, #tpu.memory_space<vmem>>, %arg7: memref<1x128xf32, #tpu.memory_space<vmem>>, %arg8: memref<1152x256xbf16, #tpu.memory_space<vmem>>, %arg9: memref<1x256xf32, #tpu.memory_space<vmem>>, %arg10: memref<100x324xf32, #tpu.memory_space<vmem>>, %arg11: memref<36x100xf32, #tpu.memory_space<vmem>>, %arg12: memref<16x36xf32, #tpu.memory_space<vmem>>, %arg13: memref<1x16xf32, #tpu.memory_space<vmem>>, %arg14: memref<256x128xbf16, #tpu.memory_space<vmem>>, %arg15: memref<1x128xf32, #tpu.memory_space<vmem>>, %arg16: memref<128x128xbf16, #tpu.memory_space<vmem>>, %arg17: memref<1x128xf32, #tpu.memory_space<vmem>>, %arg18: memref<1x1x128xf32, #tpu.memory_space<vmem>>) attributes {dimension_semantics = [#tpu.dimension_semantics<parallel>], iteration_bounds = array<i64: 2>, scalar_prefetch = 0 : i64, scratch_operands = 0 : i64, tpu.core_type = #tpu.core_type<tc>, window_params = [{transform_indices = @transform_0, window_bounds = array<i64: 1, 324, 1>}, {pipeline_mode = #tpu.pipeline_mode<synchronous>, transform_indices = @transform_1, window_bounds = array<i64: 9, 32>}, {pipeline_mode = #tpu.pipeline_mode<synchronous>, transform_indices = @transform_2, window_bounds = array<i64: 1, 32>}, {pipeline_mode = #tpu.pipeline_mode<synchronous>, transform_indices = @transform_3, window_bounds = array<i64: 288, 64>}, {pipeline_mode = #tpu.pipeline_mode<synchronous>, transform_indices = @transform_4, window_bounds = array<i64: 1, 64>}, {pipeline_mode = #tpu.pipeline_mode<synchronous>, transform_indices = @transform_5, window_bounds = array<i64: 576, 128>}, {pipeline_mode = #tpu.pipeline_mode<synchronous>, transform_indices = @transform_6, window_bounds = array<i64: 1, 128>}, {pipeline_mode = #tpu.pipeline_mode<synchronous>, transform_indices = @transform_7, window_bounds = array<i64: 1152, 256>}, {pipeline_mode = #tpu.pipeline_mode<synchronous>, transform_indices = @transform_8, window_bounds = array<i64: 1, 256>}, {pipeline_mode = #tpu.pipeline_mode<synchronous>, transform_indices = @transform_9, window_bounds = array<i64: 100, 324>}, {pipeline_mode = #tpu.pipeline_mode<synchronous>, transform_indices = @transform_10, window_bounds = array<i64: 36, 100>}, {pipeline_mode = #tpu.pipeline_mode<synchronous>, transform_indices = @transform_11, window_bounds = array<i64: 16, 36>}, {pipeline_mode = #tpu.pipeline_mode<synchronous>, transform_indices = @transform_12, window_bounds = array<i64: 1, 16>}, {pipeline_mode = #tpu.pipeline_mode<synchronous>, transform_indices = @transform_13, window_bounds = array<i64: 256, 128>}, {pipeline_mode = #tpu.pipeline_mode<synchronous>, transform_indices = @transform_14, window_bounds = array<i64: 1, 128>}, {pipeline_mode = #tpu.pipeline_mode<synchronous>, transform_indices = @transform_15, window_bounds = array<i64: 128, 128>}, {pipeline_mode = #tpu.pipeline_mode<synchronous>, transform_indices = @transform_16, window_bounds = array<i64: 1, 128>}, {transform_indices = @transform_17, window_bounds = array<i64: 1, 1, 128>}]} {
    %c0 = arith.constant 0 : index
    %c0_0 = arith.constant 0 : index
    %c0_1 = arith.constant 0 : index
    %0 = vector.load %arg1[%c0, %c0_0, %c0_1] : memref<1x324x1xf32, #tpu.memory_space<vmem>>, vector<1x324x1xf32>
    %1 = vector.shape_cast %0 : vector<1x324x1xf32> to vector<324x1xf32>
    %2 = vector.extract_strided_slice %1 {offsets = [305, 0], sizes = [19, 1], strides = [1, 1]} : vector<324x1xf32> to vector<19x1xf32>
    %3 = vector.extract_strided_slice %1 {offsets = [0, 0], sizes = [305, 1], strides = [1, 1]} : vector<324x1xf32> to vector<305x1xf32>
    %4 = tpu.concatenate %2, %3 in 0 : vector<19x1xf32>, vector<305x1xf32> -> vector<324x1xf32>
    %c0_2 = arith.constant 0 : index
    %c0_3 = arith.constant 0 : index
    %5 = vector.load %arg2[%c0_2, %c0_3] : memref<9x32xf32, #tpu.memory_space<vmem>>, vector<1x32xf32>
    %6 = vector.broadcast %4 : vector<324x1xf32> to vector<324x32xf32>
    %7 = vector.broadcast %5 : vector<1x32xf32> to vector<324x32xf32>
    %8 = arith.mulf %6, %7 : vector<324x32xf32>
    %9 = vector.extract_strided_slice %1 {offsets = [306, 0], sizes = [18, 1], strides = [1, 1]} : vector<324x1xf32> to vector<18x1xf32>
    %10 = vector.extract_strided_slice %1 {offsets = [0, 0], sizes = [306, 1], strides = [1, 1]} : vector<324x1xf32> to vector<306x1xf32>
    %11 = tpu.concatenate %9, %10 in 0 : vector<18x1xf32>, vector<306x1xf32> -> vector<324x1xf32>
    %c1 = arith.constant 1 : index
    %c0_4 = arith.constant 0 : index
    %12 = vector.load %arg2[%c1, %c0_4] : memref<9x32xf32, #tpu.memory_space<vmem>>, vector<1x32xf32>
    %13 = vector.broadcast %11 : vector<324x1xf32> to vector<324x32xf32>
    %14 = vector.broadcast %12 : vector<1x32xf32> to vector<324x32xf32>
    %15 = arith.mulf %13, %14 : vector<324x32xf32>
    %16 = arith.addf %8, %15 : vector<324x32xf32>
    %17 = vector.extract_strided_slice %1 {offsets = [307, 0], sizes = [17, 1], strides = [1, 1]} : vector<324x1xf32> to vector<17x1xf32>
    %18 = vector.extract_strided_slice %1 {offsets = [0, 0], sizes = [307, 1], strides = [1, 1]} : vector<324x1xf32> to vector<307x1xf32>
    %19 = tpu.concatenate %17, %18 in 0 : vector<17x1xf32>, vector<307x1xf32> -> vector<324x1xf32>
    %c2 = arith.constant 2 : index
    %c0_5 = arith.constant 0 : index
    %20 = vector.load %arg2[%c2, %c0_5] : memref<9x32xf32, #tpu.memory_space<vmem>>, vector<1x32xf32>
    %21 = vector.broadcast %19 : vector<324x1xf32> to vector<324x32xf32>
    %22 = vector.broadcast %20 : vector<1x32xf32> to vector<324x32xf32>
    %23 = arith.mulf %21, %22 : vector<324x32xf32>
    %24 = arith.addf %16, %23 : vector<324x32xf32>
    %25 = vector.extract_strided_slice %1 {offsets = [323, 0], sizes = [1, 1], strides = [1, 1]} : vector<324x1xf32> to vector<1x1xf32>
    %26 = vector.extract_strided_slice %1 {offsets = [0, 0], sizes = [323, 1], strides = [1, 1]} : vector<324x1xf32> to vector<323x1xf32>
    %27 = tpu.concatenate %25, %26 in 0 : vector<1x1xf32>, vector<323x1xf32> -> vector<324x1xf32>
    %c3 = arith.constant 3 : index
    %c0_6 = arith.constant 0 : index
    %28 = vector.load %arg2[%c3, %c0_6] : memref<9x32xf32, #tpu.memory_space<vmem>>, vector<1x32xf32>
    %29 = vector.broadcast %27 : vector<324x1xf32> to vector<324x32xf32>
    %30 = vector.broadcast %28 : vector<1x32xf32> to vector<324x32xf32>
    %31 = arith.mulf %29, %30 : vector<324x32xf32>
    %32 = arith.addf %24, %31 : vector<324x32xf32>
    %c4 = arith.constant 4 : index
    %c0_7 = arith.constant 0 : index
    %33 = vector.load %arg2[%c4, %c0_7] : memref<9x32xf32, #tpu.memory_space<vmem>>, vector<1x32xf32>
    %34 = vector.broadcast %1 : vector<324x1xf32> to vector<324x32xf32>
    %35 = vector.broadcast %33 : vector<1x32xf32> to vector<324x32xf32>
    %36 = arith.mulf %34, %35 : vector<324x32xf32>
    %37 = arith.addf %32, %36 : vector<324x32xf32>
    %38 = vector.extract_strided_slice %1 {offsets = [1, 0], sizes = [323, 1], strides = [1, 1]} : vector<324x1xf32> to vector<323x1xf32>
    %39 = vector.extract_strided_slice %1 {offsets = [0, 0], sizes = [1, 1], strides = [1, 1]} : vector<324x1xf32> to vector<1x1xf32>
    %40 = tpu.concatenate %38, %39 in 0 : vector<323x1xf32>, vector<1x1xf32> -> vector<324x1xf32>
    %c5 = arith.constant 5 : index
    %c0_8 = arith.constant 0 : index
    %41 = vector.load %arg2[%c5, %c0_8] : memref<9x32xf32, #tpu.memory_space<vmem>>, vector<1x32xf32>
    %42 = vector.broadcast %40 : vector<324x1xf32> to vector<324x32xf32>
    %43 = vector.broadcast %41 : vector<1x32xf32> to vector<324x32xf32>
    %44 = arith.mulf %42, %43 : vector<324x32xf32>
    %45 = arith.addf %37, %44 : vector<324x32xf32>
    %46 = vector.extract_strided_slice %1 {offsets = [17, 0], sizes = [307, 1], strides = [1, 1]} : vector<324x1xf32> to vector<307x1xf32>
    %47 = vector.extract_strided_slice %1 {offsets = [0, 0], sizes = [17, 1], strides = [1, 1]} : vector<324x1xf32> to vector<17x1xf32>
    %48 = tpu.concatenate %46, %47 in 0 : vector<307x1xf32>, vector<17x1xf32> -> vector<324x1xf32>
    %c6 = arith.constant 6 : index
    %c0_9 = arith.constant 0 : index
    %49 = vector.load %arg2[%c6, %c0_9] : memref<9x32xf32, #tpu.memory_space<vmem>>, vector<1x32xf32>
    %50 = vector.broadcast %48 : vector<324x1xf32> to vector<324x32xf32>
    %51 = vector.broadcast %49 : vector<1x32xf32> to vector<324x32xf32>
    %52 = arith.mulf %50, %51 : vector<324x32xf32>
    %53 = arith.addf %45, %52 : vector<324x32xf32>
    %54 = vector.extract_strided_slice %1 {offsets = [18, 0], sizes = [306, 1], strides = [1, 1]} : vector<324x1xf32> to vector<306x1xf32>
    %55 = vector.extract_strided_slice %1 {offsets = [0, 0], sizes = [18, 1], strides = [1, 1]} : vector<324x1xf32> to vector<18x1xf32>
    %56 = tpu.concatenate %54, %55 in 0 : vector<306x1xf32>, vector<18x1xf32> -> vector<324x1xf32>
    %c7 = arith.constant 7 : index
    %c0_10 = arith.constant 0 : index
    %57 = vector.load %arg2[%c7, %c0_10] : memref<9x32xf32, #tpu.memory_space<vmem>>, vector<1x32xf32>
    %58 = vector.broadcast %56 : vector<324x1xf32> to vector<324x32xf32>
    %59 = vector.broadcast %57 : vector<1x32xf32> to vector<324x32xf32>
    %60 = arith.mulf %58, %59 : vector<324x32xf32>
    %61 = arith.addf %53, %60 : vector<324x32xf32>
    %62 = vector.extract_strided_slice %1 {offsets = [19, 0], sizes = [305, 1], strides = [1, 1]} : vector<324x1xf32> to vector<305x1xf32>
    %63 = vector.extract_strided_slice %1 {offsets = [0, 0], sizes = [19, 1], strides = [1, 1]} : vector<324x1xf32> to vector<19x1xf32>
    %64 = tpu.concatenate %62, %63 in 0 : vector<305x1xf32>, vector<19x1xf32> -> vector<324x1xf32>
    %c8 = arith.constant 8 : index
    %c0_11 = arith.constant 0 : index
    %65 = vector.load %arg2[%c8, %c0_11] : memref<9x32xf32, #tpu.memory_space<vmem>>, vector<1x32xf32>
    %66 = vector.broadcast %64 : vector<324x1xf32> to vector<324x32xf32>
    %67 = vector.broadcast %65 : vector<1x32xf32> to vector<324x32xf32>
    %68 = arith.mulf %66, %67 : vector<324x32xf32>
    %69 = arith.addf %61, %68 : vector<324x32xf32>
    %c0_12 = arith.constant 0 : index
    %c0_13 = arith.constant 0 : index
    %70 = vector.load %arg3[%c0_12, %c0_13] : memref<1x32xf32, #tpu.memory_space<vmem>>, vector<1x32xf32>
    %71 = vector.broadcast %70 : vector<1x32xf32> to vector<324x32xf32>
    %72 = arith.addf %69, %71 : vector<324x32xf32>
    %cst = arith.constant 0.000000e+00 : f32
    %73 = vector.broadcast %cst : f32 to vector<324x32xf32>
    %74 = arith.maximumf %72, %73 : vector<324x32xf32>
    %75 = vector.extract_strided_slice %74 {offsets = [1, 0], sizes = [323, 32], strides = [1, 1]} : vector<324x32xf32> to vector<323x32xf32>
    %76 = vector.extract_strided_slice %74 {offsets = [0, 0], sizes = [1, 32], strides = [1, 1]} : vector<324x32xf32> to vector<1x32xf32>
    %77 = tpu.concatenate %75, %76 in 0 : vector<323x32xf32>, vector<1x32xf32> -> vector<324x32xf32>
    %78 = arith.maximumf %74, %77 : vector<324x32xf32>
    %79 = vector.extract_strided_slice %74 {offsets = [18, 0], sizes = [306, 32], strides = [1, 1]} : vector<324x32xf32> to vector<306x32xf32>
    %80 = vector.extract_strided_slice %74 {offsets = [0, 0], sizes = [18, 32], strides = [1, 1]} : vector<324x32xf32> to vector<18x32xf32>
    %81 = tpu.concatenate %79, %80 in 0 : vector<306x32xf32>, vector<18x32xf32> -> vector<324x32xf32>
    %82 = vector.extract_strided_slice %74 {offsets = [19, 0], sizes = [305, 32], strides = [1, 1]} : vector<324x32xf32> to vector<305x32xf32>
    %83 = vector.extract_strided_slice %74 {offsets = [0, 0], sizes = [19, 32], strides = [1, 1]} : vector<324x32xf32> to vector<19x32xf32>
    %84 = tpu.concatenate %82, %83 in 0 : vector<305x32xf32>, vector<19x32xf32> -> vector<324x32xf32>
    %85 = arith.maximumf %81, %84 : vector<324x32xf32>
    %86 = arith.maximumf %78, %85 : vector<324x32xf32>
    %c0_14 = arith.constant 0 : index
    %c0_15 = arith.constant 0 : index
    %87 = vector.load %arg10[%c0_14, %c0_15] : memref<100x324xf32, #tpu.memory_space<vmem>>, vector<100x324xf32>
    %cst_16 = arith.constant dense<0.000000e+00> : vector<100x32xf32>
    %88 = tpu.matmul %87, %86, %cst_16 {dimension_numbers = #tpu.dot_dimension_numbers<[1], [0], [0], [1], [0, 0, 1, 1], [], []>} : vector<100x324xf32>, vector<324x32xf32>, vector<100x32xf32> -> vector<100x32xf32>
    %89 = vector.extract_strided_slice %88 {offsets = [89, 0], sizes = [11, 32], strides = [1, 1]} : vector<100x32xf32> to vector<11x32xf32>
    %90 = vector.extract_strided_slice %88 {offsets = [0, 0], sizes = [89, 32], strides = [1, 1]} : vector<100x32xf32> to vector<89x32xf32>
    %91 = tpu.concatenate %89, %90 in 0 : vector<11x32xf32>, vector<89x32xf32> -> vector<100x32xf32>
    %c0_17 = arith.constant 0 : index
    %c0_18 = arith.constant 0 : index
    %92 = vector.load %arg4[%c0_17, %c0_18] : memref<288x64xbf16, #tpu.memory_space<vmem>>, vector<32x64xbf16>
    %93 = arith.truncf %91 : vector<100x32xf32> to vector<100x32xbf16>
    %cst_19 = arith.constant dense<0.000000e+00> : vector<100x64xf32>
    %94 = tpu.matmul %93, %92, %cst_19 {dimension_numbers = #tpu.dot_dimension_numbers<[1], [0], [0], [1], [0, 0, 1, 1], [], []>} : vector<100x32xbf16>, vector<32x64xbf16>, vector<100x64xf32> -> vector<100x64xf32>
    %95 = vector.extract_strided_slice %88 {offsets = [90, 0], sizes = [10, 32], strides = [1, 1]} : vector<100x32xf32> to vector<10x32xf32>
    %96 = vector.extract_strided_slice %88 {offsets = [0, 0], sizes = [90, 32], strides = [1, 1]} : vector<100x32xf32> to vector<90x32xf32>
    %97 = tpu.concatenate %95, %96 in 0 : vector<10x32xf32>, vector<90x32xf32> -> vector<100x32xf32>
    %c32 = arith.constant 32 : index
    %c0_20 = arith.constant 0 : index
    %98 = vector.load %arg4[%c32, %c0_20] : memref<288x64xbf16, #tpu.memory_space<vmem>>, vector<32x64xbf16>
    %99 = arith.truncf %97 : vector<100x32xf32> to vector<100x32xbf16>
    %cst_21 = arith.constant dense<0.000000e+00> : vector<100x64xf32>
    %100 = tpu.matmul %99, %98, %cst_21 {dimension_numbers = #tpu.dot_dimension_numbers<[1], [0], [0], [1], [0, 0, 1, 1], [], []>} : vector<100x32xbf16>, vector<32x64xbf16>, vector<100x64xf32> -> vector<100x64xf32>
    %101 = arith.addf %94, %100 : vector<100x64xf32>
    %102 = vector.extract_strided_slice %88 {offsets = [91, 0], sizes = [9, 32], strides = [1, 1]} : vector<100x32xf32> to vector<9x32xf32>
    %103 = vector.extract_strided_slice %88 {offsets = [0, 0], sizes = [91, 32], strides = [1, 1]} : vector<100x32xf32> to vector<91x32xf32>
    %104 = tpu.concatenate %102, %103 in 0 : vector<9x32xf32>, vector<91x32xf32> -> vector<100x32xf32>
    %c64 = arith.constant 64 : index
    %c0_22 = arith.constant 0 : index
    %105 = vector.load %arg4[%c64, %c0_22] : memref<288x64xbf16, #tpu.memory_space<vmem>>, vector<32x64xbf16>
    %106 = arith.truncf %104 : vector<100x32xf32> to vector<100x32xbf16>
    %cst_23 = arith.constant dense<0.000000e+00> : vector<100x64xf32>
    %107 = tpu.matmul %106, %105, %cst_23 {dimension_numbers = #tpu.dot_dimension_numbers<[1], [0], [0], [1], [0, 0, 1, 1], [], []>} : vector<100x32xbf16>, vector<32x64xbf16>, vector<100x64xf32> -> vector<100x64xf32>
    %108 = arith.addf %101, %107 : vector<100x64xf32>
    %109 = vector.extract_strided_slice %88 {offsets = [99, 0], sizes = [1, 32], strides = [1, 1]} : vector<100x32xf32> to vector<1x32xf32>
    %110 = vector.extract_strided_slice %88 {offsets = [0, 0], sizes = [99, 32], strides = [1, 1]} : vector<100x32xf32> to vector<99x32xf32>
    %111 = tpu.concatenate %109, %110 in 0 : vector<1x32xf32>, vector<99x32xf32> -> vector<100x32xf32>
    %c96 = arith.constant 96 : index
    %c0_24 = arith.constant 0 : index
    %112 = vector.load %arg4[%c96, %c0_24] : memref<288x64xbf16, #tpu.memory_space<vmem>>, vector<32x64xbf16>
    %113 = arith.truncf %111 : vector<100x32xf32> to vector<100x32xbf16>
    %cst_25 = arith.constant dense<0.000000e+00> : vector<100x64xf32>
    %114 = tpu.matmul %113, %112, %cst_25 {dimension_numbers = #tpu.dot_dimension_numbers<[1], [0], [0], [1], [0, 0, 1, 1], [], []>} : vector<100x32xbf16>, vector<32x64xbf16>, vector<100x64xf32> -> vector<100x64xf32>
    %115 = arith.addf %108, %114 : vector<100x64xf32>
    %c128 = arith.constant 128 : index
    %c0_26 = arith.constant 0 : index
    %116 = vector.load %arg4[%c128, %c0_26] : memref<288x64xbf16, #tpu.memory_space<vmem>>, vector<32x64xbf16>
    %117 = arith.truncf %88 : vector<100x32xf32> to vector<100x32xbf16>
    %cst_27 = arith.constant dense<0.000000e+00> : vector<100x64xf32>
    %118 = tpu.matmul %117, %116, %cst_27 {dimension_numbers = #tpu.dot_dimension_numbers<[1], [0], [0], [1], [0, 0, 1, 1], [], []>} : vector<100x32xbf16>, vector<32x64xbf16>, vector<100x64xf32> -> vector<100x64xf32>
    %119 = arith.addf %115, %118 : vector<100x64xf32>
    %120 = vector.extract_strided_slice %88 {offsets = [1, 0], sizes = [99, 32], strides = [1, 1]} : vector<100x32xf32> to vector<99x32xf32>
    %121 = vector.extract_strided_slice %88 {offsets = [0, 0], sizes = [1, 32], strides = [1, 1]} : vector<100x32xf32> to vector<1x32xf32>
    %122 = tpu.concatenate %120, %121 in 0 : vector<99x32xf32>, vector<1x32xf32> -> vector<100x32xf32>
    %c160 = arith.constant 160 : index
    %c0_28 = arith.constant 0 : index
    %123 = vector.load %arg4[%c160, %c0_28] : memref<288x64xbf16, #tpu.memory_space<vmem>>, vector<32x64xbf16>
    %124 = arith.truncf %122 : vector<100x32xf32> to vector<100x32xbf16>
    %cst_29 = arith.constant dense<0.000000e+00> : vector<100x64xf32>
    %125 = tpu.matmul %124, %123, %cst_29 {dimension_numbers = #tpu.dot_dimension_numbers<[1], [0], [0], [1], [0, 0, 1, 1], [], []>} : vector<100x32xbf16>, vector<32x64xbf16>, vector<100x64xf32> -> vector<100x64xf32>
    %126 = arith.addf %119, %125 : vector<100x64xf32>
    %127 = vector.extract_strided_slice %88 {offsets = [9, 0], sizes = [91, 32], strides = [1, 1]} : vector<100x32xf32> to vector<91x32xf32>
    %128 = vector.extract_strided_slice %88 {offsets = [0, 0], sizes = [9, 32], strides = [1, 1]} : vector<100x32xf32> to vector<9x32xf32>
    %129 = tpu.concatenate %127, %128 in 0 : vector<91x32xf32>, vector<9x32xf32> -> vector<100x32xf32>
    %c192 = arith.constant 192 : index
    %c0_30 = arith.constant 0 : index
    %130 = vector.load %arg4[%c192, %c0_30] : memref<288x64xbf16, #tpu.memory_space<vmem>>, vector<32x64xbf16>
    %131 = arith.truncf %129 : vector<100x32xf32> to vector<100x32xbf16>
    %cst_31 = arith.constant dense<0.000000e+00> : vector<100x64xf32>
    %132 = tpu.matmul %131, %130, %cst_31 {dimension_numbers = #tpu.dot_dimension_numbers<[1], [0], [0], [1], [0, 0, 1, 1], [], []>} : vector<100x32xbf16>, vector<32x64xbf16>, vector<100x64xf32> -> vector<100x64xf32>
    %133 = arith.addf %126, %132 : vector<100x64xf32>
    %134 = vector.extract_strided_slice %88 {offsets = [10, 0], sizes = [90, 32], strides = [1, 1]} : vector<100x32xf32> to vector<90x32xf32>
    %135 = vector.extract_strided_slice %88 {offsets = [0, 0], sizes = [10, 32], strides = [1, 1]} : vector<100x32xf32> to vector<10x32xf32>
    %136 = tpu.concatenate %134, %135 in 0 : vector<90x32xf32>, vector<10x32xf32> -> vector<100x32xf32>
    %c224 = arith.constant 224 : index
    %c0_32 = arith.constant 0 : index
    %137 = vector.load %arg4[%c224, %c0_32] : memref<288x64xbf16, #tpu.memory_space<vmem>>, vector<32x64xbf16>
    %138 = arith.truncf %136 : vector<100x32xf32> to vector<100x32xbf16>
    %cst_33 = arith.constant dense<0.000000e+00> : vector<100x64xf32>
    %139 = tpu.matmul %138, %137, %cst_33 {dimension_numbers = #tpu.dot_dimension_numbers<[1], [0], [0], [1], [0, 0, 1, 1], [], []>} : vector<100x32xbf16>, vector<32x64xbf16>, vector<100x64xf32> -> vector<100x64xf32>
    %140 = arith.addf %133, %139 : vector<100x64xf32>
    %141 = vector.extract_strided_slice %88 {offsets = [11, 0], sizes = [89, 32], strides = [1, 1]} : vector<100x32xf32> to vector<89x32xf32>
    %142 = vector.extract_strided_slice %88 {offsets = [0, 0], sizes = [11, 32], strides = [1, 1]} : vector<100x32xf32> to vector<11x32xf32>
    %143 = tpu.concatenate %141, %142 in 0 : vector<89x32xf32>, vector<11x32xf32> -> vector<100x32xf32>
    %c256 = arith.constant 256 : index
    %c0_34 = arith.constant 0 : index
    %144 = vector.load %arg4[%c256, %c0_34] : memref<288x64xbf16, #tpu.memory_space<vmem>>, vector<32x64xbf16>
    %145 = arith.truncf %143 : vector<100x32xf32> to vector<100x32xbf16>
    %cst_35 = arith.constant dense<0.000000e+00> : vector<100x64xf32>
    %146 = tpu.matmul %145, %144, %cst_35 {dimension_numbers = #tpu.dot_dimension_numbers<[1], [0], [0], [1], [0, 0, 1, 1], [], []>} : vector<100x32xbf16>, vector<32x64xbf16>, vector<100x64xf32> -> vector<100x64xf32>
    %147 = arith.addf %140, %146 : vector<100x64xf32>
    %c0_36 = arith.constant 0 : index
    %c0_37 = arith.constant 0 : index
    %148 = vector.load %arg5[%c0_36, %c0_37] : memref<1x64xf32, #tpu.memory_space<vmem>>, vector<1x64xf32>
    %149 = vector.broadcast %148 : vector<1x64xf32> to vector<100x64xf32>
    %150 = arith.addf %147, %149 : vector<100x64xf32>
    %cst_38 = arith.constant 0.000000e+00 : f32
    %151 = vector.broadcast %cst_38 : f32 to vector<100x64xf32>
    %152 = arith.maximumf %150, %151 : vector<100x64xf32>
    %153 = vector.extract_strided_slice %152 {offsets = [1, 0], sizes = [99, 64], strides = [1, 1]} : vector<100x64xf32> to vector<99x64xf32>
    %154 = vector.extract_strided_slice %152 {offsets = [0, 0], sizes = [1, 64], strides = [1, 1]} : vector<100x64xf32> to vector<1x64xf32>
    %155 = tpu.concatenate %153, %154 in 0 : vector<99x64xf32>, vector<1x64xf32> -> vector<100x64xf32>
    %156 = arith.maximumf %152, %155 : vector<100x64xf32>
    %157 = vector.extract_strided_slice %152 {offsets = [10, 0], sizes = [90, 64], strides = [1, 1]} : vector<100x64xf32> to vector<90x64xf32>
    %158 = vector.extract_strided_slice %152 {offsets = [0, 0], sizes = [10, 64], strides = [1, 1]} : vector<100x64xf32> to vector<10x64xf32>
    %159 = tpu.concatenate %157, %158 in 0 : vector<90x64xf32>, vector<10x64xf32> -> vector<100x64xf32>
    %160 = vector.extract_strided_slice %152 {offsets = [11, 0], sizes = [89, 64], strides = [1, 1]} : vector<100x64xf32> to vector<89x64xf32>
    %161 = vector.extract_strided_slice %152 {offsets = [0, 0], sizes = [11, 64], strides = [1, 1]} : vector<100x64xf32> to vector<11x64xf32>
    %162 = tpu.concatenate %160, %161 in 0 : vector<89x64xf32>, vector<11x64xf32> -> vector<100x64xf32>
    %163 = arith.maximumf %159, %162 : vector<100x64xf32>
    %164 = arith.maximumf %156, %163 : vector<100x64xf32>
    %c0_39 = arith.constant 0 : index
    %c0_40 = arith.constant 0 : index
    %165 = vector.load %arg11[%c0_39, %c0_40] : memref<36x100xf32, #tpu.memory_space<vmem>>, vector<36x100xf32>
    %cst_41 = arith.constant dense<0.000000e+00> : vector<36x64xf32>
    %166 = tpu.matmul %165, %164, %cst_41 {dimension_numbers = #tpu.dot_dimension_numbers<[1], [0], [0], [1], [0, 0, 1, 1], [], []>} : vector<36x100xf32>, vector<100x64xf32>, vector<36x64xf32> -> vector<36x64xf32>
    %167 = vector.extract_strided_slice %166 {offsets = [29, 0], sizes = [7, 64], strides = [1, 1]} : vector<36x64xf32> to vector<7x64xf32>
    %168 = vector.extract_strided_slice %166 {offsets = [0, 0], sizes = [29, 64], strides = [1, 1]} : vector<36x64xf32> to vector<29x64xf32>
    %169 = tpu.concatenate %167, %168 in 0 : vector<7x64xf32>, vector<29x64xf32> -> vector<36x64xf32>
    %c0_42 = arith.constant 0 : index
    %c0_43 = arith.constant 0 : index
    %170 = vector.load %arg6[%c0_42, %c0_43] : memref<576x128xbf16, #tpu.memory_space<vmem>>, vector<64x128xbf16>
    %171 = arith.truncf %169 : vector<36x64xf32> to vector<36x64xbf16>
    %cst_44 = arith.constant dense<0.000000e+00> : vector<36x128xf32>
    %172 = tpu.matmul %171, %170, %cst_44 {dimension_numbers = #tpu.dot_dimension_numbers<[1], [0], [0], [1], [0, 0, 1, 1], [], []>} : vector<36x64xbf16>, vector<64x128xbf16>, vector<36x128xf32> -> vector<36x128xf32>
    %173 = vector.extract_strided_slice %166 {offsets = [30, 0], sizes = [6, 64], strides = [1, 1]} : vector<36x64xf32> to vector<6x64xf32>
    %174 = vector.extract_strided_slice %166 {offsets = [0, 0], sizes = [30, 64], strides = [1, 1]} : vector<36x64xf32> to vector<30x64xf32>
    %175 = tpu.concatenate %173, %174 in 0 : vector<6x64xf32>, vector<30x64xf32> -> vector<36x64xf32>
    %c64_45 = arith.constant 64 : index
    %c0_46 = arith.constant 0 : index
    %176 = vector.load %arg6[%c64_45, %c0_46] : memref<576x128xbf16, #tpu.memory_space<vmem>>, vector<64x128xbf16>
    %177 = arith.truncf %175 : vector<36x64xf32> to vector<36x64xbf16>
    %cst_47 = arith.constant dense<0.000000e+00> : vector<36x128xf32>
    %178 = tpu.matmul %177, %176, %cst_47 {dimension_numbers = #tpu.dot_dimension_numbers<[1], [0], [0], [1], [0, 0, 1, 1], [], []>} : vector<36x64xbf16>, vector<64x128xbf16>, vector<36x128xf32> -> vector<36x128xf32>
    %179 = arith.addf %172, %178 : vector<36x128xf32>
    %180 = vector.extract_strided_slice %166 {offsets = [31, 0], sizes = [5, 64], strides = [1, 1]} : vector<36x64xf32> to vector<5x64xf32>
    %181 = vector.extract_strided_slice %166 {offsets = [0, 0], sizes = [31, 64], strides = [1, 1]} : vector<36x64xf32> to vector<31x64xf32>
    %182 = tpu.concatenate %180, %181 in 0 : vector<5x64xf32>, vector<31x64xf32> -> vector<36x64xf32>
    %c128_48 = arith.constant 128 : index
    %c0_49 = arith.constant 0 : index
    %183 = vector.load %arg6[%c128_48, %c0_49] : memref<576x128xbf16, #tpu.memory_space<vmem>>, vector<64x128xbf16>
    %184 = arith.truncf %182 : vector<36x64xf32> to vector<36x64xbf16>
    %cst_50 = arith.constant dense<0.000000e+00> : vector<36x128xf32>
    %185 = tpu.matmul %184, %183, %cst_50 {dimension_numbers = #tpu.dot_dimension_numbers<[1], [0], [0], [1], [0, 0, 1, 1], [], []>} : vector<36x64xbf16>, vector<64x128xbf16>, vector<36x128xf32> -> vector<36x128xf32>
    %186 = arith.addf %179, %185 : vector<36x128xf32>
    %187 = vector.extract_strided_slice %166 {offsets = [35, 0], sizes = [1, 64], strides = [1, 1]} : vector<36x64xf32> to vector<1x64xf32>
    %188 = vector.extract_strided_slice %166 {offsets = [0, 0], sizes = [35, 64], strides = [1, 1]} : vector<36x64xf32> to vector<35x64xf32>
    %189 = tpu.concatenate %187, %188 in 0 : vector<1x64xf32>, vector<35x64xf32> -> vector<36x64xf32>
    %c192_51 = arith.constant 192 : index
    %c0_52 = arith.constant 0 : index
    %190 = vector.load %arg6[%c192_51, %c0_52] : memref<576x128xbf16, #tpu.memory_space<vmem>>, vector<64x128xbf16>
    %191 = arith.truncf %189 : vector<36x64xf32> to vector<36x64xbf16>
    %cst_53 = arith.constant dense<0.000000e+00> : vector<36x128xf32>
    %192 = tpu.matmul %191, %190, %cst_53 {dimension_numbers = #tpu.dot_dimension_numbers<[1], [0], [0], [1], [0, 0, 1, 1], [], []>} : vector<36x64xbf16>, vector<64x128xbf16>, vector<36x128xf32> -> vector<36x128xf32>
    %193 = arith.addf %186, %192 : vector<36x128xf32>
    %c256_54 = arith.constant 256 : index
    %c0_55 = arith.constant 0 : index
    %194 = vector.load %arg6[%c256_54, %c0_55] : memref<576x128xbf16, #tpu.memory_space<vmem>>, vector<64x128xbf16>
    %195 = arith.truncf %166 : vector<36x64xf32> to vector<36x64xbf16>
    %cst_56 = arith.constant dense<0.000000e+00> : vector<36x128xf32>
    %196 = tpu.matmul %195, %194, %cst_56 {dimension_numbers = #tpu.dot_dimension_numbers<[1], [0], [0], [1], [0, 0, 1, 1], [], []>} : vector<36x64xbf16>, vector<64x128xbf16>, vector<36x128xf32> -> vector<36x128xf32>
    %197 = arith.addf %193, %196 : vector<36x128xf32>
    %198 = vector.extract_strided_slice %166 {offsets = [1, 0], sizes = [35, 64], strides = [1, 1]} : vector<36x64xf32> to vector<35x64xf32>
    %199 = vector.extract_strided_slice %166 {offsets = [0, 0], sizes = [1, 64], strides = [1, 1]} : vector<36x64xf32> to vector<1x64xf32>
    %200 = tpu.concatenate %198, %199 in 0 : vector<35x64xf32>, vector<1x64xf32> -> vector<36x64xf32>
    %c320 = arith.constant 320 : index
    %c0_57 = arith.constant 0 : index
    %201 = vector.load %arg6[%c320, %c0_57] : memref<576x128xbf16, #tpu.memory_space<vmem>>, vector<64x128xbf16>
    %202 = arith.truncf %200 : vector<36x64xf32> to vector<36x64xbf16>
    %cst_58 = arith.constant dense<0.000000e+00> : vector<36x128xf32>
    %203 = tpu.matmul %202, %201, %cst_58 {dimension_numbers = #tpu.dot_dimension_numbers<[1], [0], [0], [1], [0, 0, 1, 1], [], []>} : vector<36x64xbf16>, vector<64x128xbf16>, vector<36x128xf32> -> vector<36x128xf32>
    %204 = arith.addf %197, %203 : vector<36x128xf32>
    %205 = vector.extract_strided_slice %166 {offsets = [5, 0], sizes = [31, 64], strides = [1, 1]} : vector<36x64xf32> to vector<31x64xf32>
    %206 = vector.extract_strided_slice %166 {offsets = [0, 0], sizes = [5, 64], strides = [1, 1]} : vector<36x64xf32> to vector<5x64xf32>
    %207 = tpu.concatenate %205, %206 in 0 : vector<31x64xf32>, vector<5x64xf32> -> vector<36x64xf32>
    %c384 = arith.constant 384 : index
    %c0_59 = arith.constant 0 : index
    %208 = vector.load %arg6[%c384, %c0_59] : memref<576x128xbf16, #tpu.memory_space<vmem>>, vector<64x128xbf16>
    %209 = arith.truncf %207 : vector<36x64xf32> to vector<36x64xbf16>
    %cst_60 = arith.constant dense<0.000000e+00> : vector<36x128xf32>
    %210 = tpu.matmul %209, %208, %cst_60 {dimension_numbers = #tpu.dot_dimension_numbers<[1], [0], [0], [1], [0, 0, 1, 1], [], []>} : vector<36x64xbf16>, vector<64x128xbf16>, vector<36x128xf32> -> vector<36x128xf32>
    %211 = arith.addf %204, %210 : vector<36x128xf32>
    %212 = vector.extract_strided_slice %166 {offsets = [6, 0], sizes = [30, 64], strides = [1, 1]} : vector<36x64xf32> to vector<30x64xf32>
    %213 = vector.extract_strided_slice %166 {offsets = [0, 0], sizes = [6, 64], strides = [1, 1]} : vector<36x64xf32> to vector<6x64xf32>
    %214 = tpu.concatenate %212, %213 in 0 : vector<30x64xf32>, vector<6x64xf32> -> vector<36x64xf32>
    %c448 = arith.constant 448 : index
    %c0_61 = arith.constant 0 : index
    %215 = vector.load %arg6[%c448, %c0_61] : memref<576x128xbf16, #tpu.memory_space<vmem>>, vector<64x128xbf16>
    %216 = arith.truncf %214 : vector<36x64xf32> to vector<36x64xbf16>
    %cst_62 = arith.constant dense<0.000000e+00> : vector<36x128xf32>
    %217 = tpu.matmul %216, %215, %cst_62 {dimension_numbers = #tpu.dot_dimension_numbers<[1], [0], [0], [1], [0, 0, 1, 1], [], []>} : vector<36x64xbf16>, vector<64x128xbf16>, vector<36x128xf32> -> vector<36x128xf32>
    %218 = arith.addf %211, %217 : vector<36x128xf32>
    %219 = vector.extract_strided_slice %166 {offsets = [7, 0], sizes = [29, 64], strides = [1, 1]} : vector<36x64xf32> to vector<29x64xf32>
    %220 = vector.extract_strided_slice %166 {offsets = [0, 0], sizes = [7, 64], strides = [1, 1]} : vector<36x64xf32> to vector<7x64xf32>
    %221 = tpu.concatenate %219, %220 in 0 : vector<29x64xf32>, vector<7x64xf32> -> vector<36x64xf32>
    %c512 = arith.constant 512 : index
    %c0_63 = arith.constant 0 : index
    %222 = vector.load %arg6[%c512, %c0_63] : memref<576x128xbf16, #tpu.memory_space<vmem>>, vector<64x128xbf16>
    %223 = arith.truncf %221 : vector<36x64xf32> to vector<36x64xbf16>
    %cst_64 = arith.constant dense<0.000000e+00> : vector<36x128xf32>
    %224 = tpu.matmul %223, %222, %cst_64 {dimension_numbers = #tpu.dot_dimension_numbers<[1], [0], [0], [1], [0, 0, 1, 1], [], []>} : vector<36x64xbf16>, vector<64x128xbf16>, vector<36x128xf32> -> vector<36x128xf32>
    %225 = arith.addf %218, %224 : vector<36x128xf32>
    %c0_65 = arith.constant 0 : index
    %c0_66 = arith.constant 0 : index
    %226 = vector.load %arg7[%c0_65, %c0_66] : memref<1x128xf32, #tpu.memory_space<vmem>>, vector<1x128xf32>
    %227 = vector.broadcast %226 : vector<1x128xf32> to vector<36x128xf32>
    %228 = arith.addf %225, %227 : vector<36x128xf32>
    %cst_67 = arith.constant 0.000000e+00 : f32
    %229 = vector.broadcast %cst_67 : f32 to vector<36x128xf32>
    %230 = arith.maximumf %228, %229 : vector<36x128xf32>
    %231 = vector.extract_strided_slice %230 {offsets = [1, 0], sizes = [35, 128], strides = [1, 1]} : vector<36x128xf32> to vector<35x128xf32>
    %232 = vector.extract_strided_slice %230 {offsets = [0, 0], sizes = [1, 128], strides = [1, 1]} : vector<36x128xf32> to vector<1x128xf32>
    %233 = tpu.concatenate %231, %232 in 0 : vector<35x128xf32>, vector<1x128xf32> -> vector<36x128xf32>
    %234 = arith.maximumf %230, %233 : vector<36x128xf32>
    %235 = vector.extract_strided_slice %230 {offsets = [6, 0], sizes = [30, 128], strides = [1, 1]} : vector<36x128xf32> to vector<30x128xf32>
    %236 = vector.extract_strided_slice %230 {offsets = [0, 0], sizes = [6, 128], strides = [1, 1]} : vector<36x128xf32> to vector<6x128xf32>
    %237 = tpu.concatenate %235, %236 in 0 : vector<30x128xf32>, vector<6x128xf32> -> vector<36x128xf32>
    %238 = vector.extract_strided_slice %230 {offsets = [7, 0], sizes = [29, 128], strides = [1, 1]} : vector<36x128xf32> to vector<29x128xf32>
    %239 = vector.extract_strided_slice %230 {offsets = [0, 0], sizes = [7, 128], strides = [1, 1]} : vector<36x128xf32> to vector<7x128xf32>
    %240 = tpu.concatenate %238, %239 in 0 : vector<29x128xf32>, vector<7x128xf32> -> vector<36x128xf32>
    %241 = arith.maximumf %237, %240 : vector<36x128xf32>
    %242 = arith.maximumf %234, %241 : vector<36x128xf32>
    %c0_68 = arith.constant 0 : index
    %c0_69 = arith.constant 0 : index
    %243 = vector.load %arg12[%c0_68, %c0_69] : memref<16x36xf32, #tpu.memory_space<vmem>>, vector<16x36xf32>
    %cst_70 = arith.constant dense<0.000000e+00> : vector<16x128xf32>
    %244 = tpu.matmul %243, %242, %cst_70 {dimension_numbers = #tpu.dot_dimension_numbers<[1], [0], [0], [1], [0, 0, 1, 1], [], []>} : vector<16x36xf32>, vector<36x128xf32>, vector<16x128xf32> -> vector<16x128xf32>
    %245 = vector.extract_strided_slice %244 {offsets = [11, 0], sizes = [5, 128], strides = [1, 1]} : vector<16x128xf32> to vector<5x128xf32>
    %246 = vector.extract_strided_slice %244 {offsets = [0, 0], sizes = [11, 128], strides = [1, 1]} : vector<16x128xf32> to vector<11x128xf32>
    %247 = tpu.concatenate %245, %246 in 0 : vector<5x128xf32>, vector<11x128xf32> -> vector<16x128xf32>
    %c0_71 = arith.constant 0 : index
    %c0_72 = arith.constant 0 : index
    %248 = vector.load %arg8[%c0_71, %c0_72] : memref<1152x256xbf16, #tpu.memory_space<vmem>>, vector<128x256xbf16>
    %249 = arith.truncf %247 : vector<16x128xf32> to vector<16x128xbf16>
    %cst_73 = arith.constant dense<0.000000e+00> : vector<16x256xf32>
    %250 = tpu.matmul %249, %248, %cst_73 {dimension_numbers = #tpu.dot_dimension_numbers<[1], [0], [0], [1], [0, 0, 1, 1], [], []>} : vector<16x128xbf16>, vector<128x256xbf16>, vector<16x256xf32> -> vector<16x256xf32>
    %251 = vector.extract_strided_slice %244 {offsets = [12, 0], sizes = [4, 128], strides = [1, 1]} : vector<16x128xf32> to vector<4x128xf32>
    %252 = vector.extract_strided_slice %244 {offsets = [0, 0], sizes = [12, 128], strides = [1, 1]} : vector<16x128xf32> to vector<12x128xf32>
    %253 = tpu.concatenate %251, %252 in 0 : vector<4x128xf32>, vector<12x128xf32> -> vector<16x128xf32>
    %c128_74 = arith.constant 128 : index
    %c0_75 = arith.constant 0 : index
    %254 = vector.load %arg8[%c128_74, %c0_75] : memref<1152x256xbf16, #tpu.memory_space<vmem>>, vector<128x256xbf16>
    %255 = arith.truncf %253 : vector<16x128xf32> to vector<16x128xbf16>
    %cst_76 = arith.constant dense<0.000000e+00> : vector<16x256xf32>
    %256 = tpu.matmul %255, %254, %cst_76 {dimension_numbers = #tpu.dot_dimension_numbers<[1], [0], [0], [1], [0, 0, 1, 1], [], []>} : vector<16x128xbf16>, vector<128x256xbf16>, vector<16x256xf32> -> vector<16x256xf32>
    %257 = arith.addf %250, %256 : vector<16x256xf32>
    %258 = vector.extract_strided_slice %244 {offsets = [13, 0], sizes = [3, 128], strides = [1, 1]} : vector<16x128xf32> to vector<3x128xf32>
    %259 = vector.extract_strided_slice %244 {offsets = [0, 0], sizes = [13, 128], strides = [1, 1]} : vector<16x128xf32> to vector<13x128xf32>
    %260 = tpu.concatenate %258, %259 in 0 : vector<3x128xf32>, vector<13x128xf32> -> vector<16x128xf32>
    %c256_77 = arith.constant 256 : index
    %c0_78 = arith.constant 0 : index
    %261 = vector.load %arg8[%c256_77, %c0_78] : memref<1152x256xbf16, #tpu.memory_space<vmem>>, vector<128x256xbf16>
    %262 = arith.truncf %260 : vector<16x128xf32> to vector<16x128xbf16>
    %cst_79 = arith.constant dense<0.000000e+00> : vector<16x256xf32>
    %263 = tpu.matmul %262, %261, %cst_79 {dimension_numbers = #tpu.dot_dimension_numbers<[1], [0], [0], [1], [0, 0, 1, 1], [], []>} : vector<16x128xbf16>, vector<128x256xbf16>, vector<16x256xf32> -> vector<16x256xf32>
    %264 = arith.addf %257, %263 : vector<16x256xf32>
    %265 = vector.extract_strided_slice %244 {offsets = [15, 0], sizes = [1, 128], strides = [1, 1]} : vector<16x128xf32> to vector<1x128xf32>
    %266 = vector.extract_strided_slice %244 {offsets = [0, 0], sizes = [15, 128], strides = [1, 1]} : vector<16x128xf32> to vector<15x128xf32>
    %267 = tpu.concatenate %265, %266 in 0 : vector<1x128xf32>, vector<15x128xf32> -> vector<16x128xf32>
    %c384_80 = arith.constant 384 : index
    %c0_81 = arith.constant 0 : index
    %268 = vector.load %arg8[%c384_80, %c0_81] : memref<1152x256xbf16, #tpu.memory_space<vmem>>, vector<128x256xbf16>
    %269 = arith.truncf %267 : vector<16x128xf32> to vector<16x128xbf16>
    %cst_82 = arith.constant dense<0.000000e+00> : vector<16x256xf32>
    %270 = tpu.matmul %269, %268, %cst_82 {dimension_numbers = #tpu.dot_dimension_numbers<[1], [0], [0], [1], [0, 0, 1, 1], [], []>} : vector<16x128xbf16>, vector<128x256xbf16>, vector<16x256xf32> -> vector<16x256xf32>
    %271 = arith.addf %264, %270 : vector<16x256xf32>
    %c512_83 = arith.constant 512 : index
    %c0_84 = arith.constant 0 : index
    %272 = vector.load %arg8[%c512_83, %c0_84] : memref<1152x256xbf16, #tpu.memory_space<vmem>>, vector<128x256xbf16>
    %273 = arith.truncf %244 : vector<16x128xf32> to vector<16x128xbf16>
    %cst_85 = arith.constant dense<0.000000e+00> : vector<16x256xf32>
    %274 = tpu.matmul %273, %272, %cst_85 {dimension_numbers = #tpu.dot_dimension_numbers<[1], [0], [0], [1], [0, 0, 1, 1], [], []>} : vector<16x128xbf16>, vector<128x256xbf16>, vector<16x256xf32> -> vector<16x256xf32>
    %275 = arith.addf %271, %274 : vector<16x256xf32>
    %276 = vector.extract_strided_slice %244 {offsets = [1, 0], sizes = [15, 128], strides = [1, 1]} : vector<16x128xf32> to vector<15x128xf32>
    %277 = vector.extract_strided_slice %244 {offsets = [0, 0], sizes = [1, 128], strides = [1, 1]} : vector<16x128xf32> to vector<1x128xf32>
    %278 = tpu.concatenate %276, %277 in 0 : vector<15x128xf32>, vector<1x128xf32> -> vector<16x128xf32>
    %c640 = arith.constant 640 : index
    %c0_86 = arith.constant 0 : index
    %279 = vector.load %arg8[%c640, %c0_86] : memref<1152x256xbf16, #tpu.memory_space<vmem>>, vector<128x256xbf16>
    %280 = arith.truncf %278 : vector<16x128xf32> to vector<16x128xbf16>
    %cst_87 = arith.constant dense<0.000000e+00> : vector<16x256xf32>
    %281 = tpu.matmul %280, %279, %cst_87 {dimension_numbers = #tpu.dot_dimension_numbers<[1], [0], [0], [1], [0, 0, 1, 1], [], []>} : vector<16x128xbf16>, vector<128x256xbf16>, vector<16x256xf32> -> vector<16x256xf32>
    %282 = arith.addf %275, %281 : vector<16x256xf32>
    %283 = vector.extract_strided_slice %244 {offsets = [3, 0], sizes = [13, 128], strides = [1, 1]} : vector<16x128xf32> to vector<13x128xf32>
    %284 = vector.extract_strided_slice %244 {offsets = [0, 0], sizes = [3, 128], strides = [1, 1]} : vector<16x128xf32> to vector<3x128xf32>
    %285 = tpu.concatenate %283, %284 in 0 : vector<13x128xf32>, vector<3x128xf32> -> vector<16x128xf32>
    %c768 = arith.constant 768 : index
    %c0_88 = arith.constant 0 : index
    %286 = vector.load %arg8[%c768, %c0_88] : memref<1152x256xbf16, #tpu.memory_space<vmem>>, vector<128x256xbf16>
    %287 = arith.truncf %285 : vector<16x128xf32> to vector<16x128xbf16>
    %cst_89 = arith.constant dense<0.000000e+00> : vector<16x256xf32>
    %288 = tpu.matmul %287, %286, %cst_89 {dimension_numbers = #tpu.dot_dimension_numbers<[1], [0], [0], [1], [0, 0, 1, 1], [], []>} : vector<16x128xbf16>, vector<128x256xbf16>, vector<16x256xf32> -> vector<16x256xf32>
    %289 = arith.addf %282, %288 : vector<16x256xf32>
    %290 = vector.extract_strided_slice %244 {offsets = [4, 0], sizes = [12, 128], strides = [1, 1]} : vector<16x128xf32> to vector<12x128xf32>
    %291 = vector.extract_strided_slice %244 {offsets = [0, 0], sizes = [4, 128], strides = [1, 1]} : vector<16x128xf32> to vector<4x128xf32>
    %292 = tpu.concatenate %290, %291 in 0 : vector<12x128xf32>, vector<4x128xf32> -> vector<16x128xf32>
    %c896 = arith.constant 896 : index
    %c0_90 = arith.constant 0 : index
    %293 = vector.load %arg8[%c896, %c0_90] : memref<1152x256xbf16, #tpu.memory_space<vmem>>, vector<128x256xbf16>
    %294 = arith.truncf %292 : vector<16x128xf32> to vector<16x128xbf16>
    %cst_91 = arith.constant dense<0.000000e+00> : vector<16x256xf32>
    %295 = tpu.matmul %294, %293, %cst_91 {dimension_numbers = #tpu.dot_dimension_numbers<[1], [0], [0], [1], [0, 0, 1, 1], [], []>} : vector<16x128xbf16>, vector<128x256xbf16>, vector<16x256xf32> -> vector<16x256xf32>
    %296 = arith.addf %289, %295 : vector<16x256xf32>
    %297 = vector.extract_strided_slice %244 {offsets = [5, 0], sizes = [11, 128], strides = [1, 1]} : vector<16x128xf32> to vector<11x128xf32>
    %298 = vector.extract_strided_slice %244 {offsets = [0, 0], sizes = [5, 128], strides = [1, 1]} : vector<16x128xf32> to vector<5x128xf32>
    %299 = tpu.concatenate %297, %298 in 0 : vector<11x128xf32>, vector<5x128xf32> -> vector<16x128xf32>
    %c1024 = arith.constant 1024 : index
    %c0_92 = arith.constant 0 : index
    %300 = vector.load %arg8[%c1024, %c0_92] : memref<1152x256xbf16, #tpu.memory_space<vmem>>, vector<128x256xbf16>
    %301 = arith.truncf %299 : vector<16x128xf32> to vector<16x128xbf16>
    %cst_93 = arith.constant dense<0.000000e+00> : vector<16x256xf32>
    %302 = tpu.matmul %301, %300, %cst_93 {dimension_numbers = #tpu.dot_dimension_numbers<[1], [0], [0], [1], [0, 0, 1, 1], [], []>} : vector<16x128xbf16>, vector<128x256xbf16>, vector<16x256xf32> -> vector<16x256xf32>
    %303 = arith.addf %296, %302 : vector<16x256xf32>
    %c0_94 = arith.constant 0 : index
    %c0_95 = arith.constant 0 : index
    %304 = vector.load %arg9[%c0_94, %c0_95] : memref<1x256xf32, #tpu.memory_space<vmem>>, vector<1x256xf32>
    %305 = vector.broadcast %304 : vector<1x256xf32> to vector<16x256xf32>
    %306 = arith.addf %303, %305 : vector<16x256xf32>
    %cst_96 = arith.constant 0.000000e+00 : f32
    %307 = vector.broadcast %cst_96 : f32 to vector<16x256xf32>
    %308 = arith.maximumf %306, %307 : vector<16x256xf32>
    %c0_97 = arith.constant 0 : index
    %c0_98 = arith.constant 0 : index
    %309 = vector.load %arg13[%c0_97, %c0_98] : memref<1x16xf32, #tpu.memory_space<vmem>>, vector<1x16xf32>
    %cst_99 = arith.constant dense<0.000000e+00> : vector<1x256xf32>
    %310 = tpu.matmul %309, %308, %cst_99 {dimension_numbers = #tpu.dot_dimension_numbers<[1], [0], [0], [1], [0, 0, 1, 1], [], []>} : vector<1x16xf32>, vector<16x256xf32>, vector<1x256xf32> -> vector<1x256xf32>
    %311 = arith.truncf %310 : vector<1x256xf32> to vector<1x256xbf16>
    %c0_100 = arith.constant 0 : index
    %c0_101 = arith.constant 0 : index
    %312 = vector.load %arg14[%c0_100, %c0_101] : memref<256x128xbf16, #tpu.memory_space<vmem>>, vector<256x128xbf16>
    %cst_102 = arith.constant dense<0.000000e+00> : vector<1x128xf32>
    %313 = tpu.matmul %311, %312, %cst_102 {dimension_numbers = #tpu.dot_dimension_numbers<[1], [0], [0], [1], [0, 0, 1, 1], [], []>} : vector<1x256xbf16>, vector<256x128xbf16>, vector<1x128xf32> -> vector<1x128xf32>
    %c0_103 = arith.constant 0 : index
    %c0_104 = arith.constant 0 : index
    %314 = vector.load %arg15[%c0_103, %c0_104] : memref<1x128xf32, #tpu.memory_space<vmem>>, vector<1x128xf32>
    %315 = arith.addf %313, %314 : vector<1x128xf32>
    %cst_105 = arith.constant 0.000000e+00 : f32
    %316 = vector.broadcast %cst_105 : f32 to vector<1x128xf32>
    %317 = arith.maximumf %315, %316 : vector<1x128xf32>
    %318 = arith.truncf %317 : vector<1x128xf32> to vector<1x128xbf16>
    %c0_106 = arith.constant 0 : index
    %c0_107 = arith.constant 0 : index
    %319 = vector.load %arg16[%c0_106, %c0_107] : memref<128x128xbf16, #tpu.memory_space<vmem>>, vector<128x128xbf16>
    %cst_108 = arith.constant dense<0.000000e+00> : vector<1x128xf32>
    %320 = tpu.matmul %318, %319, %cst_108 {dimension_numbers = #tpu.dot_dimension_numbers<[1], [0], [0], [1], [0, 0, 1, 1], [], []>} : vector<1x128xbf16>, vector<128x128xbf16>, vector<1x128xf32> -> vector<1x128xf32>
    %c0_109 = arith.constant 0 : index
    %c0_110 = arith.constant 0 : index
    %321 = vector.load %arg17[%c0_109, %c0_110] : memref<1x128xf32, #tpu.memory_space<vmem>>, vector<1x128xf32>
    %322 = arith.addf %320, %321 : vector<1x128xf32>
    %c0_111 = arith.constant 0 : index
    %c0_112 = arith.constant 0 : index
    %c0_113 = arith.constant 0 : index
    %323 = vector.load %arg18[%c0_111, %c0_112, %c0_113] : memref<1x1x128xf32, #tpu.memory_space<vmem>>, vector<1x1x128xf32>
    %324 = vector.shape_cast %323 : vector<1x1x128xf32> to vector<1x128xf32>
    %325 = vector.shape_cast %322 : vector<1x128xf32> to vector<1x1x128xf32>
    tpu.vector_store %arg18[%c0_111, %c0_112, %c0_113], %325 {strides = array<i32>} : memref<1x1x128xf32, #tpu.memory_space<vmem>>, vector<1x1x128xf32>,
    return
  }
  func.func @transform_0(%arg0: i32) -> (i32, i32, i32) {
    %c0_i32 = arith.constant 0 : i32
    %c0_i32_0 = arith.constant 0 : i32
    %c0_i32_1 = arith.constant 0 : i32
    return %arg0, %c0_i32, %c0_i32_0 : i32, i32, i32
  }
  func.func @transform_1(%arg0: i32) -> (i32, i32) {
    %c0_i32 = arith.constant 0 : i32
    %c0_i32_0 = arith.constant 0 : i32
    %c0_i32_1 = arith.constant 0 : i32
    return %c0_i32, %c0_i32_0 : i32, i32
  }
  func.func @transform_2(%arg0: i32) -> (i32, i32) {
    %c0_i32 = arith.constant 0 : i32
    %c0_i32_0 = arith.constant 0 : i32
    %c0_i32_1 = arith.constant 0 : i32
    return %c0_i32, %c0_i32_0 : i32, i32
  }
  func.func @transform_3(%arg0: i32) -> (i32, i32) {
    %c0_i32 = arith.constant 0 : i32
    %c0_i32_0 = arith.constant 0 : i32
    %c0_i32_1 = arith.constant 0 : i32
    return %c0_i32, %c0_i32_0 : i32, i32
  }
  func.func @transform_4(%arg0: i32) -> (i32, i32) {
    %c0_i32 = arith.constant 0 : i32
    %c0_i32_0 = arith.constant 0 : i32
    %c0_i32_1 = arith.constant 0 : i32
    return %c0_i32, %c0_i32_0 : i32, i32
  }
  func.func @transform_5(%arg0: i32) -> (i32, i32) {
    %c0_i32 = arith.constant 0 : i32
    %c0_i32_0 = arith.constant 0 : i32
    %c0_i32_1 = arith.constant 0 : i32
    return %c0_i32, %c0_i32_0 : i32, i32
  }
  func.func @transform_6(%arg0: i32) -> (i32, i32) {
    %c0_i32 = arith.constant 0 : i32
    %c0_i32_0 = arith.constant 0 : i32
    %c0_i32_1 = arith.constant 0 : i32
    return %c0_i32, %c0_i32_0 : i32, i32
  }
  func.func @transform_7(%arg0: i32) -> (i32, i32) {
    %c0_i32 = arith.constant 0 : i32
    %c0_i32_0 = arith.constant 0 : i32
    %c0_i32_1 = arith.constant 0 : i32
    return %c0_i32, %c0_i32_0 : i32, i32
  }
  func.func @transform_8(%arg0: i32) -> (i32, i32) {
    %c0_i32 = arith.constant 0 : i32
    %c0_i32_0 = arith.constant 0 : i32
    %c0_i32_1 = arith.constant 0 : i32
    return %c0_i32, %c0_i32_0 : i32, i32
  }
  func.func @transform_9(%arg0: i32) -> (i32, i32) {
    %c0_i32 = arith.constant 0 : i32
    %c0_i32_0 = arith.constant 0 : i32
    %c0_i32_1 = arith.constant 0 : i32
    return %c0_i32, %c0_i32_0 : i32, i32
  }
  func.func @transform_10(%arg0: i32) -> (i32, i32) {
    %c0_i32 = arith.constant 0 : i32
    %c0_i32_0 = arith.constant 0 : i32
    %c0_i32_1 = arith.constant 0 : i32
    return %c0_i32, %c0_i32_0 : i32, i32
  }
  func.func @transform_11(%arg0: i32) -> (i32, i32) {
    %c0_i32 = arith.constant 0 : i32
    %c0_i32_0 = arith.constant 0 : i32
    %c0_i32_1 = arith.constant 0 : i32
    return %c0_i32, %c0_i32_0 : i32, i32
  }
  func.func @transform_12(%arg0: i32) -> (i32, i32) {
    %c0_i32 = arith.constant 0 : i32
    %c0_i32_0 = arith.constant 0 : i32
    %c0_i32_1 = arith.constant 0 : i32
    return %c0_i32, %c0_i32_0 : i32, i32
  }
  func.func @transform_13(%arg0: i32) -> (i32, i32) {
    %c0_i32 = arith.constant 0 : i32
    %c0_i32_0 = arith.constant 0 : i32
    %c0_i32_1 = arith.constant 0 : i32
    return %c0_i32, %c0_i32_0 : i32, i32
  }
  func.func @transform_14(%arg0: i32) -> (i32, i32) {
    %c0_i32 = arith.constant 0 : i32
    %c0_i32_0 = arith.constant 0 : i32
    %c0_i32_1 = arith.constant 0 : i32
    return %c0_i32, %c0_i32_0 : i32, i32
  }
  func.func @transform_15(%arg0: i32) -> (i32, i32) {
    %c0_i32 = arith.constant 0 : i32
    %c0_i32_0 = arith.constant 0 : i32
    %c0_i32_1 = arith.constant 0 : i32
    return %c0_i32, %c0_i32_0 : i32, i32
  }
  func.func @transform_16(%arg0: i32) -> (i32, i32) {
    %c0_i32 = arith.constant 0 : i32
    %c0_i32_0 = arith.constant 0 : i32
    %c0_i32_1 = arith.constant 0 : i32
    return %c0_i32, %c0_i32_0 : i32, i32
  }
  func.func @transform_17(%arg0: i32) -> (i32, i32, i32) {
    %c0_i32 = arith.constant 0 : i32
    %c0_i32_0 = arith.constant 0 : i32
    %c0_i32_1 = arith.constant 0 : i32
    return %arg0, %c0_i32, %c0_i32_0 : i32, i32, i32
  }
}

</mosaic_0001>

<bundles_post_ra>
// kernel: tpu_custom_call.1
= control target key start
LH: loop header
LB: loop body
LE: loop exit
PB: predicated region body
PF: predicated region fallthrough
CT: control target
= control target key end

     0   :  { %s16207_s0 = inlined_call_operand.vmem [shape: f32[2,324,1], index: 0, kind: input, shape index: {}]   ;;  %s16208_s1 = inlined_call_operand.vmem [shape: f32[9,32], index: 1, kind: input, shape index: {}]   ;;  %s16209_s2 = inlined_call_operand.vmem [shape: f32[1,32], index: 2, kind: input, shape index: {}]   ;;  %s16210_s3 = inlined_call_operand.vmem [shape: bf16[288,64], index: 3, kind: input, shape index: {}]   ;;  %s16211_s4 = inlined_call_operand.vmem [shape: f32[1,64], index: 4, kind: input, shape index: {}]   ;;  %s16212_s5 = inlined_call_operand.vmem [shape: bf16[576,128], index: 5, kind: input, shape index: {}]   ;;  %s16213_s6 = inlined_call_operand.vmem [shape: f32[1,128], index: 6, kind: input, shape index: {}]   ;;  %s16214_s7 = inlined_call_operand.hbm [shape: bf16[1152,256], index: 7, kind: input, shape index: {}]   ;;  %s16215_s8 = inlined_call_operand.vmem [shape: f32[1,256], index: 8, kind: input, shape index: {}]   ;;  %s16216_s9 = inlined_call_operand.vmem [shape: f32[100,324], index: 9, kind: input, shape index: {}]   ;;  %s16217_s10 = inlined_call_operand.vmem [shape: f32[36,100], index: 10, kind: input, shape index: {}]   ;;  %s16218_s11 = inlined_call_operand.vmem [shape: f32[16,36], index: 11, kind: input, shape index: {}]   ;;  %s16219_s12 = inlined_call_operand.vmem [shape: f32[1,16], index: 12, kind: input, shape index: {}]   ;;  %s16220_s13 = inlined_call_operand.vmem [shape: bf16[256,128], index: 13, kind: input, shape index: {}]   ;;  %s16221_s14 = inlined_call_operand.vmem [shape: f32[1,128], index: 14, kind: input, shape index: {}]   ;;  %s16222_s15 = inlined_call_operand.vmem [shape: bf16[128,128], index: 15, kind: input, shape index: {}]   ;;  %s16223_s16 = inlined_call_operand.vmem [shape: f32[1,128], index: 16, kind: input, shape index: {}]   ;;  %s16224_s17 = inlined_call_operand.hbm [shape: f32[2,1,128], index: 17, kind: output, shape index: {}]  }
   0x1   :  { %16514 = sst [smem:[#allocation105_spill]] %s16207_s0 }
   0x2   :  { %16515 = sst [smem:[#allocation106_spill]] %s16208_s1 }
   0x3   :  { %16516 = sst [smem:[#allocation107_spill]] %s16209_s2 }
   0x4   :  { %16517 = sst [smem:[#allocation108_spill]] %s16210_s3 }
   0x5   :  { %16518 = sst [smem:[#allocation109_spill]] %s16211_s4 }
   0x6   :  { %16519 = sst [smem:[#allocation110_spill]] %s16212_s5 }
   0x7   :  { %22 = vsyncpa [#allocation3], 0 }
   0x8   :  { %23 = vsyncpa [#allocation4], 0 }
   0x9   :  { %25 = vsyncpa [#allocation4 + $0x1], 0  ;;  %s10618_s24 = smov 0   ;;  %s10620_s25 = smov 0  }
   0xa   :  { %s10622_s26 = smov 0   ;;  %s10624_s27 = smov 0  }
   0xb LB: > { %16520 = sst [smem:[#allocation8_spill]] %s10515_s26  ;;  %s10639_s28 = sadd.s32 4294967295, %s10519_s27   ;;  %s10519_s27 = sphi %s10624_s27, %s17260_s27   ;;  %s10515_s26 = sphi %s10622_s26, %s17259_s26   ;;  %s10511_s25 = sphi %s10620_s25, %s17258_s25   ;;  %s10507_s24 = sphi %s10618_s24, %s17257_s24  }
   0xc   : > { %s8753_s29 = sadd.s32 4294967294, %s10519_s27   ;;  %s10643_s0 = sadd.s32 1, %s10519_s27  }
   0xd   : > { %s400_s30 = sadd.s32 1, %s10515_s26  ;;  %s397_s18 = ssub.s32 %s10519_s27, %s10643_s0 }
   0xe   : > { %p410_p0 = scmp.ne.s32.totalorder %s10515_s26, %s10511_s25  ;;  %p398_p1 = scmp.eq.s32.totalorder %s397_s18, 0 }
   0xf   : > { %p411_p2 = scmp.eq.s32.totalorder %s10639_s28, 1  ;;  %p416_p3 = scmp.ne.s32.totalorder %s10511_s25, %s10507_s24 }
  0x10   : > { %p417_p4 = scmp.eq.s32.totalorder %s8753_s29, 1  ;;  %p8754_p7 = scmp.ge.s32.totalorder %s10519_s27, 1 }
  0x11   : > { %s10654_s19 = scalar_select %p398_p1, %s10515_s26, %s400_s30  }
  0x12   : > { %p10656_p5 = por %p411_p2, %p410_p0  ;;  %p10660_p6 = por %p417_p4, %p416_p3 }
  0x13   : > { %16521 = sst [smem:[#allocation9_spill]] %s10654_s19  ;;  %p424_p8 = scmp.lt.s32.totalorder %s10519_s27, 3 }
  0x14   : > { %s16523_s20 = scalar_select %p10660_p6, 1, 0 }
  0x15   : > { %p10018_p9 = scmp.eq.s32.totalorder %s10639_s28, 0  ;;  %p10667_p10 = pnand %p8754_p7, %p424_p8 }
  0x16   : > { %s10521_s22 = smov [#allocation2]  }
  0x17   : > { %s454_s23 = sshll.u32 %s10521_s22, 4  ;;  %p10010_p11 = pneg %p10667_p10  ;;  %s455_s23 = int_to_ptr.vmem [resolvable:$true] %s454_s23 }
  0x18   : > { %s10440_s29 = scalar_lea.vmem %s455_s23, 18432  ;;  %p10448_p3 = scmp.lt.s32.totalorder %s455_s23, %s455_s23 }
  0x19   : > { %p10011_p12 = pnand %p10018_p9, %p10010_p11  ;;  %p10441_p0 = scmp.ne.s32.totalorder %s455_s23, %s10440_s29 }
  0x1a   : > { %p10449_p4 = scmp.lt.s32.totalorder %s10440_s29, %s10440_s29 }
  0x1b   : > { %p10431_p13 = pneg %p10011_p12 }
  0x1c   : > { %p10450_p6 = por %p10449_p4, %p10448_p3 }
  0x1d   : > { %p10443_p1 = pnand %p10441_p0, %p10431_p13 }
  0x1f   : > { %p10444_p2 = pneg %p10443_p1 }
  0x21   : > { %p10451_p7 = pnand %p10450_p6, %p10444_p2 }
  0x23   : > { %10454 = shalt.err (!%p10451_p7)
}
  0x24   : > { %s10522_s30 = smov 128   ;;  %s10523_s18 = smov 8  }
  0x25   : > { %10013 = dma.hbm_to_vmem [thread:$0]  (!%p10011_p12), %s16214_s7, 18432, %s455_s23, [#allocation3], %s10522_s30, %s10522_s30, %s10523_s18  }
  0x26   : > { %505 = sbr.rel (%p10667_p10) target bundleno = 3218 (0xc92), region = 88 }
  0x2b   : > { %10498 = dma.done.wait (%p10018_p9), [#allocation3], 18432  }
  0x2c   : > { %10500 = vsyncadd (%p10018_p9), [#allocation3], 4294948864  ;;  %p556_p8 = scmp.lt.s32.totalorder %s10639_s28, 1  ;;  %v16227_v0 = vmov 0   ;;  %s16525_s21 = sld [smem:[#allocation105_spill]]  ;;  %vm651_vm0 = vcmask 1042432  }
  0x2d   : > { %10060 = vset.pattern.permute.xlu1 %v16227_v0  ;;  %10059 = vset.pattern.permute.xlu0 %v16227_v0  ;;  %vm949_vm1 = vcmask 1041408   ;;  %vm1288_vm2 = vcmask 1040384   ;;  %vm606_vm3 = vcmask 1046528   ;;  %vm942_vm4 = vcmask 1045504   ;;  %s16682_s2 = sld [smem:[#allocation107_spill]]  ;;  %s554_s30 = sand.u32 1, %s10511_s25  }
  0x2e   : > { %s557_s22 = scalar_select %p556_p8, %s10639_s28, 1  ;;  %vm1281_vm5 = vcmask 1044480   ;;  %vm10526_vm6 = vmmov 0   ;;  %vm3685_vm7 = vcmask 1043456   ;;  %vm3645_vm8 = vcmask 556032  }
  0x2f   : > { %s17215_s3 = sld [smem:[#allocation108_spill]]  ;;  %vm4078_vm9 = vcmask 261120   ;;  %vm5662_vm10 = vcmask 818176   ;;  %vm5856_vm11 = vcmask 523264   ;;  %vm6888_vm12 = vcmask 293888   ;;  %s9108_s19 = sshll.u32 %s10639_s28, 4 }
  0x30   : > { %s10003_s26 = smul.u32 328, %s557_s22  ;;  %s16639_s22 = sld [smem:[#allocation106_spill]]  ;;  %vm8319_vm13 = vcmask 130048  }
  0x31   : > { %s17251_s4 = sld [smem:[#allocation109_spill]]  ;;  %s16166_s23 = scalar_lea.hbm %s16224_s17, %s9108_s19 }
  0x32   : > { %s10691_s29 = scalar_lea.vmem %s16525_s21, %s10003_s26  ;;  %s17252_s5 = sld [smem:[#allocation110_spill]] }
  0x33   : > { %v10694_v1 = vld [vmem:[%s10691_s29 + $0xf0] sm:$0xff]  ;;  %v10697_v2 = vld [vmem:[%s10691_s29 + $0xf8] sm:$0xff]  ;;  %v10700_v3 = vld [vmem:[%s10691_s29 + $0xe0] sm:$0xff]  ;;  %s8674_s21 = scalar_lea.sflag [#allocation4], %s554_s30  ;;  %s10527_s28 = smov [#allocation5]  }
  0x34   : > { %v711_v4 = vrot.slane %v10694_v1, 5  ;;  %v713_v5 = vrot.slane %v10697_v2, 5  ;;  %v10705_v6 = vld [vmem:[%s10691_s29 + $0xe8] sm:$0xff]  ;;  %v707_v7 = vrot.slane %v10700_v3, 5  ;;  %v10709_v8 = vld [vmem:[%s10691_s29 + $0x100] sm:$0xff]  ;;  %v1009_v15 = vrot.slane %v10694_v1, 6 }
  0x35   : > { %16526 = vst [vmem:[#allocation10_spill] sm:$0xff] %v10709_v8  ;;  %v709_v9 = vrot.slane %v10705_v6, 5  ;;  %v16231_v10 = vrot.slane %v10709_v8, 5  ;;  %v1007_v14 = vrot.slane %v10705_v6, 6  ;;  %v1005_v17 = vrot.slane %v10700_v3, 6  ;;  %v10728_v21 = vld [vmem:[%s10691_s29 + $0x68] sm:$0xff] }
  0x36   : > { %v714_v11 = vsel %vm651_vm0, %v711_v4, %v713_v5  ;;  %v1011_v19 = vrot.slane %v10697_v2, 6  ;;  %v16230_v20 = vrot.slane %v10709_v8, 6  ;;  %v10732_v23 = vld [vmem:[%s10691_s29 + $0x70] sm:$0xff]  ;;  %v10735_v24 = vld [vmem:[%s10691_s29 + $0x60] sm:$0xff]  ;;  %v677_v25 = vrot.slane %v10728_v21, 5  ;;  %v10739_v26 = vld [vmem:[%s10691_s29 + $0x78] sm:$0xff] }
  0x37   : > { %866 = vperm.xlu1 %10060, %v714_v11   ;;  %v710_v12 = vsel %vm651_vm0, %v707_v7, %v709_v9  ;;  %v716_v13 = vsel %vm651_vm0, %v713_v5, %v16231_v10  ;;  %v712_v16 = vsel %vm651_vm0, %v709_v9, %v711_v4  ;;  %v1010_v18 = vsel %vm949_vm1, %v1007_v14, %v1009_v15  ;;  %v10748_v31 = vld [vmem:[%s10691_s29 + $0x80] sm:$0xff]  ;;  %v10762_v41 = vld [vmem:[%s10691_s29 + $0xd8] sm:$0xff]  ;;  %s10459_s26 = sshll.u32 %s10527_s28, 4  ;;  %s10460_s26 = int_to_ptr.vmem [resolvable:$false] %s10459_s26 }
  0x38   : > { %858 = vperm.xlu0 %10059, %v710_v12   ;;  %v1008_v22 = vsel %vm949_vm1, %v1005_v17, %v1007_v14  ;;  %v1014_v27 = vsel %vm949_vm1, %v1011_v19, %v16230_v20  ;;  %v679_v28 = vrot.slane %v10732_v23, 5  ;;  %v1012_v29 = vsel %vm949_vm1, %v1009_v15, %v1011_v19  ;;  %16527 = vst [vmem:[#allocation11_spill] sm:$0xff] %v10748_v31  ;;  %v10782_v55 = vld [vmem:[%s10691_s29 + $0x58] sm:$0xff]  ;;  %v10800_v12 = vld [vmem:[%s10691_s29 + $0xd0] sm:$0xff]  ;;  %v10805_v15 = vld [vmem:[%s10691_s29 + $0x108] sm:$0xff] }
  0x39   : > { %v675_v30 = vrot.slane %v10735_v24, 5  ;;  %v681_v33 = vrot.slane %v10739_v26, 5  ;;  %v16234_v34 = vrot.slane %v10748_v31, 5  ;;  %v975_v37 = vrot.slane %v10728_v21, 6 }
  0x3a   : > { %v680_v32 = vsel %vm651_vm0, %v677_v25, %v679_v28  ;;  %v977_v38 = vrot.slane %v10732_v23, 6  ;;  %v973_v40 = vrot.slane %v10735_v24, 6  ;;  %v979_v42 = vrot.slane %v10739_v26, 6 }
  0x3b   : > { %870 = vperm.xlu1 %10060, %v716_v13   ;;  %v678_v35 = vsel %vm651_vm0, %v675_v30, %v677_v25  ;;  %v684_v36 = vsel %vm651_vm0, %v681_v33, %v16234_v34  ;;  %v682_v39 = vsel %vm651_vm0, %v679_v28, %v681_v33  ;;  %v16235_v43 = vrot.slane %v10748_v31, 6  ;;  %v10817_v25 = vld [vmem:[%s10691_s29 + $0x110] sm:$0xff] }
  0x3c   : > { %862 = vperm.xlu0 %10059, %v712_v16   ;;  %v978_v44 = vsel %vm949_vm1, %v975_v37, %v977_v38  ;;  %v976_v45 = vsel %vm949_vm1, %v973_v40, %v975_v37  ;;  %v1003_v46 = vrot.slane %v10762_v41, 6  ;;  %v980_v48 = vsel %vm949_vm1, %v977_v38, %v979_v42  ;;  %16528 = vst [vmem:[#allocation12_spill] sm:$0xff] %v10817_v25  ;;  %v11106_v34 = vld [vmem:[%s10691_s29 + $0x30] sm:$0xff] }
  0x3d   : > { %v982_v47 = vsel %vm949_vm1, %v979_v42, %v16235_v43  ;;  %v705_v49 = vrot.slane %v10762_v41, 5  ;;  %v1346_v51 = vrot.slane %v10705_v6, 7  ;;  %v1348_v52 = vrot.slane %v10694_v1, 7 }
  0x3e   : > { %v1006_v50 = vsel %vm949_vm1, %v1003_v46, %v1005_v17  ;;  %v1344_v54 = vrot.slane %v10700_v3, 7  ;;  %v1350_v57 = vrot.slane %v10697_v2, 7  ;;  %v1352_v58 = vrot.slane %v10709_v8, 7 }
  0x3f   : > { %1160 = vperm.xlu1 %10060, %v1010_v18   ;;  %v708_v53 = vsel %vm651_vm0, %v705_v49, %v707_v7  ;;  %v1349_v56 = vsel %vm1288_vm2, %v1346_v51, %v1348_v52  ;;  %v971_v59 = vrot.slane %v10782_v55, 6  ;;  %v673_v61 = vrot.slane %v10782_v55, 5  ;;  %v10810_v18 = vld [vmem:[%s10691_s29 + $0x50] sm:$0xff] }
  0x40   : > { %1156 = vperm.xlu0 %10059, %v1008_v22   ;;  %v1347_v60 = vsel %vm1288_vm2, %v1344_v54, %v1346_v51  ;;  %v1314_v62 = vrot.slane %v10728_v21, 7  ;;  %v1353_v63 = vsel %vm1288_vm2, %v1350_v57, %v1352_v58  ;;  %v1351_v3 = vsel %vm1288_vm2, %v1348_v52, %v1350_v57 }
  0x41   : > { %v1316_v4 = vrot.slane %v10732_v23, 7  ;;  %v974_v5 = vsel %vm949_vm1, %v971_v59, %v973_v40  ;;  %v676_v6 = vsel %vm651_vm0, %v673_v61, %v675_v30  ;;  %v1312_v7 = vrot.slane %v10735_v24, 7 }
  0x42   : > { %v1318_v9 = vrot.slane %v10739_v26, 7  ;;  %v1320_v11 = vrot.slane %v10748_v31, 7  ;;  %v1001_v17 = vrot.slane %v10800_v12, 6  ;;  %v703_v21 = vrot.slane %v10800_v12, 5 }
  0x43   : > { %1168 = vperm.xlu1 %10060, %v1014_v27   ;;  %v1317_v13 = vsel %vm1288_vm2, %v1314_v62, %v1316_v4  ;;  %v1315_v14 = vsel %vm1288_vm2, %v1312_v7, %v1314_v62  ;;  %v1354_v22 = vrot.slane %v10805_v15, 7  ;;  %v1342_v28 = vrot.slane %v10762_v41, 7  ;;  %v10838_v41 = vld [vmem:[%s10691_s29 + $0xc8] sm:$0xff]  ;;  %v10868_v62 = vld [vmem:[%s10691_s29 + $0xc0] sm:$0xff] }
  0x44   : > { %1164 = vperm.xlu0 %10059, %v1012_v29   ;;  %v1321_v16 = vsel %vm1288_vm2, %v1318_v9, %v1320_v11  ;;  %v1319_v19 = vsel %vm1288_vm2, %v1316_v4, %v1318_v9  ;;  %v1004_v24 = vsel %vm949_vm1, %v1001_v17, %v1003_v46  ;;  %v706_v27 = vsel %vm651_vm0, %v703_v21, %v705_v49 }
  0x45   : > { %v671_v29 = vrot.slane %v10810_v18, 5  ;;  %v1355_v30 = vsel %vm1288_vm2, %v1352_v58, %v1354_v22  ;;  %v16233_v33 = vrot.slane %v10817_v25, 7  ;;  %v1310_v38 = vrot.slane %v10782_v55, 7 }
  0x46   : > { %v969_v40 = vrot.slane %v10810_v18, 6  ;;  %v1308_v58 = vrot.slane %v10810_v18, 7  ;;  %v2033_v9 = vrot.slane %v10709_v8, 1 }
  0x47   : > { %798 = vperm.xlu1 %10060, %v680_v32   ;;  %v1345_v32 = vsel %vm1288_vm2, %v1342_v28, %v1344_v54  ;;  %v674_v37 = vsel %vm651_vm0, %v671_v29, %v673_v61  ;;  %v1313_v42 = vsel %vm1288_vm2, %v1310_v38, %v1312_v7  ;;  %v10854_v54 = vld [vmem:[%s10691_s29 + $0x48] sm:$0xff]  ;;  %v10880_v7 = vld [vmem:[%s10691_s29 + $0x118] sm:$0xff] }
  0x48   : > { %794 = vperm.xlu0 %10059, %v678_v35   ;;  %v10826_v35 = vld [vmem:[%s10691_s29 + $0x88] sm:$0xff]  ;;  %v972_v46 = vsel %vm949_vm1, %v969_v40, %v971_v59  ;;  %v967_v59 = vrot.slane %v10854_v54, 6 }
  0x4a   : > { %v970_v61 = vsel %vm949_vm1, %v967_v59, %v969_v40 }
  0x4b   : > { %806 = vperm.xlu1 %10060, %v684_v36   ;;  %v10829_v36 = vld [vmem:[%s10691_s29 + $0x90] sm:$0xff] }
  0x4c   : > { %802 = vperm.xlu0 %10059, %v682_v39   ;;  %16529 = vst [vmem:[#allocation13_spill] sm:$0xff] %v10829_v36  ;;  %v1357_v39 = vsel %vm1288_vm2, %v1354_v22, %v16233_v33 }
  0x4f   : > { %1096 = vperm.xlu1 %10060, %v978_v44   ;;  %v1322_v44 = vrot.slane %v10826_v35, 7 }
  0x50   : > { %1092 = vperm.xlu0 %10059, %v976_v45   ;;  %v16236_v45 = vrot.slane %v10829_v36, 7 }
  0x51   : > { %v1323_v49 = vsel %vm1288_vm2, %v1320_v11, %v1322_v44  ;;  %v2035_v11 = vrot.slane %v10805_v15, 1 }
  0x53   : > { %1104 = vperm.xlu1 %10060, %v982_v47   ;;  %v1325_v47 = vsel %vm1288_vm2, %v1322_v44, %v16236_v45  ;;  %v2036_v18 = vsel %vm606_vm3, %v2033_v9, %v2035_v11 }
  0x54   : > { %1100 = vperm.xlu0 %10059, %v980_v48   ;;  %v999_v48 = vrot.slane %v10838_v41, 6 }
  0x56   : > { %v1002_v51 = vsel %vm949_vm1, %v999_v48, %v1001_v17  ;;  %v10891_v17 = vld [vmem:[%s10691_s29 + $0x40] sm:$0xff] }
  0x57   : > { %1152 = vperm.xlu1 %10060, %v1006_v50   ;;  %v701_v50 = vrot.slane %v10838_v41, 5 }
  0x58   : > { %854 = vperm.xlu0 %10059, %v708_v53   ;;  %v1340_v53 = vrot.slane %v10800_v12, 7 }
  0x59   : > { %v704_v52 = vsel %vm651_vm0, %v701_v50, %v703_v21  ;;  %v965_v21 = vrot.slane %v10891_v17, 6 }
  0x5a   : > { %v1343_v55 = vsel %vm1288_vm2, %v1340_v53, %v1342_v28 }
  0x5b   : > { %1499 = vperm.xlu1 %10060, %v1349_v56   ;;  %v669_v56 = vrot.slane %v10854_v54, 5 }
  0x5c   : > { %1495 = vperm.xlu0 %10059, %v1347_v60   ;;  %v1311_v60 = vsel %vm1288_vm2, %v1308_v58, %v1310_v38  ;;  %v1999_v38 = vrot.slane %v10739_v26, 1 }
  0x5d   : > { %v672_v57 = vsel %vm651_vm0, %v669_v56, %v671_v29  ;;  %v1306_v29 = vrot.slane %v10854_v54, 7 }
  0x5f   : > { %1507 = vperm.xlu1 %10060, %v1353_v63   ;;  %v997_v63 = vrot.slane %v10868_v62, 6 }
  0x60   : > { %1503 = vperm.xlu0 %10059, %v1351_v3   ;;  %v699_v3 = vrot.slane %v10868_v62, 5 }
  0x61   : > { %v1000_v4 = vsel %vm949_vm1, %v997_v63, %v999_v48 }
  0x63   : > { %1088 = vperm.xlu1 %10060, %v974_v5   ;;  %v702_v5 = vsel %vm651_vm0, %v699_v3, %v701_v50 }
  0x64   : > { %790 = vperm.xlu0 %10059, %v676_v6   ;;  %v1338_v6 = vrot.slane %v10838_v41, 7 }
  0x66   : > { %v1341_v12 = vsel %vm1288_vm2, %v1338_v6, %v1340_v53 }
  0x67   : > { %1435 = vperm.xlu1 %10060, %v1317_v13   ;;  %v2031_v13 = vrot.slane %v10697_v2, 1 }
  0x68   : > { %1431 = vperm.xlu0 %10059, %v1315_v14   ;;  %v2037_v14 = vrot.slane %v10817_v25, 1 }
  0x6b   : > { %1443 = vperm.xlu1 %10060, %v1321_v16   ;;  %v2039_v16 = vrot.slane %v10880_v7, 1 }
  0x6c   : > { %1439 = vperm.xlu0 %10059, %v1319_v19   ;;  %v2034_v19 = vsel %vm606_vm3, %v2031_v13, %v2033_v9 }
  0x6d   : > { %v2040_v22 = vsel %vm606_vm3, %v2037_v14, %v2039_v16 }
  0x6f   : > { %1148 = vperm.xlu1 %10060, %v1004_v24   ;;  %v2038_v24 = vsel %vm606_vm3, %v2035_v11, %v2037_v14  ;;  %v10967_v11 = vld [vmem:[%s10691_s29 + $0xf0] sm:$0xff] }
  0x70   : > { %850 = vperm.xlu0 %10059, %v706_v27   ;;  %v968_v27 = vsel %vm949_vm1, %v965_v21, %v967_v59 }
  0x73   : > { %1511 = vperm.xlu1 %10060, %v1355_v30   ;;  %v2001_v30 = vrot.slane %v10748_v31, 1 }
  0x74   : > { %1491 = vperm.xlu0 %10059, %v1345_v32   ;;  %v2003_v32 = vrot.slane %v10826_v35, 1 }
  0x75   : > { %v2002_v48 = vsel %vm606_vm3, %v1999_v38, %v2001_v30 }
  0x76   : > { %v2004_v44 = vsel %vm606_vm3, %v2001_v30, %v2003_v32 }
  0x77   : > { %786 = vperm.xlu1 %10060, %v674_v37   ;;  %v1309_v37 = vsel %vm1288_vm2, %v1306_v29, %v1308_v58 }
  0x78   : > { %1515 = vperm.xlu0 %10059, %v1357_v39   ;;  %v10916_v39 = vld [vmem:[%s10691_s29 + $0x98] sm:$0xff] }
  0x7b   : > { %1427 = vperm.xlu1 %10060, %v1313_v42  }
  0x7c   : > { %1084 = vperm.xlu0 %10059, %v972_v46   ;;  %v2005_v46 = vrot.slane %v10829_v36, 1 }
  0x7e   : > { %v2006_v53 = vsel %vm606_vm3, %v2003_v32, %v2005_v46 }
  0x7f   : > { %1451 = vperm.xlu1 %10060, %v1325_v47   ;;  %v2007_v47 = vrot.slane %v10916_v39, 1 }
  0x80   : > { %1447 = vperm.xlu0 %10059, %v1323_v49   ;;  %v10930_v49 = vld [vmem:[%s10691_s29 + $0xb8] sm:$0xff] }
  0x83   : > { %1144 = vperm.xlu1 %10060, %v1002_v51  }
  0x84   : > { %846 = vperm.xlu0 %10059, %v704_v52   ;;  %v995_v52 = vrot.slane %v10930_v49, 6 }
  0x86   : > { %v998_v58 = vsel %vm949_vm1, %v995_v52, %v997_v63 }
  0x87   : > { %1845 = vperm.xlu1 %10060, %v10697_v2   ;;  %v1304_v2 = vrot.slane %v10891_v17, 7 }
  0x88   : > { %1487 = vperm.xlu0 %10059, %v1343_v55   ;;  %v697_v55 = vrot.slane %v10930_v49, 5 }
  0x8a   : > { %v700_v59 = vsel %vm651_vm0, %v697_v55, %v699_v3  ;;  %v2029_v3 = vrot.slane %v10967_v11, 1 }
  0x8b   : > { %1853 = vperm.xlu1 %10060, %v10805_v15  }
  0x8c   : > { %1849 = vperm.xlu0 %10059, %v10709_v8  }
  0x8f   : > { %782 = vperm.xlu1 %10060, %v672_v57  }
  0x90   : > { %1857 = vperm.xlu0 %10059, %v10817_v25  }
  0x93   : > { %1423 = vperm.xlu1 %10060, %v1311_v60   ;;  %v1336_v60 = vrot.slane %v10868_v62, 7 }
  0x94   : > { %1080 = vperm.xlu0 %10059, %v970_v61   ;;  %v10954_v61 = vld [vmem:[%s10691_s29 + $0x120] sm:$0xff] }
  0x95   : > { %v2041_v9 = vrot.slane %v10954_v61, 1  ;;  %v1339_v63 = vsel %vm1288_vm2, %v1336_v60, %v1338_v6 }
  0x97   : > { %1785 = vperm.xlu1 %10060, %v10748_v31   ;;  %v2042_v41 = vsel %vm606_vm3, %v2039_v16, %v2041_v9 }
  0x98   : > { %1781 = vperm.xlu0 %10059, %v10739_v26  }
  0x9b   : > { %1793 = vperm.xlu1 %10060, %v10829_v36  }
  0x9c   : > { %1789 = vperm.xlu0 %10059, %v10826_v35  }
  0x9f   : > { %1140 = vperm.xlu1 %10060, %v1000_v4  }
  0xa0   : > { %842 = vperm.xlu0 %10059, %v702_v5  }
  0xa3   : > { %1841 = vperm.xlu1 %10060, %v10694_v1   ;;  %v667_v1 = vrot.slane %v10891_v17, 5 }
  0xa4   : > { %1483 = vperm.xlu0 %10059, %v1341_v12   ;;  %v10971_v12 = vld [vmem:[%s10691_s29 + $0x38] sm:$0xff] }
  0xa5   : > { %v670_v28 = vsel %vm651_vm0, %v667_v1, %v669_v56  ;;  %v665_v6 = vrot.slane %v10971_v12, 5  ;;  %v963_v32 = vrot.slane %v10971_v12, 6 }
  0xa7   : > { %2176 = vperm.xlu1 %10060, %v2036_v18   ;;  %v10976_v18 = vld [vmem:[%s10691_s29 + $0x128] sm:$0xff]  ;;  %v668_v16 = vsel %vm651_vm0, %v665_v6, %v667_v1  ;;  %v1307_v1 = vsel %vm1288_vm2, %v1304_v2, %v1306_v29 }
  0xa8   : > { %2172 = vperm.xlu0 %10059, %v2034_v19   ;;  %16530 = vst [vmem:[#allocation14_spill] sm:$0xff] %v10976_v18 }
  0xab   : > { %2184 = vperm.xlu1 %10060, %v2040_v22   ;;  %v10981_v22 = vld [vmem:[%s10691_s29 + $0xe8] sm:$0xff] }
  0xac   : > { %2180 = vperm.xlu0 %10059, %v2038_v24   ;;  %v2032_v24 = vsel %vm606_vm3, %v2029_v3, %v2031_v13 }
  0xaf   : > { %1076 = vperm.xlu1 %10060, %v968_v27   ;;  %v16229_v27 = vrot.slane %v10976_v18, 1 }
  0xb0   : > { %778 = vperm.xlu0 %10059, %v670_v28  }
  0xb1   : > { %v2044_v13 = vsel %vm606_vm3, %v2041_v9, %v16229_v27 }
  0xb2   : > { %v10918_v40 = vpop.permute.xlu1 %866 }
  0xb3   : > { %v10920_v42 = vpop.permute.xlu0 %858  ;;  %1777 = vperm.xlu1 %10060, %v10732_v23   ;;  %v2008_v23 = vsel %vm606_vm3, %v2005_v46, %v2007_v47  ;;  %v11016_v46 = vld [vmem:[%s10691_s29 + $0x70] sm:$0xff] }
  0xb4   : > { %1419 = vperm.xlu0 %10059, %v1309_v37   ;;  %16531 = vst [vmem:[#allocation15_spill] sm:$0xff] %v11016_v46  ;;  %v16544_v17 = vrot.slane %v11016_v46, 1 }
  0xb6   : > { %v10932_v50 = vpop.permute.xlu1 %870 }
  0xb7   : > { %v10934_v51 = vpop.permute.xlu0 %862  ;;  %2112 = vperm.xlu1 %10060, %v2004_v44  }
  0xb8   : > { %2108 = vperm.xlu0 %10059, %v2002_v48   ;;  %v16241_v48 = vrot.slane %v11016_v46, 1 }
  0xba   : > { %v10942_v56 = vpop.permute.xlu1 %1160  ;;  %v2000_v29 = vsel %vm606_vm3, %v16241_v48, %v1999_v38 }
  0xbb   : > { %v10944_v57 = vpop.permute.xlu0 %1156  ;;  %2120 = vperm.xlu1 %10060, %v2008_v23   ;;  %v966_v23 = vsel %vm949_vm1, %v963_v32, %v965_v21 }
  0xbc   : > { %2116 = vperm.xlu0 %10059, %v2006_v53   ;;  %v11025_v53 = vld [vmem:[%s10691_s29 + $0xa0] sm:$0xff] }
  0xbd   : > { %v2009_v9 = vrot.slane %v11025_v53, 1 }
  0xbe   : > { %v10956_v4 = vpop.permute.xlu1 %1168 }
  0xbf   : > { %v10958_v5 = vpop.permute.xlu0 %1164  ;;  %1136 = vperm.xlu1 %10060, %v998_v58   ;;  %v11028_v58 = vld [vmem:[%s10691_s29 + $0xa8] sm:$0xff] }
  0xc0   : > { %838 = vperm.xlu0 %10059, %v700_v59   ;;  %16532 = vst [vmem:[#allocation16_spill] sm:$0xff] %v11028_v58  ;;  %v16232_v21 = vrot.slane %v11028_v58, 1  ;;  %v16254_v31 = vrot.slane %v11028_v58, 6 }
  0xc2   : > { %v10973_v14 = vpop.permute.xlu1 %798  ;;  %v2012_v26 = vsel %vm606_vm3, %v2009_v9, %v16232_v21 }
  0xc3   : > { %v10978_v19 = vpop.permute.xlu0 %794  ;;  %1837 = vperm.xlu1 %10060, %v10981_v22  }
  0xc4   : > { %1479 = vperm.xlu0 %10059, %v1339_v63   ;;  %v11042_v63 = vld [vmem:[%s10691_s29 + $0xb0] sm:$0xff] }
  0xc5   : > { %v16240_v38 = vrot.slane %v11042_v63, 6 }
  0xc6   : > { %v10994_v28 = vpop.permute.xlu1 %806 }
  0xc7   : > { %v10996_v30 = vpop.permute.xlu0 %802  ;;  %2188 = vperm.xlu1 %10060, %v2042_v41  }
  0xc8   : > { %2168 = vperm.xlu0 %10059, %v2032_v24  }
  0xca   : > { %v11006_v37 = vpop.permute.xlu1 %1096 }
  0xcb   : > { %v11008_v44 = vpop.permute.xlu0 %1092  ;;  %774 = vperm.xlu1 %10060, %v668_v16   ;;  %v11049_v16 = vld [vmem:[%s10691_s29 + $0x68] sm:$0xff] }
  0xcc   : > { %2192 = vperm.xlu0 %10059, %v2044_v13   ;;  %16533 = vst [vmem:[#allocation17_spill] sm:$0xff] %v11049_v16  ;;  %v2010_v13 = vsel %vm606_vm3, %v2007_v47, %v2009_v9  ;;  %v16238_v9 = vrot.slane %v10930_v49, 7 }
  0xce   : > { %v11030_v54 = vpop.permute.xlu1 %1104 }
  0xcf   : > { %v11032_v59 = vpop.permute.xlu0 %1100  ;;  %1415 = vperm.xlu1 %10060, %v1307_v1   ;;  %v16239_v1 = vrot.slane %v11042_v63, 5 }
  0xd0   : > { %1072 = vperm.xlu0 %10059, %v966_v23  }
  0xd1   : > { %v698_v47 = vsel %vm651_vm0, %v16239_v1, %v697_v55  ;;  %v16242_v55 = vrot.slane %v10981_v22, 1  ;;  %v16243_v1 = vrot.slane %v10976_v18, 2 }
  0xd2   : > { %v11044_v41 = vpop.permute.xlu1 %1152 }
  0xd3   : > { %v11046_v24 = vpop.permute.xlu0 %854  ;;  %2104 = vperm.xlu1 %10060, %v2000_v29   ;;  %v996_v29 = vsel %vm949_vm1, %v16240_v38, %v995_v52  ;;  %v1337_v52 = vsel %vm1288_vm2, %v16238_v9, %v1336_v60  ;;  %v2439_v60 = vrot.slane %v10954_v61, 2  ;;  %v2030_v33 = vsel %vm606_vm3, %v16242_v55, %v2029_v3 }
  0xd4   : > { %1773 = vperm.xlu0 %10059, %v11049_v16   ;;  %v16244_v3 = vrot.slane %v10971_v12, 7 }
  0xd6   : > { %v11060_v23 = vpop.permute.xlu1 %1499 }
  0xd7   : > { %v11062_v0 = vpop.permute.xlu0 %1495  ;;  %2128 = vperm.xlu1 %10060, %v2012_v26   ;;  %v16237_v26 = vrot.slane %v10805_v15, 2 }
  0xd8   : > { %16534 = vst [vmem:[#allocation18_spill] sm:$0xff] %v11062_v0  ;;  %2124 = vperm.xlu0 %10059, %v2010_v13   ;;  %v2435_v13 = vrot.slane %v10817_v25, 2 }
  0xda   : > { %v11075_v27 = vpop.permute.xlu1 %1507  ;;  %v2436_v62 = vsel %vm942_vm4, %v16237_v26, %v2435_v13  ;;  %v16245_v26 = vrot.slane %v11106_v34, 5 }
  0xdb   : > { %v11077_v20 = vpop.permute.xlu0 %1503  ;;  %1132 = vperm.xlu1 %10060, %v996_v29   ;;  %v11092_v29 = vld [vmem:[%s10691_s29 + $0xe0] sm:$0xff] }
  0xdc   : > { %834 = vperm.xlu0 %10059, %v698_v47   ;;  %16537 = vst [vmem:[#allocation21_spill] sm:$0xff] %v11092_v29  ;;  %v2437_v47 = vrot.slane %v10880_v7, 2 }
  0xde   : > { %v11087_v10 = vpop.permute.xlu1 %1088  ;;  %v2438_v9 = vsel %vm942_vm4, %v2435_v13, %v2437_v47  ;;  %v2442_v13 = vsel %vm942_vm4, %v2439_v60, %v16243_v1 }
  0xdf   : > { %16535 = vst [vmem:[#allocation19_spill] sm:$0xff] %v11087_v10  ;;  %v11089_v21 = vpop.permute.xlu0 %790  ;;  %1833 = vperm.xlu1 %10060, %v11092_v29  }
  0xe0   : > { %16536 = vst [vmem:[#allocation20_spill] sm:$0xff] %v11089_v21  ;;  %1475 = vperm.xlu0 %10059, %v1337_v52   ;;  %v2440_v52 = vsel %vm942_vm4, %v2437_v47, %v2439_v60 }
  0xe2   : > { %v11108_v43 = vpop.permute.xlu1 %1435 }
  0xe3   : > { %16538 = vst [vmem:[#allocation22_spill] sm:$0xff] %v11108_v43  ;;  %v11110_v45 = vpop.permute.xlu0 %1431  ;;  %2570 = vperm.xlu1 %10060, %v2436_v62   ;;  %v16246_v62 = vrot.slane %v11106_v34, 6 }
  0xe4   : > { %16539 = vst [vmem:[#allocation23_spill] sm:$0xff] %v11110_v45  ;;  %2164 = vperm.xlu0 %10059, %v2030_v33   ;;  %v666_v33 = vsel %vm651_vm0, %v16245_v26, %v665_v6  ;;  %v1305_v6 = vsel %vm1288_vm2, %v16244_v3, %v1304_v2  ;;  %v16253_v3 = vrot.slane %v10826_v35, 2 }
  0xe5   : > { %v964_v60 = vsel %vm949_vm1, %v16246_v62, %v963_v32  ;;  %v11162_v62 = vld [vmem:[%s10691_s29 + $0x60] sm:$0xff] }
  0xe6   : > { %v11116_v38 = vpop.permute.xlu1 %1443 }
  0xe7   : > { %v11118_v48 = vpop.permute.xlu0 %1439  ;;  %2578 = vperm.xlu1 %10060, %v2440_v52  }
  0xe8   : > { %2574 = vperm.xlu0 %10059, %v2438_v9   ;;  %v16247_v9 = vrot.slane %v11049_v16, 1 }
  0xea   : > { %v11130_v47 = vpop.permute.xlu1 %1148  ;;  %v1998_v2 = vsel %vm606_vm3, %v16247_v9, %v16544_v17  ;;  %v16252_v17 = vrot.slane %v11028_v58, 2 }
  0xeb   : > { %16540 = vst [vmem:[#allocation24_spill] sm:$0xff] %v11130_v47  ;;  %v11132_v55 = vpop.permute.xlu0 %850  ;;  %770 = vperm.xlu1 %10060, %v666_v33   ;;  %v2403_v33 = vrot.slane %v10829_v36, 2  ;;  %v16255_v47 = vrot.slane %v11028_v58, 5 }
  0xec   : > { %16541 = vst [vmem:[#allocation25_spill] sm:$0xff] %v11132_v55  ;;  %2582 = vperm.xlu0 %10059, %v2442_v13   ;;  %v2405_v13 = vrot.slane %v10916_v39, 2 }
  0xed   : > { %v2404_v9 = vsel %vm942_vm4, %v16253_v3, %v2403_v33 }
  0xee   : > { %v11145_v52 = vpop.permute.xlu1 %1511 }
  0xef   : > { %16542 = vst [vmem:[#allocation26_spill] sm:$0xff] %v11145_v52  ;;  %v11147_v1 = vpop.permute.xlu0 %1491  ;;  %1411 = vperm.xlu1 %10060, %v1305_v6   ;;  %v2406_v6 = vsel %vm942_vm4, %v2403_v33, %v2405_v13 }
  0xf0   : > { %16543 = vst [vmem:[#allocation27_spill] sm:$0xff] %v11147_v1  ;;  %1068 = vperm.xlu0 %10059, %v964_v60   ;;  %v2407_v60 = vrot.slane %v11025_v53, 2 }
  0xf2   : > { %v11157_v26 = vpop.permute.xlu1 %786  ;;  %v2408_v55 = vsel %vm942_vm4, %v2405_v13, %v2407_v60 }
  0xf3   : > { %16545 = vst [vmem:[#allocation28_spill] sm:$0xff] %v11157_v26  ;;  %v11159_v32 = vpop.permute.xlu0 %1515  ;;  %2100 = vperm.xlu1 %10060, %v1998_v2   ;;  %v2410_v2 = vsel %vm942_vm4, %v2407_v60, %v16252_v17  ;;  %v16552_v17 = vrot.slane %v11042_v63, 5  ;;  %v16257_v60 = vrot.slane %v11042_v63, 7 }
  0xf4   : > { %16546 = vst [vmem:[#allocation29_spill] sm:$0xff] %v11159_v32  ;;  %1769 = vperm.xlu0 %10059, %v11162_v62  }
  0xf5   : > { %v696_v13 = vsel %vm651_vm0, %v16255_v47, %v16552_v17  ;;  %v16261_v17 = vrot.slane %v11092_v29, 1 }
  0xf6   : > { %v11171_v8 = vpop.permute.xlu1 %1427 }
  0xf7   : > { %16547 = vst [vmem:[#allocation30_spill] sm:$0xff] %v11171_v8  ;;  %v11173_v26 = vpop.permute.xlu0 %1084  ;;  %2510 = vperm.xlu1 %10060, %v2406_v6  }
  0xf8   : > { %16548 = vst [vmem:[#allocation31_spill] sm:$0xff] %v11173_v26  ;;  %2506 = vperm.xlu0 %10059, %v2404_v9   ;;  %v16551_v9 = vrot.slane %v11042_v63, 6 }
  0xfa   : > { %v11181_v21 = vpop.permute.xlu1 %1451  ;;  %v994_v6 = vsel %vm949_vm1, %v16254_v31, %v16551_v9  ;;  %v16555_v9 = vrot.slane %v10930_v49, 7 }
  0xfb   : > { %16549 = vst [vmem:[#allocation32_spill] sm:$0xff] %v11181_v21  ;;  %v11183_v33 = vpop.permute.xlu0 %1447  ;;  %2518 = vperm.xlu1 %10060, %v2410_v2  }
  0xfc   : > { %16550 = vst [vmem:[#allocation33_spill] sm:$0xff] %v11183_v33  ;;  %2514 = vperm.xlu0 %10059, %v2408_v55   ;;  %v11201_v55 = vld [vmem:[%s10691_s29 + $0x100] sm:$0xff]  ;;  %v1335_v31 = vsel %vm1288_vm2, %v16257_v60, %v16555_v9  ;;  %v2740_v9 = vrot.slane %v10880_v7, 3  ;;  %v16558_v60 = vrot.slane %v10981_v22, 1  ;;  %v16265_v7 = vrot.slane %v10976_v18, 3 }
  0xfd   : > { %v16259_v2 = vrot.slane %v11201_v55, 2 }
  0xfe   : > { %v11196_v3 = vpop.permute.xlu1 %1144 }
  0xff   : > { %16553 = vst [vmem:[#allocation34_spill] sm:$0xff] %v11196_v3  ;;  %v11198_v26 = vpop.permute.xlu0 %846  ;;  %1128 = vperm.xlu1 %10060, %v994_v6   ;;  %v11215_v3 = vld [vmem:[%s10691_s29 + $0xd8] sm:$0xff]  ;;  %v16557_v6 = vrot.slane %v10805_v15, 2 }
 0x100   : > { %16554 = vst [vmem:[#allocation35_spill] sm:$0xff] %v11198_v26  ;;  %830 = vperm.xlu0 %10059, %v696_v13   ;;  %v2738_v13 = vrot.slane %v10817_v25, 3  ;;  %v2028_v26 = vsel %vm606_vm3, %v16261_v17, %v16558_v60  ;;  %v11242_v60 = vld [vmem:[%s10691_s29 + $0x28] sm:$0xff] }
 0x101   : > { %v2434_v49 = vsel %vm942_vm4, %v16259_v2, %v16557_v6  ;;  %v2742_v2 = vrot.slane %v10954_v61, 3  ;;  %v16267_v21 = vrot.slane %v11242_v60, 5 }
 0x102   : > { %v11210_v47 = vpop.permute.xlu1 %1845  ;;  %v2741_v6 = vsel %vm1281_vm5, %v2738_v13, %v2740_v9 }
 0x103   : > { %v11212_v8 = vpop.permute.xlu0 %1487  ;;  %1829 = vperm.xlu1 %10060, %v11215_v3  }
 0x104   : > { %16556 = vst [vmem:[#allocation36_spill] sm:$0xff] %v11212_v8  ;;  %1471 = vperm.xlu0 %10059, %v1335_v31   ;;  %v16264_v8 = vrot.slane %v10805_v15, 3 }
 0x106   : > { %v11231_v31 = vpop.permute.xlu1 %1853  ;;  %v2739_v25 = vsel %vm1281_vm5, %v16264_v8, %v2738_v13 }
 0x107   : > { %16559 = vst [vmem:[#allocation37_spill] sm:$0xff] %v11231_v31  ;;  %v11233_v10 = vpop.permute.xlu0 %1849  ;;  %2566 = vperm.xlu1 %10060, %v2434_v49   ;;  %v16266_v49 = vrot.slane %v11242_v60, 6  ;;  %v2743_v31 = vsel %vm1281_vm5, %v2740_v9, %v2742_v2  ;;  %v16269_v9 = vrot.slane %v11106_v34, 7 }
 0x108   : > { %16560 = vst [vmem:[#allocation38_spill] sm:$0xff] %v11233_v10  ;;  %2160 = vperm.xlu0 %10059, %v2028_v26   ;;  %v2745_v26 = vsel %vm1281_vm5, %v2742_v2, %v16265_v7  ;;  %v16566_v7 = vrot.slane %v11106_v34, 5 }
 0x10a   : > { %v11244_v17 = vpop.permute.xlu1 %782  ;;  %v664_v2 = vsel %vm651_vm0, %v16267_v21, %v16566_v7  ;;  %v16274_v7 = vrot.slane %v11162_v62, 1 }
 0x10b   : > { %16561 = vst [vmem:[#allocation39_spill] sm:$0xff] %v11244_v17  ;;  %v11246_v33 = vpop.permute.xlu0 %1857  ;;  %2877 = vperm.xlu1 %10060, %v2741_v6  }
 0x10c   : > { %16562 = vst [vmem:[#allocation40_spill] sm:$0xff] %v11246_v33  ;;  %2873 = vperm.xlu0 %10059, %v2739_v25   ;;  %v16565_v25 = vrot.slane %v11106_v34, 6 }
 0x10e   : > { %v11254_v13 = vpop.permute.xlu1 %1423  ;;  %v962_v6 = vsel %vm949_vm1, %v16266_v49, %v16565_v25  ;;  %v16569_v25 = vrot.slane %v10971_v12, 7 }
 0x10f   : > { %16563 = vst [vmem:[#allocation41_spill] sm:$0xff] %v11254_v13  ;;  %v11256_v8 = vpop.permute.xlu0 %1080  ;;  %2885 = vperm.xlu1 %10060, %v2745_v26  }
 0x110   : > { %16564 = vst [vmem:[#allocation42_spill] sm:$0xff] %v11256_v8  ;;  %2881 = vperm.xlu0 %10059, %v2743_v31   ;;  %v11274_v31 = vld [vmem:[%s10691_s29 + $0x80] sm:$0xff]  ;;  %v1303_v49 = vsel %vm1288_vm2, %v16269_v9, %v16569_v25  ;;  %v2708_v25 = vrot.slane %v10916_v39, 3  ;;  %v16573_v9 = vrot.slane %v11049_v16, 1 }
 0x111   : > { %v16270_v26 = vrot.slane %v11274_v31, 2 }
 0x112   : > { %v11269_v17 = vpop.permute.xlu1 %1785 }
 0x113   : > { %16567 = vst [vmem:[#allocation43_spill] sm:$0xff] %v11269_v17  ;;  %v11271_v8 = vpop.permute.xlu0 %1781  ;;  %1064 = vperm.xlu1 %10060, %v962_v6   ;;  %v11288_v17 = vld [vmem:[%s10691_s29 + $0x58] sm:$0xff]  ;;  %v16572_v6 = vrot.slane %v10826_v35, 2 }
 0x114   : > { %16568 = vst [vmem:[#allocation44_spill] sm:$0xff] %v11271_v8  ;;  %766 = vperm.xlu0 %10059, %v664_v2   ;;  %v2706_v2 = vrot.slane %v10829_v36, 3  ;;  %v16275_v36 = vrot.slane %v11028_v58, 3 }
 0x115   : > { %v2402_v12 = vsel %vm942_vm4, %v16270_v26, %v16572_v6  ;;  %v2710_v26 = vrot.slane %v11025_v53, 3 }
 0x116   : > { %v11283_v21 = vpop.permute.xlu1 %1793  ;;  %v2709_v6 = vsel %vm1281_vm5, %v2706_v2, %v2708_v25 }
 0x117   : > { %16570 = vst [vmem:[#allocation45_spill] sm:$0xff] %v11283_v21  ;;  %v11285_v13 = vpop.permute.xlu0 %1789  ;;  %1765 = vperm.xlu1 %10060, %v11288_v17   ;;  %v16276_v21 = vrot.slane %v10826_v35, 3 }
 0x118   : > { %16571 = vst [vmem:[#allocation46_spill] sm:$0xff] %v11285_v13  ;;  %1407 = vperm.xlu0 %10059, %v1303_v49   ;;  %v1996_v13 = vsel %vm606_vm3, %v16274_v7, %v16573_v9  ;;  %v2711_v7 = vsel %vm1281_vm5, %v2708_v25, %v2710_v26  ;;  %v16281_v25 = vrot.slane %v11028_v58, 7 }
 0x119   : > { %v2707_v16 = vsel %vm1281_vm5, %v16276_v21, %v2706_v2 }
 0x11a   : > { %v11304_v8 = vpop.permute.xlu1 %1140 }
 0x11b   : > { %16574 = vst [vmem:[#allocation47_spill] sm:$0xff] %v11304_v8  ;;  %v11306_v49 = vpop.permute.xlu0 %842  ;;  %2502 = vperm.xlu1 %10060, %v2402_v12   ;;  %v16278_v12 = vrot.slane %v11025_v53, 6  ;;  %v16279_v8 = vrot.slane %v11025_v53, 5 }
 0x11c   : > { %16575 = vst [vmem:[#allocation48_spill] sm:$0xff] %v11306_v49  ;;  %2096 = vperm.xlu0 %10059, %v1996_v13   ;;  %v2713_v13 = vsel %vm1281_vm5, %v2710_v26, %v16275_v36  ;;  %v16581_v36 = vrot.slane %v11028_v58, 5 }
 0x11e   : > { %v11314_v33 = vpop.permute.xlu1 %1841  ;;  %v694_v26 = vsel %vm651_vm0, %v16279_v8, %v16581_v36  ;;  %v16287_v36 = vrot.slane %v11215_v3, 1  ;;  %v11354_v8 = vld [vmem:[%s10691_s29 + $0x20] sm:$0xff] }
 0x11f   : > { %16576 = vst [vmem:[#allocation49_spill] sm:$0xff] %v11314_v33  ;;  %v11316_v9 = vpop.permute.xlu0 %1483  ;;  %2813 = vperm.xlu1 %10060, %v2709_v6   ;;  %16585 = vst [vmem:[#allocation55_spill] sm:$0xff] %v11354_v8 }
 0x120   : > { %16577 = vst [vmem:[#allocation50_spill] sm:$0xff] %v11316_v9  ;;  %2809 = vperm.xlu0 %10059, %v2707_v16   ;;  %v16580_v16 = vrot.slane %v11028_v58, 6 }
 0x122   : > { %v11324_v49 = vpop.permute.xlu1 %2176  ;;  %v992_v6 = vsel %vm949_vm1, %v16278_v12, %v16580_v16  ;;  %v16584_v16 = vrot.slane %v11042_v63, 7 }
 0x123   : > { %16578 = vst [vmem:[#allocation51_spill] sm:$0xff] %v11324_v49  ;;  %v11326_v2 = vpop.permute.xlu0 %2172  ;;  %2821 = vperm.xlu1 %10060, %v2713_v13  }
 0x124   : > { %16579 = vst [vmem:[#allocation52_spill] sm:$0xff] %v11326_v2  ;;  %2817 = vperm.xlu0 %10059, %v2711_v7   ;;  %v11344_v7 = vld [vmem:[%s10691_s29 + $0xf8] sm:$0xff]  ;;  %v1333_v12 = vsel %vm1288_vm2, %v16281_v25, %v16584_v16  ;;  %v16289_v16 = vrot.slane %v11354_v8, 5  ;;  %v16589_v25 = vrot.slane %v11092_v29, 1  ;;  %v16593_v29 = vrot.slane %v10805_v15, 3 }
 0x125   : > { %v16284_v13 = vrot.slane %v11344_v7, 2 }
 0x126   : > { %v11339_v21 = vpop.permute.xlu1 %2184 }
 0x127   : > { %16582 = vst [vmem:[#allocation53_spill] sm:$0xff] %v11339_v21  ;;  %v11341_v9 = vpop.permute.xlu0 %2180  ;;  %1124 = vperm.xlu1 %10060, %v992_v6   ;;  %v11361_v6 = vld [vmem:[%s10691_s29 + $0xd0] sm:$0xff] }
 0x128   : > { %16583 = vst [vmem:[#allocation54_spill] sm:$0xff] %v11341_v9  ;;  %826 = vperm.xlu0 %10059, %v694_v26   ;;  %v16588_v26 = vrot.slane %v11201_v55, 2 }
 0x12a   : > { %v11356_v33 = vpop.permute.xlu1 %1076  ;;  %v2432_v63 = vsel %vm942_vm4, %v16284_v13, %v16588_v26  ;;  %v16291_v13 = vrot.slane %v11242_v60, 7 }
 0x12b   : > { %16586 = vst [vmem:[#allocation56_spill] sm:$0xff] %v11356_v33  ;;  %v11358_v21 = vpop.permute.xlu0 %778  ;;  %1825 = vperm.xlu1 %10060, %v11361_v6   ;;  %v2026_v33 = vsel %vm606_vm3, %v16287_v36, %v16589_v25  ;;  %v16293_v36 = vrot.slane %v11354_v8, 6 }
 0x12c   : > { %16587 = vst [vmem:[#allocation57_spill] sm:$0xff] %v11358_v21  ;;  %1467 = vperm.xlu0 %10059, %v1333_v12   ;;  %v16290_v21 = vrot.slane %v11201_v55, 3  ;;  %v16592_v12 = vrot.slane %v11242_v60, 5 }
 0x12e   : > { %v11376_v9 = vpop.permute.xlu1 %1777  ;;  %v662_v26 = vsel %vm651_vm0, %v16289_v16, %v16592_v12  ;;  %v2737_v25 = vsel %vm1281_vm5, %v16290_v21, %v16593_v29  ;;  %v16294_v12 = vrot.slane %v11288_v17, 1  ;;  %v16597_v16 = vrot.slane %v11242_v60, 6 }
 0x12f   : > { %16590 = vst [vmem:[#allocation58_spill] sm:$0xff] %v11376_v9  ;;  %v11378_v2 = vpop.permute.xlu0 %1419  ;;  %2562 = vperm.xlu1 %10060, %v2432_v63   ;;  %v16596_v63 = vrot.slane %v11106_v34, 7  ;;  %v16600_v34 = vrot.slane %v11162_v62, 1  ;;  %v16605_v62 = vrot.slane %v10826_v35, 3  ;;  %v16609_v35 = vrot.slane %v11025_v53, 6 }
 0x130   : > { %16591 = vst [vmem:[#allocation59_spill] sm:$0xff] %v11378_v2  ;;  %2156 = vperm.xlu0 %10059, %v2026_v33   ;;  %v960_v29 = vsel %vm949_vm1, %v16293_v36, %v16597_v16  ;;  %v11426_v36 = vld [vmem:[%s10691_s29 + $0x50] sm:$0xff] }
 0x131   : > { %v1301_v15 = vsel %vm1288_vm2, %v16291_v13, %v16596_v63  ;;  %v11418_v63 = vld [vmem:[%s10691_s29 + $0x78] sm:$0xff]  ;;  %16604 = vst [vmem:[#allocation67_spill] sm:$0xff] %v11426_v36 }
 0x132   : > { %v11392_v2 = vpop.permute.xlu1 %2112  ;;  %16601 = vst [vmem:[#allocation64_spill] sm:$0xff] %v11418_v63  ;;  %v16296_v13 = vrot.slane %v11418_v63, 2 }
 0x133   : > { %16594 = vst [vmem:[#allocation60_spill] sm:$0xff] %v11392_v2  ;;  %v11394_v33 = vpop.permute.xlu0 %2108  ;;  %762 = vperm.xlu1 %10060, %v662_v26   ;;  %v1994_v26 = vsel %vm606_vm3, %v16294_v12, %v16600_v34  ;;  %v16606_v34 = vrot.slane %v11274_v31, 2  ;;  %v16312_v2 = vrot.slane %v11344_v7, 3 }
 0x134   : > { %16595 = vst [vmem:[#allocation61_spill] sm:$0xff] %v11394_v33  ;;  %2869 = vperm.xlu0 %10059, %v2737_v25   ;;  %v16295_v25 = vrot.slane %v11274_v31, 3 }
 0x135   : > { %v2400_v12 = vsel %vm942_vm4, %v16296_v13, %v16606_v34  ;;  %v16303_v13 = vrot.slane %v11025_v53, 7 }
 0x136   : > { %v11407_v21 = vpop.permute.xlu1 %2120 }
 0x137   : > { %16598 = vst [vmem:[#allocation62_spill] sm:$0xff] %v11407_v21  ;;  %v11409_v9 = vpop.permute.xlu0 %2116  ;;  %1403 = vperm.xlu1 %10060, %v1301_v15   ;;  %v2705_v15 = vsel %vm1281_vm5, %v16295_v25, %v16605_v62  ;;  %v16610_v25 = vrot.slane %v11025_v53, 5 }
 0x138   : > { %16599 = vst [vmem:[#allocation63_spill] sm:$0xff] %v11409_v9  ;;  %1060 = vperm.xlu0 %10059, %v960_v29   ;;  %v16299_v29 = vrot.slane %v10916_v39, 6 }
 0x13a   : > { %v11421_v33 = vpop.permute.xlu1 %1136  ;;  %v990_v62 = vsel %vm949_vm1, %v16299_v29, %v16609_v35  ;;  %v11471_v29 = vld [vmem:[%s10691_s29 + $0x138] sm:$0xff] }
 0x13b   : > { %16602 = vst [vmem:[#allocation65_spill] sm:$0xff] %v11421_v33  ;;  %v11423_v16 = vpop.permute.xlu0 %838  ;;  %2092 = vperm.xlu1 %10060, %v1994_v26   ;;  %v16298_v26 = vrot.slane %v10916_v39, 5 }
 0x13c   : > { %16603 = vst [vmem:[#allocation66_spill] sm:$0xff] %v11423_v16  ;;  %1761 = vperm.xlu0 %10059, %v11426_v36  }
 0x13d   : > { %v692_v34 = vsel %vm651_vm0, %v16298_v26, %v16610_v25  ;;  %v11468_v26 = vld [vmem:[%s10691_s29 + $0x130] sm:$0xff]  ;;  %v608_v25 = vrot.slane %v11471_v29, 1 }
 0x13e   : > { %v11441_v16 = vpop.permute.xlu1 %1837  ;;  %16614 = vst [vmem:[#allocation72_spill] sm:$0xff] %v11468_v26 }
 0x13f   : > { %16607 = vst [vmem:[#allocation68_spill] sm:$0xff] %v11441_v16  ;;  %v11443_v33 = vpop.permute.xlu0 %1479  ;;  %2805 = vperm.xlu1 %10060, %v2705_v15   ;;  %v16613_v15 = vrot.slane %v11028_v58, 7  ;;  %v16618_v58 = vrot.slane %v10967_v11, 2 }
 0x140   : > { %16608 = vst [vmem:[#allocation69_spill] sm:$0xff] %v11443_v33  ;;  %2498 = vperm.xlu0 %10059, %v2400_v12   ;;  %v16617_v12 = vrot.slane %v11344_v7, 2 }
 0x141   : > { %v1331_v35 = vsel %vm1288_vm2, %v16303_v13, %v16613_v15  ;;  %v16311_v13 = vrot.slane %v11468_v26, 1 }
 0x142   : > { %v11456_v16 = vpop.permute.xlu1 %2188  ;;  %v2430_v15 = vsel %vm942_vm4, %v16618_v58, %v16617_v12 }
 0x143   : > { %16611 = vst [vmem:[#allocation70_spill] sm:$0xff] %v11456_v16  ;;  %v11458_v33 = vpop.permute.xlu0 %2168  ;;  %1120 = vperm.xlu1 %10060, %v990_v62   ;;  %v11498_v16 = vld [vmem:[%s10691_s29] sm:$0xff] }
 0x144   : > { %16612 = vst [vmem:[#allocation71_spill] sm:$0xff] %v11458_v33  ;;  %822 = vperm.xlu0 %10059, %v692_v34   ;;  %v11478_v34 = vld [vmem:[%s10691_s29 + $0xc8] sm:$0xff]  ;;  %v16620_v33 = vrot.slane %v11361_v6, 1 }
 0x146   : > { %v11473_v9 = vpop.permute.xlu1 %774 }
 0x147   : > { %16615 = vst [vmem:[#allocation73_spill] sm:$0xff] %v11473_v9  ;;  %v11475_v62 = vpop.permute.xlu0 %2192  ;;  %1821 = vperm.xlu1 %10060, %v11478_v34   ;;  %v16619_v9 = vrot.slane %v11215_v3, 1  ;;  %v609_v3 = vsel %vm606_vm3, %v16311_v13, %v608_v25  ;;  %v16316_v13 = vrot.slane %v10976_v18, 5 }
 0x148   : > { %16616 = vst [vmem:[#allocation74_spill] sm:$0xff] %v11475_v62  ;;  %1463 = vperm.xlu0 %10059, %v1331_v35   ;;  %v11495_v35 = vld [vmem:[%s10691_s29 + $0x140] sm:$0xf] }
 0x149   : > { %v2024_v21 = vsel %vm606_vm3, %v16620_v33, %v16619_v9  ;;  %16621 = vst [vmem:[#allocation75_spill] sm:$0xff] %v11495_v35  ;;  %v610_v12 = vrot.slane %v11495_v35, 1  ;;  %v16314_v9 = vrot.slane %v11498_v16, 5  ;;  %v16624_v33 = vrot.slane %v11201_v55, 3 }
 0x14a   : > { %v11500_v62 = vpop.permute.xlu1 %1415  ;;  %v727_v55 = vrot.slane %v11468_v26, 5 }
 0x14b   : > { %16622 = vst [vmem:[#allocation76_spill] sm:$0xff] %v11500_v62  ;;  %v11502_v58 = vpop.permute.xlu0 %1072  ;;  %2558 = vperm.xlu1 %10060, %v2430_v15   ;;  %v2735_v49 = vsel %vm1281_vm5, %v16312_v2, %v16624_v33  ;;  %v11517_v62 = vld [vmem:[%s10691_s29 + $0x18] sm:$0xff] }
 0x14c   : > { %16623 = vst [vmem:[#allocation77_spill] sm:$0xff] %v11502_v58  ;;  %2152 = vperm.xlu0 %10059, %v2024_v21   ;;  %v730_v21 = vsel %vm651_vm0, %v610_v12, %v16314_v9  ;;  %v611_v58 = vsel %vm606_vm3, %v608_v25, %v610_v12  ;;  %v16320_v33 = vrot.slane %v11517_v62, 5  ;;  %v946_v9 = vrot.slane %v11495_v35, 2 }
 0x14d   : > { %v16321_v12 = vrot.slane %v11468_v26, 2 }
 0x14e   : > { %v11514_v10 = vpop.permute.xlu1 %2104 }
 0x14f   : > { %16625 = vst [vmem:[#allocation78_spill] sm:$0xff] %v11514_v10  ;;  %v11519_v15 = vpop.permute.xlu0 %1773  ;;  %733 = vperm.xlu1 %10060, %v609_v3   ;;  %v944_v3 = vrot.slane %v11471_v29, 2 }
 0x150   : > { %16626 = vst [vmem:[#allocation79_spill] sm:$0xff] %v11519_v15  ;;  %2865 = vperm.xlu0 %10059, %v2735_v49   ;;  %v728_v49 = vsel %vm651_vm0, %v16316_v13, %v727_v55  ;;  %v16629_v15 = vrot.slane %v11354_v8, 5  ;;  %v16322_v55 = vrot.slane %v11517_v62, 6 }
 0x151   : > { %v945_v13 = vsel %vm942_vm4, %v16321_v12, %v944_v3  ;;  %v16326_v12 = vrot.slane %v10976_v18, 6 }
 0x152   : > { %v11528_v2 = vpop.permute.xlu1 %2128  ;;  %v660_v25 = vsel %vm651_vm0, %v16320_v33, %v16629_v15  ;;  %v16634_v33 = vrot.slane %v11354_v8, 6 }
 0x153   : > { %16627 = vst [vmem:[#allocation80_spill] sm:$0xff] %v11528_v2  ;;  %v11530_v10 = vpop.permute.xlu0 %2124  ;;  %742 = vperm.xlu1 %10060, %v730_v21  }
 0x154   : > { %16628 = vst [vmem:[#allocation81_spill] sm:$0xff] %v11530_v10  ;;  %737 = vperm.xlu0 %10059, %v611_v58   ;;  %v947_v58 = vsel %vm942_vm4, %v944_v3, %v946_v9  ;;  %v16323_v10 = vrot.slane %v11498_v16, 6 }
 0x156   : > { %v11543_v2 = vpop.permute.xlu1 %1132  ;;  %v1028_v3 = vsel %vm949_vm1, %v946_v9, %v16323_v10 }
 0x157   : > { %16630 = vst [vmem:[#allocation82_spill] sm:$0xff] %v11543_v2  ;;  %v11545_v21 = vpop.permute.xlu0 %834  ;;  %894 = vperm.xlu1 %10060, %v728_v49   ;;  %v958_v49 = vsel %vm949_vm1, %v16322_v55, %v16634_v33  ;;  %v16327_v55 = vrot.slane %v11426_v36, 1 }
 0x158   : > { %16631 = vst [vmem:[#allocation83_spill] sm:$0xff] %v11545_v21  ;;  %758 = vperm.xlu0 %10059, %v660_v25   ;;  %v16325_v25 = vrot.slane %v11354_v8, 7  ;;  %v1025_v21 = vrot.slane %v11468_v26, 6 }
 0x15a   : > { %v11553_v35 = vpop.permute.xlu1 %1833  ;;  %v1026_v9 = vsel %vm949_vm1, %v16326_v12, %v1025_v21  ;;  %v11597_v21 = vld [vmem:[%s16639_s22 + $0x1] ss:$0 sm:$0xff] }
 0x15b   : > { %16632 = vst [vmem:[#allocation84_spill] sm:$0xff] %v11553_v35  ;;  %v11555_v15 = vpop.permute.xlu0 %1475  ;;  %1035 = vperm.xlu1 %10060, %v947_v58  }
 0x15c   : > { %16633 = vst [vmem:[#allocation85_spill] sm:$0xff] %v11555_v15  ;;  %1031 = vperm.xlu0 %10059, %v945_v13   ;;  %v16636_v13 = vrot.slane %v11242_v60, 7 }
 0x15e   : > { %v11568_v2 = vpop.permute.xlu1 %2570  ;;  %v1299_v33 = vsel %vm1288_vm2, %v16325_v25, %v16636_v13  ;;  %v11617_v13 = vld [vmem:[%s16639_s22] ss:$0 sm:$0xff] }
 0x15f   : > { %v11570_v58 = vpop.permute.xlu0 %2164  ;;  %1056 = vperm.xlu1 %10060, %v958_v49   ;;  %v16637_v49 = vrot.slane %v11288_v17, 1  ;;  %v16640_v17 = vrot.slane %v11274_v31, 3  ;;  %16641 = vst [vmem:[#allocation88_spill] sm:$0xff] %v11617_v13 }
 0x160   : > { %16635 = vst [vmem:[#allocation86_spill] sm:$0xff] %v11570_v58  ;;  %1040 = vperm.xlu0 %10059, %v1028_v3   ;;  %v16328_v3 = vrot.slane %v11418_v63, 3 }
 0x161   : > { %v1992_v60 = vsel %vm606_vm3, %v16327_v55, %v16637_v49  ;;  %v11611_v49 = vld [vmem:[%s10691_s29 + $0x90] sm:$0xff]  ;;  %v1233_v55 = vmul.f32 %v11597_v21, %v10956_v4  ;;  %v16646_v4 = vrot.slane %v10916_v39, 6 }
 0x162   : > { %v11581_v10 = vpop.permute.xlu1 %2578 }
 0x163   : > { %v11583_v15 = vpop.permute.xlu0 %2574  ;;  %1399 = vperm.xlu1 %10060, %v1299_v33   ;;  %v11602_v33 = vld [vmem:[%s10691_s29 + $0x48] sm:$0xff] }
 0x164   : > { %1192 = vperm.xlu0 %10059, %v1026_v9   ;;  %v2703_v9 = vsel %vm1281_vm5, %v16328_v3, %v16640_v17  ;;  %v1231_v17 = vmul.f32 %v11597_v21, %v10942_v56  ;;  %v1230_v3 = vmul.f32 %v11597_v21, %v10944_v57  ;;  %v935_v56 = vmul.f32 %v11617_v13, %v10932_v50 }
 0x165   : > { %v933_v57 = vmul.f32 %v11617_v13, %v10934_v51  ;;  %v16336_v50 = vrot.slane %v10916_v39, 7 }
 0x166   : > { %v11592_v25 = vpop.permute.xlu1 %770 }
 0x167   : > { %16638 = vst [vmem:[#allocation87_spill] sm:$0xff] %v11592_v25  ;;  %v11599_v12 = vpop.permute.xlu0 %2582  ;;  %2088 = vperm.xlu1 %10060, %v1992_v60   ;;  %v16642_v60 = vrot.slane %v11418_v63, 2  ;;  %v16643_v25 = vrot.slane %v11016_v46, 2  ;;  %v1232_v63 = vmul.f32 %v11597_v21, %v10958_v5  ;;  %v934_v5 = vmul.f32 %v11617_v13, %v10918_v40 }
 0x168   : > { %1757 = vperm.xlu0 %10059, %v11602_v33   ;;  %v1214_v40 = vmul.f32 %v11597_v21, %v11008_v44  ;;  %v919_v44 = vmul.f32 %v11617_v13, %v10994_v28  ;;  %v1229_v28 = vmul.f32 %v11597_v21, %v11044_v41 }
 0x169   : > { %v2398_v35 = vsel %vm942_vm4, %v16643_v25, %v16642_v60  ;;  %v932_v25 = vmul.f32 %v11617_v13, %v10920_v42  ;;  %v16647_v60 = vrot.slane %v11611_v49, 6  ;;  %v16649_v42 = vrot.slane %v11611_v49, 5 }
 0x16a   : > { %v11631_v58 = vpop.permute.xlu1 %1411  ;;  %v1273_v8 = vadd.f32 %v1232_v63, %v934_v5  ;;  %v917_v63 = vmul.f32 %v11617_v13, %v10973_v14 }
 0x16b   : > { %16644 = vst [vmem:[#allocation89_spill] sm:$0xff] %v11631_v58  ;;  %v11635_v36 = vpop.permute.xlu0 %1068  ;;  %2801 = vperm.xlu1 %10060, %v2703_v9   ;;  %v988_v31 = vsel %vm949_vm1, %v16647_v60, %v16646_v4  ;;  %v16648_v9 = vrot.slane %v10916_v39, 5  ;;  %v1272_v58 = vadd.f32 %v1231_v17, %v933_v57  ;;  %v1271_v51 = vadd.f32 %v1230_v3, %v932_v25  ;;  %v11689_v25 = vld [vmem:[%s10691_s29 + $0x10] sm:$0xff] }
 0x16c   : > { %16645 = vst [vmem:[#allocation90_spill] sm:$0xff] %v11635_v36  ;;  %2494 = vperm.xlu0 %10059, %v2398_v35   ;;  %v1274_v35 = vadd.f32 %v1233_v55, %v935_v56  ;;  %v1215_v4 = vmul.f32 %v11597_v21, %v11006_v37  ;;  %v1217_v60 = vmul.f32 %v11597_v21, %v11030_v54  ;;  %v16341_v54 = vrot.slane %v10981_v22, 2 }
 0x16d   : > { %v690_v36 = vsel %vm651_vm0, %v16649_v42, %v16648_v9  ;;  %v11667_v9 = vld [vmem:[%s16639_s22 + $0x2] ss:$0 sm:$0xff]  ;;  %v916_v37 = vmul.f32 %v11617_v13, %v10978_v19  ;;  %v918_v55 = vmul.f32 %v11617_v13, %v10996_v30  ;;  %v1216_v17 = vmul.f32 %v11597_v21, %v11032_v59  ;;  %v11704_v42 = vld [vmem:[%s16639_s22 + $0x3] ss:$0 sm:$0xff] }
 0x16e   : > { %v11656_v46 = vpop.permute.xlu1 %2100  ;;  %v931_v30 = vmul.f32 %v11617_v13, %v11046_v24  ;;  %v1256_v56 = vadd.f32 %v1215_v4, %v917_v63  ;;  %v1258_v5 = vadd.f32 %v1217_v60, %v919_v44  ;;  %v1572_v41 = vmul.f32 %v11667_v9, %v11075_v27 }
 0x16f   : > { %16650 = vst [vmem:[#allocation91_spill] sm:$0xff] %v11656_v46  ;;  %v11669_v3 = vpop.permute.xlu0 %1769  ;;  %1116 = vperm.xlu1 %10060, %v988_v31   ;;  %v16652_v31 = vrot.slane %v11025_v53, 7  ;;  %v1569_v53 = vmul.f32 %v11667_v9, %v11062_v0  ;;  %v1255_v57 = vadd.f32 %v1214_v40, %v916_v37  ;;  %v1571_v4 = vmul.f32 %v11667_v9, %v11077_v20 }
 0x170   : > { %16651 = vst [vmem:[#allocation92_spill] sm:$0xff] %v11669_v3  ;;  %818 = vperm.xlu0 %10059, %v690_v36   ;;  %v1570_v36 = vmul.f32 %v11667_v9, %v11060_v23  ;;  %v16653_v40 = vrot.slane %v10967_v11, 2  ;;  %v16344_v63 = vrot.slane %v11689_v25, 5  ;;  %v1257_v37 = vadd.f32 %v1216_v17, %v918_v55 }
 0x171   : > { %v1329_v14 = vsel %vm1288_vm2, %v16336_v50, %v16652_v31  ;;  %v11711_v31 = vld [vmem:[%s10691_s29 + $0xc0] sm:$0xff]  ;;  %v1669_v50 = vmul.f32 %v11704_v42, %v11075_v27  ;;  %v1554_v44 = vmul.f32 %v11667_v9, %v11108_v43  ;;  %v16654_v19 = vrot.slane %v11361_v6, 1 }
 0x172   : > { %v11699_v59 = vpop.permute.xlu1 %2510  ;;  %v2428_v60 = vsel %vm942_vm4, %v16341_v54, %v16653_v40  ;;  %v16655_v27 = vrot.slane %v11478_v34, 1  ;;  %v1270_v46 = vadd.f32 %v1229_v28, %v931_v30  ;;  %v1611_v0 = vadd.f32 %v1570_v36, %v1272_v58 }
 0x173   : > { %v11708_v24 = vpop.permute.xlu0 %2506  ;;  %1817 = vperm.xlu1 %10060, %v11711_v31   ;;  %v1610_v13 = vadd.f32 %v1569_v53, %v1271_v51  ;;  %v1668_v40 = vmul.f32 %v11704_v42, %v11077_v20  ;;  %v1613_v55 = vadd.f32 %v1572_v41, %v1274_v35  ;;  %v1553_v17 = vmul.f32 %v11667_v9, %v11110_v45 }
 0x174   : > { %1459 = vperm.xlu0 %10059, %v1329_v14   ;;  %v2022_v3 = vsel %vm606_vm3, %v16655_v27, %v16654_v19  ;;  %v16343_v14 = vrot.slane %v10967_v11, 3  ;;  %v1556_v6 = vmul.f32 %v11667_v9, %v11116_v38  ;;  %v1653_v19 = vmul.f32 %v11704_v42, %v11116_v38 }
 0x175   : > { %v1710_v58 = vadd.f32 %v1669_v50, %v1611_v0  ;;  %v1612_v51 = vadd.f32 %v1571_v4, %v1273_v8  ;;  %v16656_v20 = vrot.slane %v11517_v62, 5  ;;  %v16342_v28 = vrot.slane %v11689_v25, 6 }
 0x176   : > { %v11734_v54 = vpop.permute.xlu1 %2518  ;;  %v1595_v30 = vadd.f32 %v1554_v44, %v1256_v56  ;;  %v1555_v36 = vmul.f32 %v11667_v9, %v11118_v48  ;;  %v16657_v38 = vrot.slane %v11344_v7, 3  ;;  %v16346_v8 = vrot.slane %v10954_v61, 5  ;;  %v11767_v7 = vld [vmem:[%s16639_s22 + $0x4] ss:$0 sm:$0xff] }
 0x177   : > { %v11742_v27 = vpop.permute.xlu0 %2514  ;;  %2554 = vperm.xlu1 %10060, %v2428_v60   ;;  %v658_v35 = vsel %vm651_vm0, %v16344_v63, %v16656_v20  ;;  %v1709_v50 = vadd.f32 %v1668_v40, %v1610_v13  ;;  %v1670_v53 = vmul.f32 %v11704_v42, %v11145_v52  ;;  %v1568_v56 = vmul.f32 %v11667_v9, %v11147_v1  ;;  %v11782_v40 = vld [vmem:[%s16639_s22 + $0x5] ss:$0 sm:$0xff] }
 0x178   : > { %2148 = vperm.xlu0 %10059, %v2022_v3   ;;  %v2733_v0 = vsel %vm1281_vm5, %v16343_v14, %v16657_v38  ;;  %v1652_v3 = vmul.f32 %v11704_v42, %v11118_v48  ;;  %v1594_v4 = vadd.f32 %v1553_v17, %v1255_v57  ;;  %v11771_v60 = vadd.f32 %v1556_v6, %v1258_v5  ;;  %v16675_v1 = vld [vmem:[#allocation54_spill] sm:$0xff] }
 0x179   : > { %v11773_v13 = vadd.f32 %v1653_v19, %v1595_v30  ;;  %v1671_v48 = vmul.f32 %v11704_v42, %v11159_v32  ;;  %v16660_v20 = vrot.slane %v11517_v62, 6  ;;  %v1283_v6 = vrot.slane %v11471_v29, 3  ;;  %v16661_v30 = vld [vmem:[#allocation38_spill] sm:$0xff]  ;;  %v16674_v32 = vld [vmem:[#allocation53_spill] sm:$0xff] }
 0x17a   : > { %v11769_v41 = vpop.permute.xlu1 %1128  ;;  %v11792_v19 = vadd.f32 %v1555_v36, %v1257_v37  ;;  %v1920_v38 = vmul.f32 %v11767_v7, %v16661_v30  ;;  %v1711_v14 = vadd.f32 %v1670_v53, %v1612_v51  ;;  %v11805_v63 = vadd.f32 %v1568_v56, %v1270_v46  ;;  %v16664_v37 = vld [vmem:[#allocation75_spill] sm:$0xff]  ;;  %v16668_v51 = vld [vmem:[#allocation37_spill] sm:$0xff]  ;;  %v11824_v53 = vld [vmem:[%s16639_s22 + $0x6] ss:$0 sm:$0xff] }
 0x17b   : > { %16658 = vst [vmem:[#allocation93_spill] sm:$0xff] %v11769_v41  ;;  %v11777_v44 = vpop.permute.xlu0 %830  ;;  %754 = vperm.xlu1 %10060, %v658_v35   ;;  %v956_v57 = vsel %vm949_vm1, %v16342_v28, %v16660_v20  ;;  %v1919_v35 = vmul.f32 %v11767_v7, %v11210_v47  ;;  %v11803_v28 = vadd.f32 %v1652_v3, %v1594_v4  ;;  %v1285_v36 = vrot.slane %v16664_v37, 3  ;;  %v16665_v47 = vld [vmem:[#allocation32_spill] sm:$0xff]  ;;  %v16666_v30 = vld [vmem:[#allocation51_spill] sm:$0xff] }
 0x17c   : > { %16659 = vst [vmem:[#allocation94_spill] sm:$0xff] %v11777_v44  ;;  %2861 = vperm.xlu0 %10059, %v2733_v0   ;;  %v16662_v0 = vrot.slane %v10976_v18, 5  ;;  %v1712_v5 = vadd.f32 %v1671_v48, %v1613_v55  ;;  %v11812_v52 = vmul.f32 %v11704_v42, %v16665_v47  ;;  %v2235_v41 = vmul.f32 %v11782_v40, %v16666_v30  ;;  %v16669_v55 = vld [vmem:[#allocation52_spill] sm:$0xff] }
 0x17d   : > { %v1921_v46 = vmul.f32 %v11767_v7, %v16668_v51  ;;  %v2234_v56 = vmul.f32 %v11782_v40, %v16669_v55  ;;  %v16670_v4 = vrot.slane %v10976_v18, 6  ;;  %v16671_v48 = vrot.slane %v10954_v61, 6 }
 0x17e   : > { %v726_v20 = vsel %vm651_vm0, %v16346_v8, %v16662_v0  ;;  %v11807_v17 = vpop.permute.xlu1 %1829  ;;  %v16672_v0 = vrot.slane %v11468_v26, 3  ;;  %v1960_v51 = vadd.f32 %v1919_v35, %v1709_v50  ;;  %v1961_v3 = vadd.f32 %v1920_v38, %v1710_v58 }
 0x17f   : > { %16663 = vst [vmem:[#allocation38_spill] sm:$0xff] %v11807_v17  ;;  %v11816_v44 = vpop.permute.xlu0 %1471  ;;  %1052 = vperm.xlu1 %10060, %v956_v57   ;;  %v1024_v57 = vsel %vm949_vm1, %v16671_v48, %v16670_v4  ;;  %v2322_v17 = vmul.f32 %v11824_v53, %v16674_v32  ;;  %v2321_v4 = vmul.f32 %v11824_v53, %v16675_v1  ;;  %v16677_v55 = vrot.slane %v11498_v16, 7 }
 0x180   : > { %16667 = vst [vmem:[#allocation51_spill] sm:$0xff] %v11816_v44  ;;  %890 = vperm.xlu0 %10059, %v726_v20   ;;  %v1284_v8 = vsel %vm1281_vm5, %v16672_v0, %v1283_v6  ;;  %v16673_v44 = vld [vmem:[#allocation40_spill] sm:$0xff]  ;;  %v11843_v20 = vld [vmem:[%s16639_s22 + $0x7] ss:$0 sm:$0xff]  ;;  %v1286_v0 = vsel %vm1281_vm5, %v1283_v6, %v1285_v36  ;;  %v2237_v35 = vmul.f32 %v11782_v40, %v16674_v32  ;;  %v11868_v32 = vld [vmem:[%s16639_s22 + $0x8] ss:$0 sm:$0xff] }
 0x181   : > { %v1922_v47 = vmul.f32 %v11767_v7, %v16673_v44  ;;  %v2276_v44 = vadd.f32 %v2235_v41, %v1961_v3  ;;  %v2625_v38 = vmul.f32 %v11843_v20, %v11583_v15  ;;  %v1367_v43 = vsel %vm1288_vm2, %v1285_v36, %v16677_v55  ;;  %v16678_v3 = vld [vmem:[#allocation74_spill] sm:$0xff] }
 0x182   : > { %v11847_v48 = vpop.permute.xlu1 %2566  ;;  %v1962_v37 = vadd.f32 %v1921_v46, %v1711_v14  ;;  %v2275_v6 = vadd.f32 %v2234_v56, %v1960_v51  ;;  %v2236_v58 = vmul.f32 %v11782_v40, %v16675_v1  ;;  %v2624_v41 = vmul.f32 %v11843_v20, %v11568_v2  ;;  %v16679_v46 = vld [vmem:[#allocation70_spill] sm:$0xff] }
 0x183   : > { %v11856_v45 = vpop.permute.xlu0 %2160  ;;  %1370 = vperm.xlu1 %10060, %v1284_v8   ;;  %v1963_v15 = vadd.f32 %v1922_v47, %v1712_v5  ;;  %v2363_v8 = vadd.f32 %v2322_v17, %v2276_v44  ;;  %v2324_v50 = vmul.f32 %v11824_v53, %v16678_v3  ;;  %v2323_v1 = vmul.f32 %v11824_v53, %v16679_v46 }
 0x184   : > { %16676 = vst [vmem:[#allocation37_spill] sm:$0xff] %v11856_v45  ;;  %1188 = vperm.xlu0 %10059, %v1024_v57   ;;  %v2362_v36 = vadd.f32 %v2321_v4, %v2275_v6  ;;  %v16680_v2 = vrot.slane %v11468_v26, 7  ;;  %v16681_v56 = vrot.slane %v10976_v18, 7  ;;  %v2627_v47 = vmul.f32 %v11843_v20, %v11599_v12 }
 0x185   : > { %v2278_v5 = vadd.f32 %v2237_v35, %v1963_v15  ;;  %v2666_v17 = vadd.f32 %v2625_v38, %v2363_v8  ;;  %v2277_v6 = vadd.f32 %v2236_v58, %v1962_v37  ;;  %v2626_v3 = vmul.f32 %v11843_v20, %v11581_v10  ;;  %v16683_v38 = vld [vmem:[#allocation33_spill] sm:$0xff] }
 0x186   : > { %v2878_v55 = vpop.permute.xlu1 %2877  ;;  %v1365_v57 = vsel %vm1288_vm2, %v16681_v56, %v16680_v2  ;;  %v2665_v14 = vadd.f32 %v2624_v41, %v2362_v36  ;;  %v11889_v2 = vld [vmem:[%s16682_s2] ss:$0 sm:$0xff]  ;;  %v1654_v12 = vmul.f32 %v11704_v42, %v16683_v38  ;;  %v16686_v37 = vrot.slane %v11517_v62, 7  ;;  %v16687_v56 = vld [vmem:[#allocation67_spill] sm:$0xff] }
 0x187   : > { %v2874_v44 = vpop.permute.xlu0 %2873  ;;  %v2928_v4 = vmul.f32 %v11868_v32, %v2878_v55  ;;  %1379 = vperm.xlu1 %10060, %v1367_v43   ;;  %v2365_v15 = vadd.f32 %v2324_v50, %v2278_v5  ;;  %v16684_v55 = vld [vmem:[#allocation55_spill] sm:$0xff]  ;;  %v2364_v10 = vadd.f32 %v2323_v1, %v2277_v6  ;;  %v16688_v51 = vrot.slane %v16687_v56, 1 }
 0x188   : > { %v2927_v35 = vmul.f32 %v11868_v32, %v2874_v44  ;;  %1374 = vperm.xlu0 %10059, %v1286_v0   ;;  %v16685_v43 = vrot.slane %v16684_v55, 7  ;;  %v16689_v46 = vrot.slane %v11602_v33, 1  ;;  %v16690_v44 = vld [vmem:[#allocation17_spill] sm:$0xff]  ;;  %v16691_v55 = vld [vmem:[#allocation15_spill] sm:$0xff] }
 0x189   : > { %v2969_v8 = vadd.f32 %v2928_v4, %v2666_v17  ;;  %v16352_v38 = vrot.slane %v16690_v44, 2  ;;  %v2668_v50 = vadd.f32 %v2627_v47, %v2365_v15  ;;  %v16353_v1 = vrot.slane %v16691_v55, 3 }
 0x18a   : > { %v1297_v58 = vsel %vm1288_vm2, %v16686_v37, %v16685_v43  ;;  %v2968_v41 = vadd.f32 %v2927_v35, %v2665_v14  ;;  %v2886_v36 = vpop.permute.xlu1 %2885  ;;  %v1990_v0 = vsel %vm606_vm3, %v16689_v46, %v16688_v51  ;;  %v16692_v14 = vld [vmem:[#allocation43_spill] sm:$0xff]  ;;  %v2667_v35 = vadd.f32 %v2626_v3, %v2364_v10  ;;  %v16693_v51 = vld [vmem:[#allocation44_spill] sm:$0xff] }
 0x18b   : > { %v3017_v5 = vadd.f32 %v11889_v2, %v2969_v8  ;;  %v2882_v17 = vpop.permute.xlu0 %2881  ;;  %v2930_v4 = vmul.f32 %v11868_v32, %v2886_v36  ;;  %1531 = vperm.xlu1 %10060, %v1365_v57   ;;  %v1904_v6 = vmul.f32 %v11767_v7, %v16692_v14  ;;  %v1903_v47 = vmul.f32 %v11767_v7, %v16693_v51  ;;  %v11917_v37 = vld [vmem:[%s10691_s29 + $0x88] sm:$0xff]  ;;  %v16696_v36 = vld [vmem:[#allocation45_spill] sm:$0xff] }
 0x18c   : > { %v3016_v43 = vadd.f32 %v11889_v2, %v2968_v41  ;;  %v2929_v46 = vmul.f32 %v11868_v32, %v2882_v17  ;;  %1395 = vperm.xlu0 %10059, %v1297_v58   ;;  %16695 = vst [vmem:[#allocation53_spill] sm:$0xff] %v11917_v37  ;;  %v16354_v57 = vrot.slane %v11917_v37, 5  ;;  %v1906_v56 = vmul.f32 %v11767_v7, %v16696_v36  ;;  %v16702_v36 = vld [vmem:[#allocation46_spill] sm:$0xff] }
 0x18d   : > { %v11914_v15 = vmax.f32 %v3017_v5, 0.0  ;;  %v2971_v8 = vadd.f32 %v2930_v4, %v2668_v50  ;;  %v1695_v17 = vadd.f32 %v1654_v12, %v11792_v19  ;;  %v1696_v5 = vadd.f32 %v11812_v52, %v11771_v60  ;;  %v16700_v19 = vld [vmem:[#allocation64_spill] sm:$0xff] }
 0x18e   : > { %v11922_v3 = vmax.f32 %v3016_v43, 0.0  ;;  %v2970_v10 = vadd.f32 %v2929_v46, %v2667_v35  ;;  %v11924_v41 = vpop.permute.xlu1 %1064  ;;  %v16699_v14 = vrot.slane %v16691_v55, 2  ;;  %v11940_v46 = vld [vmem:[%s10691_s29 + $0x40] sm:$0xff]  ;;  %v16701_v12 = vrot.slane %v16700_v19, 3 }
 0x18f   : > { %16694 = vst [vmem:[#allocation40_spill] sm:$0xff] %v11914_v15  ;;  %16697 = vst [vmem:[#allocation54_spill] sm:$0xff] %v11924_v41  ;;  %v3019_v50 = vadd.f32 %v11889_v2, %v2971_v8  ;;  %v11931_v4 = vpop.permute.xlu0 %766  ;;  %2084 = vperm.xlu1 %10060, %v1990_v0   ;;  %v16357_v0 = vrot.slane %v11914_v15, 1  ;;  %v1944_v51 = vadd.f32 %v1903_v47, %v11803_v28  ;;  %v16707_v28 = vrot.slane %v11611_v49, 6  ;;  %v16709_v47 = vld [vmem:[#allocation60_spill] sm:$0xff]  ;;  %v16716_v41 = vld [vmem:[#allocation13_spill] sm:$0xff] }
 0x190   : > { %16698 = vst [vmem:[#allocation55_spill] sm:$0xff] %v11931_v4  ;;  %v2396_v35 = vsel %vm942_vm4, %v16352_v38, %v16699_v14  ;;  %v3018_v43 = vadd.f32 %v11889_v2, %v2970_v10  ;;  %1753 = vperm.xlu0 %10059, %v11940_v46   ;;  %v2701_v52 = vsel %vm1281_vm5, %v16353_v1, %v16701_v12  ;;  %v16706_v12 = vrot.slane %v11611_v49, 5  ;;  %v16714_v4 = vld [vmem:[#allocation62_spill] sm:$0xff] }
 0x191   : > { %v1945_v8 = vadd.f32 %v1904_v6, %v11773_v13  ;;  %v1905_v10 = vmul.f32 %v11767_v7, %v16702_v36  ;;  %v11954_v14 = vmax.f32 %v3019_v50, 0.0  ;;  %v1947_v38 = vadd.f32 %v1906_v56, %v1696_v5  ;;  %v16711_v36 = vld [vmem:[#allocation21_spill] sm:$0xff] }
 0x192   : > { %v11956_v58 = vmax.f32 %v3018_v43, 0.0  ;;  %v11958_v19 = vpop.permute.xlu1 %1765  ;;  %v688_v1 = vsel %vm651_vm0, %v16354_v57, %v16706_v12  ;;  %v16708_v13 = vrot.slane %v11917_v37, 6  ;;  %v2219_v50 = vmul.f32 %v11782_v40, %v16709_v47  ;;  %v16712_v12 = vld [vmem:[#allocation61_spill] sm:$0xff] }
 0x193   : > { %16703 = vst [vmem:[#allocation67_spill] sm:$0xff] %v11954_v14  ;;  %16705 = vst [vmem:[#allocation43_spill] sm:$0xff] %v11958_v19  ;;  %v11972_v56 = vpop.permute.xlu0 %1407  ;;  %2797 = vperm.xlu1 %10060, %v2701_v52   ;;  %v2218_v49 = vmul.f32 %v11782_v40, %v16712_v12  ;;  %v1946_v5 = vadd.f32 %v1905_v10, %v1695_v17  ;;  %v2306_v43 = vmul.f32 %v11824_v53, %v16714_v4 }
 0x194   : > { %16704 = vst [vmem:[#allocation15_spill] sm:$0xff] %v11956_v58  ;;  %v986_v6 = vsel %vm949_vm1, %v16708_v13, %v16707_v28  ;;  %16710 = vst [vmem:[#allocation44_spill] sm:$0xff] %v11972_v56  ;;  %2490 = vperm.xlu0 %10059, %v2396_v35   ;;  %v16713_v28 = vrot.slane %v11922_v3, 1  ;;  %v16363_v52 = vrot.slane %v11956_v58, 3  ;;  %v16715_v60 = vrot.slane %v10916_v39, 7 }
 0x195   : > { %v16717_v56 = vrot.slane %v16716_v41, 7  ;;  %v2221_v45 = vmul.f32 %v11782_v40, %v16714_v4  ;;  %v16719_v17 = vrot.slane %v11954_v14, 2  ;;  %v16720_v10 = vrot.slane %v11956_v58, 2 }
 0x196   : > { %v3172_v13 = vsel %vm606_vm3, %v16713_v28, %v16357_v0  ;;  %v16718_v28 = vld [vmem:[#allocation63_spill] sm:$0xff]  ;;  %v11998_v57 = vpop.permute.xlu1 %2502  ;;  %v16721_v41 = vrot.slane %v11954_v14, 3  ;;  %v2260_v4 = vadd.f32 %v2219_v50, %v1945_v8  ;;  %v2609_v19 = vmul.f32 %v11843_v20, %v11699_v59 }
 0x197   : > { %v1327_v35 = vsel %vm1288_vm2, %v16717_v56, %v16715_v60  ;;  %v2305_v0 = vmul.f32 %v11824_v53, %v16718_v28  ;;  %v3338_v39 = vsel %vm942_vm4, %v16720_v10, %v16719_v17  ;;  %v12011_v56 = vld [vmem:[%s10691_s29 + $0x8] sm:$0xff]  ;;  %v12015_v12 = vpop.permute.xlu0 %2096  ;;  %1112 = vperm.xlu1 %10060, %v986_v6   ;;  %v3264_v26 = vmax.f32 %v11922_v3, %v3172_v13  ;;  %v16724_v6 = vld [vmem:[#allocation80_spill] sm:$0xff] }
 0x198   : > { %v3463_v60 = vsel %vm1281_vm5, %v16363_v52, %v16721_v41  ;;  %v2259_v44 = vadd.f32 %v2218_v49, %v1944_v51  ;;  %v2220_v17 = vmul.f32 %v11782_v40, %v16718_v28  ;;  %v2608_v10 = vmul.f32 %v11843_v20, %v11708_v24  ;;  %814 = vperm.xlu0 %10059, %v688_v1  }
 0x199   : > { %v3555_v37 = vmax.f32 %v3338_v39, %v3463_v60  ;;  %v16722_v41 = vrot.slane %v10981_v22, 2  ;;  %v16723_v8 = vrot.slane %v16711_v36, 2  ;;  %v2347_v50 = vadd.f32 %v2306_v43, %v2260_v4  ;;  %v16725_v60 = vld [vmem:[#allocation81_spill] sm:$0xff] }
 0x19a   : > { %v2308_v13 = vmul.f32 %v11824_v53, %v16724_v6  ;;  %v16366_v51 = vrot.slane %v12011_v56, 5  ;;  %v2262_v49 = vadd.f32 %v2221_v45, %v1947_v38  ;;  %v2346_v28 = vadd.f32 %v2305_v0, %v2259_v44  ;;  %v2814_v1 = vpop.permute.xlu1 %2813 }
 0x19b   : > { %v2426_v59 = vsel %vm942_vm4, %v16723_v8, %v16722_v41  ;;  %v3596_v39 = vmax.f32 %v3264_v26, %v3555_v37  ;;  %v2307_v24 = vmul.f32 %v11824_v53, %v16725_v60  ;;  %v16364_v22 = vrot.slane %v11956_v58, 1  ;;  %v2810_v4 = vpop.permute.xlu0 %2809  ;;  %v12037_v26 = vld [vmem:[%s10691_s29 + $0xb8] sm:$0xff] }
 0x19c   : > { %v2650_v52 = vadd.f32 %v2609_v19, %v2347_v50  ;;  %v2611_v41 = vmul.f32 %v11843_v20, %v11734_v54  ;;  %v2912_v43 = vmul.f32 %v11868_v32, %v2814_v1  ;;  %1813 = vperm.xlu1 %10060, %v12037_v26   ;;  %v2261_v45 = vadd.f32 %v2220_v17, %v1946_v5 }
 0x19d   : > { %9111 = vmatprep.subr.mxu0 %v3596_v39  ;;  %v2649_v38 = vadd.f32 %v2608_v10, %v2346_v28  ;;  %v2610_v44 = vmul.f32 %v11843_v20, %v11742_v27  ;;  %v2911_v37 = vmul.f32 %v11868_v32, %v2810_v4  ;;  %1455 = vperm.xlu0 %10059, %v1327_v35   ;;  %v16726_v54 = vrot.slane %v11478_v34, 1  ;;  %v12049_v39 = vld [vmem:[%s10691_s29 + $0xe8] sm:$0xff] }
 0x19e   : > { %v2349_v0 = vadd.f32 %v2308_v13, %v2262_v49  ;;  %v2953_v19 = vadd.f32 %v2912_v43, %v2650_v52  ;;  %v16727_v8 = vrot.slane %v11711_v31, 1  ;;  %v16368_v1 = vrot.slane %v12049_v39, 3  ;;  %v2822_v10 = vpop.permute.xlu1 %2821 }
 0x19f   : > { %v2348_v5 = vadd.f32 %v2307_v24, %v2261_v45  ;;  %v2952_v17 = vadd.f32 %v2911_v37, %v2649_v38  ;;  %v16728_v27 = vrot.slane %v11689_v25, 5  ;;  %v16729_v34 = vrot.slane %v11914_v15, 1  ;;  %v2818_v24 = vpop.permute.xlu0 %2817 }
 0x1a0   : > { %v2020_v50 = vsel %vm606_vm3, %v16727_v8, %v16726_v54  ;;  %v2652_v13 = vadd.f32 %v2611_v41, %v2349_v0  ;;  %v3001_v49 = vadd.f32 %v11889_v2, %v2953_v19  ;;  %v2914_v28 = vmul.f32 %v11868_v32, %v2822_v10  ;;  %2550 = vperm.xlu1 %10060, %v2426_v59   ;;  %v12079_v19 = vld [vmem:[%s10691_s29 + $0x118] sm:$0xff] }
 0x1a1   : > { %v656_v35 = vsel %vm651_vm0, %v16366_v51, %v16728_v27  ;;  %v12062_v52 = vsel %vm606_vm3, %v16729_v34, %v16364_v22  ;;  %v16365_v43 = vrot.slane %v12011_v56, 6  ;;  %v2651_v4 = vadd.f32 %v2610_v44, %v2348_v5  ;;  %2144 = vperm.xlu0 %10059, %v2020_v50   ;;  %v16733_v10 = vld [vmem:[#allocation49_spill] sm:$0xff]  ;;  %v16741_v22 = vld [vmem:[#allocation71_spill] sm:$0xff] }
 0x1a2   : > { %16730 = vst [vmem:[#allocation45_spill] sm:$0xff] %v12062_v52  ;;  %v3000_v45 = vadd.f32 %v11889_v2, %v2952_v17  ;;  %v2913_v38 = vmul.f32 %v11868_v32, %v2818_v24  ;;  %v12071_v54 = vmax.f32 %v3001_v49, 0.0  ;;  %v2955_v41 = vadd.f32 %v2914_v28, %v2652_v13  ;;  %v12084_v50 = vpop.permute.xlu1 %1124 }
 0x1a3   : > { %v16732_v0 = vrot.slane %v10967_v11, 3  ;;  %v16367_v44 = vrot.slane %v12079_v19, 5  ;;  %v1667_v17 = vmul.f32 %v11704_v42, %v11060_v23  ;;  %v1918_v27 = vmul.f32 %v11767_v7, %v16733_v10  ;;  %v12091_v34 = vpop.permute.xlu0 %826  ;;  %v16739_v10 = vld [vmem:[#allocation20_spill] sm:$0xff] }
 0x1a4   : > { %16731 = vst [vmem:[#allocation64_spill] sm:$0xff] %v12071_v54  ;;  %v12082_v8 = vmax.f32 %v3000_v45, 0.0  ;;  %v2954_v5 = vadd.f32 %v2913_v38, %v2651_v4  ;;  %v3003_v11 = vadd.f32 %v11889_v2, %v2955_v41  ;;  %16734 = vst [vmem:[#allocation46_spill] sm:$0xff] %v12091_v34  ;;  %750 = vperm.xlu1 %10060, %v656_v35   ;;  %v1290_v13 = vrot.slane %v12011_v56, 7 }
 0x1a5   : > { %v2731_v59 = vsel %vm1281_vm5, %v16368_v1, %v16732_v0  ;;  %v16735_v28 = vrot.slane %v11689_v25, 6  ;;  %v3139_v4 = vrot.slane %v12071_v54, 1  ;;  %v1708_v45 = vadd.f32 %v1667_v17, %v11805_v63 }
 0x1a6   : > { %v3002_v49 = vadd.f32 %v11889_v2, %v2954_v5  ;;  %2857 = vperm.xlu0 %10059, %v2731_v59   ;;  %v16370_v23 = vrot.slane %v12082_v8, 1  ;;  %v12103_v38 = vmax.f32 %v3003_v11, 0.0  ;;  %v16737_v35 = vrot.slane %v10954_v61, 5  ;;  %v16738_v59 = vld [vmem:[#allocation19_spill] sm:$0xff]  ;;  %v12119_v17 = vpop.permute.xlu1 %1825 }
 0x1a7   : > { %v954_v24 = vsel %vm949_vm1, %v16365_v43, %v16735_v28  ;;  %v1213_v5 = vmul.f32 %v11597_v21, %v16738_v59  ;;  %v16740_v28 = vld [vmem:[#allocation88_spill] sm:$0xff]  ;;  %v2233_v43 = vmul.f32 %v11782_v40, %v16741_v22  ;;  %16743 = vst [vmem:[#allocation62_spill] sm:$0xff] %v12119_v17  ;;  %v1959_v11 = vadd.f32 %v1918_v27, %v1708_v45  ;;  %v12121_v51 = vpop.permute.xlu0 %1467 }
 0x1a8   : > { %16736 = vst [vmem:[#allocation60_spill] sm:$0xff] %v12103_v38  ;;  %v724_v41 = vsel %vm651_vm0, %v16367_v44, %v16737_v35  ;;  %v915_v37 = vmul.f32 %v16740_v28, %v16739_v10  ;;  %v12117_v63 = vmax.f32 %v3002_v49, 0.0  ;;  %16744 = vst [vmem:[#allocation13_spill] sm:$0xff] %v12121_v51  ;;  %1048 = vperm.xlu1 %10060, %v954_v24   ;;  %v16745_v35 = vrot.slane %v11498_v16, 7  ;;  %v16746_v24 = vld [vmem:[#allocation30_spill] sm:$0xff] }
 0x1a9   : > { %v3140_v49 = vsel %vm606_vm3, %v16370_v23, %v3139_v4  ;;  %v1292_v45 = vrot.slane %v11689_v25, 7  ;;  %v1552_v0 = vmul.f32 %v11667_v9, %v16746_v24  ;;  %v16748_v59 = vrot.slane %v12079_v19, 6 }
 0x1aa   : > { %16742 = vst [vmem:[#allocation21_spill] sm:$0xff] %v12117_v63  ;;  %v1291_v44 = vsel %vm1288_vm2, %v16745_v35, %v1290_v13  ;;  %886 = vperm.xlu0 %10059, %v724_v41   ;;  %v16373_v10 = vrot.slane %v12117_v63, 2  ;;  %v16747_v35 = vrot.slane %v10954_v61, 6  ;;  %v2274_v41 = vadd.f32 %v2233_v43, %v1959_v11  ;;  %v12141_v52 = vpop.permute.xlu1 %2562 }
 0x1ab   : > { %v16749_v23 = vrot.slane %v12103_v38, 2  ;;  %v16750_v60 = vrot.slane %v12103_v38, 3  ;;  %v16751_v14 = vrot.slane %v12117_v63, 3  ;;  %v1254_v6 = vadd.f32 %v1213_v5, %v915_v37  ;;  %v12155_v43 = vpop.permute.xlu0 %2156 }
 0x1ac   : > { %v1022_v1 = vsel %vm949_vm1, %v16748_v59, %v16747_v35  ;;  %v2320_v59 = vmul.f32 %v11824_v53, %v16666_v30  ;;  %16752 = vst [vmem:[#allocation63_spill] sm:$0xff] %v12155_v43  ;;  %1383 = vperm.xlu1 %10060, %v1291_v44   ;;  %v3248_v11 = vmax.f32 %v12082_v8, %v3140_v49  ;;  %v12167_v44 = vld [vmem:[%s10691_s29 + $0x120] sm:$0xff] }
 0x1ad   : > { %v3306_v27 = vsel %vm942_vm4, %v16373_v10, %v16749_v23  ;;  %v3431_v61 = vsel %vm1281_vm5, %v16751_v14, %v16750_v60  ;;  %v2623_v23 = vmul.f32 %v11843_v20, %v11847_v48  ;;  %v16753_v10 = vrot.slane %v11517_v62, 7  ;;  %v16754_v60 = vld [vmem:[#allocation75_spill] sm:$0xff]  ;;  %16755 = vst [vmem:[#allocation49_spill] sm:$0xff] %v12167_v44  ;;  %v16757_v48 = vld [vmem:[#allocation22_spill] sm:$0xff] }
 0x1ae   : > { %v3539_v35 = vmax.f32 %v3306_v27, %v3431_v61  ;;  %1184 = vperm.xlu0 %10059, %v1022_v1   ;;  %v16381_v14 = vrot.slane %v11471_v29, 7  ;;  %v1622_v37 = vrot.slane %v16754_v60, 7  ;;  %v1593_v5 = vadd.f32 %v1552_v0, %v1254_v6  ;;  %v12170_v61 = vpop.permute.xlu1 %762  ;;  %v16758_v1 = vld [vmem:[#allocation58_spill] sm:$0xff] }
 0x1af   : > { %v1295_v38 = vsel %vm1288_vm2, %v1292_v45, %v16753_v10  ;;  %v1293_v51 = vsel %vm1288_vm2, %v1290_v13, %v1292_v45  ;;  %v16377_v49 = vrot.slane %v12167_v44, 7  ;;  %v2361_v27 = vadd.f32 %v2320_v59, %v2274_v41  ;;  %16756 = vst [vmem:[#allocation19_spill] sm:$0xff] %v12170_v61  ;;  %v2870_v60 = vpop.permute.xlu0 %2869 }
 0x1b0   : > { %v3580_v30 = vmax.f32 %v3248_v11, %v3539_v35  ;;  %v1651_v62 = vmul.f32 %v11704_v42, %v16757_v48  ;;  %v1902_v10 = vmul.f32 %v11767_v7, %v16758_v1  ;;  %1391 = vperm.xlu1 %10060, %v1295_v38   ;;  %v16378_v6 = vrot.slane %v12117_v63, 1  ;;  %v16759_v11 = vld [vmem:[#allocation78_spill] sm:$0xff] }
 0x1b1   : > { %v2664_v13 = vadd.f32 %v2623_v23, %v2361_v27  ;;  %v2926_v0 = vmul.f32 %v11868_v32, %v2870_v60  ;;  %v1623_v45 = vsel %vm1288_vm2, %v16381_v14, %v1622_v37  ;;  %v16379_v41 = vrot.slane %v11940_v46, 1  ;;  %v12197_v27 = vld [vmem:[%s10691_s29 + $0x68] sm:$0xff]  ;;  %v16764_v60 = vld [vmem:[#allocation24_spill] sm:$0xff] }
 0x1b2   : > { %9112 = vmatpush3.msra.mxu0 %v3580_v30  ;;  %1387 = vperm.xlu0 %10059, %v1293_v51   ;;  %v1692_v59 = vadd.f32 %v1651_v62, %v1593_v5  ;;  %v2217_v35 = vmul.f32 %v11782_v40, %v16759_v11  ;;  %v16760_v30 = vrot.slane %v10976_v18, 7  ;;  %v12192_v51 = vsel %vm606_vm3, %v3139_v4, %v16378_v6  ;;  %v12194_v37 = vpop.permute.xlu1 %1403 }
 0x1b3   : > { %16761 = vst [vmem:[#allocation20_spill] sm:$0xff] %v12192_v51  ;;  %v2967_v23 = vadd.f32 %v2926_v0, %v2664_v13  ;;  %16762 = vst [vmem:[#allocation88_spill] sm:$0xff] %v12194_v37  ;;  %v16380_v5 = vrot.slane %v12197_v27, 3  ;;  %v12202_v1 = vpop.permute.xlu0 %1060  ;;  %v16766_v0 = vrot.slane %v11602_v33, 1  ;;  %v16386_v48 = vrot.slane %v11914_v15, 3 }
 0x1b4   : > { %v1363_v38 = vsel %vm1288_vm2, %v16377_v49, %v16760_v30  ;;  %v1943_v62 = vadd.f32 %v1902_v10, %v1692_v59  ;;  %16763 = vst [vmem:[#allocation71_spill] sm:$0xff] %v12202_v1  ;;  %1630 = vperm.xlu1 %10060, %v1623_v45   ;;  %v1228_v30 = vmul.f32 %v11597_v21, %v16764_v60  ;;  %v16765_v49 = vld [vmem:[#allocation25_spill] sm:$0xff]  ;;  %v16382_v60 = vrot.slane %v11914_v15, 2  ;;  %v16772_v45 = vld [vmem:[#allocation36_spill] sm:$0xff] }
 0x1b5   : > { %v930_v4 = vmul.f32 %v16740_v28, %v16765_v49  ;;  %v3015_v13 = vadd.f32 %v11889_v2, %v2967_v23  ;;  %v1988_v6 = vsel %vm606_vm3, %v16379_v41, %v16766_v0  ;;  %v12215_v59 = vld [vmem:[%s10691_s29 + $0x60] sm:$0xff]  ;;  %v2304_v49 = vmul.f32 %v11824_v53, %v16709_v47 }
 0x1b6   : > { %1527 = vperm.xlu0 %10059, %v1363_v38   ;;  %v2258_v10 = vadd.f32 %v2217_v35, %v1943_v62  ;;  %v12224_v33 = vpop.permute.xlu1 %2092  ;;  %v16768_v23 = vrot.slane %v16691_v55, 3  ;;  %v2607_v62 = vmul.f32 %v11843_v20, %v11998_v57  ;;  %v16770_v41 = vrot.slane %v11956_v58, 2 }
 0x1b7   : > { %v12222_v38 = vmax.f32 %v3015_v13, 0.0  ;;  %16767 = vst [vmem:[#allocation30_spill] sm:$0xff] %v12224_v33  ;;  %v12233_v0 = vpop.permute.xlu0 %1761  ;;  %v16771_v13 = vrot.slane %v11956_v58, 3  ;;  %v1567_v51 = vmul.f32 %v11667_v9, %v16772_v45  ;;  %v16776_v57 = vrot.slane %v11922_v3, 1 }
 0x1b8   : > { %v2699_v35 = vsel %vm1281_vm5, %v16380_v5, %v16768_v23  ;;  %16769 = vst [vmem:[#allocation75_spill] sm:$0xff] %v12233_v0  ;;  %2080 = vperm.xlu1 %10060, %v1988_v6   ;;  %v3336_v47 = vsel %vm942_vm4, %v16382_v60, %v16770_v41  ;;  %v12247_v5 = vld [vmem:[%s10691_s29 + $0x38] sm:$0xff]  ;;  %v1269_v60 = vadd.f32 %v1228_v30, %v930_v4  ;;  %v16775_v23 = vrot.slane %v12215_v59, 2 }
 0x1b9   : > { %v3461_v55 = vsel %vm1281_vm5, %v16386_v48, %v16771_v13  ;;  %v16388_v41 = vrot.slane %v12222_v38, 3  ;;  %v2345_v58 = vadd.f32 %v2304_v49, %v2258_v10  ;;  %v16773_v13 = vld [vmem:[#allocation17_spill] sm:$0xff]  ;;  %v16777_v6 = vrot.slane %v12222_v38, 1 }
 0x1ba   : > { %1749 = vperm.xlu0 %10059, %v12247_v5   ;;  %v16774_v48 = vrot.slane %v16773_v13, 2  ;;  %v2806_v0 = vpop.permute.xlu1 %2805  ;;  %v3554_v1 = vmax.f32 %v3336_v47, %v3461_v55  ;;  %v16778_v30 = vrot.slane %v11922_v3, 2  ;;  %v16779_v4 = vrot.slane %v12222_v38, 2  ;;  %v16788_v55 = vld [vmem:[#allocation18_spill] sm:$0xff] }
 0x1bb   : > { %v3170_v14 = vsel %vm606_vm3, %v16777_v6, %v16776_v57  ;;  %v16780_v49 = vrot.slane %v11922_v3, 3  ;;  %v12280_v13 = vpop.permute.xlu0 %2498  ;;  %v2910_v57 = vmul.f32 %v11868_v32, %v2806_v0  ;;  %v16781_v6 = vld [vmem:[#allocation53_spill] sm:$0xff]  ;;  %v1666_v18 = vmul.f32 %v11704_v42, %v16788_v55 }
 0x1bc   : > { %v2394_v37 = vsel %vm942_vm4, %v16775_v23, %v16774_v48  ;;  %v12271_v10 = vsel %vm942_vm4, %v16779_v4, %v16778_v30  ;;  %v2648_v23 = vadd.f32 %v2607_v62, %v2345_v58  ;;  %2793 = vperm.xlu1 %10060, %v2699_v35   ;;  %v3263_v47 = vmax.f32 %v12222_v38, %v3170_v14  ;;  %v16783_v4 = vld [vmem:[#allocation11_spill] sm:$0xff] }
 0x1bd   : > { %v12278_v48 = vsel %vm1281_vm5, %v16388_v41, %v16780_v49  ;;  %v16782_v30 = vrot.slane %v16781_v6, 6  ;;  %v16784_v61 = vrot.slane %v16783_v4, 6  ;;  %v16391_v58 = vrot.slane %v12037_v26, 1 }
 0x1be   : > { %2486 = vperm.xlu0 %10059, %v2394_v37   ;;  %v1608_v62 = vadd.f32 %v1567_v51, %v1269_v60  ;;  %v2951_v41 = vadd.f32 %v2910_v57, %v2648_v23  ;;  %v3595_v17 = vmax.f32 %v3263_v47, %v3554_v1  ;;  %v16785_v35 = vrot.slane %v16781_v6, 5  ;;  %v12297_v37 = vpop.permute.xlu1 %1120  ;;  %v16790_v51 = vld [vmem:[#allocation68_spill] sm:$0xff]  ;;  %v12312_v57 = vld [vmem:[%s10691_s29 + $0xe0] sm:$0xff] }
 0x1bf   : > { %v984_v49 = vsel %vm949_vm1, %v16784_v61, %v16782_v30  ;;  %v16786_v14 = vrot.slane %v16783_v4, 5  ;;  %16787 = vst [vmem:[#allocation22_spill] sm:$0xff] %v12297_v37  ;;  %v12302_v61 = vpop.permute.xlu0 %822  ;;  %v1917_v1 = vmul.f32 %v11767_v7, %v16790_v51  ;;  %v16791_v60 = vrot.slane %v11711_v31, 1  ;;  %v12319_v6 = vld [vmem:[%s10691_s29 + $0xd8] sm:$0xff]  ;;  %v16792_v4 = vld [vmem:[#allocation86_spill] sm:$0xff]  ;;  %v12354_v51 = vld [vmem:[%s10691_s29 + $0x110] sm:$0xff] }
 0x1c0   : > { %v2999_v34 = vadd.f32 %v11889_v2, %v2951_v41  ;;  %9113 = vmatprep.subr.mxu0 %v3595_v17  ;;  %16789 = vst [vmem:[#allocation58_spill] sm:$0xff] %v12302_v61  ;;  %1108 = vperm.xlu1 %10060, %v984_v49   ;;  %v16392_v41 = vrot.slane %v12071_v54, 2  ;;  %v1707_v17 = vadd.f32 %v1666_v18, %v1608_v62  ;;  %v16395_v31 = vrot.slane %v12071_v54, 3  ;;  %v16807_v37 = vld [vmem:[#allocation52_spill] sm:$0xff] }
 0x1c1   : > { %v686_v0 = vsel %vm651_vm0, %v16786_v14, %v16785_v35  ;;  %v2018_v23 = vsel %vm606_vm3, %v16391_v58, %v16791_v60  ;;  %v2232_v49 = vmul.f32 %v11782_v40, %v16792_v4  ;;  %v16794_v14 = vrot.slane %v12117_v63, 2 }
 0x1c2   : > { %810 = vperm.xlu0 %10059, %v686_v0   ;;  %v12316_v55 = vmax.f32 %v2999_v34, 0.0  ;;  %v12325_v35 = vpop.permute.xlu1 %1821  ;;  %v16796_v60 = vrot.slane %v12117_v63, 3  ;;  %v16797_v62 = vrot.slane %v12049_v39, 3  ;;  %v16803_v30 = vrot.slane %v12082_v8, 2 }
 0x1c3   : > { %16793 = vst [vmem:[#allocation78_spill] sm:$0xff] %v12325_v35  ;;  %v3304_v18 = vsel %vm942_vm4, %v16392_v41, %v16794_v14  ;;  %v12334_v0 = vpop.permute.xlu0 %1463  ;;  %v1958_v14 = vadd.f32 %v1917_v1, %v1707_v17  ;;  %v12345_v41 = vld [vmem:[%s10691_s29 + $0xb0] sm:$0xff]  ;;  %v16801_v17 = vrot.slane %v12082_v8, 1  ;;  %v16805_v63 = vrot.slane %v12082_v8, 3 }
 0x1c4   : > { %16795 = vst [vmem:[#allocation24_spill] sm:$0xff] %v12334_v0  ;;  %2140 = vperm.xlu1 %10060, %v2018_v23   ;;  %v3429_v58 = vsel %vm1281_vm5, %v16395_v31, %v16796_v60  ;;  %v16798_v23 = vrot.slane %v12312_v57, 3  ;;  %v16799_v60 = vrot.slane %v16711_v36, 2  ;;  %v16800_v31 = vrot.slane %v12319_v6, 2 }
 0x1c5   : > { %v16802_v47 = vrot.slane %v12316_v55, 1  ;;  %v16806_v36 = vrot.slane %v12316_v55, 3  ;;  %v2622_v0 = vmul.f32 %v11843_v20, %v12141_v52 }
 0x1c6   : > { %1809 = vperm.xlu0 %10059, %v12345_v41   ;;  %v2729_v34 = vsel %vm1281_vm5, %v16798_v23, %v16797_v62  ;;  %v2424_v1 = vsel %vm942_vm4, %v16800_v31, %v16799_v60  ;;  %v16804_v62 = vrot.slane %v12316_v55, 2  ;;  %v2273_v31 = vadd.f32 %v2232_v49, %v1958_v14  ;;  %v12381_v60 = vpop.permute.xlu1 %2558 }
 0x1c7   : > { %v3138_v39 = vsel %vm606_vm3, %v16802_v47, %v16801_v17  ;;  %v12379_v35 = vsel %vm1281_vm5, %v16806_v36, %v16805_v63  ;;  %v3538_v47 = vmax.f32 %v3304_v18, %v3429_v58  ;;  %v16809_v49 = vrot.slane %v12079_v19, 5 }
 0x1c8   : > { %v12372_v23 = vsel %vm942_vm4, %v16804_v62, %v16803_v30  ;;  %v3247_v61 = vmax.f32 %v12316_v55, %v3138_v39  ;;  %v2319_v30 = vmul.f32 %v11824_v53, %v16807_v37  ;;  %v12388_v62 = vpop.permute.xlu0 %2152  ;;  %2853 = vperm.xlu1 %10060, %v2729_v34   ;;  %v16810_v14 = vrot.slane %v12354_v51, 5 }
 0x1c9   : > { %16808 = vst [vmem:[#allocation25_spill] sm:$0xff] %v12388_v62  ;;  %v16398_v18 = vrot.slane %v12354_v51, 6  ;;  %v16811_v39 = vrot.slane %v12011_v56, 5  ;;  %v16812_v37 = vrot.slane %v11498_v16, 5 }
 0x1ca   : > { %2546 = vperm.xlu0 %10059, %v2424_v1   ;;  %v3579_v63 = vmax.f32 %v3247_v61, %v3538_v47  ;;  %v722_v58 = vsel %vm651_vm0, %v16810_v14, %v16809_v49  ;;  %v2360_v34 = vadd.f32 %v2319_v30, %v2273_v31  ;;  %v12403_v17 = vpop.permute.xlu1 %733  ;;  %v16814_v47 = vrot.slane %v12079_v19, 6 }
 0x1cb   : > { %v654_v36 = vsel %vm651_vm0, %v16812_v37, %v16811_v39  ;;  %16813 = vst [vmem:[#allocation36_spill] sm:$0xff] %v12403_v17  ;;  %v16815_v14 = vrot.slane %v12011_v56, 6  ;;  %v16816_v39 = vrot.slane %v11498_v16, 6  ;;  %v16397_v30 = vrot.slane %v12079_v19, 7 }
 0x1cc   : > { %9114 = vmatpush3.msra.mxu0 %v3579_v63  ;;  %v2866_v52 = vpop.permute.xlu0 %2865  ;;  %882 = vperm.xlu1 %10060, %v722_v58   ;;  %v2663_v61 = vadd.f32 %v2622_v0, %v2360_v34  ;;  %v1020_v49 = vsel %vm949_vm1, %v16398_v18, %v16814_v47  ;;  %v16820_v34 = vld [vmem:[#allocation72_spill] sm:$0xff]  ;;  %v16822_v16 = vrot.slane %v12167_v44, 7  ;;  %v10393_v44 = vld [vmem:[%s10691_s29 + $0xa8] sm:$0xff] }
 0x1cd   : > { %v2925_v1 = vmul.f32 %v11868_v32, %v2866_v52  ;;  %v952_v31 = vsel %vm949_vm1, %v16816_v39, %v16815_v14  ;;  %v16821_v52 = vrot.slane %v16820_v34, 7 }
 0x1ce   : > { %746 = vperm.xlu0 %10059, %v654_v36   ;;  %v12417_v58 = vpop.permute.xlu1 %742  ;;  %v16819_v36 = vrot.slane %v11471_v29, 7  ;;  %v16826_v29 = vrot.slane %v11914_v15, 2 }
 0x1cf   : > { %v2966_v63 = vadd.f32 %v2925_v1, %v2663_v61  ;;  %16817 = vst [vmem:[#allocation17_spill] sm:$0xff] %v12417_v58  ;;  %v1361_v61 = vsel %vm1288_vm2, %v16397_v30, %v16822_v16  ;;  %v16829_v16 = vrot.slane %v11922_v3, 3 }
 0x1d0   : > { %v12419_v0 = vpop.permute.xlu0 %737  ;;  %1180 = vperm.xlu1 %10060, %v1020_v49   ;;  %v1621_v47 = vsel %vm1288_vm2, %v16821_v52, %v16819_v36  ;;  %v16824_v49 = vld [vmem:[#allocation31_spill] sm:$0xff] }
 0x1d1   : > { %16818 = vst [vmem:[#allocation53_spill] sm:$0xff] %v12419_v0  ;;  %v3014_v37 = vadd.f32 %v11889_v2, %v2966_v63  ;;  %v1212_v39 = vmul.f32 %v11597_v21, %v16824_v49  ;;  %v16827_v63 = vrot.slane %v11922_v3, 2  ;;  %v16830_v49 = vld [vmem:[#allocation28_spill] sm:$0xff] }
 0x1d2   : > { %1044 = vperm.xlu0 %10059, %v952_v31   ;;  %v12434_v14 = vpop.permute.xlu1 %894  ;;  %v914_v18 = vmul.f32 %v16740_v28, %v16830_v49  ;;  %v16835_v28 = vrot.slane %v12222_v38, 3 }
 0x1d3   : > { %v12432_v1 = vmax.f32 %v3014_v37, 0.0  ;;  %16823 = vst [vmem:[#allocation11_spill] sm:$0xff] %v12434_v14  ;;  %v3334_v36 = vsel %vm942_vm4, %v16827_v63, %v16826_v29  ;;  %v16828_v37 = vrot.slane %v11914_v15, 3  ;;  %v16833_v63 = vrot.slane %v12222_v38, 1  ;;  %v16839_v14 = vld [vmem:[#allocation79_spill] sm:$0xff] }
 0x1d4   : > { %v12438_v31 = vpop.permute.xlu0 %758  ;;  %1626 = vperm.xlu1 %10060, %v1621_v47   ;;  %v1253_v15 = vadd.f32 %v1212_v39, %v914_v18 }
 0x1d5   : > { %16825 = vst [vmem:[#allocation18_spill] sm:$0xff] %v12438_v31  ;;  %v16401_v52 = vrot.slane %v12432_v1, 1  ;;  %v3459_v30 = vsel %vm1281_vm5, %v16829_v16, %v16828_v37  ;;  %v16402_v21 = vrot.slane %v12432_v1, 2  ;;  %v16403_v47 = vrot.slane %v12432_v1, 3  ;;  %v16831_v31 = vld [vmem:[#allocation41_spill] sm:$0xff] }
 0x1d6   : > { %1523 = vperm.xlu0 %10059, %v1361_v61   ;;  %v1551_v29 = vmul.f32 %v11667_v9, %v16831_v31  ;;  %v12457_v61 = vpop.permute.xlu1 %1035  ;;  %v16834_v37 = vrot.slane %v12222_v38, 2  ;;  %v16406_v38 = vrot.slane %v12247_v5, 1 }
 0x1d7   : > { %16832 = vst [vmem:[#allocation68_spill] sm:$0xff] %v12457_v61  ;;  %v3168_v3 = vsel %vm606_vm3, %v16401_v52, %v16833_v63  ;;  %v12476_v49 = vsel %vm1281_vm5, %v16403_v47, %v16835_v28  ;;  %v3553_v52 = vmax.f32 %v3334_v36, %v3459_v30  ;;  %v16838_v47 = vld [vmem:[#allocation23_spill] sm:$0xff]  ;;  %v1901_v30 = vmul.f32 %v11767_v7, %v16839_v14 }
 0x1d8   : > { %v12469_v16 = vsel %vm942_vm4, %v16402_v21, %v16834_v37  ;;  %v12478_v17 = vpop.permute.xlu0 %1031  ;;  %1725 = vperm.xlu1 %10060, %v12011_v56   ;;  %v3262_v63 = vmax.f32 %v12432_v1, %v3168_v3  ;;  %v12485_v21 = vld [vmem:[%s10691_s29] sm:$0xff]  ;;  %v1592_v28 = vadd.f32 %v1551_v29, %v1253_v15  ;;  %v12498_v3 = vld [vmem:[%s10691_s29 + $0x30] sm:$0xff]  ;;  %v16841_v15 = vrot.slane %v11940_v46, 1 }
 0x1d9   : > { %16836 = vst [vmem:[#allocation86_spill] sm:$0xff] %v12478_v17  ;;  %v1650_v17 = vmul.f32 %v11704_v42, %v16838_v47  ;;  %v16408_v47 = vrot.slane %v12215_v59, 3  ;;  %v16842_v14 = vld [vmem:[#allocation91_spill] sm:$0xff]  ;;  %v10389_v46 = vld [vmem:[%s10691_s29 + $0x140] sm:$0xf] }
 0x1da   : > { %1721 = vperm.xlu0 %10059, %v12485_v21   ;;  %v3594_v18 = vmax.f32 %v3262_v63, %v3553_v52  ;;  %v12489_v39 = vpop.permute.xlu1 %1056  ;;  %v1986_v52 = vsel %vm606_vm3, %v16406_v38, %v16841_v15  ;;  %v2216_v63 = vmul.f32 %v11782_v40, %v16842_v14  ;;  %v16845_v15 = vrot.slane %v12197_v27, 3  ;;  %v12535_v27 = vld [vmem:[%s16639_s22] ss:$0 sm:$0xff]  ;;  %v12561_v61 = vld [vmem:[%s10691_s29 + $0xd0] sm:$0xff] }
 0x1db   : > { %16837 = vst [vmem:[#allocation52_spill] sm:$0xff] %v12489_v39  ;;  %v1691_v29 = vadd.f32 %v1650_v17, %v1592_v28 }
 0x1dc   : > { %9115 = vmatprep.subr.mxu0 %v3594_v18  ;;  %v12495_v36 = vpop.permute.xlu0 %1040  ;;  %1745 = vperm.xlu1 %10060, %v12498_v3   ;;  %v12511_v18 = vld [vmem:[%s10691_s29 + $0x58] sm:$0xff]  ;;  %v2697_v17 = vsel %vm1281_vm5, %v16408_v47, %v16845_v15 }
 0x1dd   : > { %16840 = vst [vmem:[#allocation31_spill] sm:$0xff] %v12495_v36  ;;  %v16409_v37 = vrot.slane %v12511_v18, 2  ;;  %v1942_v58 = vadd.f32 %v1901_v30, %v1691_v29  ;;  %v16846_v36 = vrot.slane %v12215_v59, 2  ;;  %v16850_v47 = vld [vmem:[#allocation61_spill] sm:$0xff] }
 0x1de   : > { %1729 = vperm.xlu0 %10059, %v11689_v25   ;;  %v12514_v39 = vpop.permute.xlu1 %1399 }
 0x1df   : > { %16843 = vst [vmem:[#allocation28_spill] sm:$0xff] %v12514_v39  ;;  %v2257_v38 = vadd.f32 %v2216_v63, %v1942_v58  ;;  %v2392_v30 = vsel %vm942_vm4, %v16409_v37, %v16846_v36  ;;  %v12542_v58 = vld [vmem:[%s16639_s22 + $0x1] ss:$0 sm:$0xff]  ;;  %v16849_v63 = vld [vmem:[#allocation34_spill] sm:$0xff]  ;;  %v2303_v36 = vmul.f32 %v11824_v53, %v16850_v47  ;;  %v2606_v37 = vmul.f32 %v11843_v20, %v12280_v13 }
 0x1e0   : > { %v12516_v25 = vpop.permute.xlu0 %1192  ;;  %2076 = vperm.xlu1 %10060, %v1986_v52   ;;  %v16848_v52 = vld [vmem:[#allocation35_spill] sm:$0xff]  ;;  %v1227_v15 = vmul.f32 %v12542_v58, %v16849_v63  ;;  %v16416_v63 = vrot.slane %v12319_v6, 3  ;;  %v16854_v39 = vld [vmem:[#allocation50_spill] sm:$0xff]  ;;  %v16419_v13 = vrot.slane %v12561_v61, 2 }
 0x1e1   : > { %16844 = vst [vmem:[#allocation41_spill] sm:$0xff] %v12516_v25  ;;  %v1566_v47 = vmul.f32 %v11667_v9, %v16854_v39  ;;  %v2344_v0 = vadd.f32 %v2303_v36, %v2257_v38  ;;  %v12574_v38 = vld [vmem:[%s10691_s29 + $0x108] sm:$0xff] }
 0x1e2   : > { %1881 = vperm.xlu0 %10059, %v10389_v46   ;;  %v12530_v29 = vpop.permute.xlu1 %2088  ;;  %v929_v46 = vmul.f32 %v12535_v27, %v16848_v52  ;;  %v16852_v52 = vrot.slane %v12037_v26, 1  ;;  %v16417_v36 = vrot.slane %v12574_v38, 6 }
 0x1e3   : > { %16847 = vst [vmem:[#allocation23_spill] sm:$0xff] %v12530_v29  ;;  %v16853_v29 = vrot.slane %v12345_v41, 1 }
 0x1e4   : > { %v12550_v28 = vpop.permute.xlu0 %1757  ;;  %2789 = vperm.xlu1 %10060, %v2697_v17   ;;  %v1268_v17 = vadd.f32 %v1227_v15, %v929_v46 }
 0x1e5   : > { %16851 = vst [vmem:[#allocation79_spill] sm:$0xff] %v12550_v28  ;;  %v2016_v25 = vsel %vm606_vm3, %v16853_v29, %v16852_v52  ;;  %v16855_v29 = vrot.slane %v12312_v57, 3  ;;  %v16858_v57 = vld [vmem:[#allocation27_spill] sm:$0xff] }
 0x1e6   : > { %2482 = vperm.xlu0 %10059, %v2392_v30   ;;  %v2802_v28 = vpop.permute.xlu1 %2801  ;;  %v2647_v30 = vadd.f32 %v2606_v37, %v2344_v0  ;;  %v1607_v52 = vadd.f32 %v1566_v47, %v1268_v17  ;;  %v16856_v0 = vrot.slane %v12319_v6, 2  ;;  %v16860_v47 = vld [vmem:[#allocation84_spill] sm:$0xff] }
 0x1e7   : > { %v2909_v26 = vmul.f32 %v11868_v32, %v2802_v28  ;;  %v2727_v9 = vsel %vm1281_vm5, %v16416_v63, %v16855_v29  ;;  %v1665_v28 = vmul.f32 %v11704_v42, %v16858_v57  ;;  %v1916_v17 = vmul.f32 %v11767_v7, %v16860_v47 }
 0x1e8   : > { %v12564_v62 = vpop.permute.xlu0 %2494  ;;  %2136 = vperm.xlu1 %10060, %v2016_v25   ;;  %v2422_v37 = vsel %vm942_vm4, %v16419_v13, %v16856_v0  ;;  %v16862_v42 = vrot.slane %v12354_v51, 5  ;;  %v16866_v47 = vrot.slane %v12082_v8, 2 }
 0x1e9   : > { %v2950_v46 = vadd.f32 %v2909_v26, %v2647_v30  ;;  %v16861_v30 = vrot.slane %v12354_v51, 6  ;;  %v1706_v0 = vadd.f32 %v1665_v28, %v1607_v52  ;;  %v1970_v52 = vrot.slane %v12485_v21, 1  ;;  %v16871_v21 = vld [vmem:[#allocation12_spill] sm:$0xff] }
 0x1ea   : > { %1805 = vperm.xlu0 %10059, %v10393_v44   ;;  %v16418_v44 = vrot.slane %v12574_v38, 5  ;;  %v12583_v25 = vpop.permute.xlu1 %1116  ;;  %v1971_v28 = vrot.slane %v12011_v56, 1  ;;  %v16870_v56 = vrot.slane %v12079_v19, 7  ;;  %v16872_v13 = vrot.slane %v16871_v21, 7 }
 0x1eb   : > { %16857 = vst [vmem:[#allocation91_spill] sm:$0xff] %v12583_v25  ;;  %v2998_v15 = vadd.f32 %v11889_v2, %v2950_v46  ;;  %v1018_v26 = vsel %vm949_vm1, %v16417_v36, %v16861_v30  ;;  %v16876_v19 = vrot.slane %v12316_v55, 3 }
 0x1ec   : > { %v12588_v29 = vpop.permute.xlu0 %818  ;;  %2849 = vperm.xlu1 %10060, %v2727_v9   ;;  %v720_v46 = vsel %vm651_vm0, %v16418_v44, %v16862_v42  ;;  %v16863_v9 = vld [vmem:[#allocation37_spill] sm:$0xff]  ;;  %v16868_v42 = vrot.slane %v12071_v54, 3 }
 0x1ed   : > { %16859 = vst [vmem:[#allocation35_spill] sm:$0xff] %v12588_v29  ;;  %v12597_v63 = vmax.f32 %v2998_v15, 0.0  ;;  %v2231_v57 = vmul.f32 %v11782_v40, %v16863_v9  ;;  %v16869_v40 = vrot.slane %v12082_v8, 3  ;;  %v16873_v15 = vrot.slane %v12316_v55, 1 }
 0x1ee   : > { %2542 = vperm.xlu0 %10059, %v2422_v37   ;;  %v12606_v7 = vpop.permute.xlu1 %1817  ;;  %v16865_v37 = vrot.slane %v12071_v54, 2 }
 0x1ef   : > { %16864 = vst [vmem:[#allocation34_spill] sm:$0xff] %v12606_v7  ;;  %v3427_v36 = vsel %vm1281_vm5, %v16869_v40, %v16868_v42  ;;  %v16422_v44 = vrot.slane %v12597_v63, 2  ;;  %v16874_v54 = vrot.slane %v12597_v63, 1  ;;  %v16875_v42 = vrot.slane %v12316_v55, 2  ;;  %v12659_v55 = vld [vmem:[%s10691_s29 + $0x28] sm:$0xff] }
 0x1f0   : > { %v3302_v30 = vsel %vm942_vm4, %v16866_v47, %v16865_v37  ;;  %v12615_v51 = vpop.permute.xlu0 %1459  ;;  %1176 = vperm.xlu1 %10060, %v1018_v26   ;;  %v16421_v37 = vrot.slane %v12597_v63, 3  ;;  %v1957_v47 = vadd.f32 %v1916_v17, %v1706_v0  ;;  %v1359_v26 = vsel %vm1288_vm2, %v16872_v13, %v16870_v56 }
 0x1f1   : > { %16867 = vst [vmem:[#allocation61_spill] sm:$0xff] %v12615_v51  ;;  %v3136_v8 = vsel %vm606_vm3, %v16874_v54, %v16873_v15  ;;  %v12640_v17 = vsel %vm942_vm4, %v16422_v44, %v16875_v42  ;;  %v3537_v15 = vmax.f32 %v3302_v30, %v3427_v36  ;;  %v2318_v56 = vmul.f32 %v11824_v53, %v16741_v22  ;;  %v12666_v30 = vld [vmem:[%s10691_s29 + $0x10] sm:$0xff]  ;;  %v12670_v53 = vld [vmem:[%s10691_s29 + $0x18] sm:$0xff] }
 0x1f2   : > { %878 = vperm.xlu0 %10059, %v720_v46   ;;  %v12647_v13 = vsel %vm1281_vm5, %v16421_v37, %v16876_v19  ;;  %v2272_v0 = vadd.f32 %v2231_v57, %v1957_v47  ;;  %v12649_v46 = vpop.permute.xlu1 %2554  ;;  %v3246_v54 = vmax.f32 %v12597_v63, %v3136_v8  ;;  %v1972_v57 = vsel %vm606_vm3, %v1970_v52, %v1971_v28  ;;  %v16879_v37 = vld [vmem:[#allocation42_spill] sm:$0xff] }
 0x1f3   : > { %v2621_v47 = vmul.f32 %v11843_v20, %v12381_v60  ;;  %v1973_v8 = vrot.slane %v12666_v30, 1  ;;  %v16423_v22 = vrot.slane %v12670_v53, 1  ;;  %v10398_v60 = vld [vmem:[%s10691_s29 + $0x138] sm:$0xff]  ;;  %v16426_v7 = vrot.slane %v12511_v18, 3 }
 0x1f4   : > { %v12656_v21 = vpop.permute.xlu0 %2148  ;;  %1741 = vperm.xlu1 %10060, %v12659_v55   ;;  %v3578_v36 = vmax.f32 %v3246_v54, %v3537_v15  ;;  %v2359_v42 = vadd.f32 %v2318_v56, %v2272_v0  ;;  %v12681_v54 = vld [vmem:[%s10691_s29 + $0x50] sm:$0xff]  ;;  %v1211_v0 = vmul.f32 %v12542_v58, %v16879_v37 }
 0x1f5   : > { %16877 = vst [vmem:[#allocation50_spill] sm:$0xff] %v12656_v21  ;;  %v16424_v15 = vrot.slane %v12681_v54, 2  ;;  %v1974_v56 = vsel %vm606_vm3, %v1971_v28, %v1973_v8 }
 0x1f6   : > { %1519 = vperm.xlu0 %10059, %v1359_v26   ;;  %9116 = vmatpush3.msra.mxu0 %v3578_v36  ;;  %v12673_v19 = vpop.permute.xlu1 %754  ;;  %v2662_v52 = vadd.f32 %v2621_v47, %v2359_v42  ;;  %v1976_v26 = vsel %vm606_vm3, %v1973_v8, %v16423_v22  ;;  %v12695_v42 = vld [vmem:[%s16639_s22 + $0x2] ss:$0 sm:$0xff]  ;;  %v16884_v8 = vrot.slane %v12511_v18, 2 }
 0x1f7   : > { %16878 = vst [vmem:[#allocation27_spill] sm:$0xff] %v12673_v19 }
 0x1f8   : > { %v2862_v40 = vpop.permute.xlu0 %2861  ;;  %2048 = vperm.xlu1 %10060, %v1972_v57   ;;  %v16425_v57 = vrot.slane %v12498_v3, 1 }
 0x1f9   : > { %v2924_v20 = vmul.f32 %v11868_v32, %v2862_v40  ;;  %v16881_v32 = vld [vmem:[#allocation39_spill] sm:$0xff] }
 0x1fa   : > { %1877 = vperm.xlu0 %10059, %v10398_v60   ;;  %v12688_v36 = vpop.permute.xlu1 %1052  ;;  %v913_v40 = vmul.f32 %v12535_v27, %v16881_v32  ;;  %v16882_v60 = vld [vmem:[#allocation59_spill] sm:$0xff]  ;;  %v16885_v32 = vrot.slane %v12247_v5, 1 }
 0x1fb   : > { %v2965_v47 = vadd.f32 %v2924_v20, %v2662_v52  ;;  %16880 = vst [vmem:[#allocation84_spill] sm:$0xff] %v12688_v36  ;;  %v1550_v44 = vmul.f32 %v12695_v42, %v16882_v60  ;;  %v2390_v52 = vsel %vm942_vm4, %v16424_v15, %v16884_v8  ;;  %v16889_v15 = vrot.slane %v12432_v1, 1  ;;  %v10404_v36 = vld [vmem:[%s10691_s29 + $0xa0] sm:$0xff] }
 0x1fc   : > { %v12699_v37 = vpop.permute.xlu0 %890  ;;  %2056 = vperm.xlu1 %10060, %v1976_v26   ;;  %v1252_v20 = vadd.f32 %v1211_v0, %v913_v40  ;;  %v1984_v22 = vsel %vm606_vm3, %v16425_v57, %v16885_v32  ;;  %v16890_v57 = vrot.slane %v12432_v1, 2  ;;  %v12762_v40 = vld [vmem:[%s16639_s22 + $0x4] ss:$0 sm:$0xff] }
 0x1fd   : > { %16883 = vst [vmem:[#allocation37_spill] sm:$0xff] %v12699_v37  ;;  %v3013_v28 = vadd.f32 %v11889_v2, %v2965_v47  ;;  %v12721_v47 = vld [vmem:[%s10691_s29 + $0xc8] sm:$0xff] }
 0x1fe   : > { %2052 = vperm.xlu0 %10059, %v1974_v56   ;;  %v12715_v26 = vpop.permute.xlu1 %1370  ;;  %v1591_v2 = vadd.f32 %v1550_v44, %v1252_v20 }
 0x1ff   : > { %v12713_v19 = vmax.f32 %v3013_v28, 0.0  ;;  %16886 = vst [vmem:[#allocation12_spill] sm:$0xff] %v12715_v26  ;;  %v16887_v28 = vrot.slane %v12215_v59, 3 }
 0x200   : > { %v12717_v56 = vpop.permute.xlu0 %1188  ;;  %2478 = vperm.xlu1 %10060, %v2390_v52  }
 0x201   : > { %v16427_v0 = vrot.slane %v12713_v19, 1  ;;  %v16429_v8 = vrot.slane %v12713_v19, 2  ;;  %v16430_v32 = vrot.slane %v12713_v19, 3  ;;  %v2695_v44 = vsel %vm1281_vm5, %v16426_v7, %v16887_v28 }
 0x202   : > { %2072 = vperm.xlu0 %10059, %v1984_v22   ;;  %v12734_v22 = vld [vmem:[%s16639_s22 + $0x3] ss:$0 sm:$0xff]  ;;  %v12738_v20 = vpop.permute.xlu1 %1379  ;;  %v16892_v7 = vrot.slane %v12432_v1, 3 }
 0x203   : > { %v1649_v52 = vmul.f32 %v12734_v22, %v16746_v24  ;;  %16888 = vst [vmem:[#allocation42_spill] sm:$0xff] %v12738_v20  ;;  %v3166_v59 = vsel %vm606_vm3, %v16427_v0, %v16889_v15  ;;  %v12750_v28 = vsel %vm942_vm4, %v16429_v8, %v16890_v57  ;;  %v16894_v15 = vld [vmem:[#allocation92_spill] sm:$0xff]  ;;  %v16896_v8 = vrot.slane %v12561_v61, 2 }
 0x204   : > { %16891 = vst [vmem:[#allocation39_spill] sm:$0xff] %v12750_v28  ;;  %v12757_v24 = vsel %vm1281_vm5, %v16430_v32, %v16892_v7  ;;  %v1900_v0 = vmul.f32 %v12762_v40, %v16894_v15  ;;  %v12766_v26 = vpop.permute.xlu0 %1374  ;;  %1801 = vperm.xlu1 %10060, %v10404_v36   ;;  %v3261_v57 = vmax.f32 %v12713_v19, %v3166_v59  ;;  %v16897_v7 = vrot.slane %v12721_v47, 2  ;;  %v12780_v15 = vld [vmem:[%s16639_s22 + $0x5] ss:$0 sm:$0xff]  ;;  %v16900_v59 = vld [vmem:[#allocation16_spill] sm:$0xff] }
 0x205   : > { %16893 = vst [vmem:[#allocation59_spill] sm:$0xff] %v12757_v24  ;;  %16895 = vst [vmem:[#allocation92_spill] sm:$0xff] %v12766_v26  ;;  %v1690_v1 = vadd.f32 %v1649_v52, %v1591_v2  ;;  %v2215_v36 = vmul.f32 %v12780_v15, %v12015_v12  ;;  %v16898_v2 = vmax.f32 %v12271_v10, %v12278_v48  ;;  %v16899_v52 = vrot.slane %v12345_v41, 1  ;;  %v16905_v48 = vld [vmem:[#allocation10_spill] sm:$0xff] }
 0x206   : > { %2785 = vperm.xlu0 %10059, %v2695_v44   ;;  %v2420_v32 = vsel %vm942_vm4, %v16897_v7, %v16896_v8  ;;  %v16901_v29 = vrot.slane %v16900_v59, 1  ;;  %v16434_v7 = vrot.slane %v12561_v61, 3  ;;  %v12793_v21 = vpop.permute.xlu1 %1531  ;;  %v16904_v10 = vrot.slane %v12574_v38, 5 }
 0x207   : > { %v3593_v44 = vmax.f32 %v3261_v57, %v16898_v2  ;;  %16902 = vst [vmem:[#allocation95_spill] sm:$0xff] %v12793_v21  ;;  %v1941_v51 = vadd.f32 %v1900_v0, %v1690_v1  ;;  %v16906_v57 = vrot.slane %v16905_v48, 5 }
 0x208   : > { %v2014_v8 = vsel %vm606_vm3, %v16901_v29, %v16899_v52  ;;  %v12795_v25 = vpop.permute.xlu0 %1395  ;;  %2538 = vperm.xlu1 %10060, %v2420_v32   ;;  %v16907_v29 = vrot.slane %v12319_v6, 3  ;;  %v12812_v32 = vld [vmem:[%s16639_s22 + $0x6] ss:$0 sm:$0xff] }
 0x209   : > { %16903 = vst [vmem:[#allocation96_spill] sm:$0xff] %v12795_v25  ;;  %9117 = vmatprep.subr.mxu0 %v3593_v44  ;;  %v718_v2 = vsel %vm651_vm0, %v16906_v57, %v16904_v10  ;;  %v2256_v20 = vadd.f32 %v2215_v36, %v1941_v51  ;;  %v2302_v1 = vmul.f32 %v12812_v32, %v16759_v11  ;;  %v12819_v51 = vld [vmem:[%s16639_s22 + $0x7] ss:$0 sm:$0xff]  ;;  %v16910_v44 = vld [vmem:[#allocation48_spill] sm:$0xff]  ;;  %v16911_v10 = vld [vmem:[#allocation47_spill] sm:$0xff]  ;;  %v16913_v25 = vrot.slane %v16905_v48, 6 }
 0x20a   : > { %2132 = vperm.xlu0 %10059, %v2014_v8   ;;  %v2725_v52 = vsel %vm1281_vm5, %v16434_v7, %v16907_v29  ;;  %v12807_v0 = vpop.permute.xlu1 %2084  ;;  %v2605_v6 = vmul.f32 %v12819_v51, %v12564_v62  ;;  %v928_v8 = vmul.f32 %v12535_v27, %v16910_v44  ;;  %v1226_v57 = vmul.f32 %v12542_v58, %v16911_v10  ;;  %v12830_v29 = vld [vmem:[%s10691_s29 + $0x20] sm:$0xff] }
 0x20b   : > { %16908 = vst [vmem:[#allocation10_spill] sm:$0xff] %v12807_v0  ;;  %v1977_v11 = vrot.slane %v12830_v29, 1  ;;  %v2343_v7 = vadd.f32 %v2302_v1, %v2256_v20  ;;  %v16912_v0 = vrot.slane %v12574_v38, 6  ;;  %v12858_v10 = vld [vmem:[%s16682_s2] ss:$0 sm:$0xff] }
 0x20c   : > { %v12823_v36 = vpop.permute.xlu0 %1753  ;;  %874 = vperm.xlu1 %10060, %v718_v2   ;;  %v1267_v38 = vadd.f32 %v1226_v57, %v928_v8  ;;  %v1664_v57 = vmul.f32 %v12734_v22, %v16772_v45  ;;  %v12894_v45 = vld [vmem:[%s10691_s29 + $0xc0] sm:$0xff] }
 0x20d   : > { %16909 = vst [vmem:[#allocation97_spill] sm:$0xff] %v12823_v36  ;;  %v1016_v62 = vsel %vm949_vm1, %v16913_v25, %v16912_v0  ;;  %v16914_v36 = vld [vmem:[#allocation69_spill] sm:$0xff]  ;;  %v2646_v44 = vadd.f32 %v2605_v6, %v2343_v7  ;;  %v16915_v25 = vrot.slane %v12670_v53, 1  ;;  %v1979_v7 = vrot.slane %v12659_v55, 1 }
 0x20e   : > { %2845 = vperm.xlu0 %10059, %v2725_v52   ;;  %v1565_v2 = vmul.f32 %v12695_v42, %v16914_v36  ;;  %v2798_v21 = vpop.permute.xlu1 %2797  ;;  %v12845_v52 = vld [vmem:[%s16639_s22 + $0x8] ss:$0 sm:$0xff] }
 0x20f   : > { %v2908_v20 = vmul.f32 %v12845_v52, %v2798_v21  ;;  %v1978_v48 = vsel %vm606_vm3, %v16915_v25, %v1977_v11 }
 0x210   : > { %v12840_v24 = vpop.permute.xlu0 %2490  ;;  %1737 = vperm.xlu1 %10060, %v12830_v29   ;;  %v1606_v1 = vadd.f32 %v1565_v2, %v1267_v38  ;;  %v16919_v2 = vrot.slane %v12498_v3, 1  ;;  %v16924_v38 = vrot.slane %v12597_v63, 1 }
 0x211   : > { %v2949_v0 = vadd.f32 %v2908_v20, %v2646_v44  ;;  %v10411_v44 = vld [vmem:[%s10691_s29 + $0x130] sm:$0xff] }
 0x212   : > { %1172 = vperm.xlu0 %10059, %v1016_v62   ;;  %v12853_v6 = vpop.permute.xlu1 %1112  ;;  %v16918_v62 = vld [vmem:[#allocation38_spill] sm:$0xff]  ;;  %v1982_v20 = vsel %vm606_vm3, %v1979_v7, %v16919_v2 }
 0x213   : > { %16916 = vst [vmem:[#allocation48_spill] sm:$0xff] %v12853_v6  ;;  %v2997_v21 = vadd.f32 %v12858_v10, %v2949_v0  ;;  %v1915_v25 = vmul.f32 %v12762_v40, %v16918_v62  ;;  %v1980_v0 = vsel %vm606_vm3, %v1977_v11, %v1979_v7  ;;  %v2230_v62 = vmul.f32 %v12780_v15, %v12155_v43 }
 0x214   : > { %v12861_v8 = vpop.permute.xlu0 %814  ;;  %2060 = vperm.xlu1 %10060, %v1978_v48   ;;  %v12876_v48 = vld [vmem:[%s10691_s29 + $0x48] sm:$0xff]  ;;  %v16920_v7 = vrot.slane %v12511_v18, 3 }
 0x215   : > { %16917 = vst [vmem:[#allocation47_spill] sm:$0xff] %v12861_v8  ;;  %v12872_v6 = vmax.f32 %v2997_v21, 0.0  ;;  %v1705_v8 = vadd.f32 %v1664_v57, %v1606_v1  ;;  %v16921_v1 = vrot.slane %v12681_v54, 3  ;;  %v16923_v2 = vrot.slane %v12876_v48, 2 }
 0x216   : > { %1873 = vperm.xlu0 %10059, %v10411_v44  }
 0x217   : > { %v12881_v44 = vpop.permute.xlu1 %1813  ;;  %v1956_v11 = vadd.f32 %v1915_v25, %v1705_v8  ;;  %v2693_v57 = vsel %vm1281_vm5, %v16921_v1, %v16920_v7  ;;  %v16925_v8 = vrot.slane %v12872_v6, 1  ;;  %v16926_v25 = vrot.slane %v12597_v63, 2 }
 0x218   : > { %v12883_v28 = vpop.permute.xlu0 %1455  ;;  %2068 = vperm.xlu1 %10060, %v1982_v20   ;;  %v16922_v20 = vrot.slane %v12681_v54, 2  ;;  %v16929_v1 = vrot.slane %v12597_v63, 3  ;;  %v16930_v43 = vrot.slane %v12872_v6, 3  ;;  %v2317_v63 = vmul.f32 %v12812_v32, %v16792_v4 }
 0x219   : > { %v3134_v18 = vsel %vm606_vm3, %v16925_v8, %v16924_v38 }
 0x21a   : > { %2064 = vperm.xlu0 %10059, %v1980_v0   ;;  %v2388_v21 = vsel %vm942_vm4, %v16923_v2, %v16922_v20  ;;  %v16927_v0 = vrot.slane %v12872_v6, 2  ;;  %v12919_v26 = vsel %vm1281_vm5, %v16930_v43, %v16929_v1  ;;  %v2271_v2 = vadd.f32 %v2230_v62, %v1956_v11 }
 0x21b   : > { %16931 = vst [vmem:[#allocation38_spill] sm:$0xff] %v12919_v26  ;;  %v12921_v20 = vpop.permute.xlu1 %2550  ;;  %v3245_v59 = vmax.f32 %v12872_v6, %v3134_v18  ;;  %v16933_v43 = vmax.f32 %v12372_v23, %v12379_v35  ;;  %v16934_v11 = vrot.slane %v12721_v47, 2  ;;  %v16935_v18 = vrot.slane %v12894_v45, 2  ;;  %v10414_v26 = vld [vmem:[%s10691_s29 + $0x98] sm:$0xff] }
 0x21c   : > { %v12912_v7 = vsel %vm942_vm4, %v16927_v0, %v16926_v25  ;;  %v12926_v8 = vpop.permute.xlu0 %2144  ;;  %2781 = vperm.xlu1 %10060, %v2693_v57   ;;  %v2620_v25 = vmul.f32 %v12819_v51, %v12649_v46  ;;  %v16443_v1 = vrot.slane %v12721_v47, 3  ;;  %v2358_v57 = vadd.f32 %v2317_v63, %v2271_v2 }
 0x21d   : > { %16928 = vst [vmem:[#allocation69_spill] sm:$0xff] %v12912_v7  ;;  %16932 = vst [vmem:[#allocation98_spill] sm:$0xff] %v12926_v8  ;;  %v3577_v62 = vmax.f32 %v3245_v59, %v16933_v43  ;;  %v2418_v0 = vsel %vm942_vm4, %v16935_v18, %v16934_v11  ;;  %v2372_v35 = vrot.slane %v12666_v30, 2  ;;  %v2373_v23 = vrot.slane %v12670_v53, 2  ;;  %v16937_v59 = vld [vmem:[#allocation56_spill] sm:$0xff]  ;;  %v16938_v11 = vld [vmem:[#allocation57_spill] sm:$0xff] }
 0x21e   : > { %2474 = vperm.xlu0 %10059, %v2388_v21   ;;  %v2661_v46 = vadd.f32 %v2620_v25, %v2358_v57  ;;  %v1210_v43 = vmul.f32 %v12542_v58, %v16937_v59  ;;  %v912_v2 = vmul.f32 %v12535_v27, %v16938_v11  ;;  %v16939_v63 = vrot.slane %v12561_v61, 3 }
 0x21f   : > { %9118 = vmatpush3.msra.mxu0 %v3577_v62  ;;  %v12941_v38 = vpop.permute.xlu1 %750  ;;  %v16940_v62 = vld [vmem:[#allocation76_spill] sm:$0xff]  ;;  %v2375_v61 = vrot.slane %v12830_v29, 2  ;;  %v16448_v11 = vrot.slane %v12659_v55, 2 }
 0x220   : > { %16936 = vst [vmem:[#allocation99_spill] sm:$0xff] %v12941_v38  ;;  %2534 = vperm.xlu1 %10060, %v2418_v0   ;;  %v2723_v25 = vsel %vm1281_vm5, %v16443_v1, %v16939_v63  ;;  %v1549_v18 = vmul.f32 %v12695_v42, %v16940_v62  ;;  %v905_v57 = vmul.f32 %v12535_v27, %v12941_v38 }
 0x221   : > { %v2858_v4 = vpop.permute.xlu0 %2857  ;;  %v2378_v37 = vsel %vm942_vm4, %v2375_v61, %v16448_v11  ;;  %v16946_v11 = vrot.slane %v12713_v19, 2 }
 0x222   : > { %v2923_v21 = vmul.f32 %v12845_v52, %v2858_v4  ;;  %1797 = vperm.xlu0 %10059, %v10414_v26  }
 0x223   : > { %v12958_v0 = vpop.permute.xlu1 %1048 }
 0x224   : > { %v2964_v26 = vadd.f32 %v2923_v21, %v2661_v46  ;;  %16941 = vst [vmem:[#allocation56_spill] sm:$0xff] %v12958_v0  ;;  %v1203_v59 = vmul.f32 %v12542_v58, %v12958_v0  ;;  %1733 = vperm.xlu1 %10060, %v12670_v53   ;;  %v2374_v46 = vsel %vm942_vm4, %v2372_v35, %v2373_v23 }
 0x225   : > { %v887_v4 = vpop.permute.xlu0 %886  ;;  %v1251_v21 = vadd.f32 %v1210_v43, %v912_v2  ;;  %v10415_v43 = vld [vmem:[%s10691_s29 + $0x128] sm:$0xff] }
 0x226   : > { %v3012_v63 = vadd.f32 %v12858_v10, %v2964_v26  ;;  %2841 = vperm.xlu0 %10059, %v2723_v25   ;;  %v1244_v1 = vadd.f32 %v1203_v59, %v905_v57  ;;  %v939_v0 = vmul.f32 %v12535_v27, %v887_v4  ;;  %v16452_v25 = vrot.slane %v12876_v48, 3  ;;  %v12987_v59 = vld [vmem:[%s10691_s29 + $0x40] sm:$0xff] }
 0x227   : > { %v12971_v62 = vpop.permute.xlu1 %1383  ;;  %v1590_v8 = vadd.f32 %v1549_v18, %v1251_v21  ;;  %v1648_v57 = vmul.f32 %v12734_v22, %v16831_v31  ;;  %v2376_v4 = vsel %vm942_vm4, %v2373_v23, %v2375_v61  ;;  %v16945_v21 = vrot.slane %v12713_v19, 1  ;;  %v16950_v61 = vld [vmem:[#allocation43_spill] sm:$0xff] }
 0x228   : > { %v12969_v7 = vmax.f32 %v3012_v63, 0.0  ;;  %16942 = vst [vmem:[#allocation57_spill] sm:$0xff] %v12971_v62  ;;  %2446 = vperm.xlu1 %10060, %v2374_v46   ;;  %v16948_v23 = vrot.slane %v12713_v19, 3 }
 0x229   : > { %v1185_v38 = vpop.permute.xlu0 %1184 }
 0x22a   : > { %v1237_v35 = vmul.f32 %v12542_v58, %v1185_v38  ;;  %1869 = vperm.xlu0 %10059, %v10415_v43   ;;  %v16449_v2 = vrot.slane %v12969_v7, 1  ;;  %v16450_v26 = vrot.slane %v12969_v7, 2  ;;  %v16451_v18 = vrot.slane %v12969_v7, 3 }
 0x22b   : > { %v12992_v38 = vpop.permute.xlu1 %1391 }
 0x22c   : > { %v12990_v46 = vadd.f32 %v1237_v35, %v939_v0  ;;  %16944 = vst [vmem:[#allocation101_spill] sm:$0xff] %v12992_v38  ;;  %v3164_v43 = vsel %vm606_vm3, %v16449_v2, %v16945_v21  ;;  %v13004_v31 = vsel %vm942_vm4, %v16450_v26, %v16946_v11  ;;  %v13011_v0 = vsel %vm1281_vm5, %v16451_v18, %v16948_v23 }
 0x22d   : > { %16947 = vst [vmem:[#allocation102_spill] sm:$0xff] %v13004_v31  ;;  %16949 = vst [vmem:[#allocation103_spill] sm:$0xff] %v13011_v0  ;;  %v1899_v35 = vmul.f32 %v12762_v40, %v16950_v61  ;;  %v13015_v63 = vpop.permute.xlu0 %1387  ;;  %2454 = vperm.xlu1 %10060, %v2378_v37   ;;  %v3260_v21 = vmax.f32 %v12969_v7, %v3164_v43  ;;  %v1689_v11 = vadd.f32 %v1648_v57, %v1590_v8  ;;  %v16958_v61 = vld [vmem:[#allocation32_spill] sm:$0xff]  ;;  %v16964_v0 = vld [vmem:[#allocation77_spill] sm:$0xff] }
 0x22e   : > { %16943 = vst [vmem:[#allocation100_spill] sm:$0xff] %v12990_v46  ;;  %16951 = vst [vmem:[#allocation43_spill] sm:$0xff] %v13015_v63  ;;  %v1542_v19 = vmul.f32 %v12695_v42, %v13015_v63  ;;  %2450 = vperm.xlu0 %10059, %v2376_v4   ;;  %v16952_v26 = vrot.slane %v12681_v54, 3  ;;  %v2214_v37 = vmul.f32 %v12780_v15, %v12224_v33  ;;  %v16954_v8 = vrot.slane %v12876_v48, 2  ;;  %v13039_v54 = vld [vmem:[%s10691_s29 + $0xb8] sm:$0xff] }
 0x22f   : > { %v16953_v43 = vmax.f32 %v12469_v16, %v12476_v49  ;;  %v16955_v57 = vrot.slane %v12987_v59, 2  ;;  %v13048_v33 = vmul.f32 %v12695_v42, %v16958_v61  ;;  %v16960_v16 = vld [vmem:[#allocation65_spill] sm:$0xff]  ;;  %v1209_v18 = vmul.f32 %v12542_v58, %v16964_v0 }
 0x230   : > { %v2691_v23 = vsel %vm1281_vm5, %v16452_v25, %v16952_v26  ;;  %v16956_v26 = vld [vmem:[#allocation29_spill] sm:$0xff]  ;;  %v1225_v49 = vmul.f32 %v12542_v58, %v16960_v16  ;;  %v1940_v31 = vadd.f32 %v1899_v35, %v1689_v11  ;;  %v16968_v0 = vrot.slane %v12894_v45, 3  ;;  %v16969_v11 = vld [vmem:[#allocation82_spill] sm:$0xff] }
 0x231   : > { %v3592_v2 = vmax.f32 %v3260_v21, %v16953_v43  ;;  %v2386_v4 = vsel %vm942_vm4, %v16955_v57, %v16954_v8  ;;  %v13044_v25 = vmul.f32 %v12695_v42, %v16956_v26  ;;  %16959 = vst [vmem:[#allocation32_spill] sm:$0xff] %v13048_v33  ;;  %v13052_v21 = vadd.f32 %v1542_v19, %v1244_v1  ;;  %v13054_v43 = vpop.permute.xlu1 %1630  ;;  %v16963_v8 = vld [vmem:[#allocation66_spill] sm:$0xff]  ;;  %v13060_v26 = vpop.permute.xlu0 %1527  ;;  %v16965_v61 = vld [vmem:[#allocation33_spill] sm:$0xff] }
 0x232   : > { %16962 = vst [vmem:[#allocation104_spill] sm:$0xff] %v13054_v43  ;;  %v927_v57 = vmul.f32 %v12535_v27, %v16963_v8  ;;  %2777 = vperm.xlu1 %10060, %v2691_v23   ;;  %v13064_v33 = vmul.f32 %v12695_v42, %v16965_v61  ;;  %v1663_v1 = vmul.f32 %v12734_v22, %v16854_v39  ;;  %v16966_v19 = vld [vmem:[#allocation73_spill] sm:$0xff]  ;;  %v16967_v8 = vrot.slane %v12721_v47, 3 }
 0x233   : > { %16957 = vst [vmem:[#allocation29_spill] sm:$0xff] %v13044_v25  ;;  %16961 = vst [vmem:[#allocation65_spill] sm:$0xff] %v13052_v21  ;;  %9119 = vmatprep.subr.mxu0 %v3592_v2  ;;  %v911_v16 = vmul.f32 %v12535_v27, %v16966_v19  ;;  %2470 = vperm.xlu0 %10059, %v2386_v4   ;;  %v1224_v2 = vmul.f32 %v12542_v58, %v16969_v11  ;;  %v16970_v23 = vld [vmem:[#allocation85_spill] sm:$0xff]  ;;  %v16971_v25 = vrot.slane %v12894_v45, 2  ;;  %v16973_v4 = vld [vmem:[#allocation83_spill] sm:$0xff] }
 0x234   : > { %v2721_v35 = vsel %vm1281_vm5, %v16968_v0, %v16967_v8  ;;  %v1564_v61 = vmul.f32 %v12695_v42, %v16970_v23  ;;  %v2255_v21 = vadd.f32 %v2214_v37, %v1940_v31  ;;  %v16972_v39 = vrot.slane %v13039_v54, 2  ;;  %v16974_v43 = vld [vmem:[#allocation89_spill] sm:$0xff]  ;;  %v16975_v0 = vld [vmem:[#allocation46_spill] sm:$0xff] }
 0x235   : > { %v926_v47 = vmul.f32 %v12535_v27, %v16973_v4  ;;  %v1548_v63 = vmul.f32 %v12695_v42, %v16974_v43  ;;  %v1222_v8 = vmul.f32 %v12542_v58, %v12084_v50  ;;  %v924_v11 = vmul.f32 %v12535_v27, %v16975_v0  ;;  %v13092_v23 = vpop.permute.xlu1 %2080  ;;  %v16978_v4 = vld [vmem:[#allocation24_spill] sm:$0xff]  ;;  %v16980_v0 = vld [vmem:[#allocation14_spill] sm:$0xff] }
 0x236   : > { %v2416_v19 = vsel %vm942_vm4, %v16972_v39, %v16971_v25  ;;  %16976 = vst [vmem:[#allocation66_spill] sm:$0xff] %v13092_v23  ;;  %v1266_v31 = vadd.f32 %v1225_v49, %v927_v57  ;;  %v1250_v37 = vadd.f32 %v1209_v18, %v911_v16  ;;  %v2301_v46 = vmul.f32 %v12812_v32, %v16842_v14  ;;  %v13098_v39 = vpop.permute.xlu0 %1749 }
 0x237   : > { %v2604_v25 = vmul.f32 %v12819_v51, %v12840_v24  ;;  %16977 = vst [vmem:[#allocation77_spill] sm:$0xff] %v13098_v39  ;;  %2837 = vperm.xlu1 %10060, %v2721_v35   ;;  %v1561_v43 = vmul.f32 %v12695_v42, %v16978_v4  ;;  %2530 = vperm.xlu0 %10059, %v2416_v19   ;;  %v16979_v50 = vrot.slane %v16820_v34, 1  ;;  %v16981_v38 = vrot.slane %v16980_v0, 1 }
 0x238   : > { %v2675_v18 = vrot.slane %v12666_v30, 3  ;;  %v2676_v14 = vrot.slane %v12670_v53, 3  ;;  %v1647_v24 = vmul.f32 %v12734_v22, %v16882_v60  ;;  %v1605_v57 = vadd.f32 %v1564_v61, %v1266_v31  ;;  %v16984_v61 = vld [vmem:[#allocation49_spill] sm:$0xff] }
 0x239   : > { %v2045_v49 = vsel %vm606_vm3, %v16981_v38, %v16979_v50  ;;  %v2342_v16 = vadd.f32 %v2301_v46, %v2255_v21  ;;  %v2381_v35 = vrot.slane %v12247_v5, 2  ;;  %v13114_v19 = vmul.f32 %v12734_v22, %v16914_v36  ;;  %v2794_v34 = vpop.permute.xlu1 %2793  ;;  %v16982_v38 = vld [vmem:[#allocation51_spill] sm:$0xff]  ;;  %v16983_v50 = vld [vmem:[#allocation62_spill] sm:$0xff] }
 0x23a   : > { %v1265_v23 = vadd.f32 %v1224_v2, %v926_v47  ;;  %v1589_v4 = vadd.f32 %v1548_v63, %v1250_v37  ;;  %v1263_v0 = vadd.f32 %v1222_v8, %v924_v11  ;;  %v1563_v30 = vmul.f32 %v12695_v42, %v16982_v38  ;;  %v13120_v60 = vpop.permute.xlu0 %2486  ;;  %v16985_v8 = vld [vmem:[#allocation25_spill] sm:$0xff] }
 0x23b   : > { %v1914_v53 = vmul.f32 %v12762_v40, %v16983_v50  ;;  %v2645_v39 = vadd.f32 %v2604_v25, %v2342_v16  ;;  %v2907_v46 = vmul.f32 %v12845_v52, %v2794_v34  ;;  %2196 = vperm.xlu1 %10060, %v2045_v49   ;;  %1865 = vperm.xlu0 %10059, %v16984_v61   ;;  %v2678_v63 = vrot.slane %v12830_v29, 3 }
 0x23c   : > { %v1602_v21 = vadd.f32 %v1561_v43, %v1263_v0  ;;  %v2677_v36 = vsel %vm1281_vm5, %v2675_v18, %v2676_v14  ;;  %v16465_v2 = vrot.slane %v12659_v55, 3  ;;  %v1704_v47 = vadd.f32 %v1663_v1, %v1605_v57 }
 0x23d   : > { %v2229_v11 = vmul.f32 %v12780_v15, %v16985_v8  ;;  %v2948_v31 = vadd.f32 %v2907_v46, %v2645_v39  ;;  %v16986_v37 = vrot.slane %v12987_v59, 2  ;;  %v1660_v43 = vmul.f32 %v12734_v22, %v16982_v38  ;;  %v1109_v29 = vpop.permute.xlu1 %1108  ;;  %v17051_v8 = vld [vmem:[#allocation91_spill] sm:$0xff] }
 0x23e   : > { %v1911_v25 = vmul.f32 %v12762_v40, %v12881_v44  ;;  %v2411_v0 = vrot.slane %v12345_v41, 2  ;;  %v2686_v1 = vrot.slane %v12987_v59, 3  ;;  %v1955_v49 = vadd.f32 %v1914_v53, %v1704_v47  ;;  %v811_v57 = vpop.permute.xlu0 %810 }
 0x23f   : > { %v2384_v34 = vsel %vm942_vm4, %v2381_v35, %v16986_v37  ;;  %v13140_v18 = vadd.f32 %v1647_v24, %v1589_v4  ;;  %v2996_v39 = vadd.f32 %v12858_v10, %v2948_v31  ;;  %v1218_v16 = vmul.f32 %v12542_v58, %v1109_v29  ;;  %2749 = vperm.xlu1 %10060, %v2677_v36  }
 0x240   : > { %v1604_v50 = vadd.f32 %v1563_v30, %v1265_v23  ;;  %v1701_v46 = vadd.f32 %v1660_v43, %v1602_v21  ;;  %v920_v38 = vmul.f32 %v12535_v27, %v811_v57  ;;  %2466 = vperm.xlu0 %10059, %v2384_v34   ;;  %v2681_v44 = vsel %vm1281_vm5, %v2678_v63, %v16465_v2 }
 0x241   : > { %v2316_v53 = vmul.f32 %v12812_v32, %v16863_v9  ;;  %v2270_v4 = vadd.f32 %v2229_v11, %v1955_v49  ;;  %v13150_v24 = vmax.f32 %v2996_v39, 0.0  ;;  %v2679_v61 = vsel %vm1281_vm5, %v2676_v14, %v2678_v63  ;;  %v13153_v36 = vpop.permute.xlu1 %2140 }
 0x242   : > { %v1952_v47 = vadd.f32 %v1911_v25, %v1701_v46  ;;  %v1259_v31 = vadd.f32 %v1218_v16, %v920_v38  ;;  %16987 = vst [vmem:[#allocation33_spill] sm:$0xff] %v13153_v36  ;;  %v16988_v23 = vrot.slane %v13039_v54, 2  ;;  %v16989_v21 = vrot.slane %v12876_v48, 3  ;;  %v13167_v14 = vpop.permute.xlu0 %1809  ;;  %v16994_v46 = vld [vmem:[#allocation19_spill] sm:$0xff] }
 0x243   : > { %v2619_v11 = vmul.f32 %v12819_v51, %v12921_v20  ;;  %v2226_v63 = vmul.f32 %v12780_v15, %v13153_v36  ;;  %2757 = vperm.xlu1 %10060, %v2681_v44   ;;  %v16463_v37 = vrot.slane %v13150_v24, 1  ;;  %v16462_v34 = vrot.slane %v13150_v24, 2  ;;  %v17031_v36 = vld [vmem:[#allocation41_spill] sm:$0xff] }
 0x244   : > { %v2414_v30 = vsel %vm942_vm4, %v2411_v0, %v16988_v23  ;;  %v2689_v9 = vsel %vm1281_vm5, %v2686_v1, %v16989_v21  ;;  %v1656_v48 = vmul.f32 %v12734_v22, %v12883_v28  ;;  %v1598_v43 = vadd.f32 %v13064_v33, %v1259_v31  ;;  %2753 = vperm.xlu0 %10059, %v2679_v61  }
 0x245   : > { %v2716_v25 = vrot.slane %v13039_v54, 3  ;;  %v16461_v20 = vrot.slane %v13150_v24, 3  ;;  %v2357_v29 = vadd.f32 %v2316_v53, %v2270_v4  ;;  %v13178_v49 = vadd.f32 %v2226_v63, %v1952_v47  ;;  %v2854_v38 = vpop.permute.xlu1 %2853  ;;  %v16998_v47 = vld [vmem:[#allocation71_spill] sm:$0xff] }
 0x246   : > { %v16991_v39 = vrot.slane %v12872_v6, 1  ;;  %v16992_v16 = vrot.slane %v12872_v6, 2  ;;  %v908_v54 = vmul.f32 %v12535_v27, %v16994_v46  ;;  %v16995_v53 = vrot.slane %v12872_v6, 3  ;;  %v13206_v21 = vpop.permute.xlu0 %2546 }
 0x247   : > { %16990 = vst [vmem:[#allocation73_spill] sm:$0xff] %v13178_v49  ;;  %v13202_v61 = vadd.f32 %v1656_v48, %v1598_v43  ;;  %v1206_v31 = vmul.f32 %v12542_v58, %v16998_v47  ;;  %v2660_v23 = vadd.f32 %v2619_v11, %v2357_v29  ;;  %v2922_v63 = vmul.f32 %v12845_v52, %v2854_v38  ;;  %v17001_v29 = vld [vmem:[#allocation68_spill] sm:$0xff] }
 0x248   : > { %v3132_v57 = vsel %vm606_vm3, %v16463_v37, %v16991_v39  ;;  %v13190_v33 = vsel %vm942_vm4, %v16462_v34, %v16992_v16  ;;  %v13200_v4 = vsel %vm1281_vm5, %v16461_v20, %v16995_v53  ;;  %2526 = vperm.xlu1 %10060, %v2414_v30   ;;  %2773 = vperm.xlu0 %10059, %v2689_v9   ;;  %v17000_v48 = vrot.slane %v12894_v45, 3  ;;  %v17002_v53 = vld [vmem:[#allocation44_spill] sm:$0xff] }
 0x249   : > { %16993 = vst [vmem:[#allocation82_spill] sm:$0xff] %v13190_v33  ;;  %v3244_v44 = vmax.f32 %v13150_v24, %v3132_v57  ;;  %16996 = vst [vmem:[#allocation83_spill] sm:$0xff] %v13200_v4  ;;  %v16999_v6 = vmax.f32 %v12640_v17, %v12647_v13  ;;  %v2684_v16 = vrot.slane %v12247_v5, 3  ;;  %v16467_v11 = vrot.slane %v12498_v3, 2  ;;  %v883_v47 = vpop.permute.xlu1 %882  ;;  %v10418_v39 = vld [vmem:[%s10691_s29 + $0x118] sm:$0xff] }
 0x24a   : > { %16997 = vst [vmem:[#allocation46_spill] sm:$0xff] %v13202_v61  ;;  %v2719_v43 = vsel %vm1281_vm5, %v2716_v25, %v17000_v48  ;;  %v1200_v30 = vmul.f32 %v12542_v58, %v17001_v29  ;;  %v2963_v46 = vadd.f32 %v2922_v63, %v2660_v23  ;;  %v16464_v38 = vrot.slane %v12345_v41, 3  ;;  %v17003_v63 = vld [vmem:[#allocation75_spill] sm:$0xff]  ;;  %v17004_v48 = vld [vmem:[#allocation53_spill] sm:$0xff]  ;;  %v17011_v37 = vld [vmem:[#allocation92_spill] sm:$0xff] }
 0x24b   : > { %v3576_v57 = vmax.f32 %v3244_v44, %v16999_v6  ;;  %v16466_v9 = vrot.slane %v12498_v3, 3  ;;  %v13225_v17 = vmul.f32 %v12734_v22, %v17002_v53  ;;  %v13229_v13 = vmul.f32 %v12812_v32, %v12015_v12  ;;  %v13243_v12 = vpop.permute.xlu0 %746 }
 0x24c   : > { %v13232_v45 = vadd.f32 %v13114_v19, %v1604_v50  ;;  %v1238_v44 = vmul.f32 %v12542_v58, %v12717_v56  ;;  %v13236_v23 = vadd.f32 %v1206_v31, %v908_v54  ;;  %v1898_v6 = vmul.f32 %v12762_v40, %v17003_v63  ;;  %1861 = vperm.xlu1 %10060, %v10418_v39   ;;  %v17005_v19 = vld [vmem:[#allocation37_spill] sm:$0xff]  ;;  %v17006_v31 = vld [vmem:[#allocation16_spill] sm:$0xff] }
 0x24d   : > { %9120 = vmatpush3.msra.mxu0 %v3576_v57  ;;  %v902_v20 = vmul.f32 %v12535_v27, %v17004_v48  ;;  %v3011_v34 = vadd.f32 %v12858_v10, %v2963_v46  ;;  %v940_v50 = vmul.f32 %v12535_v27, %v17005_v19  ;;  %2833 = vperm.xlu0 %10059, %v2719_v43   ;;  %v17007_v57 = vrot.slane %v17006_v31, 2 }
 0x24e   : > { %v2687_v56 = vsel %vm1281_vm5, %v2684_v16, %v2686_v1  ;;  %v2382_v54 = vsel %vm942_vm4, %v16467_v11, %v2381_v35  ;;  %v2717_v59 = vsel %vm1281_vm5, %v16464_v38, %v2716_v25  ;;  %v2685_v5 = vsel %vm1281_vm5, %v16466_v9, %v2684_v16  ;;  %v17009_v1 = vld [vmem:[#allocation31_spill] sm:$0xff] }
 0x24f   : > { %v2412_v39 = vsel %vm942_vm4, %v17007_v57, %v2411_v0  ;;  %v1241_v46 = vadd.f32 %v1200_v30, %v902_v20  ;;  %v13261_v63 = vmax.f32 %v3011_v34, 0.0  ;;  %v1201_v35 = vmul.f32 %v12542_v58, %v17009_v1  ;;  %v1181_v20 = vpop.permute.xlu1 %1180  ;;  %v13275_v30 = vpop.permute.xlu0 %1044 }
 0x250   : > { %v1279_v43 = vadd.f32 %v1238_v44, %v940_v50  ;;  %v1577_v19 = vmul.f32 %v12695_v42, %v13060_v26  ;;  %v938_v0 = vmul.f32 %v12535_v27, %v883_v47  ;;  %v1236_v34 = vmul.f32 %v12542_v58, %v1181_v20  ;;  %17010 = vst [vmem:[#allocation62_spill] sm:$0xff] %v13275_v30 }
 0x251   : > { %17008 = vst [vmem:[#allocation51_spill] sm:$0xff] %v13261_v63  ;;  %2769 = vperm.xlu1 %10060, %v2687_v56   ;;  %v16468_v25 = vrot.slane %v13261_v63, 1  ;;  %v16469_v57 = vrot.slane %v13261_v63, 2  ;;  %v1539_v44 = vmul.f32 %v12695_v42, %v17011_v37  ;;  %v1541_v50 = vmul.f32 %v12695_v42, %v12971_v62  ;;  %2462 = vperm.xlu0 %10059, %v2382_v54  }
 0x252   : > { %v904_v47 = vmul.f32 %v12535_v27, %v13243_v12  ;;  %v1202_v20 = vmul.f32 %v12542_v58, %v13275_v30  ;;  %v13288_v56 = vadd.f32 %v1236_v34, %v938_v0  ;;  %v17012_v38 = vrot.slane %v12969_v7, 1  ;;  %v17052_v30 = vld [vmem:[#allocation61_spill] sm:$0xff] }
 0x253   : > { %v17013_v9 = vrot.slane %v12969_v7, 2  ;;  %v17015_v16 = vrot.slane %v12969_v7, 3  ;;  %v17016_v37 = vrot.slane %v13261_v63, 3  ;;  %v1627_v34 = vpop.permute.xlu1 %1626  ;;  %v1618_v49 = vadd.f32 %v1577_v19, %v1279_v43  ;;  %v17022_v19 = vld [vmem:[#allocation28_spill] sm:$0xff] }
 0x254   : > { %v3162_v2 = vsel %vm606_vm3, %v16468_v25, %v17012_v38  ;;  %v1243_v0 = vadd.f32 %v1202_v20, %v904_v47  ;;  %v1638_v25 = vmul.f32 %v12734_v22, %v12971_v62  ;;  %v16471_v7 = vmov 0.0   ;;  %v17019_v20 = vld [vmem:[#allocation39_spill] sm:$0xff] }
 0x255   : > { %v13300_v11 = vsel %vm942_vm4, %v16469_v57, %v17013_v9  ;;  %v13307_v54 = vsel %vm1281_vm5, %v17016_v37, %v17015_v16  ;;  %v3259_v61 = vmax.f32 %v13261_v63, %v3162_v2  ;;  %v1676_v9 = vmul.f32 %v12734_v22, %v1627_v34  ;;  %v13315_v57 = vpop.permute.xlu0 %1523  ;;  %2829 = vperm.xlu1 %10060, %v2717_v59   ;;  %v17018_v37 = vld [vmem:[#allocation101_spill] sm:$0xff]  ;;  %v17020_v38 = vld [vmem:[#allocation59_spill] sm:$0xff] }
 0x256   : > { %17014 = vst [vmem:[#allocation49_spill] sm:$0xff] %v13300_v11  ;;  %17017 = vst [vmem:[#allocation19_spill] sm:$0xff] %v13307_v54  ;;  %9404 = vmatprep.subr.mxu1 %v16471_v7  ;;  %v1640_v16 = vmul.f32 %v12734_v22, %v17018_v37  ;;  %v1582_v47 = vadd.f32 %v1541_v50, %v1243_v0  ;;  %v1576_v2 = vmul.f32 %v12695_v42, %v13315_v57  ;;  %v17025_v0 = vld [vmem:[#allocation17_spill] sm:$0xff] }
 0x257   : > { %2522 = vperm.xlu0 %10059, %v2412_v39   ;;  %v17021_v29 = vmax.f32 %v17019_v20, %v17020_v38  ;;  %v1545_v34 = vmul.f32 %v12695_v42, %v17022_v19  ;;  %v1580_v54 = vadd.f32 %v1539_v44, %v1241_v46  ;;  %v13327_v59 = vadd.f32 %v1676_v9, %v1618_v49  ;;  %v17026_v39 = vld [vmem:[#allocation42_spill] sm:$0xff]  ;;  %v17027_v38 = vld [vmem:[#allocation100_spill] sm:$0xff] }
 0x258   : > { %v17023_v7 = vrot.slane %v12498_v3, 2  ;;  %v17024_v11 = vrot.slane %v12659_v55, 2  ;;  %v903_v1 = vmul.f32 %v12535_v27, %v17025_v0  ;;  %v1540_v4 = vmul.f32 %v12695_v42, %v17026_v39  ;;  %v17030_v44 = vld [vmem:[#allocation22_spill] sm:$0xff] }
 0x259   : > { %v3591_v43 = vmax.f32 %v3259_v61, %v17021_v29  ;;  %v13339_v61 = vadd.f32 %v1576_v2, %v17027_v38  ;;  %v1726_v29 = vpop.permute.xlu1 %1725  ;;  %v13341_v46 = vadd.f32 %v1640_v16, %v1582_v47  ;;  %v1939_v49 = vadd.f32 %v1898_v6, %v13140_v18  ;;  %2765 = vperm.xlu1 %10060, %v2685_v5   ;;  %v17032_v38 = vld [vmem:[#allocation43_spill] sm:$0xff] }
 0x25a   : > { %v2380_v50 = vsel %vm942_vm4, %v17024_v11, %v17023_v7  ;;  %v1221_v9 = vmul.f32 %v12542_v58, %v17030_v44  ;;  %v1679_v20 = vadd.f32 %v1638_v25, %v1580_v54  ;;  %v1889_v11 = vmul.f32 %v12762_v40, %v1726_v29  ;;  %v13347_v7 = vpop.permute.xlu0 %1721  ;;  %v17035_v54 = vld [vmem:[#allocation23_spill] sm:$0xff] }
 0x25b   : > { %17028 = vst [vmem:[#allocation71_spill] sm:$0xff] %v13339_v61  ;;  %9121 = vmatprep.subr.mxu0 %v3591_v43  ;;  %17029 = vst [vmem:[#allocation44_spill] sm:$0xff] %v13341_v46  ;;  %v1242_v33 = vadd.f32 %v1201_v35, %v903_v1  ;;  %v1239_v2 = vmul.f32 %v12542_v58, %v17031_v36  ;;  %v1639_v43 = vmul.f32 %v12734_v22, %v17032_v38  ;;  %v17040_v29 = vld [vmem:[#allocation11_spill] sm:$0xff]  ;;  %v17050_v61 = vld [vmem:[#allocation104_spill] sm:$0xff] }
 0x25c   : > { %2458 = vperm.xlu0 %10059, %v2380_v50   ;;  %v17033_v16 = vrot.slane %v12498_v3, 3  ;;  %v17034_v18 = vrot.slane %v12659_v55, 3  ;;  %v1586_v25 = vadd.f32 %v1545_v34, %v13236_v23  ;;  %v2213_v47 = vmul.f32 %v12780_v15, %v17035_v54  ;;  %v17039_v50 = vld [vmem:[#allocation58_spill] sm:$0xff]  ;;  %v17041_v44 = vld [vmem:[#allocation95_spill] sm:$0xff] }
 0x25d   : > { %v13361_v5 = vadd.f32 %v1889_v11, %v1679_v20  ;;  %v17037_v1 = vrot.slane %v12345_v41, 3  ;;  %v17038_v36 = vrot.slane %v17006_v31, 3  ;;  %v923_v3 = vmul.f32 %v12535_v27, %v17039_v50  ;;  %v13374_v34 = vpop.permute.xlu1 %1745  ;;  %v17042_v20 = vld [vmem:[#allocation78_spill] sm:$0xff]  ;;  %v17043_v41 = vld [vmem:[#allocation77_spill] sm:$0xff] }
 0x25e   : > { %v2683_v6 = vsel %vm1281_vm5, %v17034_v18, %v17033_v16  ;;  %v941_v55 = vmul.f32 %v12535_v27, %v17040_v29  ;;  %v1578_v23 = vmul.f32 %v12695_v42, %v17041_v44  ;;  %v1581_v16 = vadd.f32 %v1540_v4, %v1242_v33  ;;  %v1730_v18 = vpop.permute.xlu0 %1729  ;;  %v17046_v50 = vld [vmem:[#allocation14_spill] sm:$0xff] }
 0x25f   : > { %17036 = vst [vmem:[#allocation75_spill] sm:$0xff] %v13361_v5  ;;  %v2715_v35 = vsel %vm1281_vm5, %v17038_v36, %v17037_v1  ;;  %v1913_v11 = vmul.f32 %v12762_v40, %v17042_v20  ;;  %v1895_v31 = vmul.f32 %v12762_v40, %v17043_v41  ;;  %2761 = vperm.xlu1 %10060, %v2683_v6   ;;  %v17044_v1 = vld [vmem:[#allocation72_spill] sm:$0xff]  ;;  %v17047_v5 = vrot.slane %v17046_v50, 3 }
 0x260   : > { %v17045_v36 = vrot.slane %v17044_v1, 3  ;;  %v17048_v46 = vrot.slane %v17044_v1, 2  ;;  %v17049_v54 = vrot.slane %v17046_v50, 2  ;;  %v1280_v4 = vadd.f32 %v1239_v2, %v941_v55  ;;  %2825 = vperm.xlu0 %10059, %v2715_v35   ;;  %v17054_v2 = vld [vmem:[#allocation50_spill] sm:$0xff] }
 0x261   : > { %v1677_v20 = vmul.f32 %v12734_v22, %v17050_v61  ;;  %v1680_v44 = vadd.f32 %v1639_v43, %v1581_v16  ;;  %v1890_v41 = vmul.f32 %v12762_v40, %v1730_v18  ;;  %v2254_v6 = vadd.f32 %v2213_v47, %v1939_v49  ;;  %v13404_v55 = vpop.permute.xlu1 %2076  ;;  %v17056_v18 = vld [vmem:[#allocation90_spill] sm:$0xff] }
 0x262   : > { %v2746_v29 = vsel %vm1281_vm5, %v17047_v5, %v17045_v36  ;;  %v2443_v33 = vsel %vm942_vm4, %v17049_v54, %v17048_v46  ;;  %v1220_v62 = vmul.f32 %v12542_v58, %v17051_v8  ;;  %v1560_v5 = vmul.f32 %v12695_v42, %v17052_v30  ;;  %v17053_v36 = vld [vmem:[#allocation35_spill] sm:$0xff] }
 0x263   : > { %v1685_v1 = vadd.f32 %v13225_v17, %v1586_v25  ;;  %v922_v46 = vmul.f32 %v12535_v27, %v17053_v36  ;;  %v2228_v54 = vmul.f32 %v12780_v15, %v17054_v2  ;;  %v1619_v61 = vadd.f32 %v1578_v23, %v1280_v4  ;;  %v1882_v17 = vpop.permute.xlu0 %1881  ;;  %2889 = vperm.xlu1 %10060, %v2746_v29  }
 0x264   : > { %v13402_v43 = vadd.f32 %v1890_v41, %v1680_v44  ;;  %v1262_v49 = vadd.f32 %v1221_v9, %v923_v3  ;;  %v2603_v8 = vmul.f32 %v12819_v51, %v13120_v60  ;;  %v2210_v35 = vmul.f32 %v12780_v15, %v13404_v55  ;;  %2586 = vperm.xlu0 %10059, %v2443_v33  }
 0x265   : > { %v1936_v47 = vadd.f32 %v1895_v31, %v1685_v1  ;;  %v1954_v25 = vadd.f32 %v1913_v11, %v13232_v45  ;;  %v1559_v16 = vmul.f32 %v12695_v42, %v12883_v28  ;;  %v1718_v23 = vadd.f32 %v1677_v20, %v1619_v61  ;;  %v2790_v4 = vpop.permute.xlu1 %2789  ;;  %v17058_v28 = vld [vmem:[#allocation13_spill] sm:$0xff]  ;;  %v17060_v61 = vld [vmem:[#allocation99_spill] sm:$0xff] }
 0x266   : > { %17055 = vst [vmem:[#allocation53_spill] sm:$0xff] %v13402_v43  ;;  %v1928_v44 = vmul.f32 %v12762_v40, %v1882_v17  ;;  %v1208_v9 = vmul.f32 %v12542_v58, %v17056_v18  ;;  %v1601_v3 = vadd.f32 %v1560_v5, %v1262_v49  ;;  %v2341_v60 = vadd.f32 %v13229_v13, %v2254_v6  ;;  %v17059_v13 = vld [vmem:[#allocation63_spill] sm:$0xff]  ;;  %v17063_v17 = vld [vmem:[#allocation24_spill] sm:$0xff] }
 0x267   : > { %v13417_v31 = vadd.f32 %v2210_v35, %v1936_v47  ;;  %v2243_v50 = vmul.f32 %v12780_v15, %v17025_v0  ;;  %v1261_v29 = vadd.f32 %v1220_v62, %v922_v46  ;;  %v2269_v45 = vadd.f32 %v2228_v54, %v1954_v25  ;;  %v13426_v1 = vpop.permute.xlu0 %2482  ;;  %v17061_v54 = vld [vmem:[#allocation94_spill] sm:$0xff]  ;;  %v17062_v47 = vld [vmem:[#allocation93_spill] sm:$0xff] }
 0x268   : > { %v1969_v11 = vadd.f32 %v1928_v44, %v1718_v23  ;;  %v1659_v20 = vmul.f32 %v12734_v22, %v17058_v28  ;;  %v2644_v41 = vadd.f32 %v2603_v8, %v2341_v60  ;;  %v1910_v33 = vmul.f32 %v12762_v40, %v13167_v14  ;;  %v17064_v23 = vld [vmem:[#allocation56_spill] sm:$0xff] }
 0x269   : > { %17057 = vst [vmem:[#allocation37_spill] sm:$0xff] %v13417_v31  ;;  %v2906_v5 = vmul.f32 %v12845_v52, %v2790_v4  ;;  %v2315_v6 = vmul.f32 %v12812_v32, %v17059_v13  ;;  %v1600_v36 = vadd.f32 %v1559_v16, %v1261_v29  ;;  %v2330_v62 = vmul.f32 %v12812_v32, %v17060_v61  ;;  %v13440_v60 = vpop.permute.xlu1 %2136 }
 0x26a   : > { %v2284_v46 = vadd.f32 %v2243_v50, %v1969_v11  ;;  %v925_v49 = vmul.f32 %v12535_v27, %v17061_v54  ;;  %v1223_v8 = vmul.f32 %v12542_v58, %v17062_v47  ;;  %v1700_v35 = vadd.f32 %v1659_v20, %v1601_v3 }
 0x26b   : > { %v2947_v14 = vadd.f32 %v2906_v5, %v2644_v41  ;;  %v1658_v25 = vmul.f32 %v12734_v22, %v17063_v17  ;;  %v2633_v44 = vmul.f32 %v12819_v51, %v17064_v23  ;;  %v2356_v18 = vadd.f32 %v2315_v6, %v2269_v45  ;;  %v1806_v3 = vpop.permute.xlu0 %1805  ;;  %v13453_v41 = vld [vmem:[%s16639_s22 + $0x1] ss:$0 sm:$0xff]  ;;  %v17066_v5 = vld [vmem:[#allocation98_spill] sm:$0xff] }
 0x26c   : > { %v2371_v16 = vadd.f32 %v2330_v62, %v2284_v46  ;;  %v1951_v29 = vadd.f32 %v1910_v33, %v1700_v35  ;;  %v2618_v50 = vmul.f32 %v12819_v51, %v13206_v21  ;;  %v2225_v58 = vmul.f32 %v12780_v15, %v13440_v60  ;;  %v17065_v33 = vld [vmem:[#allocation84_spill] sm:$0xff] }
 0x26d   : > { %v2995_v27 = vadd.f32 %v12858_v10, %v2947_v14  ;;  %v2936_v11 = vmul.f32 %v12845_v52, %v17032_v38  ;;  %v1699_v20 = vadd.f32 %v1658_v25, %v1600_v36  ;;  %v1909_v45 = vmul.f32 %v12762_v40, %v1806_v3  ;;  %v13464_v38 = vld [vmem:[%s16639_s22] ss:$0 sm:$0xff]  ;;  %v17067_v36 = vld [vmem:[#allocation27_spill] sm:$0xff]  ;;  %v2850_v35 = vpop.permute.xlu1 %2849  ;;  %v17071_v3 = vld [vmem:[#allocation86_spill] sm:$0xff] }
 0x26e   : > { %v2674_v4 = vadd.f32 %v2633_v44, %v2371_v16  ;;  %v1204_v21 = vmul.f32 %v13453_v41, %v17065_v33  ;;  %v2312_v13 = vmul.f32 %v12812_v32, %v17066_v5  ;;  %v2266_v61 = vadd.f32 %v2225_v58, %v1951_v29  ;;  %v17069_v16 = vld [vmem:[#allocation76_spill] sm:$0xff] }
 0x26f   : > { %v13459_v6 = vmax.f32 %v2995_v27, 0.0  ;;  %v906_v62 = vmul.f32 %v13464_v38, %v17067_v36  ;;  %v1543_v46 = vmul.f32 %v12695_v42, %v17018_v37  ;;  %v13472_v47 = vadd.f32 %v1909_v45, %v1699_v20  ;;  %v13475_v25 = vpop.permute.xlu0 %2542  ;;  %v17070_v27 = vld [vmem:[#allocation87_spill] sm:$0xff] }
 0x270   : > { %v13470_v54 = vadd.f32 %v2936_v11, %v2674_v4  ;;  %v2659_v14 = vadd.f32 %v2618_v50, %v2356_v18  ;;  %v2921_v17 = vmul.f32 %v12845_v52, %v2850_v35  ;;  %v13478_v44 = vadd.f32 %v2312_v13, %v2266_v61  ;;  %v17072_v50 = vld [vmem:[#allocation85_spill] sm:$0xff]  ;;  %v17074_v61 = vld [vmem:[#allocation36_spill] sm:$0xff] }
 0x271   : > { %v16479_v23 = vrot.slane %v13459_v6, 1  ;;  %v1646_v29 = vmul.f32 %v12734_v22, %v17069_v16  ;;  %v910_v37 = vmul.f32 %v13464_v38, %v17070_v27  ;;  %v1547_v58 = vmul.f32 %v12695_v42, %v17002_v53  ;;  %v17075_v53 = vld [vmem:[#allocation12_spill] sm:$0xff]  ;;  %v1177_v16 = vpop.permute.xlu1 %1176 }
 0x272   : > { %17068 = vst [vmem:[#allocation16_spill] sm:$0xff] %v13478_v44  ;;  %v1199_v18 = vmul.f32 %v13453_v41, %v17071_v3  ;;  %v13490_v11 = vmul.f32 %v12734_v22, %v17072_v50  ;;  %v1245_v4 = vadd.f32 %v1204_v21, %v906_v62  ;;  %v2962_v20 = vadd.f32 %v2921_v17, %v2659_v14 }
 0x273   : > { %v17073_v45 = vrot.slane %v13150_v24, 1  ;;  %v1249_v13 = vadd.f32 %v1208_v9, %v910_v37  ;;  %v901_v36 = vmul.f32 %v13464_v38, %v17074_v61  ;;  %v1538_v35 = vmul.f32 %v12695_v42, %v17075_v53  ;;  %v879_v14 = vpop.permute.xlu0 %878  ;;  %v17076_v37 = vld [vmem:[#allocation69_spill] sm:$0xff] }
 0x274   : > { %v1264_v50 = vadd.f32 %v1223_v8, %v925_v49  ;;  %v1584_v44 = vadd.f32 %v1543_v46, %v1245_v4  ;;  %v3010_v21 = vadd.f32 %v12858_v10, %v2962_v20  ;;  %v1235_v62 = vmul.f32 %v13453_v41, %v1177_v16  ;;  %v17079_v4 = vld [vmem:[#allocation18_spill] sm:$0xff] }
 0x275   : > { %v3130_v33 = vsel %vm606_vm3, %v16479_v23, %v17073_v45  ;;  %v1588_v17 = vadd.f32 %v1547_v58, %v1249_v13  ;;  %v1240_v43 = vadd.f32 %v1199_v18, %v901_v36  ;;  %v937_v9 = vmul.f32 %v13464_v38, %v879_v14  ;;  %v17077_v45 = vld [vmem:[#allocation38_spill] sm:$0xff]  ;;  %v17080_v18 = vld [vmem:[#allocation52_spill] sm:$0xff] }
 0x276   : > { %v3243_v27 = vmax.f32 %v13459_v6, %v3130_v33  ;;  %v17078_v23 = vmax.f32 %v17076_v37, %v17077_v45  ;;  %v1562_v53 = vmul.f32 %v12695_v42, %v17058_v28  ;;  %v1642_v49 = vmul.f32 %v12734_v22, %v17022_v19 }
 0x277   : > { %v1637_v8 = vmul.f32 %v12734_v22, %v17026_v39  ;;  %v13514_v46 = vmax.f32 %v3010_v21, 0.0  ;;  %v907_v58 = vmul.f32 %v13464_v38, %v17079_v4  ;;  %v1205_v20 = vmul.f32 %v13453_v41, %v17080_v18  ;;  %v13523_v16 = vpop.permute.xlu0 %1519  ;;  %v17081_v21 = vld [vmem:[#allocation79_spill] sm:$0xff] }
 0x278   : > { %v3575_v31 = vmax.f32 %v3243_v27, %v17078_v23  ;;  %v1579_v33 = vadd.f32 %v1538_v35, %v1240_v43  ;;  %v1276_v13 = vadd.f32 %v1235_v62, %v937_v9  ;;  %v1742_v23 = vpop.permute.xlu1 %1741  ;;  %v1888_v28 = vmul.f32 %v12762_v40, %v13347_v7  ;;  %v17082_v43 = vld [vmem:[#allocation29_spill] sm:$0xff]  ;;  %v3607_v7 = vld [vmem:[%s16216_s9 + $0x8] sm:$0xff] }
 0x279   : > { %v1683_v36 = vadd.f32 %v1642_v49, %v1584_v44  ;;  %v1893_v19 = vmul.f32 %v12762_v40, %v1742_v23  ;;  %v16480_v27 = vrot.slane %v13514_v46, 1  ;;  %v1897_v14 = vmul.f32 %v12762_v40, %v17081_v21  ;;  %v17083_v44 = vld [vmem:[#allocation96_spill] sm:$0xff]  ;;  %3753 = vmatprep.mubr.f32.mxu0 %v3607_v7 }
 0x27a   : > { %9122 = vmatpush3.msra.mxu0 %v3575_v31  ;;  %v1673_v37 = vmul.f32 %v12734_v22, %v13315_v57  ;;  %v1615_v35 = vadd.f32 %v17082_v43, %v1276_v13  ;;  %v1575_v31 = vmul.f32 %v12695_v42, %v13523_v16  ;;  %v1544_v62 = vmul.f32 %v12695_v42, %v17083_v44  ;;  %v17086_v42 = vld [vmem:[#allocation47_spill] sm:$0xff] }
 0x27b   : > { %v1678_v9 = vadd.f32 %v1637_v8, %v1579_v33  ;;  %v13538_v45 = vadd.f32 %v1893_v19, %v1683_v36  ;;  %v17084_v49 = vrot.slane %v13261_v63, 1  ;;  %v1674_v4 = vmul.f32 %v12734_v22, %v13060_v26  ;;  %v17087_v33 = vld [vmem:[#allocation48_spill] sm:$0xff]  ;;  %v1878_v7 = vpop.permute.xlu0 %1877  ;;  %v17088_v26 = vld [vmem:[#allocation102_spill] sm:$0xff] }
 0x27c   : > { %v1616_v18 = vadd.f32 %v1575_v31, %v13288_v56  ;;  %v2049_v13 = vpop.permute.xlu1 %2048  ;;  %v13549_v21 = vadd.f32 %v1673_v37, %v1615_v35  ;;  %v921_v8 = vmul.f32 %v13464_v38, %v17086_v42  ;;  %v1219_v36 = vmul.f32 %v13453_v41, %v17087_v33  ;;  %v17089_v56 = vld [vmem:[#allocation103_spill] sm:$0xff]  ;;  %v17092_v33 = vld [vmem:[#allocation34_spill] sm:$0xff] }
 0x27d   : > { %v3160_v57 = vsel %vm606_vm3, %v16480_v27, %v17084_v49  ;;  %v1929_v19 = vadd.f32 %v1888_v28, %v1678_v9  ;;  %v2203_v43 = vmul.f32 %v12780_v15, %v2049_v13  ;;  %v1246_v49 = vadd.f32 %v1205_v20, %v907_v58 }
 0x27e   : > { %v3258_v23 = vmax.f32 %v13514_v46, %v3160_v57  ;;  %17085 = vst [vmem:[#allocation101_spill] sm:$0xff] %v13549_v21  ;;  %v1927_v22 = vmul.f32 %v12762_v40, %v1878_v7  ;;  %v17090_v31 = vmax.f32 %v17088_v26, %v17089_v56  ;;  %v13560_v57 = vadd.f32 %v1674_v4, %v1616_v18  ;;  %v17091_v21 = vld [vmem:[#allocation10_spill] sm:$0xff] }
 0x27f   : > { %v1603_v37 = vadd.f32 %v1562_v53, %v1264_v50  ;;  %v1687_v35 = vadd.f32 %v1646_v29, %v1588_v17  ;;  %v2212_v42 = vmul.f32 %v12780_v15, %v17091_v21  ;;  %v2244_v63 = vadd.f32 %v2203_v43, %v1929_v19  ;;  %v13573_v53 = vpop.permute.xlu0 %2052  ;;  %v17094_v17 = vld [vmem:[#allocation88_spill] sm:$0xff] }
 0x280   : > { %v3590_v27 = vmax.f32 %v3258_v23, %v17090_v31  ;;  %v2242_v28 = vmul.f32 %v12780_v15, %v17004_v48  ;;  %v1585_v9 = vadd.f32 %v1544_v62, %v1246_v49  ;;  %v1968_v58 = vadd.f32 %v1927_v22, %v13327_v59  ;;  %v13567_v20 = vpop.permute.xlu1 %2056  ;;  %v13580_v59 = vld [vmem:[%s16639_s22 + $0x3] ss:$0 sm:$0xff] }
 0x281   : > { %v1938_v13 = vadd.f32 %v1897_v14, %v1687_v35  ;;  %v1912_v4 = vmul.f32 %v12762_v40, %v17092_v33  ;;  %v1260_v18 = vadd.f32 %v1219_v36, %v921_v8  ;;  %v2290_v29 = vmul.f32 %v12812_v32, %v13567_v20  ;;  %v13589_v14 = vld [vmem:[%s16639_s22 + $0x4] ss:$0 sm:$0xff]  ;;  %v17097_v35 = vld [vmem:[#allocation32_spill] sm:$0xff] }
 0x282   : > { %9123 = vmatprep.subr.mxu0 %v3590_v27  ;;  %v17093_v50 = vmov 0.0   ;;  %v1643_v27 = vmul.f32 %v13580_v59, %v17094_v17  ;;  %v2329_v40 = vmul.f32 %v12812_v32, %v13243_v12  ;;  %v1894_v62 = vmul.f32 %v13589_v14, %v13374_v34  ;;  %v17095_v8 = vld [vmem:[#allocation30_spill] sm:$0xff] }
 0x283   : > { %9422 = vmatprep.mubr.msk.f32.mxu1 %vm10526_vm6, %v17093_v50  ;;  %v2283_v23 = vadd.f32 %v2242_v28, %v1968_v58  ;;  %v2299_v36 = vmul.f32 %v12812_v32, %v17095_v8  ;;  %v1702_v19 = vadd.f32 %v13490_v11, %v1603_v37  ;;  %v2253_v43 = vadd.f32 %v2212_v42, %v1938_v13  ;;  %v17096_v49 = vld [vmem:[#allocation62_spill] sm:$0xff]  ;;  %v17098_v58 = vld [vmem:[#allocation57_spill] sm:$0xff]  ;;  %v13609_v11 = vpop.permute.xlu0 %2072 }
 0x284   : > { %v13596_v7 = vadd.f32 %v2290_v29, %v2244_v63  ;;  %v2227_v12 = vmul.f32 %v12780_v15, %v17066_v5  ;;  %v2632_v22 = vmul.f32 %v12819_v51, %v17096_v49  ;;  %v1684_v26 = vadd.f32 %v1643_v27, %v1585_v9  ;;  %v13602_v31 = vpop.permute.xlu1 %2478  ;;  %v13616_v42 = vld [vmem:[%s16639_s22 + $0x5] ss:$0 sm:$0xff] }
 0x285   : > { %v2370_v56 = vadd.f32 %v2329_v40, %v2283_v23  ;;  %v1953_v34 = vadd.f32 %v1912_v4, %v1702_v19  ;;  %v1599_v28 = vadd.f32 %v17097_v35, %v1260_v18  ;;  %v2935_v32 = vmul.f32 %v12845_v52, %v17098_v58  ;;  %v13625_v4 = vld [vmem:[%s16639_s22 + $0x6] ss:$0 sm:$0xff]  ;;  %v17100_v40 = vld [vmem:[#allocation25_spill] sm:$0xff]  ;;  %v17103_v35 = vld [vmem:[#allocation55_spill] sm:$0xff] }
 0x286   : > { %v3025_v63 = vadd.f32 %v12858_v10, %v13470_v54  ;;  %v1935_v37 = vadd.f32 %v1894_v62, %v1684_v26  ;;  %v2602_v15 = vmul.f32 %v12819_v51, %v13426_v1  ;;  %v2209_v9 = vmul.f32 %v13616_v42, %v13609_v11  ;;  %v17099_v51 = vld [vmem:[#allocation66_spill] sm:$0xff] }
 0x287   : > { %v2673_v5 = vadd.f32 %v2632_v22, %v2370_v56  ;;  %v1657_v13 = vmul.f32 %v13580_v59, %v17052_v30  ;;  %v2340_v33 = vadd.f32 %v2299_v36, %v2253_v43  ;;  %v2268_v54 = vadd.f32 %v2227_v12, %v1953_v34  ;;  %v2786_v36 = vpop.permute.xlu0 %2785  ;;  %v17101_v22 = vld [vmem:[#allocation80_spill] sm:$0xff]  ;;  %v17102_v56 = vld [vmem:[#allocation54_spill] sm:$0xff] }
 0x288   : > { %v2296_v1 = vmul.f32 %v13625_v4, %v17099_v51  ;;  %v2250_v29 = vadd.f32 %v2209_v9, %v1935_v37  ;;  %v1802_v27 = vpop.permute.xlu1 %1801  ;;  %v2314_v62 = vmul.f32 %v13625_v4, %v17100_v40  ;;  %v13631_v23 = vmax.f32 %v3025_v63, 0.0  ;;  %v13657_v9 = vld [vmem:[%s16639_s22 + $0x7] ss:$0 sm:$0xff] }
 0x289   : > { %v2976_v18 = vadd.f32 %v2935_v32, %v2673_v5  ;;  %v1698_v8 = vadd.f32 %v1657_v13, %v1599_v28  ;;  %v1908_v30 = vmul.f32 %v13589_v14, %v1802_v27  ;;  %v2643_v19 = vadd.f32 %v2602_v15, %v2340_v33  ;;  %v10425_v32 = vld [vmem:[%s16639_s22 + $0x2] ss:$0 sm:$0xff] }
 0x28a   : > { %v2905_v12 = vmul.f32 %v12845_v52, %v2786_v36  ;;  %v13636_v49 = vadd.f32 %v2296_v1, %v2250_v29  ;;  %v2223_v26 = vmul.f32 %v13616_v42, %v17101_v22  ;;  %v1207_v34 = vmul.f32 %v13453_v41, %v17102_v56 }
 0x28b   : > { %v3024_v43 = vadd.f32 %v12858_v10, %v2976_v18  ;;  %v909_v58 = vmul.f32 %v13464_v38, %v17103_v35  ;;  %v1949_v28 = vadd.f32 %v1908_v30, %v1698_v8  ;;  %v1546_v10 = vmul.f32 %v10425_v32, %v17094_v17  ;;  %v13661_v1 = vpop.permute.xlu0 %2132  ;;  %v17104_v30 = vld [vmem:[#allocation33_spill] sm:$0xff] }
 0x28c   : > { %v2355_v63 = vadd.f32 %v2314_v62, %v2268_v54  ;;  %v2946_v37 = vadd.f32 %v2905_v12, %v2643_v19  ;;  %v13650_v15 = vpop.permute.xlu1 %2538  ;;  %v2310_v5 = vmul.f32 %v13625_v4, %v13440_v60  ;;  %v2617_v13 = vmul.f32 %v13657_v9, %v13475_v25  ;;  %v13667_v54 = vld [vmem:[%s16682_s2] ss:$0 sm:$0xff]  ;;  %s10461_s2 = scalar_lea.vmem %s10460_s26, 32 }
 0x28d   : > { %v13648_v52 = vmax.f32 %v3024_v43, 0.0  ;;  %v2264_v33 = vadd.f32 %v2223_v26, %v1949_v28  ;;  %v16485_v17 = vrot.slane %v13631_v23, 1  ;;  %v2224_v18 = vmul.f32 %v13616_v42, %v13661_v1 }
 0x28e   : > { %v2994_v60 = vadd.f32 %v13667_v54, %v2946_v37  ;;  %v16484_v27 = vrot.slane %v13631_v23, 2  ;;  %v16483_v40 = vrot.slane %v13631_v23, 3  ;;  %v2311_v36 = vmul.f32 %v13625_v4, %v17104_v30  ;;  %v17108_v30 = vld [vmem:[#allocation26_spill] sm:$0xff] }
 0x28f   : > { %v16488_v29 = vrot.slane %v13648_v52, 1  ;;  %v13674_v25 = vadd.f32 %v2310_v5, %v2264_v33  ;;  %v16487_v62 = vrot.slane %v13648_v52, 2  ;;  %v16486_v8 = vrot.slane %v13648_v52, 3  ;;  %v2846_v56 = vpop.permute.xlu0 %2845 }
 0x290   : > { %v13681_v19 = vmax.f32 %v2994_v60, 0.0  ;;  %v2265_v43 = vadd.f32 %v2224_v18, %v13472_v47  ;;  %v875_v12 = vpop.permute.xlu1 %874  ;;  %v1248_v26 = vadd.f32 %v1207_v34, %v909_v58  ;;  %v2658_v37 = vadd.f32 %v2617_v13, %v2355_v63  ;;  %v13710_v34 = vld [vmem:[%s16639_s22 + $0x8] ss:$0 sm:$0xff] }
 0x291   : > { %v13689_v22 = vsel %vm606_vm3, %v16488_v29, %v16485_v17  ;;  %v13698_v28 = vsel %vm942_vm4, %v16487_v62, %v16484_v27  ;;  %v13705_v47 = vsel %vm1281_vm5, %v16486_v8, %v16483_v40  ;;  %v2920_v58 = vmul.f32 %v13710_v34, %v2846_v56  ;;  %v17110_v17 = vld [vmem:[#allocation70_spill] sm:$0xff]  ;;  %v17114_v62 = vld [vmem:[#allocation95_spill] sm:$0xff] }
 0x292   : > { %17105 = vst [vmem:[#allocation39_spill] sm:$0xff] %v13689_v22  ;;  %17106 = vst [vmem:[#allocation59_spill] sm:$0xff] %v13698_v28  ;;  %v16489_v5 = vrot.slane %v13681_v19, 1  ;;  %v13714_v33 = vadd.f32 %v2311_v36, %v2265_v43  ;;  %v1587_v60 = vadd.f32 %v1546_v10, %v1248_v26  ;;  %v1573_v35 = vmul.f32 %v10425_v32, %v17108_v30  ;;  %v17111_v36 = vld [vmem:[#allocation89_spill] sm:$0xff]  ;;  %v17130_v8 = vld [vmem:[#allocation19_spill] sm:$0xff] }
 0x293   : > { %17107 = vst [vmem:[#allocation28_spill] sm:$0xff] %v13705_v47  ;;  %v2961_v40 = vadd.f32 %v2920_v58, %v2658_v37  ;;  %v17109_v63 = vrot.slane %v13459_v6, 1  ;;  %v13726_v56 = vmul.f32 %v13616_v42, %v17110_v17  ;;  %v1645_v10 = vmul.f32 %v13580_v59, %v17111_v36  ;;  %v17112_v43 = vld [vmem:[#allocation97_spill] sm:$0xff]  ;;  %v1173_v18 = vpop.permute.xlu0 %1172 }
 0x294   : > { %v1738_v27 = vpop.permute.xlu1 %1737  ;;  %v1896_v26 = vmul.f32 %v13589_v14, %v17112_v43  ;;  %v936_v37 = vmul.f32 %v13464_v38, %v875_v12  ;;  %v1234_v30 = vmul.f32 %v13453_v41, %v1173_v18  ;;  %v1675_v17 = vmul.f32 %v13580_v59, %v17114_v62  ;;  %v17116_v43 = vld [vmem:[#allocation83_spill] sm:$0xff] }
 0x295   : > { %v3128_v13 = vsel %vm606_vm3, %v16489_v5, %v17109_v63  ;;  %v3009_v58 = vadd.f32 %v13667_v54, %v2961_v40  ;;  %v17113_v63 = vld [vmem:[#allocation60_spill] sm:$0xff]  ;;  %v1686_v29 = vadd.f32 %v1645_v10, %v1587_v60  ;;  %v2211_v36 = vmul.f32 %v13616_v42, %v17099_v51  ;;  %v17115_v5 = vld [vmem:[#allocation82_spill] sm:$0xff]  ;;  %v17119_v18 = vld [vmem:[#allocation67_spill] sm:$0xff] }
 0x296   : > { %v3242_v32 = vmax.f32 %v13681_v19, %v3128_v13  ;;  %v17117_v47 = vmax.f32 %v17115_v5, %v17116_v43  ;;  %v17118_v13 = vld [vmem:[#allocation74_spill] sm:$0xff]  ;;  %v1275_v41 = vadd.f32 %v1234_v30, %v936_v37  ;;  %v1641_v62 = vmul.f32 %v13580_v59, %v17083_v44 }
 0x297   : > { %v13746_v38 = vmul.f32 %v13616_v42, %v17118_v13  ;;  %v13748_v40 = vmax.f32 %v3009_v58, 0.0  ;;  %v1937_v60 = vadd.f32 %v1896_v26, %v1686_v29  ;;  %v1672_v51 = vmul.f32 %v13580_v59, %v13523_v16  ;;  %v1874_v10 = vpop.permute.xlu0 %1873  ;;  %v17122_v59 = vld [vmem:[#allocation21_spill] sm:$0xff] }
 0x298   : > { %v3574_v28 = vmax.f32 %v3242_v32, %v17117_v47  ;;  %v13750_v12 = vpop.permute.xlu1 %2060  ;;  %v17120_v47 = vld [vmem:[#allocation71_spill] sm:$0xff]  ;;  %v1892_v32 = vmul.f32 %v13589_v14, %v1738_v27  ;;  %v1614_v58 = vadd.f32 %v1573_v35, %v1275_v41  ;;  %v1926_v37 = vmul.f32 %v13589_v14, %v1874_v10  ;;  %v17125_v27 = vld [vmem:[#allocation65_spill] sm:$0xff] }
 0x299   : > { %v1716_v5 = vadd.f32 %v1675_v17, %v17120_v47  ;;  %v16492_v30 = vrot.slane %v13748_v40, 1  ;;  %v2241_v43 = vmul.f32 %v13616_v42, %v17074_v61  ;;  %v2328_v44 = vmul.f32 %v13625_v4, %v17025_v0 }
 0x29a   : > { %9124 = vmatpush3.msra.mxu0 %v3574_v28  ;;  %v2252_v29 = vadd.f32 %v2211_v36, %v1937_v60  ;;  %v17121_v16 = vrot.slane %v17113_v63, 1  ;;  %v17123_v28 = vrot.slane %v17122_v59, 1  ;;  %v1682_v35 = vadd.f32 %v1641_v62, %v17125_v27  ;;  %v17127_v36 = vld [vmem:[#allocation23_spill] sm:$0xff] }
 0x29b   : > { %v1967_v17 = vadd.f32 %v1926_v37, %v1716_v5  ;;  %v17126_v41 = vrot.slane %v13514_v46, 1  ;;  %v13780_v0 = vadd.f32 %v1672_v51, %v1614_v58  ;;  %v2298_v60 = vmul.f32 %v13625_v4, %v17127_v36  ;;  %v13788_v5 = vpop.permute.xlu0 %2064 }
 0x29c   : > { %v13770_v26 = vsel %vm606_vm3, %v17123_v28, %v17121_v16  ;;  %v13773_v13 = vpop.permute.xlu1 %2068  ;;  %v2601_v10 = vmul.f32 %v13657_v9, %v13602_v31  ;;  %v17128_v16 = vld [vmem:[#allocation31_spill] sm:$0xff]  ;;  %v1933_v27 = vadd.f32 %v1892_v32, %v1682_v35  ;;  %v2207_v51 = vmul.f32 %v13616_v42, %v13788_v5 }
 0x29d   : > { %17124 = vst [vmem:[#allocation17_spill] sm:$0xff] %v13770_v26  ;;  %v3158_v47 = vsel %vm606_vm3, %v16492_v30, %v17126_v41  ;;  %v2208_v62 = vmul.f32 %v13616_v42, %v13773_v13  ;;  %v2631_v28 = vmul.f32 %v13657_v9, %v17128_v16  ;;  %v2282_v41 = vadd.f32 %v2241_v43, %v1967_v17  ;;  %v17129_v30 = vld [vmem:[#allocation49_spill] sm:$0xff] }
 0x29e   : > { %v3257_v37 = vmax.f32 %v13748_v40, %v3158_v47  ;;  %v2295_v58 = vmul.f32 %v13625_v4, %v13404_v55  ;;  %v2339_v36 = vadd.f32 %v2298_v60, %v2252_v29  ;;  %v17131_v63 = vmax.f32 %v17129_v30, %v17130_v8  ;;  %v17132_v60 = vld [vmem:[#allocation81_spill] sm:$0xff] }
 0x29f   : > { %v2249_v31 = vadd.f32 %v2208_v62, %v13538_v45  ;;  %v2294_v47 = vmul.f32 %v13625_v4, %v13609_v11  ;;  %v2369_v22 = vadd.f32 %v2328_v44, %v2282_v41  ;;  %v2248_v16 = vadd.f32 %v2207_v51, %v1933_v27  ;;  %v2475_v55 = vpop.permute.xlu0 %2474 }
 0x2a0   : > { %v3589_v50 = vmax.f32 %v3257_v37, %v17131_v63  ;;  %v2782_v32 = vpop.permute.xlu1 %2781  ;;  %v16496_v43 = vrot.slane %v13459_v6, 2  ;;  %v2642_v35 = vadd.f32 %v2601_v10, %v2339_v36  ;;  %v16495_v29 = vrot.slane %v13459_v6, 3  ;;  %v17134_v37 = vld [vmem:[#allocation15_spill] sm:$0xff] }
 0x2a1   : > { %v2904_v17 = vmul.f32 %v13710_v34, %v2782_v32  ;;  %v13806_v45 = vadd.f32 %v2295_v58, %v2249_v31  ;;  %v2222_v8 = vmul.f32 %v13616_v42, %v17132_v60  ;;  %v2934_v11 = vmul.f32 %v13710_v34, %v17026_v39 }
 0x2a2   : > { %9125 = vmatprep.subr.mxu0 %v3589_v50  ;;  %v2672_v63 = vadd.f32 %v2631_v28, %v2369_v22  ;;  %v13812_v30 = vadd.f32 %v2294_v47, %v2248_v16  ;;  %v13816_v44 = vmul.f32 %v13625_v4, %v17074_v61  ;;  %v17133_v62 = vrot.slane %v17119_v18, 1 }
 0x2a3   : > { %v2945_v10 = vadd.f32 %v2904_v17, %v2642_v35  ;;  %v17135_v27 = vrot.slane %v17134_v37, 1  ;;  %v13829_v39 = vmul.f32 %v13625_v4, %v17004_v48  ;;  %v2313_v22 = vmul.f32 %v13625_v4, %v17054_v2  ;;  %v1798_v31 = vpop.permute.xlu0 %1797 }
 0x2a4   : > { %v2975_v61 = vadd.f32 %v2934_v11, %v2672_v63  ;;  %v13833_v28 = vpop.permute.xlu1 %2534  ;;  %v16497_v51 = vrot.slane %v13514_v46, 2  ;;  %v2616_v58 = vmul.f32 %v13657_v9, %v13650_v15  ;;  %v17137_v47 = vrot.slane %v13150_v24, 2  ;;  %v17139_v15 = vld [vmem:[#allocation68_spill] sm:$0xff] }
 0x2a5   : > { %v13825_v41 = vsel %vm606_vm3, %v17135_v27, %v17133_v62  ;;  %v2993_v36 = vadd.f32 %v13667_v54, %v2945_v10  ;;  %v17138_v16 = vrot.slane %v13150_v24, 3  ;;  %v13851_v32 = vmul.f32 %v13657_v9, %v17071_v3  ;;  %v17140_v11 = vld [vmem:[#allocation12_spill] sm:$0xff]  ;;  %v17141_v24 = vld [vmem:[#allocation73_spill] sm:$0xff] }
 0x2a6   : > { %17136 = vst [vmem:[#allocation42_spill] sm:$0xff] %v13825_v41  ;;  %v3292_v48 = vsel %vm942_vm4, %v16496_v43, %v17137_v47  ;;  %v13855_v35 = vmul.f32 %v13657_v9, %v17139_v15  ;;  %v3023_v17 = vadd.f32 %v13667_v54, %v2975_v61  ;;  %v1907_v60 = vmul.f32 %v13589_v14, %v1798_v31  ;;  %v17142_v47 = vld [vmem:[#allocation46_spill] sm:$0xff] }
 0x2a7   : > { %v3417_v2 = vsel %vm1281_vm5, %v16495_v29, %v17138_v16  ;;  %v13861_v63 = vmul.f32 %v13710_v34, %v17140_v11  ;;  %v2354_v10 = vadd.f32 %v2313_v22, %v17141_v24  ;;  %v13864_v62 = vmax.f32 %v2993_v36, 0.0  ;;  %v17143_v29 = vld [vmem:[#allocation51_spill] sm:$0xff]  ;;  %v2842_v24 = vpop.permute.xlu0 %2841 }
 0x2a8   : > { %v16499_v27 = vrot.slane %v13514_v46, 3  ;;  %v13867_v3 = vmax.f32 %v3023_v17, 0.0  ;;  %v1948_v16 = vadd.f32 %v1907_v60, %v17142_v47  ;;  %v1734_v15 = vpop.permute.xlu1 %1733  ;;  %v3532_v50 = vmax.f32 %v3292_v48, %v3417_v2 }
 0x2a9   : > { %v17144_v61 = vrot.slane %v17143_v29, 2  ;;  %v2657_v11 = vadd.f32 %v2616_v58, %v2354_v10  ;;  %v2309_v22 = vmul.f32 %v13625_v4, %v13661_v1  ;;  %v1891_v36 = vmul.f32 %v13589_v14, %v1734_v15 }
 0x2aa   : > { %v16498_v17 = vrot.slane %v13864_v62, 1  ;;  %v2263_v43 = vadd.f32 %v2222_v8, %v1948_v16  ;;  %v2919_v60 = vmul.f32 %v13710_v34, %v2842_v24  ;;  %v2206_v47 = vmul.f32 %v13616_v42, %v13750_v12 }
 0x2ab   : > { %v13875_v31 = vsel %vm942_vm4, %v16497_v51, %v17144_v61  ;;  %v17145_v61 = vld [vmem:[#allocation44_spill] sm:$0xff]  ;;  %v17146_v10 = vrot.slane %v13681_v19, 1  ;;  %v17147_v15 = vrot.slane %v17143_v29, 3  ;;  %v2205_v16 = vmul.f32 %v13616_v42, %v13567_v20  ;;  %v1870_v48 = vpop.permute.xlu0 %1869 }
 0x2ac   : > { %v1932_v58 = vadd.f32 %v1891_v36, %v17145_v61  ;;  %v2960_v24 = vadd.f32 %v2919_v60, %v2657_v11  ;;  %v2447_v51 = vpop.permute.xlu1 %2446  ;;  %v13900_v36 = vadd.f32 %v2309_v22, %v2263_v43  ;;  %v17149_v29 = vrot.slane %v13648_v52, 1 }
 0x2ad   : > { %v3126_v1 = vsel %vm606_vm3, %v16498_v17, %v17146_v10  ;;  %v3447_v8 = vsel %vm1281_vm5, %v16499_v27, %v17147_v15  ;;  %v3287_v10 = vrot.slane %v13681_v19, 2  ;;  %v17150_v17 = vrot.slane %v13867_v3, 1 }
 0x2ae   : > { %v3241_v2 = vmax.f32 %v13864_v62, %v3126_v1  ;;  %17148 = vst [vmem:[#allocation100_spill] sm:$0xff] %v13900_v36  ;;  %v13902_v61 = vadd.f32 %v2206_v47, %v1932_v58  ;;  %v17152_v20 = vrot.slane %v13648_v52, 2  ;;  %v17153_v11 = vrot.slane %v13867_v3, 2  ;;  %v17155_v1 = vld [vmem:[#allocation92_spill] sm:$0xff]  ;;  %v17157_v58 = vld [vmem:[#allocation53_spill] sm:$0xff] }
 0x2af   : > { %v13910_v15 = vsel %vm606_vm3, %v17150_v17, %v17149_v29  ;;  %v2297_v43 = vmul.f32 %v13625_v4, %v17091_v21  ;;  %v3008_v22 = vadd.f32 %v13667_v54, %v2960_v24  ;;  %v13926_v17 = vmul.f32 %v13710_v34, %v17155_v1  ;;  %v17156_v21 = vld [vmem:[#allocation37_spill] sm:$0xff]  ;;  %v2451_v41 = vpop.permute.xlu0 %2450 }
 0x2b0   : > { %17151 = vst [vmem:[#allocation22_spill] sm:$0xff] %v13910_v15  ;;  %v13917_v60 = vsel %vm942_vm4, %v17153_v11, %v17152_v20  ;;  %v3573_v47 = vmax.f32 %v3241_v2, %v3532_v50  ;;  %v2600_v29 = vmul.f32 %v13657_v9, %v2475_v55  ;;  %v3412_v27 = vrot.slane %v13681_v19, 3  ;;  %v2455_v50 = vpop.permute.xlu1 %2454 }
 0x2b1   : > { %17154 = vst [vmem:[#allocation41_spill] sm:$0xff] %v13917_v60  ;;  %v2204_v11 = vmul.f32 %v13616_v42, %v13573_v53  ;;  %v2338_v37 = vadd.f32 %v2297_v43, %v17156_v21  ;;  %v13934_v24 = vmax.f32 %v3008_v22, 0.0  ;;  %v3547_v2 = vmax.f32 %v13875_v31, %v3447_v8 }
 0x2b2   : > { %9126 = vmatpush3.msra.mxu0 %v3573_v47  ;;  %v2246_v1 = vadd.f32 %v2205_v16, %v17157_v58  ;;  %v17158_v55 = vrot.slane %v13459_v6, 2  ;;  %v3317_v20 = vrot.slane %v13748_v40, 2  ;;  %v17159_v53 = vrot.slane %v13648_v52, 3 }
 0x2b3   : > { %v17160_v43 = vrot.slane %v13867_v3, 3  ;;  %v3442_v31 = vrot.slane %v13748_v40, 3  ;;  %v16505_v16 = vrot.slane %v13934_v24, 3  ;;  %v2641_v58 = vadd.f32 %v2600_v29, %v2338_v37 }
 0x2b4   : > { %v13941_v19 = vsel %vm942_vm4, %v3287_v10, %v17158_v55  ;;  %v2615_v21 = vmul.f32 %v13657_v9, %v13833_v28  ;;  %v17162_v55 = vrot.slane %v13459_v6, 3  ;;  %v17163_v47 = vrot.slane %v13748_v40, 1 }
 0x2b5   : > { %v13949_v22 = vsel %vm1281_vm5, %v17160_v43, %v17159_v53  ;;  %v2778_v43 = vpop.permute.xlu1 %2777  ;;  %v17164_v26 = vrot.slane %v13934_v24, 1  ;;  %v3285_v37 = vrot.slane %v13864_v62, 2  ;;  %v17165_v29 = vrot.slane %v13934_v24, 2  ;;  %v2471_v53 = vpop.permute.xlu0 %2470 }
 0x2b6   : > { %17161 = vst [vmem:[#allocation43_spill] sm:$0xff] %v13949_v22  ;;  %v13960_v18 = vsel %vm1281_vm5, %v3412_v27, %v17162_v55  ;;  %v13978_v6 = vsel %vm1281_vm5, %v16505_v16, %v3442_v31  ;;  %v2903_v55 = vmul.f32 %v13710_v34, %v2778_v43  ;;  %v3410_v59 = vrot.slane %v13864_v62, 3 }
 0x2b7   : > { %v3156_v8 = vsel %vm606_vm3, %v17164_v26, %v17163_v47  ;;  %v13973_v28 = vsel %vm942_vm4, %v17165_v29, %v3317_v20  ;;  %17166 = vst [vmem:[#allocation58_spill] sm:$0xff] %v13978_v6  ;;  %v17167_v47 = vld [vmem:[#allocation75_spill] sm:$0xff]  ;;  %v2291_v29 = vmul.f32 %v13625_v4, %v13750_v12  ;;  %v3531_v60 = vmax.f32 %v13941_v19, %v13960_v18 }
 0x2b8   : > { %v3256_v40 = vmax.f32 %v13934_v24, %v3156_v8  ;;  %v2245_v22 = vadd.f32 %v2204_v11, %v17167_v47  ;;  %v17168_v16 = vrot.slane %v13514_v46, 2  ;;  %v2292_v8 = vmul.f32 %v13625_v4, %v13788_v5  ;;  %v17170_v47 = vld [vmem:[#allocation16_spill] sm:$0xff] }
 0x2b9   : > { %v2944_v36 = vadd.f32 %v2903_v55, %v2641_v58  ;;  %v17169_v26 = vrot.slane %v13514_v46, 3  ;;  %v2656_v12 = vadd.f32 %v2615_v21, %v17170_v47  ;;  %v2593_v6 = vmul.f32 %v13657_v9, %v2447_v51  ;;  %v2838_v19 = vpop.permute.xlu1 %2837  ;;  %v2531_v46 = vpop.permute.xlu0 %2530 }
 0x2ba   : > { %v13993_v43 = vsel %vm942_vm4, %v3317_v20, %v17168_v16  ;;  %v3588_v15 = vmax.f32 %v3256_v40, %v3547_v2  ;;  %v1925_v18 = vmul.f32 %v13589_v14, %v1870_v48  ;;  %v14006_v20 = vsel %vm942_vm4, %v3285_v37, %v3287_v10 }
 0x2bb   : > { %v14000_v11 = vsel %vm1281_vm5, %v3442_v31, %v17169_v26  ;;  %v2595_v16 = vmul.f32 %v13657_v9, %v2455_v50  ;;  %v2992_v5 = vadd.f32 %v13667_v54, %v2944_v36  ;;  %v2918_v2 = vmul.f32 %v13710_v34, %v2838_v19 }
 0x2bc   : > { %9127 = vmatprep.subr.mxu0 %v3588_v15  ;;  %v14012_v31 = vsel %vm1281_vm5, %v3410_v59, %v3412_v27  ;;  %v2332_v58 = vadd.f32 %v2291_v29, %v2245_v22  ;;  %v2293_v51 = vmul.f32 %v13625_v4, %v13773_v13  ;;  %v2594_v48 = vmul.f32 %v13657_v9, %v2451_v41 }
 0x2bd   : > { %v3546_v10 = vmax.f32 %v13993_v43, %v14000_v11  ;;  %v2333_v21 = vadd.f32 %v2292_v8, %v2246_v1  ;;  %v14019_v50 = vmax.f32 %v2992_v5, 0.0  ;;  %v2599_v36 = vmul.f32 %v13657_v9, %v2471_v53  ;;  %v2197_v40 = vpop.permute.xlu1 %2196  ;;  %v1866_v29 = vpop.permute.xlu0 %1865 }
 0x2be   : > { %v2959_v55 = vadd.f32 %v2918_v2, %v2656_v12  ;;  %v2634_v15 = vadd.f32 %v2593_v6, %v13596_v7  ;;  %v1966_v27 = vadd.f32 %v1925_v18, %v13560_v57  ;;  %v3530_v22 = vmax.f32 %v14006_v20, %v14012_v31  ;;  %v17172_v12 = vld [vmem:[#allocation101_spill] sm:$0xff] }
 0x2bf   : > { %v14027_v13 = vadd.f32 %v2293_v51, %v13902_v61  ;;  %v2636_v41 = vadd.f32 %v2595_v16, %v2333_v21  ;;  %v2240_v1 = vmul.f32 %v13616_v42, %v2197_v40  ;;  %v3121_v53 = vrot.slane %v14019_v50, 1 }
 0x2c0   : > { %v3007_v26 = vadd.f32 %v13667_v54, %v2959_v55  ;;  %v2635_v43 = vadd.f32 %v2594_v48, %v2332_v58  ;;  %v1924_v7 = vmul.f32 %v13589_v14, %v1866_v29  ;;  %v3283_v57 = vrot.slane %v14019_v50, 2 }
 0x2c1   : > { %v3408_v6 = vrot.slane %v14019_v50, 3  ;;  %v14036_v8 = vadd.f32 %v2599_v36, %v13636_v49  ;;  %v2281_v11 = vadd.f32 %v2240_v1, %v1966_v27  ;;  %v17171_v47 = vrot.slane %v13864_v62, 1  ;;  %v2750_v19 = vpop.permute.xlu1 %2749  ;;  %v2467_v58 = vpop.permute.xlu0 %2466 }
 0x2c2   : > { %v14038_v61 = vmax.f32 %v3007_v26, 0.0  ;;  %v1965_v18 = vadd.f32 %v1924_v7, %v17172_v12  ;;  %v14050_v5 = vsel %vm942_vm4, %v3283_v57, %v3285_v37  ;;  %v2896_v2 = vmul.f32 %v13710_v34, %v2750_v19 }
 0x2c3   : > { %v3124_v42 = vsel %vm606_vm3, %v3121_v53, %v17171_v47  ;;  %v14055_v49 = vsel %vm1281_vm5, %v3408_v6, %v3410_v59  ;;  %v2368_v62 = vadd.f32 %v13829_v39, %v2281_v11  ;;  %v2614_v21 = vmul.f32 %v13657_v9, %v2531_v46 }
 0x2c4   : > { %v3240_v16 = vmax.f32 %v14019_v50, %v3124_v42  ;;  %v3151_v51 = vrot.slane %v14038_v61, 1  ;;  %v3529_v48 = vmax.f32 %v14050_v5, %v14055_v49  ;;  %v2280_v37 = vadd.f32 %v13746_v38, %v1965_v18 }
 0x2c5   : > { %v3313_v55 = vrot.slane %v14038_v61, 2  ;;  %v2671_v59 = vadd.f32 %v13855_v35, %v2368_v62  ;;  %v2937_v27 = vadd.f32 %v2896_v2, %v2634_v15  ;;  %v17173_v39 = vrot.slane %v13934_v24, 1  ;;  %v2758_v7 = vpop.permute.xlu1 %2757 }
 0x2c6   : > { %v3572_v36 = vmax.f32 %v3240_v16, %v3531_v60  ;;  %v3438_v1 = vrot.slane %v14038_v61, 3  ;;  %v2367_v29 = vadd.f32 %v13816_v44, %v2280_v37  ;;  %v2598_v46 = vmul.f32 %v13657_v9, %v2467_v58  ;;  %v2754_v44 = vpop.permute.xlu0 %2753 }
 0x2c7   : > { %v3154_v26 = vsel %vm606_vm3, %v3151_v51, %v17173_v39  ;;  %v17174_v60 = vrot.slane %v13934_v24, 2  ;;  %v2974_v15 = vadd.f32 %v13926_v17, %v2671_v59  ;;  %v2985_v11 = vadd.f32 %v13667_v54, %v2937_v27 }
 0x2c8   : > { %9128 = vmatpush3.msra.mxu0 %v3572_v36  ;;  %v3255_v38 = vmax.f32 %v14038_v61, %v3154_v26  ;;  %v2898_v47 = vmul.f32 %v13710_v34, %v2758_v7  ;;  %v17175_v42 = vrot.slane %v13934_v24, 3  ;;  %v2670_v18 = vadd.f32 %v13851_v32, %v2367_v29 }
 0x2c9   : > { %v14080_v35 = vsel %vm942_vm4, %v3313_v55, %v17174_v60  ;;  %v2897_v19 = vmul.f32 %v13710_v34, %v2754_v44  ;;  %v2655_v62 = vadd.f32 %v2614_v21, %v13714_v33  ;;  %v3022_v2 = vadd.f32 %v13667_v54, %v2974_v15  ;;  %v2527_v27 = vpop.permute.xlu1 %2526 }
 0x2ca   : > { %v14090_v12 = vsel %vm1281_vm5, %v3438_v1, %v17175_v42  ;;  %v3587_v16 = vmax.f32 %v3255_v38, %v3546_v10  ;;  %v14098_v58 = vmax.f32 %v2985_v11, 0.0  ;;  %v2939_v24 = vadd.f32 %v2898_v47, %v2636_v41  ;;  %v2774_v21 = vpop.permute.xlu0 %2773 }
 0x2cb   : > { %v3544_v17 = vmax.f32 %v14080_v35, %v14090_v12  ;;  %v14101_v37 = vmul.f32 %v13625_v4, %v2197_v40  ;;  %v2973_v36 = vadd.f32 %v13861_v63, %v2670_v18  ;;  %v2639_v32 = vadd.f32 %v2598_v46, %v13806_v45 }
 0x2cc   : > { %v2938_v59 = vadd.f32 %v2897_v19, %v2635_v43  ;;  %9129 = vmatprep.subr.mxu0 %v3587_v16  ;;  %v14105_v10 = vmax.f32 %v3022_v2, 0.0  ;;  %v2987_v39 = vadd.f32 %v13667_v54, %v2939_v24  ;;  %v2613_v33 = vmul.f32 %v13657_v9, %v2527_v27 }
 0x2cd   : > { %v3230_v26 = vrot.slane %v14098_v58, 5  ;;  %v3021_v41 = vadd.f32 %v13667_v54, %v2973_v36  ;;  %v2902_v63 = vmul.f32 %v13710_v34, %v2774_v21  ;;  %v3390_v45 = vrot.slane %v14098_v58, 6  ;;  %v1862_v11 = vpop.permute.xlu1 %1861 }
 0x2ce   : > { %v2986_v4 = vadd.f32 %v13667_v54, %v2938_v59  ;;  %v14114_v40 = vmax.f32 %v2987_v39, 0.0  ;;  %v2654_v43 = vadd.f32 %v2613_v33, %v13674_v25  ;;  %v17176_v29 = vrot.slane %v13631_v23, 1  ;;  %v2834_v42 = vpop.permute.xlu0 %2833 }
 0x2cf   : > { %v3515_v7 = vrot.slane %v14098_v58, 7  ;;  %v14121_v38 = vmax.f32 %v3021_v41, 0.0  ;;  %v2943_v15 = vadd.f32 %v2902_v63, %v14036_v8  ;;  %v1923_v44 = vmul.f32 %v13589_v14, %v1862_v11 }
 0x2d0   : > { %v3232_v46 = vsel %vm651_vm0, %v17176_v29, %v3230_v26  ;;  %v14123_v60 = vmax.f32 %v2986_v4, 0.0  ;;  %v3393_v25 = vrot.slane %v14114_v40, 6  ;;  %v3518_v18 = vrot.slane %v14114_v40, 7 }
 0x2d1   : > { %v3273_v47 = vmax.f32 %v13631_v23, %v3232_v46  ;;  %v17177_v19 = vrot.slane %v13631_v23, 2  ;;  %v2991_v2 = vadd.f32 %v13667_v54, %v2943_v15  ;;  %v2917_v24 = vmul.f32 %v13710_v34, %v2834_v42  ;;  %v2770_v41 = vpop.permute.xlu1 %2769 }
 0x2d2   : > { %v3391_v8 = vrot.slane %v14123_v60, 6  ;;  %v3516_v36 = vrot.slane %v14123_v60, 7  ;;  %v1964_v59 = vadd.f32 %v1923_v44, %v13780_v0  ;;  %v17178_v14 = vrot.slane %v13631_v23, 3  ;;  %v2463_v46 = vpop.permute.xlu0 %2462 }
 0x2d3   : > { %v3398_v16 = vsel %vm949_vm1, %v17177_v19, %v3390_v45  ;;  %v3181_v39 = vrot.slane %v14105_v10, 1  ;;  %v3179_v33 = vrot.slane %v14121_v38, 1  ;;  %v14143_v21 = vmax.f32 %v2991_v2, 0.0 }
 0x2d4   : > { %v3523_v27 = vsel %vm1288_vm2, %v17178_v14, %v3515_v7  ;;  %v2958_v26 = vadd.f32 %v2917_v24, %v2655_v62  ;;  %v3394_v4 = vsel %vm949_vm1, %v3391_v8, %v3393_v25  ;;  %v3519_v63 = vsel %vm1288_vm2, %v3516_v36, %v3518_v18 }
 0x2d5   : > { %v2279_v29 = vadd.f32 %v13726_v56, %v1964_v59  ;;  %v2901_v0 = vmul.f32 %v13710_v34, %v2770_v41  ;;  %v3564_v23 = vmax.f32 %v3394_v4, %v3519_v63  ;;  %v3392_v15 = vsel %vm949_vm1, %v3390_v45, %v3391_v8  ;;  %v2830_v59 = vpop.permute.xlu1 %2829  ;;  %v17183_v41 = vld [vmem:[#allocation22_spill] sm:$0xff] }
 0x2d6   : > { %v3006_v11 = vadd.f32 %v13667_v54, %v2958_v26  ;;  %v2597_v44 = vmul.f32 %v13657_v9, %v2463_v46  ;;  %v3517_v42 = vsel %vm1288_vm2, %v3515_v7, %v3516_v36  ;;  %v3119_v62 = vrot.slane %v14143_v21, 1 }
 0x2d7   : > { %v2942_v19 = vadd.f32 %v2901_v0, %v2639_v32  ;;  %v3605_v25 = vmax.f32 %v3273_v47, %v3564_v23  ;;  %v3563_v2 = vmax.f32 %v3392_v15, %v3517_v42  ;;  %v3562_v18 = vmax.f32 %v3398_v16, %v3523_v27  ;;  %v2523_v47 = vpop.permute.xlu0 %2522  ;;  %v17180_v16 = vld [vmem:[#allocation39_spill] sm:$0xff] }
 0x2d8   : > { %v14154_v24 = vmax.f32 %v3006_v11, 0.0  ;;  %v2638_v56 = vadd.f32 %v2597_v44, %v13812_v30  ;;  %v3122_v45 = vsel %vm606_vm3, %v3119_v62, %v3121_v53  ;;  %v17179_v8 = vrot.slane %v13867_v3, 1  ;;  %v17185_v44 = vld [vmem:[#allocation100_spill] sm:$0xff] }
 0x2d9   : > { %v2990_v7 = vadd.f32 %v13667_v54, %v2942_v19  ;;  %v2916_v32 = vmul.f32 %v13710_v34, %v2830_v59  ;;  %9405 = vmatpush3.msk.msra.mxu1 %vm3685_vm7, %v3605_v25  ;;  %v17181_v36 = vmax.f32 %v13648_v52, %v17180_v16  ;;  %v3239_v27 = vmax.f32 %v14143_v21, %v3122_v45  ;;  %v2766_v19 = vpop.permute.xlu1 %2765  ;;  %v17186_v25 = vld [vmem:[#allocation59_spill] sm:$0xff] }
 0x2da   : > { %v3184_v14 = vsel %vm606_vm3, %v3181_v39, %v17179_v8  ;;  %v2612_v26 = vmul.f32 %v13657_v9, %v2523_v47  ;;  %v17182_v53 = vmov 0.0   ;;  %v17184_v4 = vmax.f32 %v13867_v3, %v17183_v41 }
 0x2db   : > { %v3604_v30 = vmax.f32 %v17181_v36, %v3563_v2  ;;  %9406 = vmatprep.subr.mxu1 %v17182_v53  ;;  %v3270_v0 = vmax.f32 %v14105_v10, %v3184_v14  ;;  %v3149_v46 = vrot.slane %v14154_v24, 1  ;;  %v14177_v23 = vmax.f32 %v2990_v7, 0.0  ;;  %v17187_v2 = vld [vmem:[#allocation28_spill] sm:$0xff]  ;;  %v17189_v7 = vld [vmem:[#allocation41_spill] sm:$0xff] }
 0x2dc   : > { %v3603_v63 = vmax.f32 %v17184_v4, %v3562_v18  ;;  %v2957_v15 = vadd.f32 %v2916_v32, %v2654_v43  ;;  %v3571_v52 = vmax.f32 %v3239_v27, %v3530_v22  ;;  %v3182_v11 = vsel %vm606_vm3, %v3179_v33, %v3181_v39  ;;  %v2459_v39 = vpop.permute.xlu0 %2458  ;;  %v17190_v32 = vld [vmem:[#allocation43_spill] sm:$0xff] }
 0x2dd   : > { %9407 = vmatpush3.msra.mxu1 %v3604_v30  ;;  %v2653_v42 = vadd.f32 %v2612_v26, %v17185_v44  ;;  %v17188_v18 = vmax.f32 %v17186_v25, %v17187_v2  ;;  %v3152_v43 = vsel %vm606_vm3, %v3149_v46, %v3151_v51  ;;  %v3269_v20 = vmax.f32 %v14121_v38, %v3182_v11  ;;  %v17192_v26 = vld [vmem:[#allocation58_spill] sm:$0xff] }
 0x2de   : > { %9408 = vmatprep.subr.mxu1 %v17182_v53  ;;  %v3005_v31 = vadd.f32 %v13667_v54, %v2957_v15  ;;  %v2900_v22 = vmul.f32 %v13710_v34, %v2766_v19  ;;  %9130 = vmatpush3.msra.mxu0 %v3571_v52  ;;  %v3254_v45 = vmax.f32 %v14154_v24, %v3152_v43  ;;  %v3117_v8 = vrot.slane %v14177_v23, 1  ;;  %v2762_v15 = vpop.permute.xlu1 %2761 }
 0x2df   : > { %v3602_v59 = vmax.f32 %v3270_v0, %v17188_v18  ;;  %9409 = vmatpush3.msra.mxu1 %v3603_v63  ;;  %v2596_v14 = vmul.f32 %v13657_v9, %v2459_v39  ;;  %v17191_v51 = vmax.f32 %v17189_v7, %v17190_v32  ;;  %v2366_v16 = vadd.f32 %v14101_v37, %v2279_v29 }
 0x2e0   : > { %9410 = vmatprep.subr.mxu1 %v17182_v53  ;;  %v3281_v36 = vrot.slane %v14143_v21, 2  ;;  %v14205_v30 = vmax.f32 %v3005_v31, 0.0  ;;  %v2941_v27 = vadd.f32 %v2900_v22, %v2638_v56  ;;  %v17193_v41 = vmax.f32 %v13973_v28, %v17192_v26 }
 0x2e1   : > { %v3601_v47 = vmax.f32 %v3269_v20, %v17191_v51  ;;  %9411 = vmatpush3.msra.mxu1 %v3602_v59  ;;  %v3120_v63 = vsel %vm606_vm3, %v3117_v8, %v3119_v62  ;;  %v2637_v0 = vadd.f32 %v2596_v14, %v14027_v13  ;;  %v3406_v29 = vrot.slane %v14143_v21, 3  ;;  %v2826_v62 = vpop.permute.xlu0 %2825 }
 0x2e2   : > { %v3586_v4 = vmax.f32 %v3254_v45, %v17193_v41  ;;  %9412 = vmatprep.subr.mxu1 %v17182_v53  ;;  %v3238_v52 = vmax.f32 %v14177_v23, %v3120_v63  ;;  %v3284_v37 = vsel %vm942_vm4, %v3281_v36, %v3283_v57  ;;  %v2989_v56 = vadd.f32 %v13667_v54, %v2941_v27  ;;  %v2890_v20 = vpop.permute.xlu1 %2889 }
 0x2e3   : > { %v2899_v28 = vmul.f32 %v13710_v34, %v2762_v15  ;;  %9413 = vmatpush3.msra.mxu1 %v3601_v47  ;;  %v3147_v13 = vrot.slane %v14205_v30, 1  ;;  %v3311_v11 = vrot.slane %v14154_v24, 2  ;;  %v2915_v44 = vmul.f32 %v13710_v34, %v2826_v62 }
 0x2e4   : > { %9131 = vmatprep.subr.mxu0 %v3586_v4  ;;  %v3570_v19 = vmax.f32 %v3238_v52, %v3529_v48  ;;  %v3409_v57 = vsel %vm1281_vm5, %v3406_v29, %v3408_v6  ;;  %v3436_v21 = vrot.slane %v14154_v24, 3  ;;  %9414 = vmatprep.subr.mxu1 %v17182_v53  ;;  %v14231_v25 = vmax.f32 %v2989_v56, 0.0 }
 0x2e5   : > { %v2940_v2 = vadd.f32 %v2899_v28, %v2637_v0  ;;  %v3150_v18 = vsel %vm606_vm3, %v3147_v13, %v3149_v46  ;;  %v3528_v59 = vmax.f32 %v3284_v37, %v3409_v57  ;;  %v2956_v43 = vadd.f32 %v2915_v44, %v2653_v42  ;;  %v2587_v24 = vpop.permute.xlu0 %2586 }
 0x2e6   : > { %9132 = vmatpush3.msra.mxu0 %v3570_v19  ;;  %v3253_v5 = vmax.f32 %v14205_v30, %v3150_v18  ;;  %v3314_v50 = vsel %vm942_vm4, %v3311_v11, %v3313_v55  ;;  %v3439_v6 = vsel %vm1281_vm5, %v3436_v21, %v3438_v1  ;;  %v2931_v48 = vmul.f32 %v13710_v34, %v2890_v20 }
 0x2e7   : > { %v2988_v49 = vadd.f32 %v13667_v54, %v2940_v2  ;;  %v3115_v46 = vrot.slane %v14231_v25, 1  ;;  %v3543_v42 = vmax.f32 %v3314_v50, %v3439_v6  ;;  %v3004_v31 = vadd.f32 %v13667_v54, %v2956_v43 }
 0x2e8   : > { %v2628_v22 = vmul.f32 %v13657_v9, %v2587_v24  ;;  %v3585_v55 = vmax.f32 %v3253_v5, %v3544_v17  ;;  %v3279_v61 = vrot.slane %v14177_v23, 2  ;;  %v3404_v34 = vrot.slane %v14177_v23, 3 }
 0x2e9   : > { %v14250_v39 = vmax.f32 %v2988_v49, 0.0  ;;  %v3118_v1 = vsel %vm606_vm3, %v3115_v46, %v3117_v8  ;;  %v3309_v45 = vrot.slane %v14205_v30, 2  ;;  %v3045_v14 = vmax.f32 %v3004_v31, 0.0 }
 0x2ea   : > { %v2669_v7 = vadd.f32 %v2628_v22, %v2366_v16  ;;  %9133 = vmatprep.subr.mxu0 %v3585_v55  ;;  %v3237_v32 = vmax.f32 %v14231_v25, %v3118_v1  ;;  %v3282_v9 = vsel %vm942_vm4, %v3279_v61, %v3281_v36  ;;  %v3407_v12 = vsel %vm1281_vm5, %v3404_v34, %v3406_v29 }
 0x2eb   : > { %v3113_v35 = vrot.slane %v14250_v39, 1  ;;  %v3312_v17 = vsel %vm942_vm4, %v3309_v45, %v3311_v11  ;;  %v3434_v51 = vrot.slane %v14205_v30, 3  ;;  %v3145_v23 = vrot.slane %v3045_v14, 1  ;;  %v17194_v30 = vld [vmem:[#allocation60_spill] sm:$0xff] }
 0x2ec   : > { %v2972_v8 = vadd.f32 %v2931_v48, %v2669_v7  ;;  %v3569_v47 = vmax.f32 %v3237_v32, %v3528_v59  ;;  %v3527_v27 = vmax.f32 %v3282_v9, %v3407_v12  ;;  %v3111_v41 = vrot.slane %v14114_v40, 1  ;;  %v17199_v7 = vld [vmem:[#allocation17_spill] sm:$0xff] }
 0x2ed   : > { %v3116_v26 = vsel %vm606_vm3, %v3113_v35, %v3115_v46  ;;  %v3437_v16 = vsel %vm1281_vm5, %v3434_v51, %v3436_v21  ;;  %v3277_v36 = vrot.slane %v14231_v25, 2  ;;  %v3148_v63 = vsel %vm606_vm3, %v3145_v23, %v3147_v13 }
 0x2ee   : > { %v3020_v4 = vadd.f32 %v13667_v54, %v2972_v8  ;;  %9134 = vmatpush3.msra.mxu0 %v3569_v47  ;;  %v3236_v0 = vmax.f32 %v14250_v39, %v3116_v26  ;;  %v17195_v15 = vrot.slane %v17194_v30, 1  ;;  %v3252_v37 = vmax.f32 %v3045_v14, %v3148_v63  ;;  %v17202_v8 = vld [vmem:[#allocation20_spill] sm:$0xff] }
 0x2ef   : > { %v3542_v56 = vmax.f32 %v3312_v17, %v3437_v16  ;;  %v3114_v28 = vsel %vm606_vm3, %v3111_v41, %v3113_v35  ;;  %v3280_v44 = vsel %vm942_vm4, %v3277_v36, %v3279_v61  ;;  %v3402_v57 = vrot.slane %v14231_v25, 3 }
 0x2f0   : > { %v3146_v52 = vsel %vm606_vm3, %v17195_v15, %v3145_v23  ;;  %v14273_v62 = vmax.f32 %v3020_v4, 0.0  ;;  %v3568_v11 = vmax.f32 %v3236_v0, %v3527_v27  ;;  %v3235_v54 = vmax.f32 %v14114_v40, %v3114_v28  ;;  %v17206_v4 = vld [vmem:[#allocation67_spill] sm:$0xff] }
 0x2f1   : > { %v3251_v29 = vmax.f32 %v17194_v30, %v3146_v52  ;;  %v3584_v13 = vmax.f32 %v3252_v37, %v3543_v42  ;;  %v3307_v21 = vrot.slane %v3045_v14, 2  ;;  %v3432_v2 = vrot.slane %v3045_v14, 3  ;;  %v17198_v14 = vld [vmem:[#allocation21_spill] sm:$0xff] }
 0x2f2   : > { %v3109_v18 = vrot.slane %v14123_v60, 1  ;;  %v3275_v59 = vrot.slane %v14250_v39, 2  ;;  %v3400_v43 = vrot.slane %v14250_v39, 3  ;;  %v3405_v20 = vsel %vm1281_vm5, %v3402_v57, %v3404_v34 }
 0x2f3   : > { %v3583_v19 = vmax.f32 %v3251_v29, %v3542_v56  ;;  %9135 = vmatprep.subr.mxu0 %v3584_v13  ;;  %v3310_v5 = vsel %vm942_vm4, %v3307_v21, %v3309_v45  ;;  %v17196_v50 = vrot.slane %v17194_v30, 2  ;;  %v3177_v49 = vrot.slane %v14273_v62, 1 }
 0x2f4   : > { %9136 = vmatpush3.msra.mxu0 %v3568_v11  ;;  %v3526_v25 = vmax.f32 %v3280_v44, %v3405_v20  ;;  %v3435_v48 = vsel %vm1281_vm5, %v3432_v2, %v3434_v51  ;;  %v3112_v24 = vsel %vm606_vm3, %v3109_v18, %v3111_v41  ;;  %v3278_v46 = vsel %vm942_vm4, %v3275_v59, %v3277_v36  ;;  %v17201_v51 = vld [vmem:[#allocation64_spill] sm:$0xff]  ;;  %v3610_v20 = vld [vmem:[%s16216_s9 + $0x20] sm:$0xff] }
 0x2f5   : > { %v3308_v6 = vsel %vm942_vm4, %v17196_v50, %v3307_v21  ;;  %9137 = vmatprep.subr.mxu0 %v3583_v19  ;;  %v3541_v42 = vmax.f32 %v3310_v5, %v3435_v48  ;;  %v3234_v31 = vmax.f32 %v14123_v60, %v3112_v24  ;;  %v3403_v22 = vsel %vm1281_vm5, %v3400_v43, %v3402_v57 }
 0x2f6   : > { %v17197_v55 = vrot.slane %v17194_v30, 3  ;;  %v3567_v39 = vmax.f32 %v3235_v54, %v3526_v25  ;;  %v3525_v1 = vmax.f32 %v3278_v46, %v3403_v22  ;;  %v3180_v45 = vsel %vm606_vm3, %v3177_v49, %v3179_v33  ;;  %v3609_v46 = vld [vmem:[%s16216_s9 + $0x18] sm:$0xff] }
 0x2f7   : > { %v17200_v32 = vmax.f32 %v17198_v14, %v17199_v7  ;;  %v3268_v35 = vmax.f32 %v14273_v62, %v3180_v45  ;;  %v3343_v60 = vrot.slane %v14105_v10, 2  ;;  %v3468_v12 = vrot.slane %v14105_v10, 3  ;;  %v3611_v45 = vld [vmem:[%s16216_s9 + $0x28] sm:$0xff] }
 0x2f8   : > { %v3433_v61 = vsel %vm1281_vm5, %v17197_v55, %v3432_v2  ;;  %9138 = vmatpush3.msra.mxu0 %v3567_v39  ;;  %v3566_v17 = vmax.f32 %v3234_v31, %v3525_v1  ;;  %v17203_v47 = vmax.f32 %v17201_v51, %v17202_v8  ;;  %v3108_v27 = vrot.slane %v14098_v58, 1  ;;  %v17213_v31 = vld [vmem:[#allocation45_spill] sm:$0xff]  ;;  %v3608_v39 = vld [vmem:[%s16216_s9 + $0x10] sm:$0xff]  ;;  %v3615_v14 = vld [vmem:[%s16216_s9 + $0x48] sm:$0xff] }
 0x2f9   : > { %v3540_v34 = vmax.f32 %v3308_v6, %v3433_v61  ;;  %v3582_v9 = vmax.f32 %v17200_v32, %v3541_v42  ;;  %v3274_v33 = vrot.slane %v14114_v40, 2  ;;  %v17204_v26 = vrot.slane %v13867_v3, 2  ;;  %v17212_v42 = vld [vmem:[#allocation40_spill] sm:$0xff]  ;;  %v3619_v7 = vld [vmem:[%s16216_s9 + $0x68] sm:$0xff]  ;;  %v3614_v32 = vld [vmem:[%s16216_s9 + $0x40] sm:$0xff] }
 0x2fa   : > { %v17205_v41 = vrot.slane %v13867_v3, 3  ;;  %v3399_v10 = vrot.slane %v14114_v40, 3  ;;  %v17207_v63 = vrot.slane %v17206_v4, 1  ;;  %v3110_v15 = vsel %vm606_vm3, %v3108_v27, %v3109_v18  ;;  %v17208_v18 = vld [vmem:[#allocation42_spill] sm:$0xff]  ;;  %v3613_v61 = vld [vmem:[%s16216_s9 + $0x38] sm:$0xff]  ;;  %v3612_v1 = vld [vmem:[%s16216_s9 + $0x30] sm:$0xff] }
 0x2fb   : > { %v3581_v23 = vmax.f32 %v17203_v47, %v3540_v34  ;;  %9139 = vmatprep.subr.mxu0 %v3582_v9  ;;  %v3346_v16 = vsel %vm942_vm4, %v3343_v60, %v17204_v26  ;;  %v3276_v52 = vsel %vm942_vm4, %v3274_v33, %v3275_v59  ;;  %v3233_v29 = vmax.f32 %v14098_v58, %v3110_v15  ;;  %v3606_v58 = vld [vmem:[%s16216_s9] sm:$0xff]  ;;  %v17209_v59 = vld [vmem:[#allocation15_spill] sm:$0xff] }
 0x2fc   : > { %v3471_v36 = vsel %vm1281_vm5, %v3468_v12, %v17205_v41  ;;  %v3178_v0 = vsel %vm606_vm3, %v17207_v63, %v3177_v49  ;;  %9140 = vmatpush3.msra.mxu0 %v3566_v17  ;;  %v3401_v3 = vsel %vm1281_vm5, %v3399_v10, %v3400_v43  ;;  %v3341_v56 = vrot.slane %v14121_v38, 2  ;;  %v3616_v34 = vld [vmem:[%s16216_s9 + $0x50] sm:$0xff]  ;;  %v3618_v9 = vld [vmem:[%s16216_s9 + $0x60] sm:$0xff]  ;;  %v3625_v17 = vld [vmem:[%s16216_s9 + $0x98] sm:$0xff] }
 0x2fd   : > { %v3559_v30 = vmax.f32 %v3346_v16, %v3471_v36  ;;  %v3267_v37 = vmax.f32 %v17206_v4, %v3178_v0  ;;  %9141 = vmatprep.subr.mxu0 %v3581_v23  ;;  %v3466_v40 = vrot.slane %v14121_v38, 3  ;;  %v3524_v11 = vmax.f32 %v3276_v52, %v3401_v3  ;;  %v3620_v51 = vld [vmem:[%s16216_s9 + $0x70] sm:$0xff]  ;;  %v3623_v23 = vld [vmem:[%s16216_s9 + $0x88] sm:$0xff]  ;;  %v3626_v26 = vld [vmem:[%s16216_s9 + $0xa0] sm:$0xff] }
 0x2fe   : > { %v3339_v54 = vrot.slane %v14273_v62, 2  ;;  %v3464_v44 = vrot.slane %v14273_v62, 3  ;;  %v3344_v13 = vsel %vm942_vm4, %v3341_v56, %v3343_v60  ;;  %v3266_v62 = vmax.f32 %v17209_v59, %v17208_v18  ;;  %v3617_v60 = vld [vmem:[%s16216_s9 + $0x58] sm:$0xff]  ;;  %v3624_v8 = vld [vmem:[%s16216_s9 + $0x90] sm:$0xff]  ;;  %v3627_v27 = vld [vmem:[%s16216_s9 + $0xa8] sm:$0xff] }
 0x2ff   : > { %v3600_v28 = vmax.f32 %v3268_v35, %v3559_v30  ;;  %v3469_v19 = vsel %vm1281_vm5, %v3466_v40, %v3468_v12  ;;  %v3565_v57 = vmax.f32 %v3233_v29, %v3524_v11  ;;  %v17210_v5 = vrot.slane %v17206_v4, 2  ;;  %v3622_v35 = vld [vmem:[%s16216_s9 + $0x80] sm:$0xff]  ;;  %v3621_v12 = vld [vmem:[%s16216_s9 + $0x78] sm:$0xff]  ;;  %v3628_v47 = vld [vmem:[%s16216_s9 + $0xb0] sm:$0xff] }
 0x300   : > { %v3558_v21 = vmax.f32 %v3344_v13, %v3469_v19  ;;  %v3342_v2 = vsel %vm942_vm4, %v3339_v54, %v3341_v56  ;;  %v3467_v38 = vsel %vm1281_vm5, %v3464_v44, %v3466_v40  ;;  %v17211_v6 = vrot.slane %v17206_v4, 3  ;;  %v3631_v33 = vld [vmem:[%s16216_s9 + $0xc8] sm:$0xff]  ;;  %v3630_v16 = vld [vmem:[%s16216_s9 + $0xc0] sm:$0xff]  ;;  %v3629_v36 = vld [vmem:[%s16216_s9 + $0xb8] sm:$0xff] }
 0x301   : > { %9415 = vmatpush3.msra.mxu1 %v3600_v28  ;;  %v3557_v43 = vmax.f32 %v3342_v2, %v3467_v38  ;;  %v3340_v50 = vsel %vm942_vm4, %v17210_v5, %v3339_v54  ;;  %9142 = vmatpush3.msra.mxu0 %v3565_v57  ;;  %v17214_v22 = vmax.f32 %v17212_v42, %v17213_v31  ;;  %v3634_v41 = vld [vmem:[%s16216_s9 + $0xe0] sm:$0xff]  ;;  %v3633_v10 = vld [vmem:[%s16216_s9 + $0xd8] sm:$0xff]  ;;  %v3632_v63 = vld [vmem:[%s16216_s9 + $0xd0] sm:$0xff] }
 0x302   : > { %9416 = vmatprep.subr.mxu1 %v17182_v53  ;;  %v3465_v49 = vsel %vm1281_vm5, %v17211_v6, %v3464_v44  ;;  %v3599_v25 = vmax.f32 %v3267_v37, %v3558_v21  ;;  %3754 = vmatmul.mubr.f32.vlgmr.msra.gmra.mxu0 %v3606_v58  ;;  %v3637_v4 = vld [vmem:[%s16216_s9 + $0xf8] sm:$0xff]  ;;  %v3636_v0 = vld [vmem:[%s16216_s9 + $0xf0] sm:$0xff]  ;;  %v3635_v15 = vld [vmem:[%s16216_s9 + $0xe8] sm:$0xff] }
 0x303   : > { %v3556_v48 = vmax.f32 %v3340_v50, %v3465_v49  ;;  %v3598_v24 = vmax.f32 %v3266_v62, %v3557_v43  ;;  %9493 = vmatprep.subr.bf16.mxu0 %v17182_v53  ;;  %3758 = vmatprep.mubr.f32.mxu0 %v3610_v20  ;;  %v3640_v30 = vld [vmem:[%s16216_s9 + $0x110] sm:$0xff]  ;;  %v3639_v52 = vld [vmem:[%s16216_s9 + $0x108] sm:$0xff]  ;;  %v3638_v29 = vld [vmem:[%s16216_s9 + $0x100] sm:$0xff] }
 0x304   : > { %9417 = vmatpush3.msra.mxu1 %v3599_v25  ;;  %v3643_v37 = vld [vmem:[%s16216_s9 + $0x128] sm:$0xf]  ;;  %v3642_v3 = vld [vmem:[%s16216_s9 + $0x120] sm:$0xf]  ;;  %v3641_v56 = vld [vmem:[%s16216_s9 + $0x118] sm:$0xff] }
 0x305   : > { %v3597_v55 = vmax.f32 %v17214_v22, %v3556_v48  ;;  %9418 = vmatprep.subr.mxu1 %v17182_v53  ;;  %v3644_v40 = vld [vmem:[%s16216_s9 + $0x130] sm:$0xf]  ;;  %v10061_v28 = vld [vmem:[%s17215_s3 + $0x18] sm:$0xff]   ;;  %v10062_v11 = vld [vmem:[%s17215_s3 + $0x8] sm:$0xff]  }
 0x306   : > { %9419 = vmatpush3.msra.mxu1 %v3598_v24  ;;  %3759 = vmatmul.mubr.f32.gmra.mxu0 %v3609_v46  ;;  %v10063_v54 = vld [vmem:[%s17215_s3 + $0x10] sm:$0xff]   ;;  %v10064_v44 = vld [vmem:[%s17215_s3] sm:$0xff]  }
 0x307   : > { %9420 = vmatprep.subr.mxu1 %v17182_v53  ;;  %3763 = vmatprep.mubr.f32.mxu0 %v3613_v61 }
 0x308   : > { %9421 = vmatpush3.msra.mxu1 %v3597_v55  ;;  %9494 = vmatpush3.bf16.msra.mxu0 %v10062_v11 }
 0x309   : > { %9423 = vmatmul.mubr.msk.f32.vlgmr.msra.gmra.mxu1 %vm3645_vm8, %v3608_v39  ;;  %9461 = vmatprep.subr.bf16.mxu1 %v17182_v53 }
 0x30a   : > { %9425 = vmatprep.mubr.msk.f32.mxu1 %vm10526_vm6, %v17182_v53  ;;  %3764 = vmatmul.mubr.f32.gmra.mxu0 %v3612_v1 }
 0x30b   : > { %3768 = vmatprep.mubr.f32.mxu0 %v3616_v34  ;;  %9462 = vmatpush3.bf16.msra.mxu1 %v10061_v28 }
 0x30c   : > { %9463 = vmatprep.subr.bf16.mxu1 %v17182_v53  ;;  %9495 = vmatprep.subr.bf16.mxu0 %v17182_v53 }
 0x30d   : > { %9426 = vmatmul.mubr.msk.f32.gmra.mxu1 %vm3645_vm8, %v3611_v45  ;;  %9496 = vmatpush3.bf16.msra.mxu0 %v10064_v44 }
 0x30e   : > { %9428 = vmatprep.mubr.msk.f32.mxu1 %vm10526_vm6, %v17182_v53  ;;  %3769 = vmatmul.mubr.f32.gmra.mxu0 %v3615_v14 }
 0x30f   : > { %3773 = vmatprep.mubr.f32.mxu0 %v3619_v7  ;;  %9464 = vmatpush3.bf16.msra.mxu1 %v10063_v54  ;;  %v10068_v54 = vld [vmem:[%s17215_s3 + $0x30] sm:$0xff]  }
 0x310   : > { %9525 = vmatprep.subr.bf16.mxu1 %v17182_v53  ;;  %9557 = vmatprep.subr.bf16.mxu0 %v17182_v53 }
 0x311   : > { %9429 = vmatmul.mubr.msk.f32.gmra.mxu1 %vm3645_vm8, %v3614_v32 }
 0x312   : > { %9431 = vmatprep.mubr.msk.f32.mxu1 %vm10526_vm6, %v17182_v53  ;;  %3774 = vmatmul.mubr.f32.gmra.mxu0 %v3618_v9 }
 0x313   : > { %3778 = vmatprep.mubr.f32.mxu0 %v3622_v35 }
 0x315   : > { %9432 = vmatmul.mubr.msk.f32.gmra.mxu1 %vm3645_vm8, %v3617_v60 }
 0x316   : > { %9434 = vmatprep.mubr.msk.f32.mxu1 %vm10526_vm6, %v17182_v53  ;;  %3779 = vmatmul.mubr.f32.gmra.mxu0 %v3621_v12 }
 0x317   : > { %3783 = vmatprep.mubr.f32.mxu0 %v3625_v17 }
 0x319   : > { %9435 = vmatmul.mubr.msk.f32.gmra.mxu1 %vm3645_vm8, %v3620_v51 }
 0x31a   : > { %9437 = vmatprep.mubr.msk.f32.mxu1 %vm10526_vm6, %v17182_v53  ;;  %3784 = vmatmul.mubr.f32.gmra.mxu0 %v3624_v8 }
 0x31b   : > { %3788 = vmatprep.mubr.f32.mxu0 %v3628_v47 }
 0x31d   : > { %9438 = vmatmul.mubr.msk.f32.gmra.mxu1 %vm3645_vm8, %v3623_v23 }
 0x31e   : > { %9440 = vmatprep.mubr.msk.f32.mxu1 %vm10526_vm6, %v17182_v53  ;;  %3789 = vmatmul.mubr.f32.gmra.mxu0 %v3627_v27 }
 0x31f   : > { %3793 = vmatprep.mubr.f32.mxu0 %v3631_v33 }
 0x321   : > { %9441 = vmatmul.mubr.msk.f32.gmra.mxu1 %vm3645_vm8, %v3626_v26 }
 0x322   : > { %9443 = vmatprep.mubr.msk.f32.mxu1 %vm10526_vm6, %v17182_v53  ;;  %3794 = vmatmul.mubr.f32.gmra.mxu0 %v3630_v16 }
 0x323   : > { %3798 = vmatprep.mubr.f32.mxu0 %v3634_v41 }
 0x325   : > { %9444 = vmatmul.mubr.msk.f32.gmra.mxu1 %vm3645_vm8, %v3629_v36 }
 0x326   : > { %9446 = vmatprep.mubr.msk.f32.mxu1 %vm10526_vm6, %v17182_v53  ;;  %3799 = vmatmul.mubr.f32.gmra.mxu0 %v3633_v10 }
 0x327   : > { %3803 = vmatprep.mubr.f32.mxu0 %v3637_v4 }
 0x329   : > { %9447 = vmatmul.mubr.msk.f32.gmra.mxu1 %vm3645_vm8, %v3632_v63 }
 0x32a   : > { %9449 = vmatprep.mubr.msk.f32.mxu1 %vm10526_vm6, %v17182_v53  ;;  %3804 = vmatmul.mubr.f32.gmra.mxu0 %v3636_v0 }
 0x32b   : > { %3808 = vmatprep.mubr.f32.mxu0 %v3640_v30 }
 0x32d   : > { %9450 = vmatmul.mubr.msk.f32.gmra.mxu1 %vm3645_vm8, %v3635_v15 }
 0x32e   : > { %9452 = vmatprep.mubr.msk.f32.mxu1 %vm10526_vm6, %v17182_v53  ;;  %3809 = vmatmul.mubr.f32.gmra.mxu0 %v3639_v52 }
 0x32f   : > { %3813 = vmatprep.mubr.f32.mxu0 %v3643_v37 }
 0x331   : > { %9453 = vmatmul.mubr.msk.f32.gmra.mxu1 %vm3645_vm8, %v3638_v29 }
 0x332   : > { %9455 = vmatprep.mubr.msk.f32.mxu1 %vm10526_vm6, %v17182_v53  ;;  %3814 = vmatmul.mubr.f32.gmra.mxu0 %v3642_v3 }
 0x333   : > { %9497 = vmatprep.mubr.msk.bf16.mxu0 %vm10526_vm6, %v17182_v53 }
 0x335   : > { %9456 = vmatmul.mubr.msk.f32.gmra.mxu1 %vm3645_vm8, %v3641_v56 }
 0x336   : > { %9458 = vmatprep.mubr.msk.f32.mxu1 %vm10526_vm6, %v17182_v53 }
 0x339   : > { %9459 = vmatmul.mubr.msk.f32.gmra.mxu1 %vm3645_vm8, %v3644_v40 }
 0x33a   : > { %9465 = vmatprep.mubr.msk.bf16.mxu1 %vm10526_vm6, %v17182_v53 }
 0x3c2   : > { %v9143_v13 = vpop.f32.mrf.mxu0 }
 0x3c4   : > { %v9144_v19 = vpop.f32.mrf.mxu0 }
 0x3c5   : > { %v9145_v58 = vadd.f32 %v9144_v19, %v9143_v13 }
 0x3c6   : > { %v9146_v57 = vpop.f32.mrf.mxu0 }
 0x3c8   : > { %v9147_v2 = vpop.f32.mrf.mxu0 }
 0x3c9   : > { %v3885_v21 = vpop.f32.mrf.mxu1  ;;  %v9148_v38 = vadd.f32 %v9147_v2, %v9146_v57 }
 0x3ca   : > { %v9149_v59 = vpop.f32.mrf.mxu0  ;;  %v14519_v62 = vadd.f32 %v9145_v58, %v3885_v21 }
 0x3cb   : > { %v9424_v18 = vpop.f32.mrf.mxu1 }
 0x3cc   : > { %v9150_v20 = vpop.f32.mrf.mxu0  ;;  %v4788_v25 = vrot.slane %v14519_v62, 1 }
 0x3cd   : > { %v3890_v43 = vpop.f32.mrf.mxu1  ;;  %v9151_v50 = vadd.f32 %v9150_v20, %v9149_v59 }
 0x3ce   : > { %v14521_v5 = vadd.f32 %v9148_v38, %v3890_v43  ;;  %v9152_v49 = vpop.f32.mrf.mxu0 }
 0x3cf   : > { %v9427_v6 = vpop.f32.mrf.mxu1 }
 0x3d0   : > { %v9153_v24 = vpop.f32.mrf.mxu0  ;;  %v4789_v42 = vrot.slane %v14521_v5, 1  ;;  %v5107_v17 = vrot.slane %v14521_v5, 2 }
 0x3d1   : > { %v3895_v48 = vpop.f32.mrf.mxu1  ;;  %v9154_v22 = vadd.f32 %v9153_v24, %v9152_v49 }
 0x3d2   : > { %v14527_v31 = vadd.f32 %v9151_v50, %v3895_v48  ;;  %v9155_v61 = vpop.f32.mrf.mxu0  ;;  %v14530_v39 = vsel %vm606_vm3, %v4788_v25, %v4789_v42 }
 0x3d3   : > { %v9430_v55 = vpop.f32.mrf.mxu1 }
 0x3d4   : > { %v9156_v34 = vpop.f32.mrf.mxu0  ;;  %v4791_v45 = vrot.slane %v14527_v31, 1  ;;  %v5108_v32 = vrot.slane %v14527_v31, 2 }
 0x3d5   : > { %v3900_v1 = vpop.f32.mrf.mxu1  ;;  %v9157_v7 = vadd.f32 %v9156_v34, %v9155_v61 }
 0x3d6   : > { %v14533_v14 = vadd.f32 %v9154_v22, %v3900_v1  ;;  %v9158_v35 = vpop.f32.mrf.mxu0  ;;  %v14537_v60 = vsel %vm606_vm3, %v4789_v42, %v4791_v45  ;;  %v14549_v36 = vsel %vm942_vm4, %v5107_v17, %v5108_v32 }
 0x3d7   : > { %v9433_v9 = vpop.f32.mrf.mxu1 }
 0x3d8   : > { %v5110_v12 = vrot.slane %v14533_v14, 2  ;;  %v9159_v8 = vpop.f32.mrf.mxu0  ;;  %v4793_v41 = vrot.slane %v14533_v14, 1 }
 0x3d9   : > { %v3905_v51 = vpop.f32.mrf.mxu1  ;;  %v9160_v33 = vadd.f32 %v9159_v8, %v9158_v35 }
 0x3da   : > { %v14545_v27 = vadd.f32 %v9157_v7, %v3905_v51  ;;  %v9161_v16 = vpop.f32.mrf.mxu0  ;;  %v14552_v10 = vsel %vm942_vm4, %v5108_v32, %v5110_v12  ;;  %v14555_v0 = vsel %vm606_vm3, %v4791_v45, %v4793_v41 }
 0x3db   : > { %v9436_v26 = vpop.f32.mrf.mxu1 }
 0x3dc   : > { %v9162_v63 = vpop.f32.mrf.mxu0  ;;  %v4795_v30 = vrot.slane %v14545_v27, 1  ;;  %v5112_v40 = vrot.slane %v14545_v27, 2 }
 0x3dd   : > { %v3910_v4 = vpop.f32.mrf.mxu1  ;;  %v9163_v37 = vadd.f32 %v9162_v63, %v9161_v16 }
 0x3de   : > { %v14560_v52 = vadd.f32 %v9160_v33, %v3910_v4  ;;  %v9164_v3 = vpop.f32.mrf.mxu0  ;;  %v14563_v56 = vsel %vm606_vm3, %v4793_v41, %v4795_v30  ;;  %v14579_v18 = vsel %vm942_vm4, %v5110_v12, %v5112_v40 }
 0x3df   : > { %v9439_v29 = vpop.f32.mrf.mxu1 }
 0x3e0   : > { %v9165_v11 = vpop.f32.mrf.mxu0  ;;  %v4797_v19 = vrot.slane %v14560_v52, 1  ;;  %v5114_v59 = vrot.slane %v14560_v52, 2 }
 0x3e1   : > { %v3915_v28 = vpop.f32.mrf.mxu1  ;;  %v9166_v58 = vadd.f32 %v9165_v11, %v9164_v3 }
 0x3e2   : > { %v14573_v57 = vadd.f32 %v9163_v37, %v3915_v28  ;;  %v9167_v2 = vpop.f32.mrf.mxu0  ;;  %v14576_v38 = vsel %vm606_vm3, %v4795_v30, %v4797_v19  ;;  %v14586_v49 = vsel %vm942_vm4, %v5112_v40, %v5114_v59 }
 0x3e3   : > { %v9442_v21 = vpop.f32.mrf.mxu1 }
 0x3e4   : > { %v9168_v20 = vpop.f32.mrf.mxu0  ;;  %v4799_v50 = vrot.slane %v14573_v57, 1  ;;  %v5116_v55 = vrot.slane %v14573_v57, 2 }
 0x3e5   : > { %v3920_v43 = vpop.f32.mrf.mxu1  ;;  %v9169_v48 = vadd.f32 %v9168_v20, %v9167_v2 }
 0x3e6   : > { %v14588_v25 = vadd.f32 %v9166_v58, %v3920_v43  ;;  %v9170_v42 = vpop.f32.mrf.mxu0  ;;  %v14591_v22 = vsel %vm606_vm3, %v4797_v19, %v4799_v50  ;;  %v14607_v8 = vsel %vm942_vm4, %v5114_v59, %v5116_v55  ;;  %v16510_v59 = vrot.slane %v14527_v31, 6 }
 0x3e7   : > { %v9445_v24 = vpop.f32.mrf.mxu1 }
 0x3e8   : > { %v9171_v1 = vpop.f32.mrf.mxu0  ;;  %v4801_v7 = vrot.slane %v14588_v25, 1  ;;  %v5118_v33 = vrot.slane %v14588_v25, 2 }
 0x3e9   : > { %v3925_v61 = vpop.f32.mrf.mxu1  ;;  %v9172_v35 = vadd.f32 %v9171_v1, %v9170_v42 }
 0x3ea   : > { %v14601_v9 = vadd.f32 %v9169_v48, %v3925_v61  ;;  %v9173_v17 = vpop.f32.mrf.mxu0  ;;  %v14604_v51 = vsel %vm606_vm3, %v4799_v50, %v4801_v7  ;;  %v14614_v63 = vsel %vm942_vm4, %v5116_v55, %v5118_v33 }
 0x3eb   : > { %v9448_v12 = vpop.f32.mrf.mxu1 }
 0x3ec   : > { %v9174_v16 = vpop.f32.mrf.mxu0  ;;  %v4803_v41 = vrot.slane %v14601_v9, 1  ;;  %v5120_v28 = vrot.slane %v14601_v9, 2 }
 0x3ed   : > { %v3930_v26 = vpop.f32.mrf.mxu1  ;;  %v9175_v37 = vadd.f32 %v9174_v16, %v9173_v17 }
 0x3ee   : > { %v14616_v30 = vadd.f32 %v9172_v35, %v3930_v26  ;;  %v9176_v3 = vpop.f32.mrf.mxu0  ;;  %v14619_v40 = vsel %vm606_vm3, %v4801_v7, %v4803_v41  ;;  %v14635_v42 = vsel %vm942_vm4, %v5118_v33, %v5120_v28 }
 0x3ef   : > { %v9451_v29 = vpop.f32.mrf.mxu1 }
 0x3f0   : > { %v9177_v19 = vpop.f32.mrf.mxu0  ;;  %v4805_v2 = vrot.slane %v14616_v30, 1  ;;  %v5122_v55 = vrot.slane %v14616_v30, 2  ;;  %v4019_v29 = vrot.slane %v14519_v62, 6  ;;  %v5293_v47 = vrot.slane %v14616_v30, 3 }
 0x3f1   : > { %v3935_v11 = vpop.f32.mrf.mxu1  ;;  %v9178_v20 = vadd.f32 %v9177_v19, %v9176_v3 }
 0x3f2   : > { %v14629_v43 = vadd.f32 %v9175_v37, %v3935_v11  ;;  %v9179_v48 = vpop.f32.mrf.mxu0  ;;  %v14632_v24 = vsel %vm606_vm3, %v4803_v41, %v4805_v2  ;;  %v14642_v12 = vsel %vm942_vm4, %v5120_v28, %v5122_v55  ;;  %v3967_v37 = vrot.slane %v14519_v62, 5 }
 0x3f3   : > { %v9454_v50 = vpop.f32.mrf.mxu1  ;;  %v5278_v28 = vrot.slane %v14521_v5, 3 }
 0x3f4   : > { %v9180_v1 = vpop.f32.mrf.mxu0  ;;  %v4807_v7 = vrot.slane %v14629_v43, 1  ;;  %v5279_v50 = vrot.slane %v14527_v31, 3  ;;  %v5124_v32 = vrot.slane %v14629_v43, 2  ;;  %v5295_v46 = vrot.slane %v14629_v43, 3 }
 0x3f5   : > { %v3940_v61 = vpop.f32.mrf.mxu1  ;;  %v9181_v26 = vadd.f32 %v9180_v1, %v9179_v48  ;;  %v3968_v1 = vrot.slane %v14521_v5, 5 }
 0x3f6   : > { %v14644_v17 = vadd.f32 %v9178_v20, %v3940_v61  ;;  %v14647_v41 = vsel %vm606_vm3, %v4805_v2, %v4807_v7  ;;  %v4020_v61 = vrot.slane %v14521_v5, 6  ;;  %v5281_v20 = vrot.slane %v14533_v14, 3 }
 0x3f7   : > { %v9457_v16 = vpop.f32.mrf.mxu1  ;;  %v14734_v13 = vsel %vm1281_vm5, %v5278_v28, %v5279_v50 }
 0x3f8   : > { %v3951_v33 = vrot.slane %v14644_v17, 1  ;;  %v16508_v4 = vrot.slane %v14644_v17, 7  ;;  %v14691_v58 = vsel %vm949_vm1, %v4019_v29, %v4020_v61  ;;  %v16511_v45 = vrot.slane %v14644_v17, 3 }
 0x3f9   : > { %v3945_v3 = vpop.f32.mrf.mxu1 }
 0x3fa   : > { %v14655_v19 = vadd.f32 %v9181_v26, %v3945_v3  ;;  %v14660_v2 = vsel %vm606_vm3, %v4807_v7, %v3951_v33  ;;  %v4014_v26 = vrot.slane %v14644_v17, 2  ;;  %v16509_v7 = vrot.slane %v14527_v31, 5 }
 0x3fb   : > { %v9460_v48 = vpop.f32.mrf.mxu1 }
 0x3fc   : > { %v3952_v35 = vrot.slane %v14655_v19, 1  ;;  %v4015_v3 = vrot.slane %v14655_v19, 2  ;;  %v4495_v48 = vrot.slane %v14655_v19, 7  ;;  %v14731_v34 = vsel %vm942_vm4, %v5124_v32, %v4014_v26 }
 0x3fe   : > { %v14676_v6 = vsel %vm606_vm3, %v3951_v33, %v3952_v35  ;;  %v14679_v16 = vsel %vm651_vm0, %v3952_v35, %v3967_v37  ;;  %v4016_v15 = vsel %vm942_vm4, %v4014_v26, %v4015_v3  ;;  %v4054_v44 = vsel %vm949_vm1, %v4015_v3, %v4019_v29  ;;  %v10065_v35 = vld [vmem:[%s17215_s3 + $0x28] sm:$0xff]   ;;  %v10066_v33 = vld [vmem:[%s17215_s3 + $0x38] sm:$0xff]  }
 0x3ff   : > { %v14684_v11 = vpack.c.bf16 %v4054_v44, %v4016_v15  ;;  %v14688_v21 = vpack.c.bf16 %v14679_v16, %v14676_v6  ;;  %v4023_v15 = vsel %vm949_vm1, %v4020_v61, %v16510_v59  ;;  %v14703_v44 = vsel %vm651_vm0, %v3967_v37, %v3968_v1  ;;  %v10067_v61 = vld [vmem:[%s17215_s3 + $0x20] sm:$0xff]  }
 0x400   : > { %v14708_v29 = vsel %vm1288_vm2, %v16508_v4, %v4495_v48  ;;  %v3971_v37 = vsel %vm651_vm0, %v3968_v1, %v16509_v7  ;;  %v5283_v48 = vrot.slane %v14545_v27, 3  ;;  %v14728_v3 = vsel %vm942_vm4, %v5122_v55, %v5124_v32 }
 0x401   : > { %9466 = vmatmul.mubr.msk.bf16.vlgmr.msra.gmra.mxu1 %vm4078_vm9, %v14684_v11  ;;  %9498 = vmatmul.mubr.msk.bf16.vlgmr.msra.gmra.mxu0 %vm4078_vm9, %v14688_v21  ;;  %v5285_v1 = vrot.slane %v14560_v52, 3  ;;  %v14746_v32 = vsel %vm1281_vm5, %v5279_v50, %v5281_v20  ;;  %v5287_v26 = vrot.slane %v14573_v57, 3  ;;  %v5289_v55 = vrot.slane %v14588_v25, 3 }
 0x402   : > { %9469 = vmatprep.mubr.msk.bf16.mxu1 %vm10526_vm6, %v17182_v53  ;;  %9501 = vmatprep.mubr.msk.bf16.mxu0 %vm10526_vm6, %v17182_v53  ;;  %v14749_v28 = vsel %vm1281_vm5, %v5281_v20, %v5283_v48  ;;  %v5291_v50 = vrot.slane %v14601_v9, 3  ;;  %v4060_v4 = vpack.c.bf16 %v4023_v15, %v14691_v58  ;;  %v14782_v59 = vsel %vm1281_vm5, %v5293_v47, %v5295_v46 }
 0x403   : > { %9526 = vmatpush3.bf16.msra.mxu1 %v10065_v35  ;;  %9558 = vmatpush3.bf16.msra.mxu0 %v10066_v33  ;;  %v14757_v33 = vsel %vm1281_vm5, %v5283_v48, %v5285_v1  ;;  %v14764_v23 = vsel %vm1281_vm5, %v5285_v1, %v5287_v26  ;;  %v4008_v35 = vpack.c.bf16 %v3971_v37, %v14703_v44  ;;  %v4026_v15 = vrot.slane %v14545_v27, 6 }
 0x404   : > { %9527 = vmatprep.subr.bf16.mxu1 %v17182_v53  ;;  %9559 = vmatprep.subr.bf16.mxu0 %v17182_v53  ;;  %v14771_v48 = vsel %vm1281_vm5, %v5287_v26, %v5289_v55  ;;  %v14774_v7 = vsel %vm1281_vm5, %v5289_v55, %v5291_v50  ;;  %v14779_v20 = vsel %vm1281_vm5, %v5291_v50, %v5293_v47  ;;  %v3974_v37 = vrot.slane %v14545_v27, 5 }
 0x405   : > { %17216 = vst [vmem:[#allocation11_spill] sm:$0xff] %v14782_v59  ;;  %v4024_v55 = vrot.slane %v14533_v14, 6  ;;  %v3972_v26 = vrot.slane %v14533_v14, 5  ;;  %v17219_v47 = vrot.slane %v14527_v31, 5  ;;  %v4030_v59 = vrot.slane %v14573_v57, 6 }
 0x407   : > { %9528 = vmatpush3.bf16.msra.mxu1 %v10067_v61  ;;  %9560 = vmatpush3.bf16.msra.mxu0 %v10068_v54  ;;  %v14793_v61 = vsel %vm1281_vm5, %v5295_v46, %v16511_v45  ;;  %v4027_v46 = vsel %vm949_vm1, %v4024_v55, %v4026_v15  ;;  %v3975_v50 = vsel %vm651_vm0, %v3972_v26, %v3974_v37 }
 0x408   : > { %9589 = vmatprep.subr.bf16.mxu1 %v17182_v53  ;;  %9621 = vmatprep.subr.bf16.mxu0 %v17182_v53  ;;  %17217 = vst [vmem:[#allocation78_spill] sm:$0xff] %v14793_v61  ;;  %v3973_v54 = vsel %vm651_vm0, %v17219_v47, %v3972_v26  ;;  %v3978_v61 = vrot.slane %v14573_v57, 5  ;;  %v3976_v47 = vrot.slane %v14560_v52, 5 }
 0x409   : > { %9470 = vmatmul.mubr.msk.bf16.gmra.mxu1 %vm4078_vm9, %v4060_v4  ;;  %9502 = vmatmul.mubr.msk.bf16.gmra.mxu0 %vm4078_vm9, %v4008_v35  ;;  %v17218_v4 = vrot.slane %v14527_v31, 6  ;;  %v4009_v45 = vpack.c.bf16 %v3975_v50, %v3973_v54 }
 0x40a   : > { %9473 = vmatprep.mubr.msk.bf16.mxu1 %vm10526_vm6, %v17182_v53  ;;  %9505 = vmatprep.mubr.msk.bf16.mxu0 %vm10526_vm6, %v17182_v53  ;;  %v3979_v26 = vsel %vm651_vm0, %v3976_v47, %v3978_v61 }
 0x40b   : > { %v4025_v35 = vsel %vm949_vm1, %v17218_v4, %v4024_v55  ;;  %v4028_v55 = vrot.slane %v14560_v52, 6  ;;  %v4034_v4 = vrot.slane %v14601_v9, 6 }
 0x40c   : > { %v4061_v1 = vpack.c.bf16 %v4027_v46, %v4025_v35  ;;  %v3982_v35 = vrot.slane %v14601_v9, 5 }
 0x40d   : > { %v4031_v54 = vsel %vm949_vm1, %v4028_v55, %v4030_v59  ;;  %v4029_v46 = vsel %vm949_vm1, %v4026_v15, %v4028_v55  ;;  %v4032_v15 = vrot.slane %v14588_v25, 6 }
 0x40e   : > { %v4062_v50 = vpack.c.bf16 %v4031_v54, %v4029_v46 }
 0x40f   : > { %v4035_v55 = vsel %vm949_vm1, %v4032_v15, %v4034_v4  ;;  %v4033_v54 = vsel %vm949_vm1, %v4030_v59, %v4032_v15  ;;  %v4036_v59 = vrot.slane %v14616_v30, 6 }
 0x410   : > { %v4063_v46 = vpack.c.bf16 %v4035_v55, %v4033_v54 }
 0x411   : > { %9474 = vmatmul.mubr.msk.bf16.gmra.mxu1 %vm4078_vm9, %v4061_v1  ;;  %9506 = vmatmul.mubr.msk.bf16.gmra.mxu0 %vm4078_vm9, %v4009_v45  ;;  %v3977_v1 = vsel %vm651_vm0, %v3974_v37, %v3976_v47  ;;  %v3980_v37 = vrot.slane %v14588_v25, 5  ;;  %v4037_v55 = vsel %vm949_vm1, %v4034_v4, %v4036_v59 }
 0x412   : > { %9477 = vmatprep.mubr.msk.bf16.mxu1 %vm10526_vm6, %v17182_v53  ;;  %9509 = vmatprep.mubr.msk.bf16.mxu0 %vm10526_vm6, %v17182_v53  ;;  %v4010_v45 = vpack.c.bf16 %v3979_v26, %v3977_v1 }
 0x413   : > { %v3983_v47 = vsel %vm651_vm0, %v3980_v37, %v3982_v35  ;;  %v3981_v26 = vsel %vm651_vm0, %v3978_v61, %v3980_v37  ;;  %v3984_v61 = vrot.slane %v14616_v30, 5 }
 0x414   : > { %v4011_v1 = vpack.c.bf16 %v3983_v47, %v3981_v26 }
 0x415   : > { %v3985_v47 = vsel %vm651_vm0, %v3982_v35, %v3984_v61 }
 0x419   : > { %9478 = vmatmul.mubr.msk.bf16.gmra.mxu1 %vm4078_vm9, %v4062_v50  ;;  %9510 = vmatmul.mubr.msk.bf16.gmra.mxu0 %vm4078_vm9, %v4010_v45  ;;  %v4038_v50 = vrot.slane %v14629_v43, 6  ;;  %v3986_v45 = vrot.slane %v14629_v43, 5 }
 0x41a   : > { %9481 = vmatprep.mubr.msk.bf16.mxu1 %vm10526_vm6, %v17182_v53  ;;  %9513 = vmatprep.mubr.msk.bf16.mxu0 %vm10526_vm6, %v17182_v53 }
 0x41b   : > { %v4039_v15 = vsel %vm949_vm1, %v4036_v59, %v4038_v50  ;;  %v3987_v37 = vsel %vm651_vm0, %v3984_v61, %v3986_v45 }
 0x41c   : > { %v4064_v54 = vpack.c.bf16 %v4039_v15, %v4037_v55  ;;  %v4012_v26 = vpack.c.bf16 %v3987_v37, %v3985_v47  ;;  %v4310_v15 = vrot.slane %v14655_v19, 3  ;;  %v4314_v37 = vrot.slane %v14519_v62, 7 }
 0x41e   : > { %v4349_v47 = vsel %vm1288_vm2, %v4310_v15, %v4314_v37 }
 0x421   : > { %9482 = vmatmul.mubr.msk.bf16.gmra.mxu1 %vm4078_vm9, %v4063_v46  ;;  %9514 = vmatmul.mubr.msk.bf16.gmra.mxu0 %vm4078_vm9, %v4011_v1  ;;  %v4040_v46 = vrot.slane %v14644_v17, 6  ;;  %v3988_v1 = vrot.slane %v14644_v17, 5 }
 0x422   : > { %9485 = vmatprep.mubr.msk.bf16.mxu1 %vm10526_vm6, %v17182_v53  ;;  %9517 = vmatprep.mubr.msk.bf16.mxu0 %vm10526_vm6, %v17182_v53 }
 0x423   : > { %v4041_v4 = vsel %vm949_vm1, %v4038_v50, %v4040_v46  ;;  %v3989_v35 = vsel %vm651_vm0, %v3986_v45, %v3988_v1  ;;  %v4315_v50 = vrot.slane %v14521_v5, 7  ;;  %v17220_v45 = vrot.slane %v14644_v17, 3  ;;  %v10069_v1 = vld [vmem:[%s17215_s3 + $0x48] sm:$0xff]  }
 0x424   : > { %v4065_v59 = vpack.c.bf16 %v4041_v4, %v4041_v4  ;;  %v4013_v61 = vpack.c.bf16 %v3989_v35, %v3989_v35  ;;  %v10070_v4 = vld [vmem:[%s17215_s3 + $0x58] sm:$0xff]   ;;  %v4317_v35 = vrot.slane %v14527_v31, 7 }
 0x425   : > { %v4311_v55 = vsel %vm1281_vm5, %v17220_v45, %v4310_v15  ;;  %v10072_v15 = vld [vmem:[%s17215_s3 + $0x50] sm:$0xff]  }
 0x429   : > { %9486 = vmatmul.mubr.msk.bf16.gmra.mxu1 %vm4078_vm9, %v4064_v54  ;;  %9518 = vmatmul.mubr.msk.bf16.gmra.mxu0 %vm4078_vm9, %v4012_v26  ;;  %v14879_v54 = vsel %vm1288_vm2, %v4314_v37, %v4315_v50  ;;  %v14881_v26 = vpack.c.bf16 %v4349_v47, %v4311_v55  ;;  %v4318_v37 = vsel %vm1288_vm2, %v4315_v50, %v4317_v35 }
 0x42a   : > { %9489 = vmatprep.mubr.msk.bf16.mxu1 %vm10526_vm6, %v17182_v53  ;;  %9521 = vmatprep.mubr.msk.bf16.mxu0 %vm10526_vm6, %v17182_v53  ;;  %v4502_v46 = vpack.c.bf16 %v14879_v54, %v4349_v47  ;;  %v4355_v55 = vpack.c.bf16 %v4318_v37, %v14879_v54 }
 0x431   : > { %9490 = vmatmul.mubr.msk.bf16.gmra.mxu1 %vm4078_vm9, %v4065_v59  ;;  %9522 = vmatmul.mubr.msk.bf16.gmra.mxu0 %vm4078_vm9, %v4013_v61  ;;  %v4319_v59 = vrot.slane %v14533_v14, 7  ;;  %v10071_v61 = vld [vmem:[%s17215_s3 + $0x40] sm:$0xff]  }
 0x432   : > { %9529 = vmatprep.mubr.msk.bf16.mxu1 %vm10526_vm6, %v17182_v53  ;;  %9561 = vmatprep.mubr.msk.bf16.mxu0 %vm10526_vm6, %v17182_v53 }
 0x433   : > { %v4320_v45 = vsel %vm1288_vm2, %v4317_v35, %v4319_v59 }
 0x434   : > { %v4503_v47 = vpack.c.bf16 %v4320_v45, %v4318_v37  ;;  %v4327_v37 = vrot.slane %v14588_v25, 7 }
 0x439   : > { %9530 = vmatmul.mubr.msk.bf16.vlgmr.msra.gmra.mxu1 %vm4078_vm9, %v14881_v26  ;;  %9562 = vmatmul.mubr.msk.bf16.vlgmr.msra.gmra.mxu0 %vm4078_vm9, %v4502_v46  ;;  %v4321_v46 = vrot.slane %v14545_v27, 7 }
 0x43a   : > { %9533 = vmatprep.mubr.msk.bf16.mxu1 %vm10526_vm6, %v17182_v53  ;;  %9565 = vmatprep.mubr.msk.bf16.mxu0 %vm10526_vm6, %v17182_v53 }
 0x43b   : > { %9590 = vmatpush3.bf16.msra.mxu1 %v10069_v1  ;;  %9622 = vmatpush3.bf16.msra.mxu0 %v10070_v4  ;;  %v4323_v1 = vrot.slane %v14560_v52, 7  ;;  %v4322_v50 = vsel %vm1288_vm2, %v4319_v59, %v4321_v46 }
 0x43c   : > { %9591 = vmatprep.subr.bf16.mxu1 %v17182_v53  ;;  %9623 = vmatprep.subr.bf16.mxu0 %v17182_v53  ;;  %v4356_v35 = vpack.c.bf16 %v4322_v50, %v4320_v45 }
 0x43d   : > { %v4324_v4 = vsel %vm1288_vm2, %v4321_v46, %v4323_v1  ;;  %v4329_v46 = vrot.slane %v14601_v9, 7 }
 0x43f   : > { %9592 = vmatpush3.bf16.msra.mxu1 %v10071_v61  ;;  %9624 = vmatpush3.bf16.msra.mxu0 %v10072_v15  ;;  %v4504_v61 = vpack.c.bf16 %v4324_v4, %v4322_v50  ;;  %v4325_v15 = vrot.slane %v14573_v57, 7  ;;  %v4331_v50 = vrot.slane %v14616_v30, 7 }
 0x440   : > { %9653 = vmatprep.subr.bf16.mxu1 %v17182_v53  ;;  %9685 = vmatprep.subr.bf16.mxu0 %v17182_v53 }
 0x441   : > { %9534 = vmatmul.mubr.msk.bf16.gmra.mxu1 %vm4078_vm9, %v4355_v55  ;;  %9566 = vmatmul.mubr.msk.bf16.gmra.mxu0 %vm4078_vm9, %v4503_v47  ;;  %v4326_v59 = vsel %vm1288_vm2, %v4323_v1, %v4325_v15  ;;  %v4328_v55 = vsel %vm1288_vm2, %v4325_v15, %v4327_v37  ;;  %v4330_v1 = vsel %vm1288_vm2, %v4327_v37, %v4329_v46  ;;  %v4333_v15 = vrot.slane %v14629_v43, 7 }
 0x442   : > { %9537 = vmatprep.mubr.msk.bf16.mxu1 %vm10526_vm6, %v17182_v53  ;;  %9569 = vmatprep.mubr.msk.bf16.mxu0 %vm10526_vm6, %v17182_v53  ;;  %v4357_v45 = vpack.c.bf16 %v4326_v59, %v4324_v4  ;;  %v4505_v47 = vpack.c.bf16 %v4328_v55, %v4326_v59  ;;  %v4358_v4 = vpack.c.bf16 %v4330_v1, %v4328_v55  ;;  %v17221_v37 = vrot.slane %v14644_v17, 7 }
 0x443   : > { %v4334_v59 = vsel %vm1288_vm2, %v4331_v50, %v4333_v15 }
 0x449   : > { %9538 = vmatmul.mubr.msk.bf16.gmra.mxu1 %vm4078_vm9, %v4356_v35  ;;  %9570 = vmatmul.mubr.msk.bf16.gmra.mxu0 %vm4078_vm9, %v4504_v61  ;;  %v4332_v35 = vsel %vm1288_vm2, %v4329_v46, %v4331_v50  ;;  %v4508_v50 = vpack.c.bf16 %v14708_v29, %v14708_v29  ;;  %v17222_v29 = vpack.c.bf16 %v14521_v5, %v14519_v62  ;;  %v10076_v62 = vld [vmem:[%s17215_s3 + $0x70] sm:$0xff]  }
 0x44a   : > { %9541 = vmatprep.mubr.msk.bf16.mxu1 %vm10526_vm6, %v17182_v53  ;;  %9573 = vmatprep.mubr.msk.bf16.mxu0 %vm10526_vm6, %v17182_v53  ;;  %v4506_v61 = vpack.c.bf16 %v4332_v35, %v4330_v1  ;;  %v4359_v55 = vpack.c.bf16 %v4334_v59, %v4332_v35  ;;  %v10073_v1 = vld [vmem:[%s17215_s3 + $0x68] sm:$0xff]   ;;  %v10074_v35 = vld [vmem:[%s17215_s3 + $0x78] sm:$0xff]   ;;  %v17224_v5 = vpack.c.bf16 %v14533_v14, %v14527_v31 }
 0x44b   : > { %v17227_v31 = vpack.c.bf16 %v14591_v22, %v14576_v38  ;;  %v17228_v14 = vpack.c.bf16 %v14588_v25, %v14573_v57  ;;  %v17231_v57 = vpack.c.bf16 %v14647_v41, %v14632_v24  ;;  %v17232_v25 = vpack.c.bf16 %v14644_v17, %v14629_v43 }
 0x44c   : > { %v17234_v43 = vpack.c.bf16 %v14555_v0, %v14537_v60  ;;  %v17235_v17 = vpack.c.bf16 %v14552_v10, %v14549_v36  ;;  %v17237_v36 = vpack.c.bf16 %v14586_v49, %v14579_v18  ;;  %v17238_v10 = vpack.c.bf16 %v14604_v51, %v14591_v22 }
 0x44d   : > { %v17240_v18 = vpack.c.bf16 %v14632_v24, %v14619_v40  ;;  %v17241_v49 = vpack.c.bf16 %v14642_v12, %v14635_v42  ;;  %v17242_v12 = vpack.c.bf16 %v14660_v2, %v14647_v41 }
 0x451   : > { %9542 = vmatmul.mubr.msk.bf16.gmra.mxu1 %vm4078_vm9, %v4357_v45  ;;  %9574 = vmatmul.mubr.msk.bf16.gmra.mxu0 %vm4078_vm9, %v4505_v47  ;;  %v4336_v45 = vsel %vm1288_vm2, %v4333_v15, %v17221_v37  ;;  %v17226_v15 = vpack.c.bf16 %v14560_v52, %v14545_v27  ;;  %v17229_v27 = vpack.c.bf16 %v14619_v40, %v14604_v51 }
 0x452   : > { %9545 = vmatprep.mubr.msk.bf16.mxu1 %vm10526_vm6, %v17182_v53  ;;  %9577 = vmatprep.mubr.msk.bf16.mxu0 %vm10526_vm6, %v17182_v53  ;;  %v4507_v47 = vpack.c.bf16 %v4336_v45, %v4334_v59  ;;  %v4360_v46 = vpack.c.bf16 %v4336_v45, %v4336_v45  ;;  %v17230_v52 = vpack.c.bf16 %v14616_v30, %v14601_v9 }
 0x453   : > { %v17233_v9 = vpack.c.bf16 %v14676_v6, %v14660_v2  ;;  %v4653_v30 = vpack.c.bf16 %v14655_v19, %v14655_v19  ;;  %v4831_v59 = vpack.c.bf16 %v14679_v16, %v14679_v16  ;;  %v10077_v6 = vld [vmem:[%s17215_s3 + $0x88] sm:$0xff]   ;;  %v10078_v19 = vld [vmem:[%s17215_s3 + $0x80] sm:$0xff]  }
 0x459   : > { %9546 = vmatmul.mubr.msk.bf16.gmra.mxu1 %vm4078_vm9, %v4358_v4  ;;  %9578 = vmatmul.mubr.msk.bf16.gmra.mxu0 %vm4078_vm9, %v4506_v61  ;;  %v17223_v4 = vpack.c.bf16 %v14537_v60, %v14530_v39  ;;  %v10075_v61 = vld [vmem:[%s17215_s3 + $0x60] sm:$0xff]   ;;  %v17225_v39 = vpack.c.bf16 %v14563_v56, %v14555_v0  ;;  %v17236_v60 = vpack.c.bf16 %v14576_v38, %v14563_v56  ;;  %s555_s3 = scalar_lea.vmem [#allocation5], %s554_s30 }
 0x45a   : > { %9549 = vmatprep.mubr.msk.bf16.mxu1 %vm10526_vm6, %v17182_v53  ;;  %9581 = vmatprep.mubr.msk.bf16.mxu0 %vm10526_vm6, %v17182_v53  ;;  %v17239_v0 = vpack.c.bf16 %v14614_v63, %v14607_v8 }
 0x461   : > { %9550 = vmatmul.mubr.msk.bf16.gmra.mxu1 %vm4078_vm9, %v4359_v55  ;;  %9582 = vmatmul.mubr.msk.bf16.gmra.mxu0 %vm4078_vm9, %v4507_v47  ;;  %v17243_v55 = vpack.c.bf16 %v14731_v34, %v14728_v3 }
 0x462   : > { %9553 = vmatprep.mubr.msk.bf16.mxu1 %vm10526_vm6, %v17182_v53  ;;  %9585 = vmatprep.mubr.msk.bf16.mxu0 %vm10526_vm6, %v17182_v53 }
 0x469   : > { %9554 = vmatmul.mubr.msk.bf16.gmra.mxu1 %vm4078_vm9, %v4360_v46  ;;  %9586 = vmatmul.mubr.msk.bf16.gmra.mxu0 %vm4078_vm9, %v4508_v50 }
 0x46a   : > { %9593 = vmatprep.mubr.msk.bf16.mxu1 %vm10526_vm6, %v17182_v53  ;;  %9625 = vmatprep.mubr.msk.bf16.mxu0 %vm10526_vm6, %v17182_v53 }
 0x471   : > { %9594 = vmatmul.mubr.msk.bf16.vlgmr.msra.gmra.mxu1 %vm4078_vm9, %v17222_v29  ;;  %9626 = vmatmul.mubr.msk.bf16.vlgmr.msra.gmra.mxu0 %vm4078_vm9, %v17223_v4 }
 0x472   : > { %9597 = vmatprep.mubr.msk.bf16.mxu1 %vm10526_vm6, %v17182_v53  ;;  %9629 = vmatprep.mubr.msk.bf16.mxu0 %vm10526_vm6, %v17182_v53 }
 0x473   : > { %9654 = vmatpush3.bf16.msra.mxu1 %v10073_v1  ;;  %9686 = vmatpush3.bf16.msra.mxu0 %v10074_v35 }
 0x474   : > { %9655 = vmatprep.subr.bf16.mxu1 %v17182_v53  ;;  %9687 = vmatprep.subr.bf16.mxu0 %v17182_v53 }
 0x477   : > { %9656 = vmatpush3.bf16.msra.mxu1 %v10075_v61  ;;  %9688 = vmatpush3.bf16.msra.mxu0 %v10076_v62 }
 0x478   : > { %9717 = vmatprep.subr.bf16.mxu1 %v17182_v53  ;;  %9749 = vmatprep.subr.mxu0 %v17182_v53 }
 0x479   : > { %9598 = vmatmul.mubr.msk.bf16.gmra.mxu1 %vm4078_vm9, %v17224_v5  ;;  %9630 = vmatmul.mubr.msk.bf16.gmra.mxu0 %vm4078_vm9, %v17225_v39 }
 0x47a   : > { %9601 = vmatprep.mubr.msk.bf16.mxu1 %vm10526_vm6, %v17182_v53  ;;  %9633 = vmatprep.mubr.msk.bf16.mxu0 %vm10526_vm6, %v17182_v53 }
 0x481   : > { %9602 = vmatmul.mubr.msk.bf16.gmra.mxu1 %vm4078_vm9, %v17226_v15  ;;  %9634 = vmatmul.mubr.msk.bf16.gmra.mxu0 %vm4078_vm9, %v17227_v31 }
 0x482   : > { %9605 = vmatprep.mubr.msk.bf16.mxu1 %vm10526_vm6, %v17182_v53  ;;  %9637 = vmatprep.mubr.msk.bf16.mxu0 %vm10526_vm6, %v17182_v53 }
 0x489   : > { %9606 = vmatmul.mubr.msk.bf16.gmra.mxu1 %vm4078_vm9, %v17228_v14  ;;  %9638 = vmatmul.mubr.msk.bf16.gmra.mxu0 %vm4078_vm9, %v17229_v27 }
 0x48a   : > { %9609 = vmatprep.mubr.msk.bf16.mxu1 %vm10526_vm6, %v17182_v53  ;;  %9641 = vmatprep.mubr.msk.bf16.mxu0 %vm10526_vm6, %v17182_v53 }
 0x491   : > { %9610 = vmatmul.mubr.msk.bf16.gmra.mxu1 %vm4078_vm9, %v17230_v52  ;;  %9642 = vmatmul.mubr.msk.bf16.gmra.mxu0 %vm4078_vm9, %v17231_v57 }
 0x492   : > { %9613 = vmatprep.mubr.msk.bf16.mxu1 %vm10526_vm6, %v17182_v53  ;;  %9645 = vmatprep.mubr.msk.bf16.mxu0 %vm10526_vm6, %v17182_v53 }
 0x499   : > { %9614 = vmatmul.mubr.msk.bf16.gmra.mxu1 %vm4078_vm9, %v17232_v25  ;;  %9646 = vmatmul.mubr.msk.bf16.gmra.mxu0 %vm4078_vm9, %v17233_v9 }
 0x49a   : > { %9617 = vmatprep.mubr.msk.bf16.mxu1 %vm10526_vm6, %v17182_v53  ;;  %9649 = vmatprep.mubr.msk.bf16.mxu0 %vm10526_vm6, %v17182_v53 }
 0x4a1   : > { %9618 = vmatmul.mubr.msk.bf16.gmra.mxu1 %vm4078_vm9, %v4653_v30  ;;  %9650 = vmatmul.mubr.msk.bf16.gmra.mxu0 %vm4078_vm9, %v4831_v59 }
 0x4a2   : > { %9657 = vmatprep.mubr.msk.bf16.mxu1 %vm10526_vm6, %v17182_v53  ;;  %9689 = vmatprep.mubr.msk.bf16.mxu0 %vm10526_vm6, %v17182_v53 }
 0x4a9   : > { %9658 = vmatmul.mubr.msk.bf16.vlgmr.msra.gmra.mxu1 %vm4078_vm9, %v17234_v43  ;;  %9690 = vmatmul.mubr.msk.bf16.vlgmr.msra.gmra.mxu0 %vm4078_vm9, %v17235_v17 }
 0x4aa   : > { %9661 = vmatprep.mubr.msk.bf16.mxu1 %vm10526_vm6, %v17182_v53  ;;  %9693 = vmatprep.mubr.msk.bf16.mxu0 %vm10526_vm6, %v17182_v53 }
 0x4ab   : > { %9718 = vmatpush3.bf16.msra.mxu1 %v10077_v6 }
 0x4ac   : > { %9719 = vmatprep.subr.bf16.mxu1 %v17182_v53 }
 0x4af   : > { %9720 = vmatpush3.bf16.msra.mxu1 %v10078_v19  ;;  %v17244_v19 = vpack.c.bf16 %v14746_v32, %v14734_v13  ;;  %v17245_v13 = vpack.c.bf16 %v14757_v33, %v14749_v28  ;;  %v17246_v28 = vpack.c.bf16 %v14771_v48, %v14764_v23 }
 0x4b0   : > { %9810 = vmatprep.subr.bf16.mxu1 %v17182_v53 }
 0x4b1   : > { %9662 = vmatmul.mubr.msk.bf16.gmra.mxu1 %vm4078_vm9, %v17236_v60  ;;  %9694 = vmatmul.mubr.msk.bf16.gmra.mxu0 %vm4078_vm9, %v17237_v36 }
 0x4b2   : > { %9665 = vmatprep.mubr.msk.bf16.mxu1 %vm10526_vm6, %v17182_v53  ;;  %9697 = vmatprep.mubr.msk.bf16.mxu0 %vm10526_vm6, %v17182_v53 }
 0x4b9   : > { %9666 = vmatmul.mubr.msk.bf16.gmra.mxu1 %vm4078_vm9, %v17238_v10  ;;  %9698 = vmatmul.mubr.msk.bf16.gmra.mxu0 %vm4078_vm9, %v17239_v0 }
 0x4ba   : > { %9669 = vmatprep.mubr.msk.bf16.mxu1 %vm10526_vm6, %v17182_v53  ;;  %9701 = vmatprep.mubr.msk.bf16.mxu0 %vm10526_vm6, %v17182_v53 }
 0x4c1   : > { %v4134_v56 = vpop.f32.mrf.mxu1  ;;  %v4255_v38 = vpop.f32.mrf.mxu0  ;;  %9670 = vmatmul.mubr.msk.bf16.gmra.mxu1 %vm4078_vm9, %v17240_v18  ;;  %9702 = vmatmul.mubr.msk.bf16.gmra.mxu0 %vm4078_vm9, %v17241_v49 }
 0x4c2   : > { %v15117_v22 = vadd.f32 %v4255_v38, %v4134_v56  ;;  %9673 = vmatprep.mubr.msk.bf16.mxu1 %vm10526_vm6, %v17182_v53  ;;  %9705 = vmatprep.mubr.msk.bf16.mxu0 %vm10526_vm6, %v17182_v53 }
 0x4c3   : > { %v9467_v51 = vpop.f32.mrf.mxu1  ;;  %v9499_v8 = vpop.f32.mrf.mxu0 }
 0x4c5   : > { %v4137_v63 = vpop.f32.mrf.mxu1  ;;  %v4258_v16 = vpop.f32.mrf.mxu0 }
 0x4c6   : > { %v15123_v40 = vadd.f32 %v4258_v16, %v4137_v63 }
 0x4c7   : > { %v9468_v24 = vpop.f32.mrf.mxu1  ;;  %v9500_v37 = vpop.f32.mrf.mxu0 }
 0x4c9   : > { %v4142_v45 = vpop.f32.mrf.mxu1  ;;  %v4263_v42 = vpop.f32.mrf.mxu0  ;;  %9674 = vmatmul.mubr.msk.bf16.gmra.mxu1 %vm4078_vm9, %v17242_v12  ;;  %9706 = vmatmul.mubr.msk.bf16.gmra.mxu0 %vm4078_vm9, %v17243_v55 }
 0x4ca   : > { %v15133_v47 = vadd.f32 %v4263_v42, %v4142_v45  ;;  %9677 = vmatprep.mubr.msk.bf16.mxu1 %vm10526_vm6, %v17182_v53  ;;  %9709 = vmatprep.mubr.msk.bf16.mxu0 %vm10526_vm6, %v17182_v53 }
 0x4cb   : > { %v9471_v46 = vpop.f32.mrf.mxu1  ;;  %v9503_v50 = vpop.f32.mrf.mxu0 }
 0x4cd   : > { %v4145_v1 = vpop.f32.mrf.mxu1  ;;  %v4266_v35 = vpop.f32.mrf.mxu0 }
 0x4ce   : > { %v15139_v41 = vadd.f32 %v4266_v35, %v4145_v1 }
 0x4cf   : > { %v9472_v2 = vpop.f32.mrf.mxu1  ;;  %v9504_v29 = vpop.f32.mrf.mxu0 }
 0x4d1   : > { %v4150_v4 = vpop.f32.mrf.mxu1  ;;  %v4271_v34 = vpop.f32.mrf.mxu0  ;;  %9678 = vmatmul.mubr.msk.bf16.gmra.mxu1 %vm4078_vm9, %v14688_v21  ;;  %9710 = vmatmul.mubr.msk.bf16.gmra.mxu0 %vm4078_vm9, %v14684_v11  ;;  %v5146_v21 = vpack.c.bf16 %v14691_v58, %v14691_v58  ;;  %v4975_v11 = vpack.c.bf16 %v14703_v44, %v14703_v44 }
 0x4d2   : > { %v15145_v3 = vadd.f32 %v4271_v34, %v4150_v4  ;;  %9681 = vmatprep.mubr.msk.bf16.mxu1 %vm10526_vm6, %v17182_v53  ;;  %9713 = vmatprep.mubr.msk.bf16.mxu0 %vm10526_vm6, %v17182_v53 }
 0x4d3   : > { %v9475_v61 = vpop.f32.mrf.mxu1  ;;  %v9507_v62 = vpop.f32.mrf.mxu0 }
 0x4d4   : > { %v17247_v62 = vpack.c.bf16 %v14779_v20, %v14774_v7 }
 0x4d5   : > { %v4153_v5 = vpop.f32.mrf.mxu1  ;;  %v4274_v39 = vpop.f32.mrf.mxu0 }
 0x4d6   : > { %v15151_v15 = vadd.f32 %v4274_v39, %v4153_v5 }
 0x4d7   : > { %v9476_v31 = vpop.f32.mrf.mxu1  ;;  %v9508_v14 = vpop.f32.mrf.mxu0 }
 0x4d9   : > { %v4158_v27 = vpop.f32.mrf.mxu1  ;;  %v4279_v52 = vpop.f32.mrf.mxu0  ;;  %9682 = vmatmul.mubr.msk.bf16.gmra.mxu1 %vm4078_vm9, %v4975_v11  ;;  %9714 = vmatmul.mubr.msk.bf16.gmra.mxu0 %vm4078_vm9, %v5146_v21 }
 0x4da   : > { %v15159_v57 = vadd.f32 %v4279_v52, %v4158_v27  ;;  %9721 = vmatprep.mubr.msk.bf16.mxu1 %vm10526_vm6, %v17182_v53  ;;  %9775 = vmatprep.mubr.msk.f32.mxu0 %vm10526_vm6, %v17182_v53 }
 0x4db   : > { %v9479_v58 = vpop.f32.mrf.mxu1  ;;  %v9511_v25 = vpop.f32.mrf.mxu0 }
 0x4dc   : > { %v17248_v58 = vld [vmem:[#allocation78_spill] sm:$0xff]  ;;  %v17249_v25 = vld [vmem:[#allocation11_spill] sm:$0xff] }
 0x4dd   : > { %v4161_v9 = vpop.f32.mrf.mxu1  ;;  %v4282_v44 = vpop.f32.mrf.mxu0 }
 0x4de   : > { %v15165_v30 = vadd.f32 %v4282_v44, %v4161_v9 }
 0x4df   : > { %v9480_v59 = vpop.f32.mrf.mxu1  ;;  %v9512_v6 = vpop.f32.mrf.mxu0 }
 0x4e1   : > { %v4166_v43 = vpop.f32.mrf.mxu1  ;;  %v4287_v17 = vpop.f32.mrf.mxu0  ;;  %9722 = vmatmul.mubr.msk.bf16.vlgmr.msra.gmra.mxu1 %vm4078_vm9, %v17244_v19 }
 0x4e2   : > { %v15171_v60 = vadd.f32 %v4287_v17, %v4166_v43  ;;  %9725 = vmatprep.mubr.msk.bf16.mxu1 %vm10526_vm6, %v17182_v53 }
 0x4e3   : > { %v9483_v36 = vpop.f32.mrf.mxu1  ;;  %v9515_v10 = vpop.f32.mrf.mxu0 }
 0x4e5   : > { %v4169_v0 = vpop.f32.mrf.mxu1  ;;  %v4290_v56 = vpop.f32.mrf.mxu0 }
 0x4e6   : > { %v15175_v38 = vadd.f32 %v4290_v56, %v4169_v0 }
 0x4e7   : > { %v9484_v18 = vpop.f32.mrf.mxu1  ;;  %v9516_v49 = vpop.f32.mrf.mxu0 }
 0x4e9   : > { %v4174_v51 = vpop.f32.mrf.mxu1  ;;  %v4295_v8 = vpop.f32.mrf.mxu0  ;;  %9726 = vmatmul.mubr.msk.bf16.gmra.mxu1 %vm4078_vm9, %v17245_v13 }
 0x4ea   : > { %v15181_v32 = vadd.f32 %v4295_v8, %v4174_v51  ;;  %9729 = vmatprep.mubr.msk.bf16.mxu1 %vm10526_vm6, %v17182_v53 }
 0x4eb   : > { %v9487_v63 = vpop.f32.mrf.mxu1  ;;  %v9519_v16 = vpop.f32.mrf.mxu0 }
 0x4ed   : > { %v4177_v24 = vpop.f32.mrf.mxu1  ;;  %v4298_v37 = vpop.f32.mrf.mxu0 }
 0x4ee   : > { %v15185_v45 = vadd.f32 %v4298_v37, %v4177_v24  ;;  %v5317_v24 = vpack.c.bf16 %v14879_v54, %v14879_v54 }
 0x4ef   : > { %v9488_v42 = vpop.f32.mrf.mxu1  ;;  %v9520_v12 = vpop.f32.mrf.mxu0 }
 0x4f1   : > { %v4182_v55 = vpop.f32.mrf.mxu1  ;;  %v4303_v46 = vpop.f32.mrf.mxu0  ;;  %9730 = vmatmul.mubr.msk.bf16.gmra.mxu1 %vm4078_vm9, %v17246_v28 }
 0x4f2   : > { %v15191_v33 = vadd.f32 %v4303_v46, %v4182_v55  ;;  %9733 = vmatprep.mubr.msk.bf16.mxu1 %vm10526_vm6, %v17182_v53 }
 0x4f3   : > { %v9491_v50 = vpop.f32.mrf.mxu1  ;;  %v9523_v1 = vpop.f32.mrf.mxu0 }
 0x4f5   : > { %v4185_v35 = vpop.f32.mrf.mxu1  ;;  %v4306_v2 = vpop.f32.mrf.mxu0 }
 0x4f7   : > { %v9492_v29 = vpop.f32.mrf.mxu1  ;;  %v9524_v4 = vpop.f32.mrf.mxu0 }
 0x4f9   : > { %v4428_v34 = vpop.f32.mrf.mxu1  ;;  %v4576_v61 = vpop.f32.mrf.mxu0  ;;  %9734 = vmatmul.mubr.msk.bf16.gmra.mxu1 %vm4078_vm9, %v17247_v62 }
 0x4fa   : > { %v4482_v23 = vadd.f32 %v4428_v34, %v15117_v22  ;;  %9737 = vmatprep.mubr.msk.bf16.mxu1 %vm10526_vm6, %v17182_v53  ;;  %v17250_v22 = vpack.c.bf16 %v17248_v58, %v17249_v25 }
 0x4fb   : > { %v9531_v48 = vpop.f32.mrf.mxu1  ;;  %v9563_v5 = vpop.f32.mrf.mxu0 }
 0x4fc   : > { %v15202_v39 = vadd.f32 %v4576_v61, %v4482_v23 }
 0x4fd   : > { %v4431_v21 = vpop.f32.mrf.mxu1  ;;  %v4579_v11 = vpop.f32.mrf.mxu0 }
 0x4fe   : > { %v4483_v31 = vadd.f32 %v4431_v21, %v15123_v40 }
 0x4ff   : > { %v9532_v14 = vpop.f32.mrf.mxu1  ;;  %v9564_v27 = vpop.f32.mrf.mxu0 }
 0x500   : > { %v15205_v52 = vadd.f32 %v4579_v11, %v4483_v31 }
 0x501   : > { %v4436_v7 = vpop.f32.mrf.mxu1  ;;  %v4584_v20 = vpop.f32.mrf.mxu0  ;;  %9738 = vmatmul.mubr.msk.bf16.gmra.mxu1 %vm4078_vm9, %v17250_v22 }
 0x502   : > { %v4484_v9 = vadd.f32 %v4436_v7, %v15133_v47  ;;  %9741 = vmatprep.mubr.msk.bf16.mxu1 %vm10526_vm6, %v17182_v53 }
 0x503   : > { %v9535_v44 = vpop.f32.mrf.mxu1  ;;  %v9567_v59 = vpop.f32.mrf.mxu0 }
 0x504   : > { %v15214_v6 = vadd.f32 %v4584_v20, %v4484_v9 }
 0x505   : > { %v4439_v40 = vpop.f32.mrf.mxu1  ;;  %v4587_v43 = vpop.f32.mrf.mxu0 }
 0x506   : > { %v4485_v17 = vadd.f32 %v4439_v40, %v15139_v41 }
 0x507   : > { %v9536_v19 = vpop.f32.mrf.mxu1  ;;  %v9568_v36 = vpop.f32.mrf.mxu0 }
 0x508   : > { %v15217_v10 = vadd.f32 %v4587_v43, %v4485_v17 }
 0x509   : > { %v4444_v0 = vpop.f32.mrf.mxu1  ;;  %v4592_v56 = vpop.f32.mrf.mxu0  ;;  %9742 = vmatmul.mubr.msk.bf16.gmra.mxu1 %vm4078_vm9, %v14881_v26 }
 0x50a   : > { %v4486_v47 = vadd.f32 %v4444_v0, %v15145_v3  ;;  %9745 = vmatprep.mubr.msk.bf16.mxu1 %vm10526_vm6, %v17182_v53 }
 0x50b   : > { %v9539_v18 = vpop.f32.mrf.mxu1  ;;  %v9571_v49 = vpop.f32.mrf.mxu0 }
 0x50c   : > { %v15224_v51 = vadd.f32 %v4592_v56, %v4486_v47 }
 0x50d   : > { %v4447_v8 = vpop.f32.mrf.mxu1  ;;  %v4595_v41 = vpop.f32.mrf.mxu0 }
 0x50e   : > { %v4487_v13 = vadd.f32 %v4447_v8, %v15151_v15 }
 0x50f   : > { %v9540_v63 = vpop.f32.mrf.mxu1  ;;  %v9572_v16 = vpop.f32.mrf.mxu0 }
 0x510   : > { %v15229_v37 = vadd.f32 %v4595_v41, %v4487_v13 }
 0x511   : > { %v4452_v26 = vpop.f32.mrf.mxu1  ;;  %v4600_v3 = vpop.f32.mrf.mxu0  ;;  %9746 = vmatmul.mubr.msk.bf16.gmra.mxu1 %vm4078_vm9, %v5317_v24 }
 0x512   : > { %v4488_v42 = vadd.f32 %v4452_v26, %v15159_v57  ;;  %9818 = vmatprep.mubr.msk.bf16.mxu1 %vm10526_vm6, %v17182_v53 }
 0x513   : > { %v9543_v12 = vpop.f32.mrf.mxu1  ;;  %v9575_v55 = vpop.f32.mrf.mxu0 }
 0x514   : > { %v15235_v46 = vadd.f32 %v4600_v3, %v4488_v42 }
 0x515   : > { %v4455_v15 = vpop.f32.mrf.mxu1  ;;  %v4603_v28 = vpop.f32.mrf.mxu0 }
 0x516   : > { %v4489_v50 = vadd.f32 %v4455_v15, %v15165_v30 }
 0x517   : > { %v9544_v54 = vpop.f32.mrf.mxu1  ;;  %v9576_v1 = vpop.f32.mrf.mxu0 }
 0x518   : > { %v15238_v35 = vadd.f32 %v4603_v28, %v4489_v50 }
 0x519   : > { %v4460_v2 = vpop.f32.mrf.mxu1  ;;  %v4608_v29 = vpop.f32.mrf.mxu0 }
 0x51a   : > { %v4490_v4 = vadd.f32 %v4460_v2, %v15171_v60 }
 0x51b   : > { %v9547_v57 = vpop.f32.mrf.mxu1  ;;  %v9579_v34 = vpop.f32.mrf.mxu0 }
 0x51c   : > { %v15241_v61 = vadd.f32 %v4608_v29, %v4490_v4 }
 0x51d   : > { %v4463_v62 = vpop.f32.mrf.mxu1  ;;  %v4611_v23 = vpop.f32.mrf.mxu0 }
 0x51e   : > { %v4491_v48 = vadd.f32 %v4463_v62, %v15175_v38 }
 0x51f   : > { %v9548_v5 = vpop.f32.mrf.mxu1  ;;  %v9580_v21 = vpop.f32.mrf.mxu0 }
 0x520   : > { %v15244_v11 = vadd.f32 %v4611_v23, %v4491_v48 }
 0x521   : > { %v4468_v30 = vpop.f32.mrf.mxu1  ;;  %v4616_v31 = vpop.f32.mrf.mxu0 }
 0x522   : > { %v4492_v14 = vadd.f32 %v4468_v30, %v15181_v32 }
 0x523   : > { %v9551_v27 = vpop.f32.mrf.mxu1  ;;  %v9583_v7 = vpop.f32.mrf.mxu0 }
 0x524   : > { %v15247_v20 = vadd.f32 %v4616_v31, %v4492_v14 }
 0x525   : > { %v4471_v60 = vpop.f32.mrf.mxu1  ;;  %v4619_v58 = vpop.f32.mrf.mxu0 }
 0x526   : > { %v4493_v25 = vadd.f32 %v4471_v60, %v15185_v45 }
 0x527   : > { %v9552_v22 = vpop.f32.mrf.mxu1  ;;  %v9584_v9 = vpop.f32.mrf.mxu0 }
 0x528   : > { %v15250_v44 = vadd.f32 %v4619_v58, %v4493_v25 }
 0x529   : > { %v4476_v38 = vpop.f32.mrf.mxu1  ;;  %v4624_v59 = vpop.f32.mrf.mxu0 }
 0x52a   : > { %v4494_v40 = vadd.f32 %v4476_v38, %v15191_v33 }
 0x52b   : > { %v9555_v43 = vpop.f32.mrf.mxu1  ;;  %v9587_v17 = vpop.f32.mrf.mxu0 }
 0x52c   : > { %v15253_v19 = vadd.f32 %v4624_v59, %v4494_v40 }
 0x52d   : > { %v4479_v32 = vpop.f32.mrf.mxu1  ;;  %v4627_v36 = vpop.f32.mrf.mxu0 }
 0x52f   : > { %v9556_v0 = vpop.f32.mrf.mxu1  ;;  %v9588_v56 = vpop.f32.mrf.mxu0 }
 0x531   : > { %v4721_v47 = vpop.f32.mrf.mxu1  ;;  %v4899_v18 = vpop.f32.mrf.mxu0 }
 0x532   : > { %v4775_v45 = vadd.f32 %v4721_v47, %v15202_v39 }
 0x533   : > { %v9595_v49 = vpop.f32.mrf.mxu1  ;;  %v9627_v8 = vpop.f32.mrf.mxu0 }
 0x534   : > { %v15256_v41 = vadd.f32 %v4899_v18, %v4775_v45 }
 0x535   : > { %v4724_v13 = vpop.f32.mrf.mxu1  ;;  %v4902_v63 = vpop.f32.mrf.mxu0 }
 0x536   : > { %v4776_v33 = vadd.f32 %v4724_v13, %v15205_v52 }
 0x537   : > { %v9596_v16 = vpop.f32.mrf.mxu1  ;;  %v9628_v24 = vpop.f32.mrf.mxu0 }
 0x538   : > { %v15259_v26 = vadd.f32 %v4902_v63, %v4776_v33 }
 0x539   : > { %v4729_v3 = vpop.f32.mrf.mxu1  ;;  %v4907_v42 = vpop.f32.mrf.mxu0 }
 0x53a   : > { %v4777_v12 = vadd.f32 %v4729_v3, %v15214_v6 }
 0x53b   : > { %v9599_v55 = vpop.f32.mrf.mxu1  ;;  %v9631_v15 = vpop.f32.mrf.mxu0 }
 0x53c   : > { %v15262_v28 = vadd.f32 %v4907_v42, %v4777_v12 }
 0x53d   : > { %v4732_v39 = vpop.f32.mrf.mxu1  ;;  %v4910_v50 = vpop.f32.mrf.mxu0 }
 0x53e   : > { %v4778_v54 = vadd.f32 %v4732_v39, %v15217_v10 }
 0x53f   : > { %v9600_v1 = vpop.f32.mrf.mxu1  ;;  %v9632_v2 = vpop.f32.mrf.mxu0 }
 0x540   : > { %v15265_v29 = vadd.f32 %v4910_v50, %v4778_v54 }
 0x541   : > { %v4737_v52 = vpop.f32.mrf.mxu1  ;;  %v4915_v4 = vpop.f32.mrf.mxu0 }
 0x542   : > { %v4779_v57 = vadd.f32 %v4737_v52, %v15224_v51 }
 0x543   : > { %v9603_v34 = vpop.f32.mrf.mxu1  ;;  %v9635_v62 = vpop.f32.mrf.mxu0 }
 0x544   : > { %v15268_v23 = vadd.f32 %v4915_v4, %v4779_v57 }
 0x545   : > { %v4740_v6 = vpop.f32.mrf.mxu1  ;;  %v4918_v48 = vpop.f32.mrf.mxu0 }
 0x546   : > { %v4780_v5 = vadd.f32 %v4740_v6, %v15229_v37 }
 0x547   : > { %v9604_v21 = vpop.f32.mrf.mxu1  ;;  %v9636_v30 = vpop.f32.mrf.mxu0 }
 0x548   : > { %v15271_v31 = vadd.f32 %v4918_v48, %v4780_v5 }
 0x549   : > { %v4745_v10 = vpop.f32.mrf.mxu1  ;;  %v4923_v14 = vpop.f32.mrf.mxu0 }
 0x54a   : > { %v4781_v27 = vadd.f32 %v4745_v10, %v15235_v46 }
 0x54b   : > { %v9607_v7 = vpop.f32.mrf.mxu1  ;;  %v9639_v60 = vpop.f32.mrf.mxu0 }
 0x54c   : > { %v15274_v58 = vadd.f32 %v4923_v14, %v4781_v27 }
 0x54d   : > { %v4748_v51 = vpop.f32.mrf.mxu1  ;;  %v4926_v25 = vpop.f32.mrf.mxu0 }
 0x54e   : > { %v4782_v22 = vadd.f32 %v4748_v51, %v15238_v35 }
 0x54f   : > { %v9608_v9 = vpop.f32.mrf.mxu1  ;;  %v9640_v38 = vpop.f32.mrf.mxu0 }
 0x550   : > { %v15277_v59 = vadd.f32 %v4926_v25, %v4782_v22 }
 0x551   : > { %v4753_v37 = vpop.f32.mrf.mxu1  ;;  %v4931_v40 = vpop.f32.mrf.mxu0 }
 0x552   : > { %v4783_v43 = vadd.f32 %v4753_v37, %v15241_v61 }
 0x553   : > { %v9611_v17 = vpop.f32.mrf.mxu1  ;;  %v9643_v32 = vpop.f32.mrf.mxu0 }
 0x554   : > { %v15280_v36 = vadd.f32 %v4931_v40, %v4783_v43 }
 0x555   : > { %v4756_v46 = vpop.f32.mrf.mxu1  ;;  %v4934_v0 = vpop.f32.mrf.mxu0 }
 0x556   : > { %v4784_v56 = vadd.f32 %v4756_v46, %v15244_v11 }
 0x557   : > { %v9612_v47 = vpop.f32.mrf.mxu1  ;;  %v9644_v18 = vpop.f32.mrf.mxu0 }
 0x558   : > { %v15283_v45 = vadd.f32 %v4934_v0, %v4784_v56 }
 0x559   : > { %v4761_v35 = vpop.f32.mrf.mxu1  ;;  %v4939_v49 = vpop.f32.mrf.mxu0 }
 0x55a   : > { %v4785_v8 = vadd.f32 %v4761_v35, %v15247_v20 }
 0x55b   : > { %v9615_v13 = vpop.f32.mrf.mxu1  ;;  %v9647_v63 = vpop.f32.mrf.mxu0 }
 0x55c   : > { %v15286_v33 = vadd.f32 %v4939_v49, %v4785_v8 }
 0x55d   : > { %v4764_v61 = vpop.f32.mrf.mxu1  ;;  %v4942_v16 = vpop.f32.mrf.mxu0 }
 0x55e   : > { %v4786_v24 = vadd.f32 %v4764_v61, %v15250_v44 }
 0x55f   : > { %v9616_v3 = vpop.f32.mrf.mxu1  ;;  %v9648_v42 = vpop.f32.mrf.mxu0 }
 0x560   : > { %v15289_v12 = vadd.f32 %v4942_v16, %v4786_v24 }
 0x561   : > { %v4769_v11 = vpop.f32.mrf.mxu1  ;;  %v4947_v55 = vpop.f32.mrf.mxu0 }
 0x562   : > { %v4787_v15 = vadd.f32 %v4769_v11, %v15253_v19 }
 0x563   : > { %v9619_v39 = vpop.f32.mrf.mxu1  ;;  %v9651_v50 = vpop.f32.mrf.mxu0 }
 0x564   : > { %v15292_v54 = vadd.f32 %v4947_v55, %v4787_v15 }
 0x565   : > { %v4772_v20 = vpop.f32.mrf.mxu1  ;;  %v4950_v1 = vpop.f32.mrf.mxu0 }
 0x567   : > { %v9620_v2 = vpop.f32.mrf.mxu1  ;;  %v9652_v52 = vpop.f32.mrf.mxu0 }
 0x569   : > { %v5040_v4 = vpop.f32.mrf.mxu1  ;;  %v5211_v57 = vpop.f32.mrf.mxu0 }
 0x56a   : > { %v5094_v44 = vadd.f32 %v5040_v4, %v15256_v41 }
 0x56b   : > { %v9659_v34 = vpop.f32.mrf.mxu1  ;;  %v9691_v62 = vpop.f32.mrf.mxu0 }
 0x56c   : > { %v15295_v6 = vadd.f32 %v5211_v57, %v5094_v44 }
 0x56d   : > { %v5043_v48 = vpop.f32.mrf.mxu1  ;;  %v5214_v5 = vpop.f32.mrf.mxu0 }
 0x56e   : > { %v5095_v19 = vadd.f32 %v5043_v48, %v15259_v26 }
 0x56f   : > { %v9660_v21 = vpop.f32.mrf.mxu1  ;;  %v9692_v30 = vpop.f32.mrf.mxu0 }
 0x570   : > { %v15298_v10 = vadd.f32 %v5214_v5, %v5095_v19 }
 0x571   : > { %v5048_v14 = vpop.f32.mrf.mxu1  ;;  %v5219_v27 = vpop.f32.mrf.mxu0 }
 0x572   : > { %v5096_v7 = vadd.f32 %v5048_v14, %v15262_v28 }
 0x573   : > { %v9663_v60 = vpop.f32.mrf.mxu1  ;;  %v9695_v51 = vpop.f32.mrf.mxu0 }
 0x574   : > { %v15301_v25 = vadd.f32 %v5219_v27, %v5096_v7 }
 0x575   : > { %v5051_v41 = vpop.f32.mrf.mxu1  ;;  %v5222_v22 = vpop.f32.mrf.mxu0 }
 0x576   : > { %v5097_v9 = vadd.f32 %v5051_v41, %v15265_v29 }
 0x577   : > { %v9664_v38 = vpop.f32.mrf.mxu1  ;;  %v9696_v37 = vpop.f32.mrf.mxu0 }
 0x578   : > { %v15304_v40 = vadd.f32 %v5222_v22, %v5097_v9  ;;  %v15338_v38 = vld [vmem:[%s17251_s4] ss:$0 sm:$0xff]  ;;  %s8686_s4 = sshll.u32 %s555_s3, 4  ;;  %s16168_s4 = int_to_ptr.vmem [resolvable:$true] %s8686_s4 }
 0x579   : > { %v5056_v26 = vpop.f32.mrf.mxu1  ;;  %v5227_v43 = vpop.f32.mrf.mxu0  ;;  %s10455_s18 = scalar_lea.vmem %s16168_s4, 16  ;;  %p10462_p11 = scmp.lt.s32.totalorder %s16168_s4, %s10460_s26 }
 0x57a   : > { %v5098_v17 = vadd.f32 %v5056_v26, %v15268_v23  ;;  %p10456_p6 = scmp.ne.s32.totalorder %s16168_s4, %s10455_s18  ;;  %p10463_p12 = scmp.lt.s32.totalorder %s10461_s2, %s10455_s18 }
 0x57b   : > { %v9667_v32 = vpop.f32.mrf.mxu1  ;;  %v9699_v46 = vpop.f32.mrf.mxu0 }
 0x57c   : > { %v15307_v0 = vadd.f32 %v5227_v43, %v5098_v17  ;;  %p10457_p9 = pnand %p10456_p6, %p10656_p5  ;;  %p10464_p13 = por %p10463_p12, %p10462_p11 }
 0x57d   : > { %v5059_v28 = vpop.f32.mrf.mxu1  ;;  %v5230_v56 = vpop.f32.mrf.mxu0 }
 0x57e   : > { %v5099_v47 = vadd.f32 %v5059_v28, %v15271_v31  ;;  %p10458_p10 = pneg %p10457_p9 }
 0x57f   : > { %v9668_v18 = vpop.f32.mrf.mxu1  ;;  %v9700_v35 = vpop.f32.mrf.mxu0 }
 0x580   : > { %v15310_v49 = vadd.f32 %v5230_v56, %v5099_v47  ;;  %p10465_p0 = pnand %p10464_p13, %p10458_p10 }
 0x581   : > { %v5064_v29 = vpop.f32.mrf.mxu1  ;;  %v5235_v8 = vpop.f32.mrf.mxu0 }
 0x582   : > { %v5100_v13 = vadd.f32 %v5064_v29, %v15274_v58 }
 0x583   : > { %v9671_v63 = vpop.f32.mrf.mxu1  ;;  %v9703_v61 = vpop.f32.mrf.mxu0 }
 0x584   : > { %v15313_v16 = vadd.f32 %v5235_v8, %v5100_v13 }
 0x585   : > { %v5067_v23 = vpop.f32.mrf.mxu1  ;;  %v5238_v24 = vpop.f32.mrf.mxu0 }
 0x586   : > { %v5101_v3 = vadd.f32 %v5067_v23, %v15277_v59 }
 0x587   : > { %v9672_v42 = vpop.f32.mrf.mxu1  ;;  %v9704_v11 = vpop.f32.mrf.mxu0 }
 0x588   : > { %v15316_v55 = vadd.f32 %v5238_v24, %v5101_v3 }
 0x589   : > { %v5072_v31 = vpop.f32.mrf.mxu1  ;;  %v5243_v15 = vpop.f32.mrf.mxu0 }
 0x58a   : > { %v5102_v39 = vadd.f32 %v5072_v31, %v15280_v36 }
 0x58b   : > { %v9675_v50 = vpop.f32.mrf.mxu1  ;;  %v9707_v20 = vpop.f32.mrf.mxu0 }
 0x58c   : > { %v15319_v1 = vadd.f32 %v5243_v15, %v5102_v39 }
 0x58d   : > { %v5075_v58 = vpop.f32.mrf.mxu1  ;;  %v5246_v2 = vpop.f32.mrf.mxu0 }
 0x58e   : > { %v5103_v52 = vadd.f32 %v5075_v58, %v15283_v45 }
 0x58f   : > { %v9676_v4 = vpop.f32.mrf.mxu1  ;;  %v9708_v57 = vpop.f32.mrf.mxu0 }
 0x590   : > { %v15322_v44 = vadd.f32 %v5246_v2, %v5103_v52 }
 0x591   : > { %v5080_v59 = vpop.f32.mrf.mxu1  ;;  %v5251_v34 = vpop.f32.mrf.mxu0 }
 0x592   : > { %v5104_v62 = vadd.f32 %v5080_v59, %v15286_v33 }
 0x593   : > { %v9679_v48 = vpop.f32.mrf.mxu1  ;;  %v9711_v5 = vpop.f32.mrf.mxu0 }
 0x594   : > { %v15325_v19 = vadd.f32 %v5251_v34, %v5104_v62 }
 0x595   : > { %v15327_v36 = vpop.f32.mrf.mxu1  ;;  %v15329_v21 = vpop.f32.mrf.mxu0 }
 0x597   : > { %v9680_v30 = vpop.f32.mrf.mxu1  ;;  %v9712_v14 = vpop.f32.mrf.mxu0 }
 0x599   : > { %v15331_v27 = vpop.f32.mrf.mxu1  ;;  %v15333_v45 = vpop.f32.mrf.mxu0 }
 0x59b   : > { %v9683_v7 = vpop.f32.mrf.mxu1  ;;  %v9715_v60 = vpop.f32.mrf.mxu0 }
 0x59d   : > { %v5091_v51 = vpop.f32.mrf.mxu1  ;;  %v5262_v41 = vpop.f32.mrf.mxu0 }
 0x59f   : > { %v9684_v22 = vpop.f32.mrf.mxu1  ;;  %v9716_v33 = vpop.f32.mrf.mxu0 }
 0x5a1   : > { %v5382_v9 = vpop.f32.mrf.mxu1 }
 0x5a2   : > { %v5436_v37 = vadd.f32 %v5382_v9, %v15295_v6 }
 0x5a3   : > { %v9723_v26 = vpop.f32.mrf.mxu1 }
 0x5a4   : > { %v5456_v43 = vadd.f32 %v15338_v38, %v5436_v37 }
 0x5a5   : > { %v5385_v17 = vpop.f32.mrf.mxu1 }
 0x5a6   : > { %v5437_v32 = vadd.f32 %v5385_v17, %v15298_v10  ;;  %v15343_v46 = vmax.f32 %v5456_v43, 0.0 }
 0x5a7   : > { %v9724_v28 = vpop.f32.mrf.mxu1 }
 0x5a8   : > { %v5457_v56 = vadd.f32 %v15338_v38, %v5437_v32  ;;  %v5584_v29 = vrot.slane %v15343_v46, 6  ;;  %v5625_v8 = vrot.slane %v15343_v46, 7  ;;  %v5495_v24 = vrot.slane %v15343_v46, 1 }
 0x5a9   : > { %v5390_v47 = vpop.f32.mrf.mxu1 }
 0x5aa   : > { %v5470_v18 = vmax.f32 %v5457_v56, 0.0  ;;  %v5438_v35 = vadd.f32 %v5390_v47, %v15301_v25 }
 0x5ab   : > { %v9727_v6 = vpop.f32.mrf.mxu1 }
 0x5ac   : > { %v5458_v13 = vadd.f32 %v15338_v38, %v5438_v35  ;;  %v5585_v63 = vrot.slane %v5470_v18, 6  ;;  %v5626_v61 = vrot.slane %v5470_v18, 7  ;;  %v5496_v23 = vrot.slane %v5470_v18, 1 }
 0x5ad   : > { %v5393_v10 = vpop.f32.mrf.mxu1  ;;  %v5549_v50 = vrot.slane %v5470_v18, 2  ;;  %v5590_v57 = vrot.slane %v5470_v18, 3 }
 0x5ae   : > { %v15351_v3 = vmax.f32 %v5458_v13, 0.0  ;;  %v5439_v42 = vadd.f32 %v5393_v10, %v15304_v40  ;;  %v15357_v25 = vsel %vm949_vm1, %v5584_v29, %v5585_v63  ;;  %v15362_v11 = vsel %vm1288_vm2, %v5625_v8, %v5626_v61 }
 0x5af   : > { %v9728_v31 = vpop.f32.mrf.mxu1  ;;  %v5643_v15 = vmax.f32 %v15357_v25, %v15362_v11  ;;  %v5497_v39 = vsel %vm606_vm3, %v5495_v24, %v5496_v23  ;;  %v5659_v25 = vld [vmem:[%s16217_s10 + $0x10] sm:$0xff]  ;;  %v5660_v11 = vld [vmem:[%s16217_s10 + $0x18] sm:$0xff] }
 0x5b0   : > { %v5498_v20 = vrot.slane %v15351_v3, 1  ;;  %v5550_v40 = vrot.slane %v15351_v3, 2  ;;  %v5591_v58 = vrot.slane %v15351_v3, 3  ;;  %v5459_v2 = vadd.f32 %v15338_v38, %v5439_v42 }
 0x5b1   : > { %v5398_v52 = vpop.f32.mrf.mxu1  ;;  %v5536_v4 = vmax.f32 %v15343_v46, %v5497_v39 }
 0x5b2   : > { %v15372_v59 = vmax.f32 %v5459_v2, 0.0  ;;  %v5440_v34 = vadd.f32 %v5398_v52, %v15307_v0  ;;  %v5499_v62 = vsel %vm606_vm3, %v5496_v23, %v5498_v20  ;;  %v5551_v48 = vsel %vm942_vm4, %v5549_v50, %v5550_v40 }
 0x5b3   : > { %v9731_v5 = vpop.f32.mrf.mxu1  ;;  %v5537_v30 = vmax.f32 %v5470_v18, %v5499_v62  ;;  %v5592_v14 = vsel %vm1281_vm5, %v5590_v57, %v5591_v58 }
 0x5b4   : > { %v5500_v7 = vrot.slane %v15372_v59, 1  ;;  %v5552_v60 = vrot.slane %v15372_v59, 2  ;;  %v5593_v51 = vrot.slane %v15372_v59, 3  ;;  %v5460_v41 = vadd.f32 %v15338_v38, %v5440_v34 }
 0x5b5   : > { %v5401_v22 = vpop.f32.mrf.mxu1  ;;  %v5631_v33 = vmax.f32 %v5551_v48, %v5592_v14 }
 0x5b6   : > { %v15382_v9 = vmax.f32 %v5460_v41, 0.0  ;;  %v5441_v0 = vadd.f32 %v5401_v22, %v15310_v49  ;;  %v5501_v37 = vsel %vm606_vm3, %v5498_v20, %v5500_v7  ;;  %v5553_v26 = vsel %vm942_vm4, %v5550_v40, %v5552_v60 }
 0x5b7   : > { %v9732_v43 = vpop.f32.mrf.mxu1  ;;  %v5538_v17 = vmax.f32 %v15351_v3, %v5501_v37  ;;  %v5594_v32 = vsel %vm1281_vm5, %v5591_v58, %v5593_v51  ;;  %v15389_v28 = vmax.f32 %v5536_v4, %v5631_v33 }
 0x5b8   : > { %v5502_v56 = vrot.slane %v15382_v9, 1  ;;  %v5554_v47 = vrot.slane %v15382_v9, 2  ;;  %v5595_v18 = vrot.slane %v15382_v9, 3  ;;  %v5461_v35 = vadd.f32 %v15338_v38, %v5441_v0 }
 0x5b9   : > { %v5406_v49 = vpop.f32.mrf.mxu1  ;;  %v5632_v6 = vmax.f32 %v5553_v26, %v5594_v32 }
 0x5ba   : > { %v15395_v13 = vmax.f32 %v5461_v35, 0.0  ;;  %v5442_v63 = vadd.f32 %v5406_v49, %v15313_v16  ;;  %v5503_v61 = vsel %vm606_vm3, %v5500_v7, %v5502_v56  ;;  %v5555_v23 = vsel %vm942_vm4, %v5552_v60, %v5554_v47 }
 0x5bb   : > { %v9735_v10 = vpop.f32.mrf.mxu1  ;;  %v5539_v24 = vmax.f32 %v15372_v59, %v5503_v61  ;;  %v5596_v3 = vsel %vm1281_vm5, %v5593_v51, %v5595_v18  ;;  %v15402_v42 = vmax.f32 %v5537_v30, %v5632_v6 }
 0x5bc   : > { %v5504_v31 = vrot.slane %v15395_v13, 1  ;;  %v5556_v39 = vrot.slane %v15395_v13, 2  ;;  %v5597_v50 = vrot.slane %v15395_v13, 3  ;;  %v5462_v20 = vadd.f32 %v15338_v38, %v5442_v63 }
 0x5bd   : > { %v5409_v16 = vpop.f32.mrf.mxu1  ;;  %v5633_v40 = vmax.f32 %v5555_v23, %v5596_v3 }
 0x5be   : > { %v15408_v58 = vmax.f32 %v5462_v20, 0.0  ;;  %v5443_v2 = vadd.f32 %v5409_v16, %v15316_v55  ;;  %v5505_v52 = vsel %vm606_vm3, %v5502_v56, %v5504_v31  ;;  %v5557_v4 = vsel %vm942_vm4, %v5554_v47, %v5556_v39 }
 0x5bf   : > { %v9736_v57 = vpop.f32.mrf.mxu1  ;;  %v5540_v59 = vmax.f32 %v15382_v9, %v5505_v52  ;;  %v5598_v34 = vsel %vm1281_vm5, %v5595_v18, %v5597_v50  ;;  %v15415_v62 = vmax.f32 %v5538_v17, %v5633_v40  ;;  %v5106_v40 = vadd.f32 %v15331_v27, %v15292_v54 }
 0x5c0   : > { %v5506_v48 = vrot.slane %v15408_v58, 1  ;;  %v5558_v5 = vrot.slane %v15408_v58, 2  ;;  %v5599_v30 = vrot.slane %v15408_v58, 3  ;;  %v5463_v14 = vadd.f32 %v15338_v38, %v5443_v2 }
 0x5c1   : > { %v5414_v55 = vpop.f32.mrf.mxu1  ;;  %v5634_v7 = vmax.f32 %v5557_v4, %v5598_v34  ;;  %v5277_v27 = vadd.f32 %v15333_v45, %v5106_v40 }
 0x5c2   : > { %v15421_v60 = vmax.f32 %v5463_v14, 0.0  ;;  %v5444_v51 = vadd.f32 %v5414_v55, %v15319_v1  ;;  %v5507_v41 = vsel %vm606_vm3, %v5504_v31, %v5506_v48  ;;  %v5559_v22 = vsel %vm942_vm4, %v5556_v39, %v5558_v5 }
 0x5c3   : > { %v9739_v33 = vpop.f32.mrf.mxu1  ;;  %v5541_v9 = vmax.f32 %v15395_v13, %v5507_v41  ;;  %v5600_v0 = vsel %vm1281_vm5, %v5597_v50, %v5599_v30  ;;  %v15428_v37 = vmax.f32 %v5539_v24, %v5634_v7  ;;  %v5105_v1 = vadd.f32 %v15327_v36, %v15289_v12 }
 0x5c4   : > { %v5508_v26 = vrot.slane %v15421_v60, 1  ;;  %v5560_v43 = vrot.slane %v15421_v60, 2  ;;  %v5601_v17 = vrot.slane %v15421_v60, 3  ;;  %v5464_v32 = vadd.f32 %v15338_v38, %v5444_v51 }
 0x5c5   : > { %v5417_v56 = vpop.f32.mrf.mxu1  ;;  %v5635_v47 = vmax.f32 %v5559_v22, %v5600_v0 }
 0x5c6   : > { %v15436_v18 = vmax.f32 %v5464_v32, 0.0  ;;  %v5445_v35 = vadd.f32 %v5417_v56, %v15322_v44  ;;  %v5509_v49 = vsel %vm606_vm3, %v5506_v48, %v5508_v26  ;;  %v5561_v6 = vsel %vm942_vm4, %v5558_v5, %v5560_v43 }
 0x5c7   : > { %v9740_v13 = vpop.f32.mrf.mxu1  ;;  %v5542_v63 = vmax.f32 %v15408_v58, %v5509_v49  ;;  %v5602_v61 = vsel %vm1281_vm5, %v5599_v30, %v5601_v17  ;;  %v15443_v23 = vmax.f32 %v5540_v59, %v5635_v47  ;;  %v5276_v44 = vadd.f32 %v15329_v21, %v5105_v1 }
 0x5c8   : > { %v5510_v10 = vrot.slane %v15436_v18, 1  ;;  %v5562_v12 = vrot.slane %v15436_v18, 2  ;;  %v5603_v36 = vrot.slane %v15436_v18, 3  ;;  %v5465_v24 = vadd.f32 %v15338_v38, %v5445_v35 }
 0x5c9   : > { %v5422_v3 = vpop.f32.mrf.mxu1  ;;  %v5636_v31 = vmax.f32 %v5561_v6, %v5602_v61 }
 0x5ca   : > { %v5478_v39 = vmax.f32 %v5465_v24, 0.0  ;;  %v5446_v50 = vadd.f32 %v5422_v3, %v15325_v19  ;;  %v5511_v20 = vsel %vm606_vm3, %v5508_v26, %v5510_v10  ;;  %v5563_v16 = vsel %vm942_vm4, %v5560_v43, %v5562_v12 }
 0x5cb   : > { %v9743_v58 = vpop.f32.mrf.mxu1  ;;  %v5543_v2 = vmax.f32 %v15421_v60, %v5511_v20  ;;  %v5604_v52 = vsel %vm1281_vm5, %v5601_v17, %v5603_v36  ;;  %v15457_v4 = vmax.f32 %v5541_v9, %v5636_v31 }
 0x5cc   : > { %v5512_v21 = vrot.slane %v5478_v39, 1  ;;  %v5564_v57 = vrot.slane %v5478_v39, 2  ;;  %v5605_v59 = vrot.slane %v5478_v39, 3  ;;  %v5466_v34 = vadd.f32 %v15338_v38, %v5446_v50 }
 0x5cd   : > { %v5425_v19 = vpop.f32.mrf.mxu1  ;;  %v5637_v48 = vmax.f32 %v5563_v16, %v5604_v52  ;;  %v5533_v50 = vrot.slane %v15343_v46, 5  ;;  %v5657_v46 = vld [vmem:[%s16217_s10] sm:$0xff] }
 0x5ce   : > { %v5479_v5 = vmax.f32 %v5466_v34, 0.0  ;;  %v5447_v30 = vadd.f32 %v5425_v19, %v5276_v44  ;;  %v5513_v14 = vsel %vm606_vm3, %v5510_v10, %v5512_v21  ;;  %v5565_v54 = vsel %vm942_vm4, %v5562_v12, %v5564_v57 }
 0x5cf   : > { %v9744_v55 = vpop.f32.mrf.mxu1  ;;  %v5544_v7 = vmax.f32 %v15436_v18, %v5513_v14  ;;  %v5606_v60 = vsel %vm1281_vm5, %v5603_v36, %v5605_v59  ;;  %v5650_v51 = vmax.f32 %v5542_v63, %v5637_v48 }
 0x5d0   : > { %v5514_v41 = vrot.slane %v5479_v5, 1  ;;  %v5566_v22 = vrot.slane %v5479_v5, 2  ;;  %v5607_v33 = vrot.slane %v5479_v5, 3  ;;  %v5467_v9 = vadd.f32 %v15338_v38, %v5447_v30 }
 0x5d1   : > { %v5430_v0 = vpop.f32.mrf.mxu1  ;;  %v5638_v26 = vmax.f32 %v5565_v54, %v5606_v60  ;;  %v10085_v54 = vld [vmem:[%s17252_s5 + $0x20] sm:$0xff]  }
 0x5d2   : > { %v5480_v43 = vmax.f32 %v5467_v9, 0.0  ;;  %v5448_v17 = vadd.f32 %v5430_v0, %v5277_v27  ;;  %v5515_v32 = vsel %vm606_vm3, %v5512_v21, %v5514_v41  ;;  %v5567_v1 = vsel %vm942_vm4, %v5564_v57, %v5566_v22  ;;  %v10086_v27 = vld [vmem:[%s17252_s5] sm:$0xff]  }
 0x5d3   : > { %v9747_v45 = vpop.f32.mrf.mxu1  ;;  %v5545_v56 = vmax.f32 %v5478_v39, %v5515_v32  ;;  %v5608_v47 = vsel %vm1281_vm5, %v5605_v59, %v5607_v33  ;;  %v5651_v18 = vmax.f32 %v5543_v2, %v5638_v26 }
 0x5d4   : > { %v5516_v35 = vrot.slane %v5480_v43, 1  ;;  %v5568_v49 = vrot.slane %v5480_v43, 2  ;;  %v5609_v6 = vrot.slane %v5480_v43, 3  ;;  %v5468_v13 = vadd.f32 %v15338_v38, %v5448_v17 }
 0x5d5   : > { %v5433_v63 = vpop.f32.mrf.mxu1  ;;  %v5639_v61 = vmax.f32 %v5567_v1, %v5608_v47 }
 0x5d6   : > { %v5481_v10 = vmax.f32 %v5468_v13, 0.0  ;;  %v5517_v12 = vsel %vm606_vm3, %v5514_v41, %v5516_v35  ;;  %v5569_v36 = vsel %vm942_vm4, %v5566_v22, %v5568_v49  ;;  %v5610_v24 = vsel %vm1281_vm5, %v5607_v33, %v5609_v6 }
 0x5d7   : > { %v9748_v44 = vpop.f32.mrf.mxu1  ;;  %v5546_v3 = vmax.f32 %v5479_v5, %v5517_v12  ;;  %v5640_v31 = vmax.f32 %v5569_v36, %v5610_v24  ;;  %v5652_v39 = vmax.f32 %v5544_v7, %v5639_v61 }
 0x5d8   : > { %v5518_v20 = vrot.slane %v5481_v10, 1  ;;  %v5570_v16 = vrot.slane %v5481_v10, 2  ;;  %v5611_v40 = vrot.slane %v5481_v10, 3 }
 0x5d9   : > { %v5653_v58 = vmax.f32 %v5545_v56, %v5640_v31 }
 0x5da   : > { %v5535_v38 = vsel %vm651_vm0, %v5518_v20, %v5533_v50  ;;  %v5519_v2 = vsel %vm606_vm3, %v5516_v35, %v5518_v20  ;;  %v5589_v52 = vsel %vm949_vm1, %v5570_v16, %v5584_v29  ;;  %v5630_v21 = vsel %vm1288_vm2, %v5611_v40, %v5625_v8  ;;  %v5658_v8 = vld [vmem:[%s16217_s10 + $0x8] sm:$0xff] }
 0x5db   : > { %v5548_v57 = vmax.f32 %v5481_v10, %v5535_v38  ;;  %v5547_v59 = vmax.f32 %v5480_v43, %v5519_v2  ;;  %v5642_v34 = vmax.f32 %v5589_v52, %v5630_v21  ;;  %v5571_v19 = vsel %vm942_vm4, %v5568_v49, %v5570_v16 }
 0x5dc   : > { %v5612_v48 = vsel %vm1281_vm5, %v5609_v6, %v5611_v40 }
 0x5dd   : > { %v5656_v5 = vmax.f32 %v5548_v57, %v5643_v15  ;;  %v5655_v30 = vmax.f32 %v5547_v59, %v5642_v34  ;;  %v5641_v14 = vmax.f32 %v5571_v19, %v5612_v48  ;;  %v5661_v15 = vld [vmem:[%s16217_s10 + $0x20] sm:$0xf] }
 0x5df   : > { %9750 = vmatpush3.msk.msra.mxu0 %vm3685_vm7, %v5656_v5  ;;  %v5654_v29 = vmax.f32 %v5546_v3, %v5641_v14 }
 0x5e0   : > { %9751 = vmatprep.subr.mxu0 %v17182_v53 }
 0x5e1   : > { %9752 = vmatpush3.msra.mxu0 %v5655_v30 }
 0x5e2   : > { %9753 = vmatprep.subr.mxu0 %v17182_v53 }
 0x5e3   : > { %9754 = vmatpush3.msra.mxu0 %v5654_v29 }
 0x5e4   : > { %9755 = vmatprep.subr.mxu0 %v17182_v53 }
 0x5e5   : > { %9756 = vmatpush3.msra.mxu0 %v5653_v58 }
 0x5e6   : > { %9757 = vmatprep.subr.mxu0 %v17182_v53 }
 0x5e7   : > { %9758 = vmatpush3.msra.mxu0 %v5652_v39 }
 0x5e8   : > { %9759 = vmatprep.subr.mxu0 %v17182_v53 }
 0x5e9   : > { %9760 = vmatpush3.msra.mxu0 %v5651_v18 }
 0x5ea   : > { %9761 = vmatprep.subr.mxu0 %v17182_v53 }
 0x5eb   : > { %9762 = vmatpush3.msra.mxu0 %v5650_v51 }
 0x5ec   : > { %9763 = vmatprep.subr.mxu0 %v17182_v53 }
 0x5ed   : > { %9764 = vmatpush3.msra.mxu0 %v15457_v4  ;;  %v10084_v4 = vld [vmem:[%s17252_s5 + $0x8] sm:$0xff]  }
 0x5ee   : > { %9765 = vmatprep.subr.mxu0 %v17182_v53 }
 0x5ef   : > { %9766 = vmatpush3.msra.mxu0 %v15443_v23  ;;  %v10083_v23 = vld [vmem:[%s17252_s5 + $0x28] sm:$0xff]  }
 0x5f0   : > { %9767 = vmatprep.subr.mxu0 %v17182_v53 }
 0x5f1   : > { %9768 = vmatpush3.msra.mxu0 %v15428_v37  ;;  %v10082_v37 = vld [vmem:[%s17252_s5 + $0x10] sm:$0xff]  }
 0x5f2   : > { %9769 = vmatprep.subr.mxu0 %v17182_v53 }
 0x5f3   : > { %9770 = vmatpush3.msra.mxu0 %v15415_v62  ;;  %v10081_v62 = vld [vmem:[%s17252_s5 + $0x30] sm:$0xff]  }
 0x5f4   : > { %9771 = vmatprep.subr.mxu0 %v17182_v53 }
 0x5f5   : > { %9772 = vmatpush3.msra.mxu0 %v15402_v42  ;;  %v10080_v42 = vld [vmem:[%s17252_s5 + $0x18] sm:$0xff]  }
 0x5f6   : > { %9773 = vmatprep.subr.mxu0 %v17182_v53  ;;  %9811 = vmatpush3.bf16.msra.mxu1 %v10080_v42 }
 0x5f7   : > { %9774 = vmatpush3.msra.mxu0 %v15389_v28  ;;  %v10079_v28 = vld [vmem:[%s17252_s5 + $0x38] sm:$0xff]   ;;  %9812 = vmatprep.subr.bf16.mxu1 %v17182_v53 }
 0x5f8   : > { %9776 = vmatmul.mubr.msk.f32.vlgmr.msra.gmra.mxu0 %vm5662_vm10, %v5657_v46  ;;  %9790 = vmatprep.subr.bf16.mxu0 %v17182_v53 }
 0x5f9   : > { %9778 = vmatprep.mubr.msk.f32.mxu0 %vm10526_vm6, %v17182_v53  ;;  %9791 = vmatpush3.bf16.msra.mxu0 %v10079_v28 }
 0x5fa   : > { %9792 = vmatprep.subr.bf16.mxu0 %v17182_v53  ;;  %9813 = vmatpush3.bf16.msra.mxu1 %v10082_v37 }
 0x5fb   : > { %9814 = vmatprep.subr.bf16.mxu1 %v17182_v53 }
 0x5fc   : > { %9779 = vmatmul.mubr.msk.f32.gmra.mxu0 %vm5662_vm10, %v5658_v8 }
 0x5fd   : > { %9781 = vmatprep.mubr.msk.f32.mxu0 %vm10526_vm6, %v17182_v53  ;;  %9793 = vmatpush3.bf16.msra.mxu0 %v10081_v62 }
 0x5fe   : > { %9794 = vmatprep.subr.bf16.mxu0 %v17182_v53  ;;  %9815 = vmatpush3.bf16.msra.mxu1 %v10084_v4 }
 0x5ff   : > { %9816 = vmatprep.subr.bf16.mxu1 %v17182_v53 }
 0x600   : > { %9782 = vmatmul.mubr.msk.f32.gmra.mxu0 %vm5662_vm10, %v5659_v25  ;;  %v10087_v25 = vld [vmem:[%s17252_s5 + $0x58] sm:$0xff]  }
 0x601   : > { %9784 = vmatprep.mubr.msk.f32.mxu0 %vm10526_vm6, %v17182_v53  ;;  %9795 = vmatpush3.bf16.msra.mxu0 %v10083_v23 }
 0x602   : > { %9796 = vmatprep.subr.bf16.mxu0 %v17182_v53  ;;  %9817 = vmatpush3.bf16.msra.mxu1 %v10086_v27  ;;  %v10089_v27 = vld [vmem:[%s17252_s5 + $0x50] sm:$0xff]  }
 0x603   : > { %9850 = vmatprep.subr.bf16.mxu1 %v17182_v53 }
 0x604   : > { %9785 = vmatmul.mubr.msk.f32.gmra.mxu0 %vm5662_vm10, %v5660_v11  ;;  %v10088_v11 = vld [vmem:[%s17252_s5 + $0x78] sm:$0xff]  }
 0x605   : > { %9787 = vmatprep.mubr.msk.f32.mxu0 %vm10526_vm6, %v17182_v53  ;;  %9797 = vmatpush3.bf16.msra.mxu0 %v10085_v54 }
 0x606   : > { %9830 = vmatprep.subr.bf16.mxu0 %v17182_v53 }
 0x608   : > { %9788 = vmatmul.mubr.msk.f32.gmra.mxu0 %vm5662_vm10, %v5661_v15 }
 0x609   : > { %9798 = vmatprep.mubr.msk.bf16.mxu0 %vm10526_vm6, %v17182_v53 }
 0x6b8   : > { %v15569_v55 = vpop.f32.mrf.mxu0 }
 0x6b9   : > { %v6360_v51 = vrot.slane %v15569_v55, 5  ;;  %v6581_v41 = vrot.slane %v15569_v55, 6  ;;  %v6135_v1 = vrot.slane %v15569_v55, 7  ;;  %v15632_v2 = vrot.slane %v15569_v55, 1 }
 0x6ba   : > { %v9777_v7 = vpop.f32.mrf.mxu0  ;;  %v15635_v52 = vrot.slane %v15569_v55, 2  ;;  %v15638_v57 = vrot.slane %v15569_v55, 3 }
 0x6bb   : > { %v10090_v7 = vld [vmem:[%s17252_s5 + $0x70] sm:$0xff]  }
 0x6bc   : > { %v15571_v60 = vpop.f32.mrf.mxu0 }
 0x6bd   : > { %v6259_v22 = vpack.c.bf16 %v15571_v60, %v15569_v55  ;;  %v6468_v33 = vrot.slane %v15571_v60, 5  ;;  %v6582_v9 = vrot.slane %v15571_v60, 6  ;;  %v6136_v26 = vrot.slane %v15571_v60, 7  ;;  %v10111_v55 = vld [vmem:[%s17252_s5 + $0x118] sm:$0xff]  }
 0x6be   : > { %v9780_v0 = vpop.f32.mrf.mxu0  ;;  %v5781_v31 = vrot.slane %v15571_v60, 1  ;;  %v5809_v39 = vrot.slane %v15571_v60, 2 }
 0x6bf   : > { %v15583_v43 = vsel %vm651_vm0, %v6360_v51, %v6468_v33  ;;  %v15586_v17 = vsel %vm949_vm1, %v6581_v41, %v6582_v9  ;;  %v15597_v35 = vsel %vm1288_vm2, %v6135_v1, %v6136_v26 }
 0x6c0   : > { %v15588_v32 = vpop.f32.mrf.mxu0  ;;  %v15647_v48 = vsel %vm606_vm3, %v15632_v2, %v5781_v31  ;;  %v5810_v5 = vsel %vm942_vm4, %v15635_v52, %v5809_v39 }
 0x6c1   : > { %v6138_v45 = vrot.slane %v15588_v32, 7  ;;  %v6470_v56 = vrot.slane %v15588_v32, 5  ;;  %v6584_v47 = vrot.slane %v15588_v32, 6  ;;  %v5783_v37 = vrot.slane %v15588_v32, 1 }
 0x6c2   : > { %v9783_v18 = vpop.f32.mrf.mxu0  ;;  %v5811_v23 = vrot.slane %v15588_v32, 2 }
 0x6c3   : > { %v15600_v49 = vsel %vm1288_vm2, %v6136_v26, %v6138_v45  ;;  %v15603_v6 = vsel %vm651_vm0, %v6468_v33, %v6470_v56  ;;  %v15606_v13 = vsel %vm949_vm1, %v6582_v9, %v6584_v47  ;;  %v15712_v26 = vsel %vm606_vm3, %v5781_v31, %v5783_v37  ;;  %v10092_v18 = vld [vmem:[%s17252_s5 + $0x68] sm:$0xff]  }
 0x6c4   : > { %v15608_v63 = vpop.f32.mrf.mxu0  ;;  %v6703_v61 = vpack.c.bf16 %v15600_v49, %v15597_v35  ;;  %v6484_v10 = vpack.c.bf16 %v15603_v6, %v15583_v43  ;;  %v6598_v12 = vpack.c.bf16 %v15606_v13, %v15586_v17  ;;  %v5812_v0 = vsel %vm942_vm4, %v5809_v39, %v5811_v23  ;;  %v10113_v43 = vld [vmem:[%s17252_s5 + $0x108] sm:$0xff]   ;;  %v10114_v17 = vld [vmem:[%s17252_s5 + $0x100] sm:$0xff]  }
 0x6c5   : > { %v5773_v36 = vrot.slane %v15608_v63, 5  ;;  %v6260_v44 = vpack.c.bf16 %v15608_v63, %v15588_v32  ;;  %v5804_v50 = vrot.slane %v15608_v63, 6  ;;  %v6011_v16 = vrot.slane %v15608_v63, 7 }
 0x6c6   : > { %v9786_v24 = vpop.f32.mrf.mxu0  ;;  %v15674_v15 = vrot.slane %v15608_v63, 1  ;;  %v5813_v28 = vrot.slane %v15608_v63, 2  ;;  %v6486_v6 = vpack.c.bf16 %v15632_v2, %v15632_v2  ;;  %v6600_v13 = vpack.c.bf16 %v15635_v52, %v15635_v52 }
 0x6c7   : > { %v15620_v3 = vsel %vm651_vm0, %v6470_v56, %v5773_v36  ;;  %v15680_v42 = vsel %vm1288_vm2, %v6138_v45, %v6011_v16  ;;  %v15691_v4 = vsel %vm949_vm1, %v6584_v47, %v5804_v50  ;;  %v10091_v47 = vld [vmem:[%s17252_s5 + $0x48] sm:$0xff]   ;;  %v10094_v24 = vld [vmem:[%s17252_s5 + $0x60] sm:$0xff]  }
 0x6c8   : > { %v15625_v20 = vpop.f32.mrf.mxu0  ;;  %v5814_v33 = vsel %vm942_vm4, %v5811_v23, %v5813_v28  ;;  %v15706_v9 = vsel %vm606_vm3, %v5783_v37, %v15674_v15  ;;  %v5831_v31 = vpack.c.bf16 %v5813_v28, %v5813_v28  ;;  %v5803_v39 = vpack.c.bf16 %v15674_v15, %v15674_v15  ;;  %v10099_v23 = vld [vmem:[%s17252_s5 + $0x88] sm:$0xff]  }
 0x6c9   : > { %v5774_v40 = vrot.slane %v15625_v20, 5  ;;  %v5805_v58 = vrot.slane %v15625_v20, 6  ;;  %v6012_v38 = vrot.slane %v15625_v20, 7  ;;  %v5830_v45 = vpack.c.bf16 %v5814_v33, %v5812_v0  ;;  %v10102_v33 = vld [vmem:[%s17252_s5 + $0xa0] sm:$0xff]  }
 0x6ca   : > { %v9789_v21 = vpop.f32.mrf.mxu0  ;;  %v5802_v56 = vpack.c.bf16 %v15706_v9, %v15712_v26  ;;  %v6155_v37 = vpack.c.bf16 %v15680_v42, %v15600_v49 }
 0x6cb   : > { %v5775_v59 = vsel %vm651_vm0, %v5773_v36, %v5774_v40  ;;  %v5806_v34 = vsel %vm949_vm1, %v5804_v50, %v5805_v58  ;;  %v15643_v19 = vsel %vm1288_vm2, %v6011_v16, %v6012_v38  ;;  %v10093_v36 = vld [vmem:[%s17252_s5 + $0x40] sm:$0xff]   ;;  %v6133_v50 = vrot.slane %v15625_v20, 3 }
 0x6cc   : > { %v15653_v30 = vsel %vm606_vm3, %v5775_v59, %v15632_v2  ;;  %v15657_v14 = vsel %vm942_vm4, %v5806_v34, %v15635_v52  ;;  %v15665_v8 = vsel %vm1281_vm5, %v15643_v19, %v15638_v57  ;;  %v6016_v16 = vrot.slane %v15571_v60, 3  ;;  %v10095_v59 = vld [vmem:[%s17252_s5 + $0x98] sm:$0xff]   ;;  %v10106_v60 = vld [vmem:[%s17252_s5 + $0xf0] sm:$0xff]  }
 0x6cd   : > { %v5801_v29 = vpack.c.bf16 %v15647_v48, %v15653_v30  ;;  %v5829_v46 = vpack.c.bf16 %v5810_v5, %v15657_v14  ;;  %v6485_v62 = vpack.c.bf16 %v15653_v30, %v15620_v3  ;;  %v6704_v54 = vpack.c.bf16 %v15665_v8, %v15680_v42  ;;  %v10096_v34 = vld [vmem:[%s17252_s5 + $0xb8] sm:$0xff]   ;;  %v6886_v42 = vld [vmem:[%s16218_s11] sm:$0xff] }
 0x6ce   : > { %v6599_v41 = vpack.c.bf16 %v15657_v14, %v15691_v4  ;;  %v6145_v40 = vsel %vm1288_vm2, %v6133_v50, %v6135_v1  ;;  %v6017_v58 = vsel %vm1281_vm5, %v15638_v57, %v6016_v16  ;;  %v6020_v5 = vrot.slane %v15608_v63, 3  ;;  %v10115_v4 = vld [vmem:[#allocation2 + $0xf0] ss:$8 sps:$4 sm:$0xff]  }
 0x6cf   : > { %9799 = vmatmul.mubr.msk.bf16.vlgmr.msra.gmra.mxu0 %vm5856_vm11, %v5829_v46  ;;  %9819 = vmatmul.mubr.msk.bf16.vlgmr.msra.gmra.mxu1 %vm5856_vm11, %v5801_v29  ;;  %v6036_v38 = vpack.c.bf16 %v6017_v58, %v15665_v8  ;;  %v6154_v21 = vpack.c.bf16 %v15597_v35, %v6145_v40  ;;  %v6018_v1 = vrot.slane %v15588_v32, 3  ;;  %v10097_v29 = vld [vmem:[%s17252_s5 + $0x90] sm:$0xff]   ;;  %v10110_v32 = vld [vmem:[%s17252_s5 + $0xe0] sm:$0xff]  }
 0x6d0   : > { %9802 = vmatprep.mubr.msk.bf16.mxu0 %vm10526_vm6, %v17182_v53  ;;  %9822 = vmatprep.mubr.msk.bf16.mxu1 %vm10526_vm6, %v17182_v53  ;;  %v10098_v46 = vld [vmem:[%s17252_s5 + $0xb0] sm:$0xff]   ;;  %v6038_v0 = vpack.c.bf16 %v6020_v5, %v6020_v5 }
 0x6d1   : > { %9831 = vmatpush3.bf16.msra.mxu0 %v10087_v25  ;;  %9851 = vmatpush3.bf16.msra.mxu1 %v10088_v11  ;;  %v6021_v25 = vsel %vm1281_vm5, %v6018_v1, %v6020_v5  ;;  %v6019_v11 = vsel %vm1281_vm5, %v6016_v16, %v6018_v1  ;;  %v10121_v16 = vld [vmem:[#allocation2 + $0xe0] ss:$8 sps:$4 sm:$0xff]   ;;  %v10127_v5 = vld [vmem:[#allocation2 + $0xd0] ss:$8 sps:$4 sm:$0xff]  }
 0x6d2   : > { %9832 = vmatprep.subr.bf16.mxu0 %v17182_v53  ;;  %9852 = vmatprep.subr.bf16.mxu1 %v17182_v53  ;;  %v6037_v28 = vpack.c.bf16 %v6021_v25, %v6019_v11  ;;  %v10135_v25 = vld [vmem:[#allocation2 + $0xc4] ss:$8 sps:$4 sm:$0xff]  }
 0x6d5   : > { %9833 = vmatpush3.bf16.msra.mxu0 %v10089_v27  ;;  %9853 = vmatpush3.bf16.msra.mxu1 %v10090_v7  ;;  %v10100_v27 = vld [vmem:[%s17252_s5 + $0xa8] sm:$0xff]   ;;  %v10101_v7 = vld [vmem:[%s17252_s5 + $0x80] sm:$0xff]  }
 0x6d6   : > { %9834 = vmatprep.subr.bf16.mxu0 %v17182_v53  ;;  %9854 = vmatprep.subr.bf16.mxu1 %v17182_v53 }
 0x6d7   : > { %9803 = vmatmul.mubr.msk.bf16.gmra.mxu0 %vm5856_vm11, %v5830_v45  ;;  %9823 = vmatmul.mubr.msk.bf16.gmra.mxu1 %vm5856_vm11, %v5802_v56  ;;  %v6156_v45 = vpack.c.bf16 %v15643_v19, %v15643_v19  ;;  %v6371_v56 = vpack.c.bf16 %v15712_v26, %v15647_v48  ;;  %v10103_v19 = vld [vmem:[%s17252_s5 + $0xd8] sm:$0xff]   ;;  %v10105_v48 = vld [vmem:[%s17252_s5 + $0xd0] sm:$0xff]  }
 0x6d8   : > { %9806 = vmatprep.mubr.msk.bf16.mxu0 %vm10526_vm6, %v17182_v53  ;;  %9826 = vmatprep.mubr.msk.bf16.mxu1 %vm10526_vm6, %v17182_v53 }
 0x6d9   : > { %9835 = vmatpush3.bf16.msra.mxu0 %v10091_v47  ;;  %9855 = vmatpush3.bf16.msra.mxu1 %v10092_v18  ;;  %v10104_v47 = vld [vmem:[%s17252_s5 + $0xf8] sm:$0xff]   ;;  %v6356_v18 = vrot.slane %v15625_v20, 1 }
 0x6da   : > { %9836 = vmatprep.subr.bf16.mxu0 %v17182_v53  ;;  %9856 = vmatprep.subr.bf16.mxu1 %v17182_v53 }
 0x6db   : > { %v6362_v63 = vsel %vm651_vm0, %v6356_v18, %v6360_v51  ;;  %v10112_v51 = vld [vmem:[%s17252_s5 + $0x110] sm:$0xff]  }
 0x6dd   : > { %9837 = vmatpush3.bf16.msra.mxu0 %v10093_v36  ;;  %9857 = vmatpush3.bf16.msra.mxu1 %v10094_v24  ;;  %v10107_v36 = vld [vmem:[%s17252_s5 + $0xc8] sm:$0xff]  }
 0x6de   : > { %9870 = vmatprep.subr.bf16.mxu0 %v17182_v53  ;;  %9890 = vmatprep.subr.bf16.mxu1 %v17182_v53  ;;  %v10108_v24 = vld [vmem:[%s17252_s5 + $0xe8] sm:$0xff]  }
 0x6df   : > { %9807 = vmatmul.mubr.msk.bf16.gmra.mxu0 %vm5856_vm11, %v5831_v31  ;;  %9827 = vmatmul.mubr.msk.bf16.gmra.mxu1 %vm5856_vm11, %v5803_v39  ;;  %v10123_v31 = vld [vmem:[#allocation2 + $0xe4] ss:$8 sps:$4 sm:$0xff]  }
 0x6e0   : > { %9838 = vmatprep.mubr.msk.bf16.mxu0 %vm10526_vm6, %v17182_v53  ;;  %9858 = vmatprep.mubr.msk.bf16.mxu1 %vm10526_vm6, %v17182_v53 }
 0x6e7   : > { %9839 = vmatmul.mubr.msk.bf16.vlgmr.msra.gmra.mxu0 %vm5856_vm11, %v6036_v38  ;;  %9859 = vmatmul.mubr.msk.bf16.vlgmr.msra.gmra.mxu1 %vm5856_vm11, %v6154_v21  ;;  %v10129_v21 = vld [vmem:[#allocation2 + $0xd4] ss:$8 sps:$4 sm:$0xff]  }
 0x6e8   : > { %9842 = vmatprep.mubr.msk.bf16.mxu0 %vm10526_vm6, %v17182_v53  ;;  %9862 = vmatprep.mubr.msk.bf16.mxu1 %vm10526_vm6, %v17182_v53 }
 0x6e9   : > { %9871 = vmatpush3.bf16.msra.mxu0 %v10095_v59  ;;  %9891 = vmatpush3.bf16.msra.mxu1 %v10096_v34 }
 0x6ea   : > { %9872 = vmatprep.subr.bf16.mxu0 %v17182_v53  ;;  %9892 = vmatprep.subr.bf16.mxu1 %v17182_v53 }
 0x6ed   : > { %9873 = vmatpush3.bf16.msra.mxu0 %v10097_v29  ;;  %9893 = vmatpush3.bf16.msra.mxu1 %v10098_v46 }
 0x6ee   : > { %9874 = vmatprep.subr.bf16.mxu0 %v17182_v53  ;;  %9894 = vmatprep.subr.bf16.mxu1 %v17182_v53 }
 0x6ef   : > { %9843 = vmatmul.mubr.msk.bf16.gmra.mxu0 %vm5856_vm11, %v6037_v28  ;;  %9863 = vmatmul.mubr.msk.bf16.gmra.mxu1 %vm5856_vm11, %v6155_v37  ;;  %v10133_v37 = vld [vmem:[#allocation2 + $0xc0] ss:$8 sps:$4 sm:$0xff]  }
 0x6f0   : > { %9846 = vmatprep.mubr.msk.bf16.mxu0 %vm10526_vm6, %v17182_v53  ;;  %9866 = vmatprep.mubr.msk.bf16.mxu1 %vm10526_vm6, %v17182_v53 }
 0x6f1   : > { %9875 = vmatpush3.bf16.msra.mxu0 %v10099_v23  ;;  %9895 = vmatpush3.bf16.msra.mxu1 %v10100_v27 }
 0x6f2   : > { %9876 = vmatprep.subr.bf16.mxu0 %v17182_v53  ;;  %9896 = vmatprep.subr.bf16.mxu1 %v17182_v53 }
 0x6f5   : > { %9877 = vmatpush3.bf16.msra.mxu0 %v10101_v7  ;;  %9897 = vmatpush3.bf16.msra.mxu1 %v10102_v33  ;;  %v10141_v7 = vld [vmem:[#allocation2 + $0xb4] ss:$8 sps:$4 sm:$0xff]  }
 0x6f6   : > { %9910 = vmatprep.subr.bf16.mxu0 %v17182_v53  ;;  %9930 = vmatprep.subr.bf16.mxu1 %v17182_v53 }
 0x6f7   : > { %9847 = vmatmul.mubr.msk.bf16.gmra.mxu0 %vm5856_vm11, %v6038_v0  ;;  %9867 = vmatmul.mubr.msk.bf16.gmra.mxu1 %vm5856_vm11, %v6156_v45  ;;  %v10139_v45 = vld [vmem:[#allocation2 + $0xb0] ss:$8 sps:$4 sm:$0xff]  }
 0x6f8   : > { %9878 = vmatprep.mubr.msk.bf16.mxu0 %vm10526_vm6, %v17182_v53  ;;  %9898 = vmatprep.mubr.msk.bf16.mxu1 %vm10526_vm6, %v17182_v53 }
 0x6ff   : > { %9879 = vmatmul.mubr.msk.bf16.vlgmr.msra.gmra.mxu0 %vm5856_vm11, %v6259_v22  ;;  %9899 = vmatmul.mubr.msk.bf16.vlgmr.msra.gmra.mxu1 %vm5856_vm11, %v6371_v56  ;;  %v6357_v22 = vsel %vm606_vm3, %v15674_v15, %v6356_v18  ;;  %v10109_v15 = vld [vmem:[%s17252_s5 + $0xc0] sm:$0xff]  }
 0x700   : > { %9882 = vmatprep.mubr.msk.bf16.mxu0 %vm10526_vm6, %v17182_v53  ;;  %9902 = vmatprep.mubr.msk.bf16.mxu1 %vm10526_vm6, %v17182_v53  ;;  %v6372_v26 = vpack.c.bf16 %v6357_v22, %v15706_v9  ;;  %v6373_v9 = vpack.c.bf16 %v6362_v63, %v6362_v63  ;;  %v10147_v18 = vld [vmem:[#allocation2 + $0xa4] ss:$8 sps:$4 sm:$0xff]  }
 0x701   : > { %9911 = vmatpush3.bf16.msra.mxu0 %v10103_v19  ;;  %9931 = vmatpush3.bf16.msra.mxu1 %v10104_v47 }
 0x702   : > { %9912 = vmatprep.subr.bf16.mxu0 %v17182_v53  ;;  %9932 = vmatprep.subr.bf16.mxu1 %v17182_v53 }
 0x705   : > { %9913 = vmatpush3.bf16.msra.mxu0 %v10105_v48  ;;  %9933 = vmatpush3.bf16.msra.mxu1 %v10106_v60 }
 0x706   : > { %9914 = vmatprep.subr.bf16.mxu0 %v17182_v53  ;;  %9934 = vmatprep.subr.bf16.mxu1 %v17182_v53 }
 0x707   : > { %9883 = vmatmul.mubr.msk.bf16.gmra.mxu0 %vm5856_vm11, %v6260_v44  ;;  %9903 = vmatmul.mubr.msk.bf16.gmra.mxu1 %vm5856_vm11, %v6372_v26  ;;  %v6261_v44 = vpack.c.bf16 %v15625_v20, %v15625_v20  ;;  %v10145_v26 = vld [vmem:[#allocation2 + $0xa0] ss:$8 sps:$4 sm:$0xff]  }
 0x708   : > { %9886 = vmatprep.mubr.msk.bf16.mxu0 %vm10526_vm6, %v17182_v53  ;;  %9906 = vmatprep.mubr.msk.bf16.mxu1 %vm10526_vm6, %v17182_v53 }
 0x709   : > { %9915 = vmatpush3.bf16.msra.mxu0 %v10107_v36  ;;  %9935 = vmatpush3.bf16.msra.mxu1 %v10108_v24 }
 0x70a   : > { %9916 = vmatprep.subr.bf16.mxu0 %v17182_v53  ;;  %9936 = vmatprep.subr.bf16.mxu1 %v17182_v53 }
 0x70d   : > { %9917 = vmatpush3.bf16.msra.mxu0 %v10109_v15  ;;  %9937 = vmatpush3.bf16.msra.mxu1 %v10110_v32  ;;  %v10153_v32 = vld [vmem:[#allocation2 + $0x94] ss:$8 sps:$4 sm:$0xff]  }
 0x70e   : > { %9950 = vmatprep.subr.bf16.mxu0 %v17182_v53 }
 0x70f   : > { %9887 = vmatmul.mubr.msk.bf16.gmra.mxu0 %vm5856_vm11, %v6261_v44  ;;  %9907 = vmatmul.mubr.msk.bf16.gmra.mxu1 %vm5856_vm11, %v6373_v9 }
 0x710   : > { %9918 = vmatprep.mubr.msk.bf16.mxu0 %vm10526_vm6, %v17182_v53  ;;  %9938 = vmatprep.mubr.msk.bf16.mxu1 %vm10526_vm6, %v17182_v53 }
 0x717   : > { %9919 = vmatmul.mubr.msk.bf16.vlgmr.msra.gmra.mxu0 %vm5856_vm11, %v6484_v10  ;;  %9939 = vmatmul.mubr.msk.bf16.vlgmr.msra.gmra.mxu1 %vm5856_vm11, %v6598_v12  ;;  %v6705_v10 = vpack.c.bf16 %v15638_v57, %v15638_v57  ;;  %v17253_v12 = vmov 0  }
 0x718   : > { %9922 = vmatprep.mubr.msk.bf16.mxu0 %vm10526_vm6, %v17182_v53  ;;  %9942 = vmatprep.mubr.msk.bf16.mxu1 %vm10526_vm6, %v17182_v53 }
 0x719   : > { %9951 = vmatpush3.bf16.msra.mxu0 %v10111_v55  ;;  %v10151_v55 = vld [vmem:[#allocation2 + $0x90] ss:$8 sps:$4 sm:$0xff]  }
 0x71a   : > { %9952 = vmatprep.subr.bf16.mxu0 %v17182_v53 }
 0x71d   : > { %9953 = vmatpush3.bf16.msra.mxu0 %v10112_v51 }
 0x71e   : > { %9954 = vmatprep.subr.bf16.mxu0 %v17182_v53 }
 0x71f   : > { %9923 = vmatmul.mubr.msk.bf16.gmra.mxu0 %vm5856_vm11, %v6485_v62  ;;  %9943 = vmatmul.mubr.msk.bf16.gmra.mxu1 %vm5856_vm11, %v6599_v41 }
 0x720   : > { %9926 = vmatprep.mubr.msk.bf16.mxu0 %vm10526_vm6, %v17182_v53  ;;  %9946 = vmatprep.mubr.msk.bf16.mxu1 %vm10526_vm6, %v17182_v53 }
 0x721   : > { %9955 = vmatpush3.bf16.msra.mxu0 %v10113_v43 }
 0x722   : > { %9956 = vmatprep.subr.bf16.mxu0 %v17182_v53 }
 0x725   : > { %9957 = vmatpush3.bf16.msra.mxu0 %v10114_v17 }
 0x727   : > { %9927 = vmatmul.mubr.msk.bf16.gmra.mxu0 %vm5856_vm11, %v6486_v6  ;;  %9947 = vmatmul.mubr.msk.bf16.gmra.mxu1 %vm5856_vm11, %v6600_v13 }
 0x728   : > { %9958 = vmatprep.mubr.msk.bf16.mxu0 %vm10526_vm6, %v17182_v53  ;;  %9980 = vmatprep.mubr.msk.f32.mxu1 %vm6888_vm12, %v6886_v42 }
 0x72f   : > { %9959 = vmatmul.mubr.msk.bf16.vlgmr.msra.gmra.mxu0 %vm5856_vm11, %v6703_v61 }
 0x730   : > { %9962 = vmatprep.mubr.msk.bf16.mxu0 %vm10526_vm6, %v17182_v53 }
 0x737   : > { %9963 = vmatmul.mubr.msk.bf16.gmra.mxu0 %vm5856_vm11, %v6704_v54  ;;  %v10117_v54 = vld [vmem:[#allocation2 + $0xf4] ss:$8 sps:$4 sm:$0xff]  }
 0x738   : > { %9966 = vmatprep.mubr.msk.bf16.mxu0 %vm10526_vm6, %v17182_v53  ;;  %7103 = vmatprep.subr.bf16.mxu0 %v10117_v54 }
 0x739   : > { %7104 = vmatpush1.bf16.msra.mxu0 %v10115_v4 }
 0x73a   : > { %7105 = vmatprep.subr.bf16.mxu0 %v10123_v31 }
 0x73d   : > { %7106 = vmatpush1.bf16.msra.mxu0 %v10121_v16 }
 0x73e   : > { %7107 = vmatprep.subr.bf16.mxu0 %v10129_v21 }
 0x73f   : > { %9967 = vmatmul.mubr.msk.bf16.gmra.mxu0 %vm5856_vm11, %v6705_v10 }
 0x740   : > { %7135 = vmatprep.mubr.bf16.mxu0 %v17253_v12 }
 0x741   : > { %7108 = vmatpush1.bf16.msra.mxu0 %v10127_v5 }
 0x742   : > { %7109 = vmatprep.subr.bf16.mxu0 %v10135_v25 }
 0x745   : > { %7110 = vmatpush1.bf16.msra.mxu0 %v10133_v37 }
 0x746   : > { %7111 = vmatprep.subr.bf16.mxu0 %v10141_v7 }
 0x749   : > { %7112 = vmatpush1.bf16.msra.mxu0 %v10139_v45 }
 0x74a   : > { %7113 = vmatprep.subr.bf16.mxu0 %v10147_v18 }
 0x74d   : > { %7114 = vmatpush1.bf16.msra.mxu0 %v10145_v26 }
 0x74e   : > { %7115 = vmatprep.subr.bf16.mxu0 %v10153_v32 }
 0x751   : > { %7116 = vmatpush1.bf16.msra.mxu0 %v10151_v55 }
 0x78f   : > { %v5900_v35 = vpop.f32.mrf.mxu0  ;;  %v5989_v49 = vpop.f32.mrf.mxu1 }
 0x790   : > { %v5990_v61 = vadd.f32 %v5989_v49, %v5900_v35 }
 0x791   : > { %v9800_v3 = vpop.f32.mrf.mxu0  ;;  %v9820_v20 = vpop.f32.mrf.mxu1 }
 0x793   : > { %v5903_v2 = vpop.f32.mrf.mxu0  ;;  %v5992_v52 = vpop.f32.mrf.mxu1 }
 0x794   : > { %v5993_v30 = vadd.f32 %v5992_v52, %v5903_v2 }
 0x795   : > { %v9801_v14 = vpop.f32.mrf.mxu0  ;;  %v9821_v8 = vpop.f32.mrf.mxu1 }
 0x797   : > { %v5908_v57 = vpop.f32.mrf.mxu0  ;;  %v5997_v62 = vpop.f32.mrf.mxu1 }
 0x798   : > { %v5998_v41 = vadd.f32 %v5997_v62, %v5908_v57 }
 0x799   : > { %v9804_v39 = vpop.f32.mrf.mxu0  ;;  %v9824_v50 = vpop.f32.mrf.mxu1 }
 0x79b   : > { %v5911_v40 = vpop.f32.mrf.mxu0  ;;  %v6000_v58 = vpop.f32.mrf.mxu1 }
 0x79c   : > { %v6001_v38 = vadd.f32 %v6000_v58, %v5911_v40 }
 0x79d   : > { %v9805_v59 = vpop.f32.mrf.mxu0  ;;  %v9825_v34 = vpop.f32.mrf.mxu1 }
 0x79f   : > { %v5916_v1 = vpop.f32.mrf.mxu0  ;;  %v6005_v29 = vpop.f32.mrf.mxu1 }
 0x7a0   : > { %v15948_v46 = vadd.f32 %v6005_v29, %v5916_v1 }
 0x7a1   : > { %v9808_v11 = vpop.f32.mrf.mxu0  ;;  %v9828_v28 = vpop.f32.mrf.mxu1 }
 0x7a3   : > { %v5919_v23 = vpop.f32.mrf.mxu0  ;;  %v6008_v27 = vpop.f32.mrf.mxu1 }
 0x7a5   : > { %v9809_v33 = vpop.f32.mrf.mxu0  ;;  %v9829_v0 = vpop.f32.mrf.mxu1 }
 0x7a7   : > { %v6106_v56 = vpop.f32.mrf.mxu0  ;;  %v6224_v19 = vpop.f32.mrf.mxu1 }
 0x7a8   : > { %v6128_v47 = vadd.f32 %v6106_v56, %v5990_v61 }
 0x7a9   : > { %v9840_v48 = vpop.f32.mrf.mxu0  ;;  %v9860_v60 = vpop.f32.mrf.mxu1 }
 0x7aa   : > { %v15950_v22 = vadd.f32 %v6224_v19, %v6128_v47 }
 0x7ab   : > { %v6109_v36 = vpop.f32.mrf.mxu0  ;;  %v6227_v24 = vpop.f32.mrf.mxu1 }
 0x7ac   : > { %v6129_v15 = vadd.f32 %v6109_v36, %v5993_v30 }
 0x7ad   : > { %v9841_v63 = vpop.f32.mrf.mxu0  ;;  %v9861_v44 = vpop.f32.mrf.mxu1 }
 0x7ae   : > { %v15952_v9 = vadd.f32 %v6227_v24, %v6129_v15 }
 0x7af   : > { %v6114_v51 = vpop.f32.mrf.mxu0  ;;  %v6232_v43 = vpop.f32.mrf.mxu1 }
 0x7b0   : > { %v6130_v17 = vadd.f32 %v6114_v51, %v5998_v41 }
 0x7b1   : > { %v9844_v6 = vpop.f32.mrf.mxu0  ;;  %v9864_v13 = vpop.f32.mrf.mxu1 }
 0x7b2   : > { %v15954_v10 = vadd.f32 %v6232_v43, %v6130_v17 }
 0x7b3   : > { %v6117_v35 = vpop.f32.mrf.mxu0  ;;  %v6235_v49 = vpop.f32.mrf.mxu1 }
 0x7b4   : > { %v6131_v61 = vadd.f32 %v6117_v35, %v6001_v38 }
 0x7b5   : > { %v9845_v3 = vpop.f32.mrf.mxu0  ;;  %v9865_v20 = vpop.f32.mrf.mxu1 }
 0x7b6   : > { %v15956_v2 = vadd.f32 %v6235_v49, %v6131_v61 }
 0x7b7   : > { %v6122_v52 = vpop.f32.mrf.mxu0  ;;  %v15958_v30 = vpop.f32.mrf.mxu1 }
 0x7b9   : > { %v9848_v14 = vpop.f32.mrf.mxu0  ;;  %v9868_v8 = vpop.f32.mrf.mxu1 }
 0x7bb   : > { %v6125_v42 = vpop.f32.mrf.mxu0  ;;  %v6243_v57 = vpop.f32.mrf.mxu1 }
 0x7bc   : > { %v6132_v57 = vadd.f32 %v6122_v52, %v15948_v46 }
 0x7bd   : > { %v9849_v62 = vpop.f32.mrf.mxu0  ;;  %v9869_v4 = vpop.f32.mrf.mxu1 }
 0x7bf   : > { %v6329_v54 = vpop.f32.mrf.mxu0  ;;  %v6441_v41 = vpop.f32.mrf.mxu1 }
 0x7c0   : > { %v6351_v55 = vadd.f32 %v6329_v54, %v15950_v22 }
 0x7c1   : > { %v9880_v31 = vpop.f32.mrf.mxu0  ;;  %v9900_v39 = vpop.f32.mrf.mxu1 }
 0x7c2   : > { %v6463_v13 = vadd.f32 %v6441_v41, %v6351_v55 }
 0x7c3   : > { %v6332_v50 = vpop.f32.mrf.mxu0  ;;  %v6444_v16 = vpop.f32.mrf.mxu1 }
 0x7c4   : > { %v6352_v35 = vadd.f32 %v6332_v50, %v15952_v9  ;;  %v8935_v9 = vld [vmem:[%s16213_s6] ss:$0 sm:$0xff] }
 0x7c5   : > { %v9881_v40 = vpop.f32.mrf.mxu0  ;;  %v9901_v58 = vpop.f32.mrf.mxu1 }
 0x7c6   : > { %v6464_v8 = vadd.f32 %v6444_v16, %v6352_v35  ;;  %v6250_v40 = vadd.f32 %v15958_v30, %v6132_v57 }
 0x7c7   : > { %v6337_v38 = vpop.f32.mrf.mxu0  ;;  %v6449_v21 = vpop.f32.mrf.mxu1 }
 0x7c8   : > { %v6353_v42 = vadd.f32 %v6337_v38, %v15954_v10 }
 0x7c9   : > { %v9884_v59 = vpop.f32.mrf.mxu0  ;;  %v9904_v34 = vpop.f32.mrf.mxu1 }
 0x7ca   : > { %v6465_v41 = vadd.f32 %v6449_v21, %v6353_v42 }
 0x7cb   : > { %v6340_v5 = vpop.f32.mrf.mxu0  ;;  %v6452_v1 = vpop.f32.mrf.mxu1 }
 0x7cc   : > { %v6354_v31 = vadd.f32 %v6340_v5, %v15956_v2 }
 0x7cd   : > { %v9885_v29 = vpop.f32.mrf.mxu0  ;;  %v9905_v25 = vpop.f32.mrf.mxu1 }
 0x7ce   : > { %v6466_v46 = vadd.f32 %v6452_v1, %v6354_v31 }
 0x7cf   : > { %v6345_v11 = vpop.f32.mrf.mxu0  ;;  %v6457_v28 = vpop.f32.mrf.mxu1 }
 0x7d0   : > { %v6355_v52 = vadd.f32 %v6345_v11, %v6250_v40 }
 0x7d1   : > { %v9888_v37 = vpop.f32.mrf.mxu0  ;;  %v9908_v23 = vpop.f32.mrf.mxu1 }
 0x7d2   : > { %v6467_v23 = vadd.f32 %v6457_v28, %v6355_v52 }
 0x7d3   : > { %v6348_v27 = vpop.f32.mrf.mxu0  ;;  %v6460_v7 = vpop.f32.mrf.mxu1 }
 0x7d5   : > { %v9889_v33 = vpop.f32.mrf.mxu0  ;;  %v9909_v0 = vpop.f32.mrf.mxu1 }
 0x7d7   : > { %v6554_v45 = vpop.f32.mrf.mxu0  ;;  %v6668_v56 = vpop.f32.mrf.mxu1 }
 0x7d8   : > { %v6576_v3 = vadd.f32 %v6554_v45, %v6463_v13 }
 0x7d9   : > { %v9920_v19 = vpop.f32.mrf.mxu0  ;;  %v9940_v47 = vpop.f32.mrf.mxu1 }
 0x7da   : > { %v6690_v22 = vadd.f32 %v6668_v56, %v6576_v3 }
 0x7db   : > { %v6557_v18 = vpop.f32.mrf.mxu0  ;;  %v6671_v48 = vpop.f32.mrf.mxu1 }
 0x7dc   : > { %v6577_v54 = vadd.f32 %v6557_v18, %v6464_v8 }
 0x7dd   : > { %v9921_v60 = vpop.f32.mrf.mxu0  ;;  %v9941_v26 = vpop.f32.mrf.mxu1 }
 0x7de   : > { %v6691_v58 = vadd.f32 %v6671_v48, %v6577_v54 }
 0x7df   : > { %v6562_v36 = vpop.f32.mrf.mxu0  ;;  %v6676_v24 = vpop.f32.mrf.mxu1 }
 0x7e0   : > { %v6578_v10 = vadd.f32 %v6562_v36, %v6465_v41 }
 0x7e1   : > { %v9924_v15 = vpop.f32.mrf.mxu0  ;;  %v9944_v32 = vpop.f32.mrf.mxu1 }
 0x7e2   : > { %v6692_v5 = vadd.f32 %v6676_v24, %v6578_v10 }
 0x7e3   : > { %v6565_v63 = vpop.f32.mrf.mxu0  ;;  %v6679_v44 = vpop.f32.mrf.mxu1 }
 0x7e4   : > { %v6579_v29 = vadd.f32 %v6565_v63, %v6466_v46 }
 0x7e5   : > { %v9925_v51 = vpop.f32.mrf.mxu0  ;;  %v9945_v43 = vpop.f32.mrf.mxu1 }
 0x7e6   : > { %v6693_v33 = vadd.f32 %v6679_v44, %v6579_v29 }
 0x7e7   : > { %v6570_v17 = vpop.f32.mrf.mxu0  ;;  %v6684_v6 = vpop.f32.mrf.mxu1 }
 0x7e8   : > { %v6580_v30 = vadd.f32 %v6570_v17, %v6467_v23 }
 0x7e9   : > { %v9928_v49 = vpop.f32.mrf.mxu0  ;;  %v9948_v61 = vpop.f32.mrf.mxu1 }
 0x7ea   : > { %v6694_v24 = vadd.f32 %v6684_v6, %v6580_v30 }
 0x7eb   : > { %v6573_v20 = vpop.f32.mrf.mxu0  ;;  %v6687_v14 = vpop.f32.mrf.mxu1 }
 0x7ed   : > { %v9929_v62 = vpop.f32.mrf.mxu0  ;;  %v9949_v4 = vpop.f32.mrf.mxu1 }
 0x7ef   : > { %v6773_v39 = vpop.f32.mrf.mxu0 }
 0x7f0   : > { %v6795_v50 = vadd.f32 %v6773_v39, %v6690_v22 }
 0x7f1   : > { %v9960_v16 = vpop.f32.mrf.mxu0 }
 0x7f2   : > { %v6807_v38 = vadd.f32 %v8935_v9, %v6795_v50 }
 0x7f3   : > { %v6776_v59 = vpop.f32.mrf.mxu0 }
 0x7f4   : > { %v6796_v34 = vadd.f32 %v6776_v59, %v6691_v58  ;;  %v15969_v25 = vmax.f32 %v6807_v38, 0.0 }
 0x7f5   : > { %v9961_v2 = vpop.f32.mrf.mxu0 }
 0x7f6   : > { %v6808_v37 = vadd.f32 %v8935_v9, %v6796_v34  ;;  %v6822_v45 = vrot.slane %v15969_v25, 1  ;;  %v6844_v1 = vrot.slane %v15969_v25, 6  ;;  %v6860_v48 = vrot.slane %v15969_v25, 7 }
 0x7f7   : > { %v6781_v27 = vpop.f32.mrf.mxu0  ;;  %v6857_v54 = vrot.slane %v15969_v25, 2  ;;  %v6873_v31 = vrot.slane %v15969_v25, 3  ;;  %v6836_v34 = vrot.slane %v15969_v25, 5 }
 0x7f8   : > { %v6813_v21 = vmax.f32 %v6808_v37, 0.0  ;;  %v6797_v7 = vadd.f32 %v6781_v27, %v6692_v5 }
 0x7f9   : > { %v9964_v0 = vpop.f32.mrf.mxu0  ;;  %v6880_v29 = vmax.f32 %v6857_v54, %v6873_v31 }
 0x7fa   : > { %v6823_v11 = vrot.slane %v6813_v21, 1  ;;  %v6845_v56 = vrot.slane %v6813_v21, 6  ;;  %v6861_v19 = vrot.slane %v6813_v21, 7  ;;  %v6809_v47 = vadd.f32 %v8935_v9, %v6797_v7 }
 0x7fb   : > { %v6784_v18 = vpop.f32.mrf.mxu0 }
 0x7fc   : > { %v6814_v60 = vmax.f32 %v6809_v47, 0.0  ;;  %v6798_v26 = vadd.f32 %v6784_v18, %v6693_v33  ;;  %v6824_v28 = vsel %vm606_vm3, %v6822_v45, %v6823_v11  ;;  %v6846_v36 = vsel %vm949_vm1, %v6844_v1, %v6845_v56  ;;  %v10124_v47 = vld [vmem:[#allocation2 + $0x60] ss:$8 sps:$4 sm:$0xff]   ;;  %v10132_v18 = vld [vmem:[#allocation2 + $0x54] ss:$8 sps:$4 sm:$0xff]  }
 0x7fd   : > { %v9965_v15 = vpop.f32.mrf.mxu0  ;;  %v6839_v32 = vmax.f32 %v15969_v25, %v6824_v28  ;;  %v6862_v63 = vsel %vm1288_vm2, %v6860_v48, %v6861_v19  ;;  %v10120_v25 = vld [vmem:[#allocation2 + $0x74] ss:$8 sps:$4 sm:$0xff]   ;;  %v10130_v48 = vld [vmem:[#allocation2 + $0x50] ss:$8 sps:$4 sm:$0xff]  }
 0x7fe   : > { %v6825_v44 = vrot.slane %v6814_v60, 1  ;;  %v6847_v55 = vrot.slane %v6814_v60, 6  ;;  %v6863_v51 = vrot.slane %v6814_v60, 7  ;;  %v6810_v43 = vadd.f32 %v8935_v9, %v6798_v26  ;;  %v10136_v26 = vld [vmem:[#allocation2 + $0x40] ss:$8 sps:$4 sm:$0xff]  }
 0x7ff   : > { %v6789_v17 = vpop.f32.mrf.mxu0  ;;  %v6876_v13 = vmax.f32 %v6846_v36, %v6862_v63  ;;  %v10144_v28 = vld [vmem:[#allocation2 + $0x34] ss:$8 sps:$4 sm:$0xff]   ;;  %v10142_v36 = vld [vmem:[#allocation2 + $0x30] ss:$8 sps:$4 sm:$0xff]   ;;  %v10148_v15 = vld [vmem:[#allocation2 + $0x20] ss:$8 sps:$4 sm:$0xff]  }
 0x800   : > { %v6815_v35 = vmax.f32 %v6810_v43, 0.0  ;;  %v6799_v49 = vadd.f32 %v6789_v17, %v6694_v24  ;;  %v6826_v61 = vsel %vm606_vm3, %v6823_v11, %v6825_v44  ;;  %v6848_v3 = vsel %vm949_vm1, %v6845_v56, %v6847_v55  ;;  %v6887_v11 = vld [vmem:[%s16218_s11 + $0x8] sm:$0xff]  ;;  %v10118_v56 = vld [vmem:[#allocation2 + $0x70] ss:$8 sps:$4 sm:$0xff]   ;;  %v10165_v17 = vld [vmem:[#allocation2 + $0x174] ss:$8 sps:$4 sm:$0xff]  }
 0x801   : > { %v9968_v20 = vpop.f32.mrf.mxu0  ;;  %v6840_v14 = vmax.f32 %v6813_v21, %v6826_v61  ;;  %v6864_v6 = vsel %vm1288_vm2, %v6861_v19, %v6863_v51  ;;  %v6881_v8 = vmax.f32 %v6839_v32, %v6876_v13  ;;  %v10126_v19 = vld [vmem:[#allocation2 + $0x64] ss:$8 sps:$4 sm:$0xff]   ;;  %v10156_v32 = vld [vmem:[#allocation2 + $0x14] ss:$8 sps:$4 sm:$0xff]   ;;  %v10154_v63 = vld [vmem:[#allocation2 + $0x10] ss:$8 sps:$4 sm:$0xff]  }
 0x802   : > { %v6827_v42 = vrot.slane %v6815_v35, 1  ;;  %v6849_v57 = vrot.slane %v6815_v35, 6  ;;  %v6865_v62 = vrot.slane %v6815_v35, 7  ;;  %v6811_v4 = vadd.f32 %v8935_v9, %v6799_v49  ;;  %v10150_v24 = vld [vmem:[#allocation2 + $0x24] ss:$8 sps:$4 sm:$0xff]  }
 0x803   : > { %v6792_v22 = vpop.f32.mrf.mxu0  ;;  %v6877_v39 = vmax.f32 %v6848_v3, %v6864_v6  ;;  %v10162_v43 = vld [vmem:[#allocation2 + $0x4] ss:$8 sps:$4 sm:$0xff]   ;;  %v10168_v13 = vld [vmem:[#allocation2 + $0x1f4] ss:$8 sps:$4 sm:$0xff]  }
 0x804   : > { %v6816_v41 = vmax.f32 %v6811_v4, 0.0  ;;  %v6828_v50 = vsel %vm606_vm3, %v6825_v44, %v6827_v42  ;;  %v6850_v40 = vsel %vm949_vm1, %v6847_v55, %v6849_v57  ;;  %v6866_v16 = vsel %vm1288_vm2, %v6863_v51, %v6865_v62  ;;  %v10157_v44 = vld [vmem:[#allocation2 + $0x80] ss:$8 sps:$4 sm:$0xff]   ;;  %v10159_v55 = vld [vmem:[#allocation2 + $0x84] ss:$8 sps:$4 sm:$0xff]  }
 0x805   : > { %v9969_v58 = vpop.f32.mrf.mxu0  ;;  %v6841_v10 = vmax.f32 %v6814_v60, %v6828_v50  ;;  %v6878_v38 = vmax.f32 %v6850_v40, %v6866_v16  ;;  %v6882_v46 = vmax.f32 %v6840_v14, %v6877_v39  ;;  %v10138_v60 = vld [vmem:[#allocation2 + $0x44] ss:$8 sps:$4 sm:$0xff]   ;;  %v10160_v51 = vld [vmem:[#allocation2] ss:$8 sps:$4 sm:$0xff]   ;;  %7117 = vmatprep.subr.bf16.mxu0 %v10159_v55  ;;  %v10166_v4 = vld [vmem:[#allocation2 + $0x1f0] ss:$8 sps:$4 sm:$0xff]  }
 0x806   : > { %v6829_v52 = vrot.slane %v6816_v41, 1  ;;  %v6851_v59 = vrot.slane %v6816_v41, 6  ;;  %v6867_v9 = vrot.slane %v6816_v41, 7  ;;  %7118 = vmatpush1.bf16.msra.mxu0 %v10157_v44  ;;  %v10174_v50 = vld [vmem:[#allocation2 + $0x1e4] ss:$8 sps:$4 sm:$0xff]  }
 0x807   : > { %v6883_v2 = vmax.f32 %v6841_v10, %v6878_v38  ;;  %7373 = vmatprep.subr.bf16.mxu0 %v10165_v17  ;;  %v10169_v10 = vld [vmem:[#allocation2 + $0x160] ss:$8 sps:$4 sm:$0xff]   ;;  %v10214_v44 = vld [vmem:[#allocation2 + $0x2f0] ss:$8 sps:$4 sm:$0xff]   ;;  %v10222_v17 = vld [vmem:[#allocation2 + $0x2e4] ss:$8 sps:$4 sm:$0xff]  }
 0x808   : > { %v6838_v5 = vsel %vm651_vm0, %v6829_v52, %v6836_v34  ;;  %v6830_v37 = vsel %vm606_vm3, %v6827_v42, %v6829_v52  ;;  %v6852_v23 = vsel %vm949_vm1, %v6849_v57, %v6851_v59  ;;  %v6868_v27 = vsel %vm1288_vm2, %v6865_v62, %v6867_v9  ;;  %v10163_v62 = vld [vmem:[#allocation2 + $0x170] ss:$8 sps:$4 sm:$0xff]   ;;  %v10172_v38 = vld [vmem:[#allocation2 + $0x1e0] ss:$8 sps:$4 sm:$0xff]   ;;  %v10177_v59 = vld [vmem:[#allocation2 + $0x154] ss:$8 sps:$4 sm:$0xff]  }
 0x809   : > { %v6843_v21 = vmax.f32 %v6816_v41, %v6838_v5  ;;  %v6842_v7 = vmax.f32 %v6815_v35, %v6830_v37  ;;  %v6859_v33 = vsel %vm942_vm4, %v6852_v23, %v6857_v54  ;;  %v6875_v30 = vsel %vm1281_vm5, %v6868_v27, %v6873_v31  ;;  %v10171_v41 = vld [vmem:[#allocation2 + $0x164] ss:$8 sps:$4 sm:$0xff]   ;;  %v10180_v9 = vld [vmem:[#allocation2 + $0x1d4] ss:$8 sps:$4 sm:$0xff]   ;;  %v10175_v34 = vld [vmem:[#allocation2 + $0x150] ss:$8 sps:$4 sm:$0xff]  }
 0x80a   : > { %v6879_v0 = vmax.f32 %v6859_v33, %v6875_v30  ;;  %v10186_v5 = vld [vmem:[#allocation2 + $0x1c4] ss:$8 sps:$4 sm:$0xff]   ;;  %v10181_v37 = vld [vmem:[#allocation2 + $0x140] ss:$8 sps:$4 sm:$0xff]   ;;  %v10189_v27 = vld [vmem:[#allocation2 + $0x134] ss:$8 sps:$4 sm:$0xff]  }
 0x80b   : > { %v6885_v45 = vmax.f32 %v6843_v21, %v6880_v29  ;;  %v10178_v29 = vld [vmem:[#allocation2 + $0x1d0] ss:$8 sps:$4 sm:$0xff]   ;;  %v10184_v23 = vld [vmem:[#allocation2 + $0x1c0] ss:$8 sps:$4 sm:$0xff]   ;;  %v10192_v21 = vld [vmem:[#allocation2 + $0x1b4] ss:$8 sps:$4 sm:$0xff]  }
 0x80c   : > { %v6884_v1 = vmax.f32 %v6842_v7, %v6879_v0  ;;  %v10187_v7 = vld [vmem:[#allocation2 + $0x130] ss:$8 sps:$4 sm:$0xff]   ;;  %v10195_v30 = vld [vmem:[#allocation2 + $0x124] ss:$8 sps:$4 sm:$0xff]  }
 0x80d   : > { %9970 = vmatprep.subr.msk.mxu1 %vm3685_vm7, %v6885_v45  ;;  %v10190_v33 = vld [vmem:[#allocation2 + $0x1b0] ss:$8 sps:$4 sm:$0xff]   ;;  %v10198_v0 = vld [vmem:[#allocation2 + $0x1a4] ss:$8 sps:$4 sm:$0xff]  }
 0x80e   : > { %9971 = vmatpush3.msk.msra.mxu1 %vm3685_vm7, %v6885_v45  ;;  %v10193_v45 = vld [vmem:[#allocation2 + $0x120] ss:$8 sps:$4 sm:$0xff]  }
 0x80f   : > { %9972 = vmatprep.subr.mxu1 %v6884_v1 }
 0x810   : > { %9973 = vmatpush3.msra.mxu1 %v6884_v1  ;;  %v10196_v1 = vld [vmem:[#allocation2 + $0x1a0] ss:$8 sps:$4 sm:$0xff]  }
 0x811   : > { %9974 = vmatprep.subr.mxu1 %v6883_v2 }
 0x812   : > { %9975 = vmatpush3.msra.mxu1 %v6883_v2  ;;  %v10183_v2 = vld [vmem:[#allocation2 + $0x144] ss:$8 sps:$4 sm:$0xff]  }
 0x813   : > { %9976 = vmatprep.subr.mxu1 %v6882_v46 }
 0x814   : > { %9977 = vmatpush3.msra.mxu1 %v6882_v46 }
 0x815   : > { %9978 = vmatprep.subr.mxu1 %v6881_v8 }
 0x816   : > { %9979 = vmatpush3.msra.mxu1 %v6881_v8 }
 0x817   : > { %9981 = vmatmul.mubr.msk.f32.vlgmr.msra.gmra.mxu1 %vm6888_vm12, %v6887_v11  ;;  %7226 = vmatprep.subr.bf16.mxu1 %v10120_v25  ;;  %v10201_v25 = vld [vmem:[#allocation2 + $0x114] ss:$8 sps:$4 sm:$0xff]  }
 0x818   : > { %7227 = vmatpush1.bf16.msra.mxu1 %v10118_v56  ;;  %7258 = vmatprep.mubr.bf16.mxu1 %v17253_v12  ;;  %v10204_v11 = vld [vmem:[#allocation2 + $0x194] ss:$8 sps:$4 sm:$0xff]   ;;  %v10199_v56 = vld [vmem:[#allocation2 + $0x110] ss:$8 sps:$4 sm:$0xff]  }
 0x819   : > { %7228 = vmatprep.subr.bf16.mxu1 %v10126_v19  ;;  %v10202_v19 = vld [vmem:[#allocation2 + $0x190] ss:$8 sps:$4 sm:$0xff]  }
 0x81c   : > { %7229 = vmatpush1.bf16.msra.mxu1 %v10124_v47  ;;  %v10207_v47 = vld [vmem:[#allocation2 + $0x104] ss:$8 sps:$4 sm:$0xff]  }
 0x81d   : > { %7230 = vmatprep.subr.bf16.mxu1 %v10132_v18  ;;  %v10210_v18 = vld [vmem:[#allocation2 + $0x184] ss:$8 sps:$4 sm:$0xff]  }
 0x820   : > { %7231 = vmatpush1.bf16.msra.mxu1 %v10130_v48 }
 0x821   : > { %7232 = vmatprep.subr.bf16.mxu1 %v10138_v60 }
 0x824   : > { %7233 = vmatpush1.bf16.msra.mxu1 %v10136_v26  ;;  %v10205_v26 = vld [vmem:[#allocation2 + $0x100] ss:$8 sps:$4 sm:$0xff]  }
 0x825   : > { %7234 = vmatprep.subr.bf16.mxu1 %v10144_v28  ;;  %v10208_v28 = vld [vmem:[#allocation2 + $0x180] ss:$8 sps:$4 sm:$0xff]  }
 0x828   : > { %7235 = vmatpush1.bf16.msra.mxu1 %v10142_v36  ;;  %v10213_v36 = vld [vmem:[#allocation2 + $0x274] ss:$8 sps:$4 sm:$0xff]  }
 0x829   : > { %7236 = vmatprep.subr.bf16.mxu1 %v10150_v24  ;;  %v10216_v24 = vld [vmem:[#allocation2 + $0x2f4] ss:$8 sps:$4 sm:$0xff]  }
 0x82c   : > { %7237 = vmatpush1.bf16.msra.mxu1 %v10148_v15 }
 0x82d   : > { %7238 = vmatprep.subr.bf16.mxu1 %v10156_v32 }
 0x830   : > { %7239 = vmatpush1.bf16.msra.mxu1 %v10154_v63  ;;  %v10211_v63 = vld [vmem:[#allocation2 + $0x270] ss:$8 sps:$4 sm:$0xff]  }
 0x831   : > { %7240 = vmatprep.subr.bf16.mxu1 %v10162_v43  ;;  %v10219_v43 = vld [vmem:[#allocation2 + $0x264] ss:$8 sps:$4 sm:$0xff]  }
 0x834   : > { %7241 = vmatpush1.bf16.msra.mxu1 %v10160_v51 }
 0x835   : > { %7524 = vmatprep.subr.bf16.mxu1 %v10168_v13  ;;  %v10217_v13 = vld [vmem:[#allocation2 + $0x260] ss:$8 sps:$4 sm:$0xff]  }
 0x8d7   : > { %v16000_v35 = vpop.f32.mrf.mxu1 }
 0x8d8   : > { %v6974_v49 = vrot.slane %v16000_v35, 3  ;;  %v6999_v3 = vrot.slane %v16000_v35, 4  ;;  %v7269_v8 = vrot.slane %v16000_v35, 5  ;;  %v7420_v60 = vrot.slane %v16000_v35, 7 }
 0x8d9   : > { %v16003_v61 = vpop.f32.mrf.mxu1 }
 0x8da   : > { %v6977_v20 = vrot.slane %v16003_v61, 3  ;;  %v7001_v14 = vrot.slane %v16003_v61, 4  ;;  %v7271_v6 = vrot.slane %v16003_v61, 5  ;;  %v7422_v48 = vrot.slane %v16003_v61, 7 }
 0x8dc   : > { %v16011_v42 = vsel %vm3685_vm7, %v7001_v14, %v6999_v3  ;;  %v16014_v57 = vsel %vm3685_vm7, %v6999_v3, %v7001_v14  ;;  %v16017_v22 = vsel %vm1281_vm5, %v6977_v20, %v6974_v49  ;;  %v16020_v54 = vsel %vm1281_vm5, %v6974_v49, %v6977_v20  ;;  %v10220_v49 = vld [vmem:[#allocation2 + $0x2e0] ss:$8 sps:$4 sm:$0xff]   ;;  %v10225_v3 = vld [vmem:[#allocation2 + $0x254] ss:$8 sps:$4 sm:$0xff]   ;;  %v10223_v14 = vld [vmem:[#allocation2 + $0x250] ss:$8 sps:$4 sm:$0xff]  }
 0x8dd   : > { %v7022_v31 = vpack.c.bf16 %v16011_v42, %v16014_v57  ;;  %v6998_v39 = vpack.c.bf16 %v16017_v22, %v16020_v54  ;;  %v16027_v40 = vsel %vm651_vm0, %v7271_v6, %v7269_v8  ;;  %v16030_v16 = vsel %vm651_vm0, %v7269_v8, %v7271_v6  ;;  %v10228_v20 = vld [vmem:[#allocation2 + $0x2d4] ss:$8 sps:$4 sm:$0xff]   ;;  %v10226_v6 = vld [vmem:[#allocation2 + $0x2d0] ss:$8 sps:$4 sm:$0xff]   ;;  %v10231_v8 = vld [vmem:[#allocation2 + $0x244] ss:$8 sps:$4 sm:$0xff]  }
 0x8de   : > { %v7882_v58 = vpack.c.bf16 %v16020_v54, %v16017_v22  ;;  %v8026_v46 = vpack.c.bf16 %v16014_v57, %v16011_v42  ;;  %v8170_v52 = vpack.c.bf16 %v16030_v16, %v16027_v40  ;;  %v7423_v15 = vsel %vm1288_vm2, %v7422_v48, %v7420_v60  ;;  %v10321_v22 = vld [vmem:[#allocation2 + $0x434] ss:$8 sps:$4 sm:$0xff]   ;;  %v10319_v54 = vld [vmem:[#allocation2 + $0x430] ss:$8 sps:$4 sm:$0xff]   ;;  %v10324_v42 = vld [vmem:[#allocation2 + $0x424] ss:$8 sps:$4 sm:$0xff]  }
 0x8df   : > { %7136 = vmatmul.mubr.bf16.vlgmr.msra.gmra.mxu0 %v7022_v31  ;;  %7259 = vmatmul.mubr.bf16.vlgmr.msra.gmra.mxu1 %v6998_v39  ;;  %v7426_v32 = vsel %vm1288_vm2, %v7420_v60, %v7422_v48  ;;  %v7292_v55 = vpack.c.bf16 %v16027_v40, %v16030_v16  ;;  %v10232_v31 = vld [vmem:[#allocation2 + $0x2c0] ss:$8 sps:$4 sm:$0xff]   ;;  %v10237_v39 = vld [vmem:[#allocation2 + $0x234] ss:$8 sps:$4 sm:$0xff]   ;;  %v10270_v48 = vld [vmem:[#allocation2 + $0x3e4] ss:$8 sps:$4 sm:$0xff]  }
 0x8e0   : > { %7374 = vmatpush1.bf16.msra.mxu0 %v10163_v62  ;;  %7525 = vmatpush1.bf16.msra.mxu1 %v10166_v4  ;;  %v7443_v51 = vpack.c.bf16 %v7423_v15, %v7426_v32  ;;  %v10234_v62 = vld [vmem:[#allocation2 + $0x2c4] ss:$8 sps:$4 sm:$0xff]   ;;  %v10229_v4 = vld [vmem:[#allocation2 + $0x240] ss:$8 sps:$4 sm:$0xff]  }
 0x8e1   : > { %7375 = vmatprep.subr.bf16.mxu0 %v10171_v41  ;;  %7526 = vmatprep.subr.bf16.mxu1 %v10174_v50  ;;  %v10240_v41 = vld [vmem:[#allocation2 + $0x2b4] ss:$8 sps:$4 sm:$0xff]   ;;  %v10235_v50 = vld [vmem:[#allocation2 + $0x230] ss:$8 sps:$4 sm:$0xff]   ;;  %v10265_v60 = vld [vmem:[#allocation2 + $0x360] ss:$8 sps:$4 sm:$0xff]  }
 0x8e2   : > { %7405 = vmatprep.mubr.bf16.mxu0 %v17253_v12  ;;  %7556 = vmatprep.mubr.bf16.mxu1 %v17253_v12  ;;  %v10282_v15 = vld [vmem:[#allocation2 + $0x3c4] ss:$8 sps:$4 sm:$0xff]   ;;  %v10277_v32 = vld [vmem:[#allocation2 + $0x340] ss:$8 sps:$4 sm:$0xff]  }
 0x8e3   : > { %v10322_v57 = vld [vmem:[#allocation2 + $0x420] ss:$8 sps:$4 sm:$0xff]  }
 0x8e4   : > { %7376 = vmatpush1.bf16.msra.mxu0 %v10169_v10  ;;  %7527 = vmatpush1.bf16.msra.mxu1 %v10172_v38  ;;  %v10238_v10 = vld [vmem:[#allocation2 + $0x2b0] ss:$8 sps:$4 sm:$0xff]   ;;  %v10243_v38 = vld [vmem:[#allocation2 + $0x224] ss:$8 sps:$4 sm:$0xff]  }
 0x8e5   : > { %7377 = vmatprep.subr.bf16.mxu0 %v10177_v59  ;;  %7528 = vmatprep.subr.bf16.mxu1 %v10180_v9  ;;  %v10246_v59 = vld [vmem:[#allocation2 + $0x2a4] ss:$8 sps:$4 sm:$0xff]   ;;  %v10241_v9 = vld [vmem:[#allocation2 + $0x220] ss:$8 sps:$4 sm:$0xff]  }
 0x8e8   : > { %7378 = vmatpush1.bf16.msra.mxu0 %v10175_v34  ;;  %7529 = vmatpush1.bf16.msra.mxu1 %v10178_v29  ;;  %v10244_v34 = vld [vmem:[#allocation2 + $0x2a0] ss:$8 sps:$4 sm:$0xff]   ;;  %v10249_v29 = vld [vmem:[#allocation2 + $0x214] ss:$8 sps:$4 sm:$0xff]  }
 0x8e9   : > { %7379 = vmatprep.subr.bf16.mxu0 %v10183_v2  ;;  %7530 = vmatprep.subr.bf16.mxu1 %v10186_v5  ;;  %v10252_v2 = vld [vmem:[#allocation2 + $0x294] ss:$8 sps:$4 sm:$0xff]   ;;  %v10247_v5 = vld [vmem:[#allocation2 + $0x210] ss:$8 sps:$4 sm:$0xff]  }
 0x8ec   : > { %7380 = vmatpush1.bf16.msra.mxu0 %v10181_v37  ;;  %7531 = vmatpush1.bf16.msra.mxu1 %v10184_v23  ;;  %v10250_v37 = vld [vmem:[#allocation2 + $0x290] ss:$8 sps:$4 sm:$0xff]   ;;  %v10255_v23 = vld [vmem:[#allocation2 + $0x204] ss:$8 sps:$4 sm:$0xff]  }
 0x8ed   : > { %7381 = vmatprep.subr.bf16.mxu0 %v10189_v27  ;;  %7532 = vmatprep.subr.bf16.mxu1 %v10192_v21  ;;  %v10258_v27 = vld [vmem:[#allocation2 + $0x284] ss:$8 sps:$4 sm:$0xff]   ;;  %v7715_v21 = vrot.slane %v16003_v61, 1 }
 0x8f0   : > { %7382 = vmatpush1.bf16.msra.mxu0 %v10187_v7  ;;  %7533 = vmatpush1.bf16.msra.mxu1 %v10190_v33  ;;  %v7716_v7 = vrot.slane %v16000_v35, 1  ;;  %v10253_v33 = vld [vmem:[#allocation2 + $0x200] ss:$8 sps:$4 sm:$0xff]  }
 0x8f1   : > { %7383 = vmatprep.subr.bf16.mxu0 %v10195_v30  ;;  %7534 = vmatprep.subr.bf16.mxu1 %v10198_v0  ;;  %v10256_v30 = vld [vmem:[#allocation2 + $0x280] ss:$8 sps:$4 sm:$0xff]   ;;  %v10261_v0 = vld [vmem:[#allocation2 + $0x374] ss:$8 sps:$4 sm:$0xff]  }
 0x8f4   : > { %7384 = vmatpush1.bf16.msra.mxu0 %v10193_v45  ;;  %7535 = vmatpush1.bf16.msra.mxu1 %v10196_v1  ;;  %v10264_v45 = vld [vmem:[#allocation2 + $0x3f4] ss:$8 sps:$4 sm:$0xff]   ;;  %v7717_v1 = vsel %vm606_vm3, %v7715_v21, %v7716_v7 }
 0x8f5   : > { %7385 = vmatprep.subr.bf16.mxu0 %v10201_v25  ;;  %7536 = vmatprep.subr.bf16.mxu1 %v10204_v11  ;;  %v7721_v25 = vsel %vm606_vm3, %v7716_v7, %v7715_v21  ;;  %v10259_v11 = vld [vmem:[#allocation2 + $0x370] ss:$8 sps:$4 sm:$0xff]  }
 0x8f8   : > { %7386 = vmatpush1.bf16.msra.mxu0 %v10199_v56  ;;  %7537 = vmatpush1.bf16.msra.mxu1 %v10202_v19  ;;  %v10262_v56 = vld [vmem:[#allocation2 + $0x3f0] ss:$8 sps:$4 sm:$0xff]   ;;  %v7587_v19 = vpack.c.bf16 %v16000_v35, %v16003_v61 }
 0x8f9   : > { %7387 = vmatprep.subr.bf16.mxu0 %v10207_v47  ;;  %7538 = vmatprep.subr.bf16.mxu1 %v10210_v18  ;;  %v7738_v47 = vpack.c.bf16 %v7721_v25, %v7717_v1  ;;  %v10267_v18 = vld [vmem:[#allocation2 + $0x364] ss:$8 sps:$4 sm:$0xff]   ;;  %v10271_v35 = vld [vmem:[#allocation2 + $0x350] ss:$8 sps:$4 sm:$0xff]  }
 0x8fa   : > { %v10274_v61 = vld [vmem:[#allocation2 + $0x3d0] ss:$8 sps:$4 sm:$0xff]  }
 0x8fc   : > { %7388 = vmatpush1.bf16.msra.mxu0 %v10205_v26  ;;  %7539 = vmatpush1.bf16.msra.mxu1 %v10208_v28  ;;  %v10268_v26 = vld [vmem:[#allocation2 + $0x3e0] ss:$8 sps:$4 sm:$0xff]   ;;  %v10273_v28 = vld [vmem:[#allocation2 + $0x354] ss:$8 sps:$4 sm:$0xff]  }
 0x8fd   : > { %7668 = vmatprep.subr.bf16.mxu0 %v10213_v36  ;;  %7819 = vmatprep.subr.bf16.mxu1 %v10216_v24  ;;  %v10276_v36 = vld [vmem:[#allocation2 + $0x3d4] ss:$8 sps:$4 sm:$0xff]   ;;  %v10279_v24 = vld [vmem:[#allocation2 + $0x344] ss:$8 sps:$4 sm:$0xff]  }
 0x8ff   : > { %7406 = vmatmul.mubr.bf16.vlgmr.msra.gmra.mxu0 %v7292_v55  ;;  %7557 = vmatmul.mubr.bf16.vlgmr.msra.gmra.mxu1 %v7443_v51  ;;  %v10288_v55 = vld [vmem:[#allocation2 + $0x3b4] ss:$8 sps:$4 sm:$0xff]   ;;  %v10283_v51 = vld [vmem:[#allocation2 + $0x330] ss:$8 sps:$4 sm:$0xff]  }
 0x900   : > { %7669 = vmatpush1.bf16.msra.mxu0 %v10211_v63  ;;  %7820 = vmatpush1.bf16.msra.mxu1 %v10214_v44  ;;  %v10280_v63 = vld [vmem:[#allocation2 + $0x3c0] ss:$8 sps:$4 sm:$0xff]   ;;  %v10285_v44 = vld [vmem:[#allocation2 + $0x334] ss:$8 sps:$4 sm:$0xff]  }
 0x901   : > { %7670 = vmatprep.subr.bf16.mxu0 %v10219_v43  ;;  %7821 = vmatprep.subr.bf16.mxu1 %v10222_v17  ;;  %v10286_v43 = vld [vmem:[#allocation2 + $0x3b0] ss:$8 sps:$4 sm:$0xff]   ;;  %v10291_v17 = vld [vmem:[#allocation2 + $0x324] ss:$8 sps:$4 sm:$0xff]  }
 0x902   : > { %7700 = vmatprep.mubr.bf16.mxu0 %v17253_v12  ;;  %7851 = vmatprep.mubr.bf16.mxu1 %v17253_v12 }
 0x904   : > { %7671 = vmatpush1.bf16.msra.mxu0 %v10217_v13  ;;  %7822 = vmatpush1.bf16.msra.mxu1 %v10220_v49  ;;  %v10294_v13 = vld [vmem:[#allocation2 + $0x3a4] ss:$8 sps:$4 sm:$0xff]   ;;  %v10289_v49 = vld [vmem:[#allocation2 + $0x320] ss:$8 sps:$4 sm:$0xff]  }
 0x905   : > { %7672 = vmatprep.subr.bf16.mxu0 %v10225_v3  ;;  %7823 = vmatprep.subr.bf16.mxu1 %v10228_v20  ;;  %v10292_v3 = vld [vmem:[#allocation2 + $0x3a0] ss:$8 sps:$4 sm:$0xff]   ;;  %v10297_v20 = vld [vmem:[#allocation2 + $0x314] ss:$8 sps:$4 sm:$0xff]  }
 0x908   : > { %7673 = vmatpush1.bf16.msra.mxu0 %v10223_v14  ;;  %7824 = vmatpush1.bf16.msra.mxu1 %v10226_v6  ;;  %v10300_v14 = vld [vmem:[#allocation2 + $0x394] ss:$8 sps:$4 sm:$0xff]   ;;  %v10295_v6 = vld [vmem:[#allocation2 + $0x310] ss:$8 sps:$4 sm:$0xff]  }
 0x909   : > { %7674 = vmatprep.subr.bf16.mxu0 %v10231_v8  ;;  %7825 = vmatprep.subr.bf16.mxu1 %v10234_v62  ;;  %v10298_v8 = vld [vmem:[#allocation2 + $0x390] ss:$8 sps:$4 sm:$0xff]   ;;  %v10303_v62 = vld [vmem:[#allocation2 + $0x304] ss:$8 sps:$4 sm:$0xff]  }
 0x90c   : > { %7675 = vmatpush1.bf16.msra.mxu0 %v10229_v4  ;;  %7826 = vmatpush1.bf16.msra.mxu1 %v10232_v31  ;;  %v10306_v4 = vld [vmem:[#allocation2 + $0x384] ss:$8 sps:$4 sm:$0xff]   ;;  %v10301_v31 = vld [vmem:[#allocation2 + $0x300] ss:$8 sps:$4 sm:$0xff]  }
 0x90d   : > { %7676 = vmatprep.subr.bf16.mxu0 %v10237_v39  ;;  %7827 = vmatprep.subr.bf16.mxu1 %v10240_v41  ;;  %v10304_v39 = vld [vmem:[#allocation2 + $0x380] ss:$8 sps:$4 sm:$0xff]   ;;  %v10309_v41 = vld [vmem:[#allocation2 + $0x474] ss:$8 sps:$4 sm:$0xff]  }
 0x910   : > { %7677 = vmatpush1.bf16.msra.mxu0 %v10235_v50  ;;  %7828 = vmatpush1.bf16.msra.mxu1 %v10238_v10  ;;  %v10307_v50 = vld [vmem:[#allocation2 + $0x470] ss:$8 sps:$4 sm:$0xff]   ;;  %v10312_v10 = vld [vmem:[#allocation2 + $0x464] ss:$8 sps:$4 sm:$0xff]  }
 0x911   : > { %7678 = vmatprep.subr.bf16.mxu0 %v10243_v38  ;;  %7829 = vmatprep.subr.bf16.mxu1 %v10246_v59  ;;  %v10310_v38 = vld [vmem:[#allocation2 + $0x460] ss:$8 sps:$4 sm:$0xff]   ;;  %v10315_v59 = vld [vmem:[#allocation2 + $0x454] ss:$8 sps:$4 sm:$0xff]  }
 0x914   : > { %7679 = vmatpush1.bf16.msra.mxu0 %v10241_v9  ;;  %7830 = vmatpush1.bf16.msra.mxu1 %v10244_v34  ;;  %v10313_v9 = vld [vmem:[#allocation2 + $0x450] ss:$8 sps:$4 sm:$0xff]   ;;  %v10318_v34 = vld [vmem:[#allocation2 + $0x444] ss:$8 sps:$4 sm:$0xff]  }
 0x915   : > { %7680 = vmatprep.subr.bf16.mxu0 %v10249_v29  ;;  %7831 = vmatprep.subr.bf16.mxu1 %v10252_v2  ;;  %v10316_v29 = vld [vmem:[#allocation2 + $0x440] ss:$8 sps:$4 sm:$0xff]  }
 0x916   : > { %v10328_v2 = vld [vmem:[#allocation2 + $0x400] ss:$8 sps:$4 sm:$0xff]  }
 0x918   : > { %7681 = vmatpush1.bf16.msra.mxu0 %v10247_v5  ;;  %7832 = vmatpush1.bf16.msra.mxu1 %v10250_v37 }
 0x919   : > { %7682 = vmatprep.subr.bf16.mxu0 %v10255_v23  ;;  %7833 = vmatprep.subr.bf16.mxu1 %v10258_v27 }
 0x91c   : > { %7683 = vmatpush1.bf16.msra.mxu0 %v10253_v33  ;;  %7834 = vmatpush1.bf16.msra.mxu1 %v10256_v30 }
 0x91d   : > { %7963 = vmatprep.subr.bf16.mxu0 %v10261_v0  ;;  %8107 = vmatprep.subr.bf16.mxu1 %v10264_v45 }
 0x91f   : > { %7701 = vmatmul.mubr.bf16.vlgmr.msra.gmra.mxu0 %v7587_v19  ;;  %7852 = vmatmul.mubr.bf16.vlgmr.msra.gmra.mxu1 %v7738_v47 }
 0x920   : > { %7964 = vmatpush1.bf16.msra.mxu0 %v10259_v11  ;;  %8108 = vmatpush1.bf16.msra.mxu1 %v10262_v56 }
 0x921   : > { %7965 = vmatprep.subr.bf16.mxu0 %v10267_v18  ;;  %8109 = vmatprep.subr.bf16.mxu1 %v10270_v48 }
 0x922   : > { %7995 = vmatprep.mubr.bf16.mxu0 %v17253_v12  ;;  %8139 = vmatprep.mubr.bf16.mxu1 %v17253_v12 }
 0x924   : > { %7966 = vmatpush1.bf16.msra.mxu0 %v10265_v60  ;;  %8110 = vmatpush1.bf16.msra.mxu1 %v10268_v26 }
 0x925   : > { %7967 = vmatprep.subr.bf16.mxu0 %v10273_v28  ;;  %8111 = vmatprep.subr.bf16.mxu1 %v10276_v36 }
 0x928   : > { %7968 = vmatpush1.bf16.msra.mxu0 %v10271_v35  ;;  %8112 = vmatpush1.bf16.msra.mxu1 %v10274_v61 }
 0x929   : > { %7969 = vmatprep.subr.bf16.mxu0 %v10279_v24  ;;  %8113 = vmatprep.subr.bf16.mxu1 %v10282_v15 }
 0x92c   : > { %7970 = vmatpush1.bf16.msra.mxu0 %v10277_v32  ;;  %8114 = vmatpush1.bf16.msra.mxu1 %v10280_v63 }
 0x92d   : > { %7971 = vmatprep.subr.bf16.mxu0 %v10285_v44  ;;  %8115 = vmatprep.subr.bf16.mxu1 %v10288_v55 }
 0x930   : > { %7972 = vmatpush1.bf16.msra.mxu0 %v10283_v51  ;;  %8116 = vmatpush1.bf16.msra.mxu1 %v10286_v43 }
 0x931   : > { %7973 = vmatprep.subr.bf16.mxu0 %v10291_v17  ;;  %8117 = vmatprep.subr.bf16.mxu1 %v10294_v13 }
 0x934   : > { %7974 = vmatpush1.bf16.msra.mxu0 %v10289_v49  ;;  %8118 = vmatpush1.bf16.msra.mxu1 %v10292_v3 }
 0x935   : > { %7975 = vmatprep.subr.bf16.mxu0 %v10297_v20  ;;  %8119 = vmatprep.subr.bf16.mxu1 %v10300_v14 }
 0x938   : > { %7976 = vmatpush1.bf16.msra.mxu0 %v10295_v6  ;;  %8120 = vmatpush1.bf16.msra.mxu1 %v10298_v8 }
 0x939   : > { %7977 = vmatprep.subr.bf16.mxu0 %v10303_v62  ;;  %8121 = vmatprep.subr.bf16.mxu1 %v10306_v4  ;;  %v8300_v62 = vlaneseq }
 0x93c   : > { %7978 = vmatpush1.bf16.msra.mxu0 %v10301_v31  ;;  %8122 = vmatpush1.bf16.msra.mxu1 %v10304_v39 }
 0x93d   : > { %8251 = vmatprep.subr.bf16.mxu0 %v10309_v41 }
 0x93f   : > { %7996 = vmatmul.mubr.bf16.vlgmr.msra.gmra.mxu0 %v7882_v58  ;;  %8140 = vmatmul.mubr.bf16.vlgmr.msra.gmra.mxu1 %v8026_v46  ;;  %v10325_v58 = vld [vmem:[#allocation2 + $0x410] ss:$8 sps:$4 sm:$0xff]   ;;  %v10330_v46 = vld [vmem:[#allocation2 + $0x404] ss:$8 sps:$4 sm:$0xff]  }
 0x940   : > { %8252 = vmatpush1.bf16.msra.mxu0 %v10307_v50  ;;  %8283 = vmatprep.mubr.bf16.mxu0 %v17253_v12  ;;  %v10327_v12 = vld [vmem:[#allocation2 + $0x414] ss:$8 sps:$4 sm:$0xff]  }
 0x941   : > { %8253 = vmatprep.subr.bf16.mxu0 %v10312_v10  ;;  %8387 = vmatprep.mubr.f32.mxu1 %v17182_v53 }
 0x944   : > { %8254 = vmatpush1.bf16.msra.mxu0 %v10310_v38  ;;  %v8301_v38 = vshrl.u32 %v8300_v62, 7 }
 0x945   : > { %8255 = vmatprep.subr.bf16.mxu0 %v10315_v59 }
 0x948   : > { %8256 = vmatpush1.bf16.msra.mxu0 %v10313_v9 }
 0x949   : > { %8257 = vmatprep.subr.bf16.mxu0 %v10318_v34 }
 0x94c   : > { %8258 = vmatpush1.bf16.msra.mxu0 %v10316_v29 }
 0x94d   : > { %8259 = vmatprep.subr.bf16.mxu0 %v10321_v22 }
 0x950   : > { %8260 = vmatpush1.bf16.msra.mxu0 %v10319_v54 }
 0x951   : > { %8261 = vmatprep.subr.bf16.mxu0 %v10324_v42 }
 0x954   : > { %8262 = vmatpush1.bf16.msra.mxu0 %v10322_v57  ;;  %v8306_v57 = vsub.s32 1, %v8301_v38 }
 0x955   : > { %8263 = vmatprep.subr.bf16.mxu0 %v10327_v12  ;;  %v8302_v12 = vsub.s32 0, %v8301_v38  ;;  %v8428_v38 = vld [vmem:[%s16221_s14] sm:$0x1] }
 0x958   : > { %8264 = vmatpush1.bf16.msra.mxu0 %v10325_v58 }
 0x959   : > { %8265 = vmatprep.subr.bf16.mxu0 %v10330_v46 }
 0x95c   : > { %8266 = vmatpush1.bf16.msra.mxu0 %v10328_v2 }
 0x95d   : > { %9983 = vmatprep.subr.bf16.mxu0 %v17182_v53 }
 0x95f   : > { %8284 = vmatmul.mubr.bf16.vlgmr.msra.gmra.mxu0 %v8170_v52 }
 0x960   : > { %9999 = vmatprep.mubr.msk.bf16.mxu0 %vm10526_vm6, %v17182_v53 }
 0x99f   : > { %v7137_v5 = vpop.f32.mrf.mxu0  ;;  %v7260_v23 = vpop.f32.mrf.mxu1 }
 0x9a0   : > { %v7261_v36 = vadd.f32 %v7260_v23, %v7137_v5  ;;  %v8298_v5 = vld [vmem:[%s16215_s8] sm:$0x3] }
 0x9a1   : > { %v7139_v37 = vpop.f32.mrf.mxu0  ;;  %v7262_v21 = vpop.f32.mrf.mxu1 }
 0x9a2   : > { %v7263_v26 = vadd.f32 %v7262_v21, %v7139_v37 }
 0x9a3   : > { %v7141_v27 = vpop.f32.mrf.mxu0  ;;  %v7264_v33 = vpop.f32.mrf.mxu1 }
 0x9a4   : > { %v7265_v28 = vadd.f32 %v7264_v33, %v7141_v27  ;;  %v8307_v33 = vrot.slane %v8298_v5, %v8306_v57 }
 0x9a5   : > { %v7143_v7 = vpop.f32.mrf.mxu0  ;;  %v7266_v0 = vpop.f32.mrf.mxu1 }
 0x9a6   : > { %v7267_v24 = vadd.f32 %v7266_v0, %v7143_v7 }
 0x9bf   : > { %v7407_v30 = vpop.f32.mrf.mxu0  ;;  %v7558_v1 = vpop.f32.mrf.mxu1 }
 0x9c0   : > { %v7416_v63 = vadd.f32 %v7407_v30, %v7261_v36  ;;  %v10334_v36 = vld [vmem:[%s16220_s13 + $0x30] sm:$0xff]  }
 0x9c1   : > { %v7409_v45 = vpop.f32.mrf.mxu0  ;;  %v7560_v11 = vpop.f32.mrf.mxu1 }
 0x9c2   : > { %v7417_v15 = vadd.f32 %v7409_v45, %v7263_v26  ;;  %v7567_v13 = vadd.f32 %v7558_v1, %v7416_v63  ;;  %v8303_v45 = vrot.slane %v8298_v5, %v8302_v12  ;;  %v10332_v26 = vld [vmem:[%s16220_s13 + $0x38] sm:$0xff]  }
 0x9c3   : > { %v7411_v25 = vpop.f32.mrf.mxu0  ;;  %v7562_v19 = vpop.f32.mrf.mxu1  ;;  %v10340_v63 = vld [vmem:[%s16220_s13 + $0x18] sm:$0xff]  }
 0x9c4   : > { %v7418_v32 = vadd.f32 %v7411_v25, %v7265_v28  ;;  %v7568_v43 = vadd.f32 %v7560_v11, %v7417_v15  ;;  %v10333_v28 = vld [vmem:[%s16220_s13 + $0x70] sm:$0xff]   ;;  %v10338_v15 = vld [vmem:[%s16220_s13 + $0x20] sm:$0xff]  }
 0x9c5   : > { %v7413_v56 = vpop.f32.mrf.mxu0  ;;  %v7564_v16 = vpop.f32.mrf.mxu1 }
 0x9c6   : > { %v7419_v44 = vadd.f32 %v7413_v56, %v7267_v24  ;;  %v7569_v17 = vadd.f32 %v7562_v19, %v7418_v32  ;;  %v10337_v24 = vld [vmem:[%s16220_s13 + $0x60] sm:$0xff]   ;;  %v10339_v32 = vld [vmem:[%s16220_s13 + $0x58] sm:$0xff]  }
 0x9c8   : > { %v7570_v3 = vadd.f32 %v7564_v16, %v7419_v44  ;;  %v10341_v44 = vld [vmem:[%s16220_s13 + $0x50] sm:$0xff]  }
 0x9df   : > { %v7702_v40 = vpop.f32.mrf.mxu0  ;;  %v7853_v47 = vpop.f32.mrf.mxu1 }
 0x9e0   : > { %v7711_v6 = vadd.f32 %v7702_v40, %v7567_v13  ;;  %v10346_v13 = vld [vmem:[%s16220_s13] sm:$0xff]  }
 0x9e1   : > { %v7704_v52 = vpop.f32.mrf.mxu0  ;;  %v7855_v48 = vpop.f32.mrf.mxu1 }
 0x9e2   : > { %v7712_v20 = vadd.f32 %v7704_v52, %v7568_v43  ;;  %v7862_v50 = vadd.f32 %v7853_v47, %v7711_v6  ;;  %v10344_v43 = vld [vmem:[%s16220_s13 + $0x8] sm:$0xff]   ;;  %v10351_v6 = vld [vmem:[%s16222_s15 + $0x18] sm:$0xff]  }
 0x9e3   : > { %v7706_v18 = vpop.f32.mrf.mxu0  ;;  %v7857_v35 = vpop.f32.mrf.mxu1 }
 0x9e4   : > { %v7713_v14 = vadd.f32 %v7706_v18, %v7569_v17  ;;  %v7863_v39 = vadd.f32 %v7855_v48, %v7712_v20  ;;  %v10331_v18 = vld [vmem:[%s16220_s13 + $0x78] sm:$0xff]   ;;  %v10345_v17 = vld [vmem:[%s16220_s13 + $0x40] sm:$0xff]   ;;  %v10349_v20 = vld [vmem:[%s16222_s15 + $0x28] sm:$0xff]  }
 0x9e5   : > { %v7708_v60 = vpop.f32.mrf.mxu0  ;;  %v7859_v55 = vpop.f32.mrf.mxu1 }
 0x9e6   : > { %v7714_v4 = vadd.f32 %v7708_v60, %v7570_v3  ;;  %v7864_v41 = vadd.f32 %v7857_v35, %v7713_v14  ;;  %v8318_v60 = vld [vmem:[%s16219_s12] sm:$0x1]  ;;  %v10335_v35 = vld [vmem:[%s16220_s13 + $0x68] sm:$0xff]   ;;  %v10348_v3 = vld [vmem:[%s16222_s15 + $0x30] sm:$0xff]  }
 0x9e7   : > { %v10350_v14 = vld [vmem:[%s16222_s15 + $0x20] sm:$0xff]  }
 0x9e8   : > { %v7865_v59 = vadd.f32 %v7859_v55, %v7714_v4  ;;  %v10342_v55 = vld [vmem:[%s16220_s13 + $0x10] sm:$0xff]  }
 0x9ff   : > { %v7997_v61 = vpop.f32.mrf.mxu0  ;;  %v8141_v49 = vpop.f32.mrf.mxu1 }
 0xa00   : > { %v8006_v29 = vadd.f32 %v7997_v61, %v7862_v50  ;;  %v10336_v61 = vld [vmem:[%s16220_s13 + $0x28] sm:$0xff]   ;;  %v10354_v50 = vld [vmem:[%s16222_s15] sm:$0xff]  }
 0xa01   : > { %v7999_v51 = vpop.f32.mrf.mxu0  ;;  %v8143_v31 = vpop.f32.mrf.mxu1 }
 0xa02   : > { %v8007_v9 = vadd.f32 %v7999_v51, %v7863_v39  ;;  %v8150_v37 = vadd.f32 %v8141_v49, %v8006_v29  ;;  %v10343_v51 = vld [vmem:[%s16220_s13 + $0x48] sm:$0xff]   ;;  %v10347_v49 = vld [vmem:[%s16222_s15 + $0x38] sm:$0xff]   ;;  %v10352_v39 = vld [vmem:[%s16222_s15 + $0x10] sm:$0xff]  }
 0xa03   : > { %v8001_v8 = vpop.f32.mrf.mxu0  ;;  %v8145_v22 = vpop.f32.mrf.mxu1  ;;  %9984 = vmatpush3.bf16.msra.mxu0 %v10347_v49 }
 0xa04   : > { %v8008_v34 = vadd.f32 %v8001_v8, %v7864_v41  ;;  %v8151_v46 = vadd.f32 %v8143_v31, %v8007_v9  ;;  %9985 = vmatprep.subr.bf16.mxu0 %v17182_v53  ;;  %v10353_v41 = vld [vmem:[%s16222_s15 + $0x8] sm:$0xff]  }
 0xa05   : > { %v8003_v10 = vpop.f32.mrf.mxu0  ;;  %v8147_v23 = vpop.f32.mrf.mxu1 }
 0xa06   : > { %v8009_v42 = vadd.f32 %v8003_v10, %v7865_v59  ;;  %v8152_v2 = vadd.f32 %v8145_v22, %v8008_v34 }
 0xa07   : > { %9986 = vmatpush3.bf16.msra.mxu0 %v10348_v3 }
 0xa08   : > { %v8153_v21 = vadd.f32 %v8147_v23, %v8009_v42  ;;  %9987 = vmatprep.subr.bf16.mxu0 %v17182_v53 }
 0xa0b   : > { %9988 = vmatpush3.bf16.msra.mxu0 %v10349_v20 }
 0xa0c   : > { %9989 = vmatprep.subr.bf16.mxu0 %v17182_v53 }
 0xa0f   : > { %9990 = vmatpush3.bf16.msra.mxu0 %v10350_v14 }
 0xa10   : > { %9991 = vmatprep.subr.bf16.mxu0 %v17182_v53 }
 0xa13   : > { %9992 = vmatpush3.bf16.msra.mxu0 %v10351_v6 }
 0xa14   : > { %9993 = vmatprep.subr.bf16.mxu0 %v17182_v53 }
 0xa17   : > { %9994 = vmatpush3.bf16.msra.mxu0 %v10352_v39 }
 0xa18   : > { %9995 = vmatprep.subr.bf16.mxu0 %v17182_v53 }
 0xa1b   : > { %9996 = vmatpush3.bf16.msra.mxu0 %v10353_v41 }
 0xa1c   : > { %9997 = vmatprep.subr.bf16.mxu0 %v17182_v53  ;;  %v8583_v53 = vld [vmem:[%s16223_s16] sm:$0x1] }
 0xa1f   : > { %v8285_v54 = vpop.f32.mrf.mxu0  ;;  %9998 = vmatpush3.bf16.msra.mxu0 %v10354_v50 }
 0xa20   : > { %v8294_v0 = vadd.f32 %v8285_v54, %v8150_v37 }
 0xa21   : > { %v8287_v58 = vpop.f32.mrf.mxu0 }
 0xa22   : > { %v8295_v7 = vadd.f32 %v8287_v58, %v8151_v46  ;;  %v8310_v40 = vadd.f32 %v8303_v45, %v8294_v0 }
 0xa23   : > { %v8289_v27 = vpop.f32.mrf.mxu0 }
 0xa24   : > { %v8296_v30 = vadd.f32 %v8289_v27, %v8152_v2  ;;  %v8311_v56 = vadd.f32 %v8307_v33, %v8295_v7  ;;  %v8314_v48 = vmax.f32 %v8310_v40, 0.0 }
 0xa25   : > { %v8291_v1 = vpop.f32.mrf.mxu0 }
 0xa26   : > { %v8297_v25 = vadd.f32 %v8291_v1, %v8153_v21  ;;  %v8312_v11 = vadd.f32 %v8303_v45, %v8296_v30  ;;  %v8315_v47 = vmax.f32 %v8311_v56, 0.0 }
 0xa28   : > { %v8313_v19 = vadd.f32 %v8307_v33, %v8297_v25  ;;  %v8316_v52 = vmax.f32 %v8312_v11, 0.0 }
 0xa2a   : > { %v8317_v16 = vmax.f32 %v8313_v19, 0.0 }
 0xa2c   : > { %8351 = vmatprep.subr.mxu1 %v8317_v16 }
 0xa2d   : > { %8352 = vmatpush1.msra.mxu1 %v8316_v52 }
 0xa2e   : > { %8353 = vmatprep.subr.mxu1 %v8315_v47 }
 0xa2f   : > { %8354 = vmatpush1.msra.mxu1 %v8314_v48 }
 0xa30   : > { %9083 = vmatmul.mubr.msk.f32.vlgmr.msra.gmra.mxu1 %vm8319_vm13, %v8318_v60  ;;  %9373 = vmatprep.subr.bf16.mxu1 %v10331_v18 }
 0xa31   : > { %9374 = vmatpush3.bf16.msra.mxu1 %v10332_v26 }
 0xa32   : > { %9375 = vmatprep.subr.bf16.mxu1 %v10333_v28 }
 0xa35   : > { %9376 = vmatpush3.bf16.msra.mxu1 %v10334_v36 }
 0xa36   : > { %9377 = vmatprep.subr.bf16.mxu1 %v10335_v35 }
 0xa39   : > { %9378 = vmatpush3.bf16.msra.mxu1 %v10336_v61 }
 0xa3a   : > { %9379 = vmatprep.subr.bf16.mxu1 %v10337_v24 }
 0xa3d   : > { %9380 = vmatpush3.bf16.msra.mxu1 %v10338_v15 }
 0xa3e   : > { %9381 = vmatprep.subr.bf16.mxu1 %v10339_v32 }
 0xa41   : > { %9382 = vmatpush3.bf16.msra.mxu1 %v10340_v63 }
 0xa42   : > { %9383 = vmatprep.subr.bf16.mxu1 %v10341_v44 }
 0xa45   : > { %9384 = vmatpush3.bf16.msra.mxu1 %v10342_v55 }
 0xa46   : > { %9385 = vmatprep.subr.bf16.mxu1 %v10343_v51 }
 0xa49   : > { %9386 = vmatpush3.bf16.msra.mxu1 %v10344_v43 }
 0xa4a   : > { %9387 = vmatprep.subr.bf16.mxu1 %v10345_v17 }
 0xa4d   : > { %9388 = vmatpush3.bf16.msra.mxu1 %v10346_v13 }
 0xaf0   : > { %v8389_v8 = vpop.f32.mrf.mxu1 }
 0xaf1   : > { %v8394_v31 = vpack.c.bf16 %v8389_v8, %v8389_v8 }
 0xaf2   : > { %v8391_v62 = vpop.f32.mrf.mxu1 }
 0xaf3   : > { %v8395_v4 = vpack.c.bf16 %v8391_v62, %v8391_v62 }
 0xaf5   : > { %8557 = vmatprep.mubr.bf16.mxu1 %v8395_v4 }
 0xaf6   : > { %8558 = vmatmul.mubr.bf16.vlgmr.msra.gmra.mxu1 %v8394_v31 }
 0xbb6   : > { %v9389_v10 = vpop.f32.mrf.mxu1 }
 0xbb8   : > { %v9390_v59 = vpop.f32.mrf.mxu1 }
 0xbb9   : > { %v9391_v9 = vadd.f32 %v9390_v59, %v9389_v10 }
 0xbba   : > { %v9392_v34 = vpop.f32.mrf.mxu1 }
 0xbbb   : > { %v8560_v29 = vadd.f32 %v9391_v9, %v8428_v38 }
 0xbbc   : > { %v9393_v22 = vpop.f32.mrf.mxu1 }
 0xbbd   : > { %v8565_v54 = vmax.f32 %v8560_v29, 0.0 }
 0xbbf   : > { %v8566_v42 = vpack.c.bf16 %v8565_v54, %v8565_v54 }
 0xbc1   : > { %10000 = vmatmul.mubr.bf16.vlgmr.msra.gmra.mxu0 %v8566_v42 }
 0xc81   : > { %v8666_v57 = vpop.f32.mrf.mxu0 }
 0xc82   : > { %v8667_v12 = vadd.f32 %v8666_v57, %v8583_v53 }
 0xc83   : > { %v10001_v58 = vpop.f32.mrf.mxu0 }
 0xc84   : > { %8672 = vst [vmem:[%s555_s3] sm:$0x1] %v8667_v12 }
 0xc85   : > { %v8669_v46 = vpop.f32.mrf.mxu0 }
 0xc86   : > { %10468 = shalt.err (!%p10465_p0)
}
 0xc87   : > { %s10469_s19 = scalar_lea.hbm %s16166_s23, 16  ;;  %s10473_s29 = scalar_lea.hbm %s16224_s17, 32 }
 0xc88   : > { %p10470_p1 = scmp.ne.s32.totalorder %s16166_s23, %s10469_s19  ;;  %p10474_p4 = scmp.lt.s32.totalorder %s16166_s23, %s16224_s17 }
 0xc89   : > { %p10475_p7 = scmp.lt.s32.totalorder %s10473_s29, %s10469_s19 }
 0xc8a   : > { %p10471_p2 = pnand %p10470_p1, %p10656_p5 }
 0xc8b   : > { %p10476_p8 = por %p10475_p7, %p10474_p4 }
 0xc8c   : > { %p10472_p3 = pneg %p10471_p2 }
 0xc8e   : > { %p10477_p6 = pnand %p10476_p8, %p10472_p3 }
 0xc90   : > { %10480 = shalt.err (!%p10477_p6)
}
 0xc91   : > { %10008 = dma.vmem_to_hbm [thread:$0]  (%p10656_p5), %s16168_s4, 16, %s16166_s23, %s8674_s21   ;;  %v10002_v2 = vpop.f32.mrf.mxu0 }
 0xc92 PF: > { %p10020_p9 = scmp.ge.s32.totalorder %s10519_s27, 2  ;;  %s8698_s18 = sand.u32 1, %s10507_s24  }
 0xc93   : > { %p17254_p10 = scmp.ne.s32.totalorder %s16523_s20, 0  ;;  %s8699_s5 = scalar_lea.sflag [#allocation4], %s8698_s18 }
 0xc95   : > { %p10015_p11 = pnand %p10020_p9, %p17254_p10 }
 0xc97   : > { %p10016_p12 = pneg %p10015_p11 }
 0xc99   : > { %10502 = dma.done.wait (%p10016_p12), %s8699_s5, 16  }
 0xc9a   : > { %10504 = vsyncadd (%p10016_p12), %s8699_s5, 4294967280  ;;  %s17255_s26 = sld [smem:[#allocation8_spill]]  ;;  %p28_p13 = scmp.ge.s32.totalorder %s10643_s0, 4  }
 0xc9b   : > { %s17256_s1 = sld [smem:[#allocation9_spill]]  ;;  %s17257_s24 = smov %s10511_s25 }
 0xc9c   : > { %s17260_s27 = smov %s10643_s0 }
 0xc9d   :  { %30 = sbr.rel (!%p28_p13) target bundleno = 11 (0xb), region = 128 }
 0xca0   : > { %s17258_s25 = smov %s17255_s26 }
 0xca1   : > { %s17259_s26 = smov %s17256_s1 }
 0xca2   :  { %8703 = vsyncpa [#allocation3], 1 }
 0xca3   :  { %8705 = vsyncpa [#allocation3 + $0x1], 1 }
 0xca4   :  { %8706 = vsyncpa [#allocation4], 1 }
 0xca5   :  { %8708 = vsyncpa [#allocation4 + $0x1], 1 }

</bundles_post_ra>
